<compile_context>
chip_gen: v7x
topology: tpu7x:2x2x1
jax: 0.10.0
libtpu: 0.0.40
codegen_flags: <defaults>
</compile_context>

<pallas_src>
import functools
import math

import jax
import jax.numpy as jnp
from jax.experimental import pallas as pl
from jax.experimental.pallas import tpu as pltpu

BN_EPS = 1e-5
_INV_SQRT2 = 1.0 / math.sqrt(2.0)
# False -> exact erf GELU (bit-faithful to nn.GELU()); True -> tanh GELU on the
# EUP (review item: moves the epilogue off the VALU, slightly different numerics).
APPROX_GELU = False


def _gelu_exact(y):
    return 0.5 * y * (1.0 + jax.lax.erf(y * _INV_SQRT2))


def _gelu(y):
    if APPROX_GELU:
        return jax.nn.gelu(y, approximate=True)
    return _gelu_exact(y)


def _round_up(v, m):
    return ((v + m - 1) // m) * m


# ----------------------------------------------------------------------------
# Fused ASPP kernel: one grid step == one image.
#
# x is the zero-padded (by d_max) image flattened to (flat_len, Cin): for an
# output "corner" row p = h*Wp + w' (Wp = W + 2*d_max), the conv tap (ki, kj)
# of rate d is x_flat[p + (d_max+(ki-1)d)*Wp + d_max+(kj-1)d].  So each tap of
# each branch is ONE contiguous 2D slice -> ONE MXU dot, no reshapes.
# Rows with w' >= W are junk and get sliced off outside the kernel.
# ----------------------------------------------------------------------------
def _aspp_fused_kernel(x_ref, w0_ref, wd_ref, bb_ref, wp_ref, pb_ref, o_ref,
                       acc_ref, *, rates, d_max, height, width, wp_cols,
                       m_rows):
    """Refs:
      x_ref  : (1, flat_len, Cin) bf16  padded + flattened image
      w0_ref : (Cin, Cout)        bf16  1x1 branch weight (BN scale folded)
      wd_ref : (R, 9, Cin, Cout)  bf16  dilated 3x3 weights (BN scale folded)
      bb_ref : (1+R, Cout)        f32   per-branch BN bias (beta)
      wp_ref : (1+R, Cout, Cout)  bf16  projection weight chunks (BN folded)
      pb_ref : (1, 1, Cout)       f32   projection bias + pooled-branch term
      o_ref  : (m_rows, Cout)           output on the (H, W+2*d_max) row grid
      acc_ref: (m_rows, Cout)     f32   VMEM projection accumulator
    """
    def tap(off):
        return x_ref[0, off:off + m_rows, :]

    center = d_max * wp_cols + d_max

    # ---- branch 0: 1x1 conv -> +beta -> GELU -> its projection chunk ----
    a = jnp.dot(tap(center), w0_ref[...], preferred_element_type=jnp.float32)
    y = _gelu(a + bb_ref[0:1, :]).astype(jnp.bfloat16)
    acc_ref[...] = jnp.dot(y, wp_ref[0], preferred_element_type=jnp.float32)

    # ---- dilated 3x3 branches (taps fully inside the padding are pruned) ----
    for r, d in enumerate(rates):
        a = None
        for ki in range(3):
            if ki != 1 and d >= height:
                continue
            for kj in range(3):
                if kj != 1 and d >= width:
                    continue
                off = (d_max + (ki - 1) * d) * wp_cols + d_max + (kj - 1) * d
                c = jnp.dot(tap(off), wd_ref[r, ki * 3 + kj],
                            preferred_element_type=jnp.float32)
                a = c if a is None else a + c
        y = _gelu(a + bb_ref[r + 1:r + 2, :]).astype(jnp.bfloat16)
        acc_ref[...] += jnp.dot(y, wp_ref[r + 1],
                                preferred_element_type=jnp.float32)

    # ---- projection epilogue: +beta +pooled-branch contribution, GELU ----
    o_ref[...] = _gelu(acc_ref[...] + pb_ref[0]).astype(o_ref.dtype)


# ----------------------------------------------------------------------------
# Deterministic parameter construction (shapes follow the PyTorch __init__).
# ----------------------------------------------------------------------------
def _conv_block(key, kh, kw, cin, cout):
    k_w, k_g, k_b = jax.random.split(key, 3)
    std = math.sqrt(2.0 / (kh * kw * cin))
    w = jax.random.normal(k_w, (kh, kw, cin, cout), jnp.float32) * std
    gamma = 1.0 + 0.1 * jax.random.normal(k_g, (cout,), jnp.float32)
    beta = 0.1 * jax.random.normal(k_b, (cout,), jnp.float32)
    # eval-mode BN (running_mean=0, running_var=1) -> per-channel scale / bias
    # TODO(synk): training-mode BatchNorm (batch statistics) is not implemented.
    scale = gamma / jnp.sqrt(1.0 + BN_EPS)
    bias = beta
    return {"w": w, "scale": scale, "bias": bias}


def init_aspp_params(key, in_channels, out_channels, atrous_rates):
    n_branches = 2 + len(atrous_rates)
    keys = jax.random.split(key, n_branches + 1)
    p = {"b0": _conv_block(keys[0], 1, 1, in_channels, out_channels)}
    for i, _rate in enumerate(atrous_rates):
        p[f"b{i + 1}"] = _conv_block(keys[i + 1], 3, 3, in_channels, out_channels)
    p["pool"] = _conv_block(keys[1 + len(atrous_rates)], 1, 1, in_channels,
                            out_channels)
    p["project"] = _conv_block(keys[-1], 1, 1, n_branches * out_channels,
                               out_channels)
    return p


# ----------------------------------------------------------------------------
# Forward pass (mirrors ASPP.forward), one fused pallas_call.
# ----------------------------------------------------------------------------
def aspp_forward(params, x_nhwc, atrous_rates, *, out_dtype=jnp.float32):
    n, h, w, cin = x_nhwc.shape
    rates = tuple(atrous_rates)
    nb_in = 1 + len(rates)          # branches computed inside the kernel
    d_max = max(rates)
    cout = params["b0"]["w"].shape[-1]

    # ---- BN scale folded into bf16 conv weights (done once, in XLA) ----
    w0 = (params["b0"]["w"].reshape(cin, cout)
          * params["b0"]["scale"]).astype(jnp.bfloat16)
    wdil = jnp.stack(
        [(params[f"b{i + 1}"]["w"] * params[f"b{i + 1}"]["scale"]
          ).reshape(9, cin, cout) for i in range(len(rates))]
    ).astype(jnp.bfloat16)
    bb = jnp.stack([params["b0"]["bias"]]
                   + [params[f"b{i + 1}"]["bias"] for i in range(len(rates))])

    wproj = (params["project"]["w"].reshape(nb_in + 1, cout, cout)
             * params["project"]["scale"])
    wproj_main = wproj[:nb_in].astype(jnp.bfloat16)
    wproj_pool = wproj[nb_in].astype(jnp.bfloat16)

    # ---- pooling branch folded into a per-image projection bias ----
    # AdaptiveAvgPool2d(1) -> 1x1 conv -> BN -> GELU; bilinear upsample of a
    # 1x1 map (align_corners=False) is a broadcast, so its projection
    # contribution is a per-image constant row.
    pooled = jnp.mean(x_nhwc.astype(jnp.float32), axis=(1, 2))      # (N, Cin)
    wpool = (params["pool"]["w"].reshape(cin, cout)
             * params["pool"]["scale"]).astype(jnp.bfloat16)
    pool_act = _gelu(jnp.dot(pooled.astype(jnp.bfloat16), wpool,
                             preferred_element_type=jnp.float32)
                     + params["pool"]["bias"])
    pool_contrib = jnp.dot(pool_act.astype(jnp.bfloat16), wproj_pool,
                           preferred_element_type=jnp.float32)
    pbias = (pool_contrib + params["project"]["bias"]).reshape(n, 1, cout)

    # ---- single zero-pad to d_max + spatial flatten (no per-rate im2col) ----
    wp_cols = w + 2 * d_max
    m_rows = _round_up(h * wp_cols, 8)
    max_off = 2 * d_max * wp_cols + 2 * d_max
    orig_len = (h + 2 * d_max) * wp_cols
    flat_len = max(orig_len, m_rows + max_off)
    xpad = jnp.pad(x_nhwc, ((0, 0), (d_max, d_max), (d_max, d_max), (0, 0)))
    xflat = xpad.reshape(n, orig_len, cin)
    xflat = jnp.pad(xflat, ((0, 0), (0, flat_len - orig_len), (0, 0)))
    xflat = xflat.astype(jnp.bfloat16)

    kernel = functools.partial(
        _aspp_fused_kernel, rates=rates, d_max=d_max, height=h, width=w,
        wp_cols=wp_cols, m_rows=m_rows)

    out_flat = pl.pallas_call(
        kernel,
        out_shape=jax.ShapeDtypeStruct((n * m_rows, cout), out_dtype),
        grid_spec=pltpu.PrefetchScalarGridSpec(
            num_scalar_prefetch=0,
            grid=(n,),
            in_specs=[
                pl.BlockSpec((1, flat_len, cin), lambda i: (i, 0, 0)),
                pl.BlockSpec((cin, cout), lambda i: (0, 0)),
                pl.BlockSpec((len(rates), 9, cin, cout),
                             lambda i: (0, 0, 0, 0)),
                pl.BlockSpec((nb_in, cout), lambda i: (0, 0)),
                pl.BlockSpec((nb_in, cout, cout), lambda i: (0, 0, 0)),
                pl.BlockSpec((1, 1, cout), lambda i: (i, 0, 0)),
            ],
            out_specs=pl.BlockSpec((m_rows, cout), lambda i: (i, 0)),
            scratch_shapes=[pltpu.VMEM((m_rows, cout), jnp.float32)],
        ),
        compiler_params=pltpu.CompilerParams(
            dimension_semantics=("parallel",)),
    )(xflat, w0, wdil, bb, wproj_main, pbias)

    # Row p = h_idx*Wp + w': columns w' >= W are junk -> drop them.
    out = out_flat.reshape(n, m_rows, cout)[:, :h * wp_cols, :]
    out = out.reshape(n, h, wp_cols, cout)[:, :, :w, :]
    return out


# ----------------------------------------------------------------------------
# Pure-JAX f32 reference (for a relaxed-tolerance correctness check).
# ----------------------------------------------------------------------------
def _bn_gelu_ref(y, p):
    return _gelu_exact(y * p["scale"] + p["bias"])


def aspp_reference(params, x, rates):
    n, h, w, cin = x.shape
    prec = jax.lax.Precision.HIGHEST
    outs = []
    y0 = jnp.einsum("nhwc,cd->nhwd", x, params["b0"]["w"].reshape(cin, -1),
                    precision=prec)
    outs.append(_bn_gelu_ref(y0, params["b0"]))
    for i, d in enumerate(rates):
        p = params[f"b{i + 1}"]
        y = jax.lax.conv_general_dilated(
            x, p["w"], (1, 1), ((d, d), (d, d)), rhs_dilation=(d, d),
            dimension_numbers=("NHWC", "HWIO", "NHWC"), precision=prec)
        outs.append(_bn_gelu_ref(y, p))
    pooled = jnp.mean(x, axis=(1, 2))
    yp = _bn_gelu_ref(jnp.dot(pooled, params["pool"]["w"].reshape(cin, -1),
                              precision=prec), params["pool"])
    outs.append(jnp.broadcast_to(yp[:, None, None, :], outs[0].shape))
    cat = jnp.concatenate(outs, axis=-1)
    cout = outs[0].shape[-1]
    yq = jnp.einsum("nhwc,cd->nhwd", cat,
                    params["project"]["w"].reshape(cat.shape[-1], cout),
                    precision=prec)
    return _bn_gelu_ref(yq, params["project"])


if __name__ == "__main__":
    key = jax.random.PRNGKey(0)
    k_param, k_x = jax.random.split(key)

    # ASPP(32, 128, (2, 4, 6)), batch=2, 16x16 feature map.  Cout=128 keeps the
    # kernel output lane-dense; grid=(2,) gives two parallel steps for v7x.
    B, CIN, H, W = 2, 32, 16, 16
    COUT = 128
    RATES = (2, 4, 6)

    x_nchw = jax.random.normal(k_x, (B, CIN, H, W), jnp.float32)
    x_nhwc = jnp.transpose(x_nchw, (0, 2, 3, 1))

    params = init_aspp_params(k_param, CIN, COUT, RATES)

    fwd = jax.jit(functools.partial(aspp_forward, atrous_rates=RATES))
    out_nhwc = fwd(params, x_nhwc)
    jax.block_until_ready(out_nhwc)
    out_nchw = jnp.transpose(out_nhwc, (0, 3, 1, 2))   # back to PyTorch layout

    assert out_nchw.shape == (B, COUT, H, W), out_nchw.shape
    assert bool(jnp.all(jnp.isfinite(out_nchw)))

    # Relaxed-tolerance check vs. an f32 reference (kernel uses bf16 MXU
    # operands with f32 accumulation).
    ref_nhwc = aspp_reference(params, x_nhwc, RATES)
    max_err = float(jnp.max(jnp.abs(out_nhwc.astype(jnp.float32) - ref_nhwc)))
    assert max_err < 0.25, f"max abs error vs f32 reference: {max_err}"

    print("KERNEL_OK")
</pallas_src>

<mosaic_0001>
module attributes {stable_mosaic.version = 11 : i64} {
  func.func @_aspp_fused_kernel(%arg0: i32, %arg1: memref<1x796x32xbf16, #tpu.memory_space<vmem>>, %arg2: memref<32x128xbf16, #tpu.memory_space<vmem>>, %arg3: memref<3x9x32x128xbf16, #tpu.memory_space<vmem>>, %arg4: memref<4x128xf32, #tpu.memory_space<vmem>>, %arg5: memref<4x128x128xbf16, #tpu.memory_space<vmem>>, %arg6: memref<1x1x128xf32, #tpu.memory_space<vmem>>, %arg7: memref<448x128xf32, #tpu.memory_space<vmem>>, %arg8: memref<448x128xf32, #tpu.memory_space<vmem>>) attributes {dimension_semantics = [#tpu.dimension_semantics<parallel>], iteration_bounds = array<i64: 2>, scalar_prefetch = 0 : i64, scratch_operands = 1 : i64, tpu.core_type = #tpu.core_type<tc>, window_params = [{transform_indices = @transform_0, window_bounds = array<i64: 1, 796, 32>}, {pipeline_mode = #tpu.pipeline_mode<synchronous>, transform_indices = @transform_1, window_bounds = array<i64: 32, 128>}, {pipeline_mode = #tpu.pipeline_mode<synchronous>, transform_indices = @transform_2, window_bounds = array<i64: 3, 9, 32, 128>}, {pipeline_mode = #tpu.pipeline_mode<synchronous>, transform_indices = @transform_3, window_bounds = array<i64: 4, 128>}, {pipeline_mode = #tpu.pipeline_mode<synchronous>, transform_indices = @transform_4, window_bounds = array<i64: 4, 128, 128>}, {transform_indices = @transform_5, window_bounds = array<i64: 1, 1, 128>}, {transform_indices = @transform_6, window_bounds = array<i64: 448, 128>}]} {
    %c0 = arith.constant 0 : index
    %c174 = arith.constant 174 : index
    %c0_0 = arith.constant 0 : index
    %0 = vector.load %arg1[%c0, %c174, %c0_0] : memref<1x796x32xbf16, #tpu.memory_space<vmem>>, vector<1x448x32xbf16>
    %1 = vector.shape_cast %0 : vector<1x448x32xbf16> to vector<448x32xbf16>
    %c0_1 = arith.constant 0 : index
    %c0_2 = arith.constant 0 : index
    %2 = vector.load %arg2[%c0_1, %c0_2] : memref<32x128xbf16, #tpu.memory_space<vmem>>, vector<32x128xbf16>
    %cst = arith.constant dense<0.000000e+00> : vector<448x128xf32>
    %3 = tpu.matmul %1, %2, %cst {dimension_numbers = #tpu.dot_dimension_numbers<[1], [0], [0], [1], [0, 0, 1, 1], [], []>} : vector<448x32xbf16>, vector<32x128xbf16>, vector<448x128xf32> -> vector<448x128xf32>
    %c0_3 = arith.constant 0 : index
    %c0_4 = arith.constant 0 : index
    %4 = vector.load %arg4[%c0_3, %c0_4] : memref<4x128xf32, #tpu.memory_space<vmem>>, vector<1x128xf32>
    %5 = vector.broadcast %4 : vector<1x128xf32> to vector<448x128xf32>
    %6 = arith.addf %3, %5 : vector<448x128xf32>
    %cst_5 = arith.constant 5.000000e-01 : f32
    %7 = vector.broadcast %cst_5 : f32 to vector<448x128xf32>
    %8 = arith.mulf %7, %6 : vector<448x128xf32>
    %cst_6 = arith.constant 0.707106769 : f32
    %9 = vector.broadcast %cst_6 : f32 to vector<448x128xf32>
    %10 = arith.mulf %6, %9 : vector<448x128xf32>
    %11 = math.erf %10 : vector<448x128xf32>
    %cst_7 = arith.constant 1.000000e+00 : f32
    %12 = vector.broadcast %cst_7 : f32 to vector<448x128xf32>
    %13 = arith.addf %12, %11 : vector<448x128xf32>
    %14 = arith.mulf %8, %13 : vector<448x128xf32>
    %15 = arith.truncf %14 : vector<448x128xf32> to vector<448x128xbf16>
    %c0_8 = arith.constant 0 : index
    %c0_9 = arith.constant 0 : index
    %c0_10 = arith.constant 0 : index
    %16 = vector.load %arg5[%c0_8, %c0_9, %c0_10] : memref<4x128x128xbf16, #tpu.memory_space<vmem>>, vector<1x128x128xbf16>
    %17 = vector.shape_cast %16 : vector<1x128x128xbf16> to vector<128x128xbf16>
    %cst_11 = arith.constant dense<0.000000e+00> : vector<448x128xf32>
    %18 = tpu.matmul %15, %17, %cst_11 {dimension_numbers = #tpu.dot_dimension_numbers<[1], [0], [0], [1], [0, 0, 1, 1], [], []>} : vector<448x128xbf16>, vector<128x128xbf16>, vector<448x128xf32> -> vector<448x128xf32>
    %c0_12 = arith.constant 0 : index
    %c0_13 = arith.constant 0 : index
    %19 = vector.load %arg8[%c0_12, %c0_13] : memref<448x128xf32, #tpu.memory_space<vmem>>, vector<448x128xf32>
    tpu.vector_store %arg8[%c0_12, %c0_13], %18 {strides = array<i32>} : memref<448x128xf32, #tpu.memory_space<vmem>>, vector<448x128xf32>,
    %c0_14 = arith.constant 0 : index
    %c116 = arith.constant 116 : index
    %c0_15 = arith.constant 0 : index
    %20 = vector.load %arg1[%c0_14, %c116, %c0_15] : memref<1x796x32xbf16, #tpu.memory_space<vmem>>, vector<1x448x32xbf16>
    %21 = vector.shape_cast %20 : vector<1x448x32xbf16> to vector<448x32xbf16>
    %c0_16 = arith.constant 0 : index
    %c0_17 = arith.constant 0 : index
    %c0_18 = arith.constant 0 : index
    %c0_19 = arith.constant 0 : index
    %22 = vector.load %arg3[%c0_16, %c0_17, %c0_18, %c0_19] : memref<3x9x32x128xbf16, #tpu.memory_space<vmem>>, vector<1x1x32x128xbf16>
    %23 = vector.shape_cast %22 : vector<1x1x32x128xbf16> to vector<32x128xbf16>
    %cst_20 = arith.constant dense<0.000000e+00> : vector<448x128xf32>
    %24 = tpu.matmul %21, %23, %cst_20 {dimension_numbers = #tpu.dot_dimension_numbers<[1], [0], [0], [1], [0, 0, 1, 1], [], []>} : vector<448x32xbf16>, vector<32x128xbf16>, vector<448x128xf32> -> vector<448x128xf32>
    %c0_21 = arith.constant 0 : index
    %c118 = arith.constant 118 : index
    %c0_22 = arith.constant 0 : index
    %25 = vector.load %arg1[%c0_21, %c118, %c0_22] : memref<1x796x32xbf16, #tpu.memory_space<vmem>>, vector<1x448x32xbf16>
    %26 = vector.shape_cast %25 : vector<1x448x32xbf16> to vector<448x32xbf16>
    %c0_23 = arith.constant 0 : index
    %c1 = arith.constant 1 : index
    %c0_24 = arith.constant 0 : index
    %c0_25 = arith.constant 0 : index
    %27 = vector.load %arg3[%c0_23, %c1, %c0_24, %c0_25] : memref<3x9x32x128xbf16, #tpu.memory_space<vmem>>, vector<1x1x32x128xbf16>
    %28 = vector.shape_cast %27 : vector<1x1x32x128xbf16> to vector<32x128xbf16>
    %cst_26 = arith.constant dense<0.000000e+00> : vector<448x128xf32>
    %29 = tpu.matmul %26, %28, %cst_26 {dimension_numbers = #tpu.dot_dimension_numbers<[1], [0], [0], [1], [0, 0, 1, 1], [], []>} : vector<448x32xbf16>, vector<32x128xbf16>, vector<448x128xf32> -> vector<448x128xf32>
    %30 = arith.addf %24, %29 : vector<448x128xf32>
    %c0_27 = arith.constant 0 : index
    %c120 = arith.constant 120 : index
    %c0_28 = arith.constant 0 : index
    %31 = vector.load %arg1[%c0_27, %c120, %c0_28] : memref<1x796x32xbf16, #tpu.memory_space<vmem>>, vector<1x448x32xbf16>
    %32 = vector.shape_cast %31 : vector<1x448x32xbf16> to vector<448x32xbf16>
    %c0_29 = arith.constant 0 : index
    %c2 = arith.constant 2 : index
    %c0_30 = arith.constant 0 : index
    %c0_31 = arith.constant 0 : index
    %33 = vector.load %arg3[%c0_29, %c2, %c0_30, %c0_31] : memref<3x9x32x128xbf16, #tpu.memory_space<vmem>>, vector<1x1x32x128xbf16>
    %34 = vector.shape_cast %33 : vector<1x1x32x128xbf16> to vector<32x128xbf16>
    %cst_32 = arith.constant dense<0.000000e+00> : vector<448x128xf32>
    %35 = tpu.matmul %32, %34, %cst_32 {dimension_numbers = #tpu.dot_dimension_numbers<[1], [0], [0], [1], [0, 0, 1, 1], [], []>} : vector<448x32xbf16>, vector<32x128xbf16>, vector<448x128xf32> -> vector<448x128xf32>
    %36 = arith.addf %30, %35 : vector<448x128xf32>
    %c0_33 = arith.constant 0 : index
    %c172 = arith.constant 172 : index
    %c0_34 = arith.constant 0 : index
    %37 = vector.load %arg1[%c0_33, %c172, %c0_34] : memref<1x796x32xbf16, #tpu.memory_space<vmem>>, vector<1x448x32xbf16>
    %38 = vector.shape_cast %37 : vector<1x448x32xbf16> to vector<448x32xbf16>
    %c0_35 = arith.constant 0 : index
    %c3 = arith.constant 3 : index
    %c0_36 = arith.constant 0 : index
    %c0_37 = arith.constant 0 : index
    %39 = vector.load %arg3[%c0_35, %c3, %c0_36, %c0_37] : memref<3x9x32x128xbf16, #tpu.memory_space<vmem>>, vector<1x1x32x128xbf16>
    %40 = vector.shape_cast %39 : vector<1x1x32x128xbf16> to vector<32x128xbf16>
    %cst_38 = arith.constant dense<0.000000e+00> : vector<448x128xf32>
    %41 = tpu.matmul %38, %40, %cst_38 {dimension_numbers = #tpu.dot_dimension_numbers<[1], [0], [0], [1], [0, 0, 1, 1], [], []>} : vector<448x32xbf16>, vector<32x128xbf16>, vector<448x128xf32> -> vector<448x128xf32>
    %42 = arith.addf %36, %41 : vector<448x128xf32>
    %c0_39 = arith.constant 0 : index
    %c174_40 = arith.constant 174 : index
    %c0_41 = arith.constant 0 : index
    %43 = vector.load %arg1[%c0_39, %c174_40, %c0_41] : memref<1x796x32xbf16, #tpu.memory_space<vmem>>, vector<1x448x32xbf16>
    %44 = vector.shape_cast %43 : vector<1x448x32xbf16> to vector<448x32xbf16>
    %c0_42 = arith.constant 0 : index
    %c4 = arith.constant 4 : index
    %c0_43 = arith.constant 0 : index
    %c0_44 = arith.constant 0 : index
    %45 = vector.load %arg3[%c0_42, %c4, %c0_43, %c0_44] : memref<3x9x32x128xbf16, #tpu.memory_space<vmem>>, vector<1x1x32x128xbf16>
    %46 = vector.shape_cast %45 : vector<1x1x32x128xbf16> to vector<32x128xbf16>
    %cst_45 = arith.constant dense<0.000000e+00> : vector<448x128xf32>
    %47 = tpu.matmul %44, %46, %cst_45 {dimension_numbers = #tpu.dot_dimension_numbers<[1], [0], [0], [1], [0, 0, 1, 1], [], []>} : vector<448x32xbf16>, vector<32x128xbf16>, vector<448x128xf32> -> vector<448x128xf32>
    %48 = arith.addf %42, %47 : vector<448x128xf32>
    %c0_46 = arith.constant 0 : index
    %c176 = arith.constant 176 : index
    %c0_47 = arith.constant 0 : index
    %49 = vector.load %arg1[%c0_46, %c176, %c0_47] : memref<1x796x32xbf16, #tpu.memory_space<vmem>>, vector<1x448x32xbf16>
    %50 = vector.shape_cast %49 : vector<1x448x32xbf16> to vector<448x32xbf16>
    %c0_48 = arith.constant 0 : index
    %c5 = arith.constant 5 : index
    %c0_49 = arith.constant 0 : index
    %c0_50 = arith.constant 0 : index
    %51 = vector.load %arg3[%c0_48, %c5, %c0_49, %c0_50] : memref<3x9x32x128xbf16, #tpu.memory_space<vmem>>, vector<1x1x32x128xbf16>
    %52 = vector.shape_cast %51 : vector<1x1x32x128xbf16> to vector<32x128xbf16>
    %cst_51 = arith.constant dense<0.000000e+00> : vector<448x128xf32>
    %53 = tpu.matmul %50, %52, %cst_51 {dimension_numbers = #tpu.dot_dimension_numbers<[1], [0], [0], [1], [0, 0, 1, 1], [], []>} : vector<448x32xbf16>, vector<32x128xbf16>, vector<448x128xf32> -> vector<448x128xf32>
    %54 = arith.addf %48, %53 : vector<448x128xf32>
    %c0_52 = arith.constant 0 : index
    %c228 = arith.constant 228 : index
    %c0_53 = arith.constant 0 : index
    %55 = vector.load %arg1[%c0_52, %c228, %c0_53] : memref<1x796x32xbf16, #tpu.memory_space<vmem>>, vector<1x448x32xbf16>
    %56 = vector.shape_cast %55 : vector<1x448x32xbf16> to vector<448x32xbf16>
    %c0_54 = arith.constant 0 : index
    %c6 = arith.constant 6 : index
    %c0_55 = arith.constant 0 : index
    %c0_56 = arith.constant 0 : index
    %57 = vector.load %arg3[%c0_54, %c6, %c0_55, %c0_56] : memref<3x9x32x128xbf16, #tpu.memory_space<vmem>>, vector<1x1x32x128xbf16>
    %58 = vector.shape_cast %57 : vector<1x1x32x128xbf16> to vector<32x128xbf16>
    %cst_57 = arith.constant dense<0.000000e+00> : vector<448x128xf32>
    %59 = tpu.matmul %56, %58, %cst_57 {dimension_numbers = #tpu.dot_dimension_numbers<[1], [0], [0], [1], [0, 0, 1, 1], [], []>} : vector<448x32xbf16>, vector<32x128xbf16>, vector<448x128xf32> -> vector<448x128xf32>
    %60 = arith.addf %54, %59 : vector<448x128xf32>
    %c0_58 = arith.constant 0 : index
    %c230 = arith.constant 230 : index
    %c0_59 = arith.constant 0 : index
    %61 = vector.load %arg1[%c0_58, %c230, %c0_59] : memref<1x796x32xbf16, #tpu.memory_space<vmem>>, vector<1x448x32xbf16>
    %62 = vector.shape_cast %61 : vector<1x448x32xbf16> to vector<448x32xbf16>
    %c0_60 = arith.constant 0 : index
    %c7 = arith.constant 7 : index
    %c0_61 = arith.constant 0 : index
    %c0_62 = arith.constant 0 : index
    %63 = vector.load %arg3[%c0_60, %c7, %c0_61, %c0_62] : memref<3x9x32x128xbf16, #tpu.memory_space<vmem>>, vector<1x1x32x128xbf16>
    %64 = vector.shape_cast %63 : vector<1x1x32x128xbf16> to vector<32x128xbf16>
    %cst_63 = arith.constant dense<0.000000e+00> : vector<448x128xf32>
    %65 = tpu.matmul %62, %64, %cst_63 {dimension_numbers = #tpu.dot_dimension_numbers<[1], [0], [0], [1], [0, 0, 1, 1], [], []>} : vector<448x32xbf16>, vector<32x128xbf16>, vector<448x128xf32> -> vector<448x128xf32>
    %66 = arith.addf %60, %65 : vector<448x128xf32>
    %c0_64 = arith.constant 0 : index
    %c232 = arith.constant 232 : index
    %c0_65 = arith.constant 0 : index
    %67 = vector.load %arg1[%c0_64, %c232, %c0_65] : memref<1x796x32xbf16, #tpu.memory_space<vmem>>, vector<1x448x32xbf16>
    %68 = vector.shape_cast %67 : vector<1x448x32xbf16> to vector<448x32xbf16>
    %c0_66 = arith.constant 0 : index
    %c8 = arith.constant 8 : index
    %c0_67 = arith.constant 0 : index
    %c0_68 = arith.constant 0 : index
    %69 = vector.load %arg3[%c0_66, %c8, %c0_67, %c0_68] : memref<3x9x32x128xbf16, #tpu.memory_space<vmem>>, vector<1x1x32x128xbf16>
    %70 = vector.shape_cast %69 : vector<1x1x32x128xbf16> to vector<32x128xbf16>
    %cst_69 = arith.constant dense<0.000000e+00> : vector<448x128xf32>
    %71 = tpu.matmul %68, %70, %cst_69 {dimension_numbers = #tpu.dot_dimension_numbers<[1], [0], [0], [1], [0, 0, 1, 1], [], []>} : vector<448x32xbf16>, vector<32x128xbf16>, vector<448x128xf32> -> vector<448x128xf32>
    %72 = arith.addf %66, %71 : vector<448x128xf32>
    %c1_70 = arith.constant 1 : index
    %c0_71 = arith.constant 0 : index
    %73 = vector.load %arg4[%c1_70, %c0_71] : memref<4x128xf32, #tpu.memory_space<vmem>>, vector<1x128xf32>
    %74 = vector.broadcast %73 : vector<1x128xf32> to vector<448x128xf32>
    %75 = arith.addf %72, %74 : vector<448x128xf32>
    %cst_72 = arith.constant 5.000000e-01 : f32
    %76 = vector.broadcast %cst_72 : f32 to vector<448x128xf32>
    %77 = arith.mulf %76, %75 : vector<448x128xf32>
    %cst_73 = arith.constant 0.707106769 : f32
    %78 = vector.broadcast %cst_73 : f32 to vector<448x128xf32>
    %79 = arith.mulf %75, %78 : vector<448x128xf32>
    %80 = math.erf %79 : vector<448x128xf32>
    %cst_74 = arith.constant 1.000000e+00 : f32
    %81 = vector.broadcast %cst_74 : f32 to vector<448x128xf32>
    %82 = arith.addf %81, %80 : vector<448x128xf32>
    %83 = arith.mulf %77, %82 : vector<448x128xf32>
    %84 = arith.truncf %83 : vector<448x128xf32> to vector<448x128xbf16>
    %c0_75 = arith.constant 0 : index
    %c0_76 = arith.constant 0 : index
    %85 = vector.load %arg8[%c0_75, %c0_76] : memref<448x128xf32, #tpu.memory_space<vmem>>, vector<448x128xf32>
    %c1_77 = arith.constant 1 : index
    %c0_78 = arith.constant 0 : index
    %c0_79 = arith.constant 0 : index
    %86 = vector.load %arg5[%c1_77, %c0_78, %c0_79] : memref<4x128x128xbf16, #tpu.memory_space<vmem>>, vector<1x128x128xbf16>
    %87 = vector.shape_cast %86 : vector<1x128x128xbf16> to vector<128x128xbf16>
    %cst_80 = arith.constant dense<0.000000e+00> : vector<448x128xf32>
    %88 = tpu.matmul %84, %87, %cst_80 {dimension_numbers = #tpu.dot_dimension_numbers<[1], [0], [0], [1], [0, 0, 1, 1], [], []>} : vector<448x128xbf16>, vector<128x128xbf16>, vector<448x128xf32> -> vector<448x128xf32>
    %89 = arith.addf %85, %88 : vector<448x128xf32>
    %c0_81 = arith.constant 0 : index
    %c0_82 = arith.constant 0 : index
    %90 = vector.load %arg8[%c0_81, %c0_82] : memref<448x128xf32, #tpu.memory_space<vmem>>, vector<448x128xf32>
    tpu.vector_store %arg8[%c0_81, %c0_82], %89 {strides = array<i32>} : memref<448x128xf32, #tpu.memory_space<vmem>>, vector<448x128xf32>,
    %c0_83 = arith.constant 0 : index
    %c58 = arith.constant 58 : index
    %c0_84 = arith.constant 0 : index
    %91 = vector.load %arg1[%c0_83, %c58, %c0_84] : memref<1x796x32xbf16, #tpu.memory_space<vmem>>, vector<1x448x32xbf16>
    %92 = vector.shape_cast %91 : vector<1x448x32xbf16> to vector<448x32xbf16>
    %c1_85 = arith.constant 1 : index
    %c0_86 = arith.constant 0 : index
    %c0_87 = arith.constant 0 : index
    %c0_88 = arith.constant 0 : index
    %93 = vector.load %arg3[%c1_85, %c0_86, %c0_87, %c0_88] : memref<3x9x32x128xbf16, #tpu.memory_space<vmem>>, vector<1x1x32x128xbf16>
    %94 = vector.shape_cast %93 : vector<1x1x32x128xbf16> to vector<32x128xbf16>
    %cst_89 = arith.constant dense<0.000000e+00> : vector<448x128xf32>
    %95 = tpu.matmul %92, %94, %cst_89 {dimension_numbers = #tpu.dot_dimension_numbers<[1], [0], [0], [1], [0, 0, 1, 1], [], []>} : vector<448x32xbf16>, vector<32x128xbf16>, vector<448x128xf32> -> vector<448x128xf32>
    %c0_90 = arith.constant 0 : index
    %c62 = arith.constant 62 : index
    %c0_91 = arith.constant 0 : index
    %96 = vector.load %arg1[%c0_90, %c62, %c0_91] : memref<1x796x32xbf16, #tpu.memory_space<vmem>>, vector<1x448x32xbf16>
    %97 = vector.shape_cast %96 : vector<1x448x32xbf16> to vector<448x32xbf16>
    %c1_92 = arith.constant 1 : index
    %c1_93 = arith.constant 1 : index
    %c0_94 = arith.constant 0 : index
    %c0_95 = arith.constant 0 : index
    %98 = vector.load %arg3[%c1_92, %c1_93, %c0_94, %c0_95] : memref<3x9x32x128xbf16, #tpu.memory_space<vmem>>, vector<1x1x32x128xbf16>
    %99 = vector.shape_cast %98 : vector<1x1x32x128xbf16> to vector<32x128xbf16>
    %cst_96 = arith.constant dense<0.000000e+00> : vector<448x128xf32>
    %100 = tpu.matmul %97, %99, %cst_96 {dimension_numbers = #tpu.dot_dimension_numbers<[1], [0], [0], [1], [0, 0, 1, 1], [], []>} : vector<448x32xbf16>, vector<32x128xbf16>, vector<448x128xf32> -> vector<448x128xf32>
    %101 = arith.addf %95, %100 : vector<448x128xf32>
    %c0_97 = arith.constant 0 : index
    %c66 = arith.constant 66 : index
    %c0_98 = arith.constant 0 : index
    %102 = vector.load %arg1[%c0_97, %c66, %c0_98] : memref<1x796x32xbf16, #tpu.memory_space<vmem>>, vector<1x448x32xbf16>
    %103 = vector.shape_cast %102 : vector<1x448x32xbf16> to vector<448x32xbf16>
    %c1_99 = arith.constant 1 : index
    %c2_100 = arith.constant 2 : index
    %c0_101 = arith.constant 0 : index
    %c0_102 = arith.constant 0 : index
    %104 = vector.load %arg3[%c1_99, %c2_100, %c0_101, %c0_102] : memref<3x9x32x128xbf16, #tpu.memory_space<vmem>>, vector<1x1x32x128xbf16>
    %105 = vector.shape_cast %104 : vector<1x1x32x128xbf16> to vector<32x128xbf16>
    %cst_103 = arith.constant dense<0.000000e+00> : vector<448x128xf32>
    %106 = tpu.matmul %103, %105, %cst_103 {dimension_numbers = #tpu.dot_dimension_numbers<[1], [0], [0], [1], [0, 0, 1, 1], [], []>} : vector<448x32xbf16>, vector<32x128xbf16>, vector<448x128xf32> -> vector<448x128xf32>
    %107 = arith.addf %101, %106 : vector<448x128xf32>
    %c0_104 = arith.constant 0 : index
    %c170 = arith.constant 170 : index
    %c0_105 = arith.constant 0 : index
    %108 = vector.load %arg1[%c0_104, %c170, %c0_105] : memref<1x796x32xbf16, #tpu.memory_space<vmem>>, vector<1x448x32xbf16>
    %109 = vector.shape_cast %108 : vector<1x448x32xbf16> to vector<448x32xbf16>
    %c1_106 = arith.constant 1 : index
    %c3_107 = arith.constant 3 : index
    %c0_108 = arith.constant 0 : index
    %c0_109 = arith.constant 0 : index
    %110 = vector.load %arg3[%c1_106, %c3_107, %c0_108, %c0_109] : memref<3x9x32x128xbf16, #tpu.memory_space<vmem>>, vector<1x1x32x128xbf16>
    %111 = vector.shape_cast %110 : vector<1x1x32x128xbf16> to vector<32x128xbf16>
    %cst_110 = arith.constant dense<0.000000e+00> : vector<448x128xf32>
    %112 = tpu.matmul %109, %111, %cst_110 {dimension_numbers = #tpu.dot_dimension_numbers<[1], [0], [0], [1], [0, 0, 1, 1], [], []>} : vector<448x32xbf16>, vector<32x128xbf16>, vector<448x128xf32> -> vector<448x128xf32>
    %113 = arith.addf %107, %112 : vector<448x128xf32>
    %c0_111 = arith.constant 0 : index
    %c174_112 = arith.constant 174 : index
    %c0_113 = arith.constant 0 : index
    %114 = vector.load %arg1[%c0_111, %c174_112, %c0_113] : memref<1x796x32xbf16, #tpu.memory_space<vmem>>, vector<1x448x32xbf16>
    %115 = vector.shape_cast %114 : vector<1x448x32xbf16> to vector<448x32xbf16>
    %c1_114 = arith.constant 1 : index
    %c4_115 = arith.constant 4 : index
    %c0_116 = arith.constant 0 : index
    %c0_117 = arith.constant 0 : index
    %116 = vector.load %arg3[%c1_114, %c4_115, %c0_116, %c0_117] : memref<3x9x32x128xbf16, #tpu.memory_space<vmem>>, vector<1x1x32x128xbf16>
    %117 = vector.shape_cast %116 : vector<1x1x32x128xbf16> to vector<32x128xbf16>
    %cst_118 = arith.constant dense<0.000000e+00> : vector<448x128xf32>
    %118 = tpu.matmul %115, %117, %cst_118 {dimension_numbers = #tpu.dot_dimension_numbers<[1], [0], [0], [1], [0, 0, 1, 1], [], []>} : vector<448x32xbf16>, vector<32x128xbf16>, vector<448x128xf32> -> vector<448x128xf32>
    %119 = arith.addf %113, %118 : vector<448x128xf32>
    %c0_119 = arith.constant 0 : index
    %c178 = arith.constant 178 : index
    %c0_120 = arith.constant 0 : index
    %120 = vector.load %arg1[%c0_119, %c178, %c0_120] : memref<1x796x32xbf16, #tpu.memory_space<vmem>>, vector<1x448x32xbf16>
    %121 = vector.shape_cast %120 : vector<1x448x32xbf16> to vector<448x32xbf16>
    %c1_121 = arith.constant 1 : index
    %c5_122 = arith.constant 5 : index
    %c0_123 = arith.constant 0 : index
    %c0_124 = arith.constant 0 : index
    %122 = vector.load %arg3[%c1_121, %c5_122, %c0_123, %c0_124] : memref<3x9x32x128xbf16, #tpu.memory_space<vmem>>, vector<1x1x32x128xbf16>
    %123 = vector.shape_cast %122 : vector<1x1x32x128xbf16> to vector<32x128xbf16>
    %cst_125 = arith.constant dense<0.000000e+00> : vector<448x128xf32>
    %124 = tpu.matmul %121, %123, %cst_125 {dimension_numbers = #tpu.dot_dimension_numbers<[1], [0], [0], [1], [0, 0, 1, 1], [], []>} : vector<448x32xbf16>, vector<32x128xbf16>, vector<448x128xf32> -> vector<448x128xf32>
    %125 = arith.addf %119, %124 : vector<448x128xf32>
    %c0_126 = arith.constant 0 : index
    %c282 = arith.constant 282 : index
    %c0_127 = arith.constant 0 : index
    %126 = vector.load %arg1[%c0_126, %c282, %c0_127] : memref<1x796x32xbf16, #tpu.memory_space<vmem>>, vector<1x448x32xbf16>
    %127 = vector.shape_cast %126 : vector<1x448x32xbf16> to vector<448x32xbf16>
    %c1_128 = arith.constant 1 : index
    %c6_129 = arith.constant 6 : index
    %c0_130 = arith.constant 0 : index
    %c0_131 = arith.constant 0 : index
    %128 = vector.load %arg3[%c1_128, %c6_129, %c0_130, %c0_131] : memref<3x9x32x128xbf16, #tpu.memory_space<vmem>>, vector<1x1x32x128xbf16>
    %129 = vector.shape_cast %128 : vector<1x1x32x128xbf16> to vector<32x128xbf16>
    %cst_132 = arith.constant dense<0.000000e+00> : vector<448x128xf32>
    %130 = tpu.matmul %127, %129, %cst_132 {dimension_numbers = #tpu.dot_dimension_numbers<[1], [0], [0], [1], [0, 0, 1, 1], [], []>} : vector<448x32xbf16>, vector<32x128xbf16>, vector<448x128xf32> -> vector<448x128xf32>
    %131 = arith.addf %125, %130 : vector<448x128xf32>
    %c0_133 = arith.constant 0 : index
    %c286 = arith.constant 286 : index
    %c0_134 = arith.constant 0 : index
    %132 = vector.load %arg1[%c0_133, %c286, %c0_134] : memref<1x796x32xbf16, #tpu.memory_space<vmem>>, vector<1x448x32xbf16>
    %133 = vector.shape_cast %132 : vector<1x448x32xbf16> to vector<448x32xbf16>
    %c1_135 = arith.constant 1 : index
    %c7_136 = arith.constant 7 : index
    %c0_137 = arith.constant 0 : index
    %c0_138 = arith.constant 0 : index
    %134 = vector.load %arg3[%c1_135, %c7_136, %c0_137, %c0_138] : memref<3x9x32x128xbf16, #tpu.memory_space<vmem>>, vector<1x1x32x128xbf16>
    %135 = vector.shape_cast %134 : vector<1x1x32x128xbf16> to vector<32x128xbf16>
    %cst_139 = arith.constant dense<0.000000e+00> : vector<448x128xf32>
    %136 = tpu.matmul %133, %135, %cst_139 {dimension_numbers = #tpu.dot_dimension_numbers<[1], [0], [0], [1], [0, 0, 1, 1], [], []>} : vector<448x32xbf16>, vector<32x128xbf16>, vector<448x128xf32> -> vector<448x128xf32>
    %137 = arith.addf %131, %136 : vector<448x128xf32>
    %c0_140 = arith.constant 0 : index
    %c290 = arith.constant 290 : index
    %c0_141 = arith.constant 0 : index
    %138 = vector.load %arg1[%c0_140, %c290, %c0_141] : memref<1x796x32xbf16, #tpu.memory_space<vmem>>, vector<1x448x32xbf16>
    %139 = vector.shape_cast %138 : vector<1x448x32xbf16> to vector<448x32xbf16>
    %c1_142 = arith.constant 1 : index
    %c8_143 = arith.constant 8 : index
    %c0_144 = arith.constant 0 : index
    %c0_145 = arith.constant 0 : index
    %140 = vector.load %arg3[%c1_142, %c8_143, %c0_144, %c0_145] : memref<3x9x32x128xbf16, #tpu.memory_space<vmem>>, vector<1x1x32x128xbf16>
    %141 = vector.shape_cast %140 : vector<1x1x32x128xbf16> to vector<32x128xbf16>
    %cst_146 = arith.constant dense<0.000000e+00> : vector<448x128xf32>
    %142 = tpu.matmul %139, %141, %cst_146 {dimension_numbers = #tpu.dot_dimension_numbers<[1], [0], [0], [1], [0, 0, 1, 1], [], []>} : vector<448x32xbf16>, vector<32x128xbf16>, vector<448x128xf32> -> vector<448x128xf32>
    %143 = arith.addf %137, %142 : vector<448x128xf32>
    %c2_147 = arith.constant 2 : index
    %c0_148 = arith.constant 0 : index
    %144 = vector.load %arg4[%c2_147, %c0_148] : memref<4x128xf32, #tpu.memory_space<vmem>>, vector<1x128xf32>
    %145 = vector.broadcast %144 : vector<1x128xf32> to vector<448x128xf32>
    %146 = arith.addf %143, %145 : vector<448x128xf32>
    %cst_149 = arith.constant 5.000000e-01 : f32
    %147 = vector.broadcast %cst_149 : f32 to vector<448x128xf32>
    %148 = arith.mulf %147, %146 : vector<448x128xf32>
    %cst_150 = arith.constant 0.707106769 : f32
    %149 = vector.broadcast %cst_150 : f32 to vector<448x128xf32>
    %150 = arith.mulf %146, %149 : vector<448x128xf32>
    %151 = math.erf %150 : vector<448x128xf32>
    %cst_151 = arith.constant 1.000000e+00 : f32
    %152 = vector.broadcast %cst_151 : f32 to vector<448x128xf32>
    %153 = arith.addf %152, %151 : vector<448x128xf32>
    %154 = arith.mulf %148, %153 : vector<448x128xf32>
    %155 = arith.truncf %154 : vector<448x128xf32> to vector<448x128xbf16>
    %c0_152 = arith.constant 0 : index
    %c0_153 = arith.constant 0 : index
    %156 = vector.load %arg8[%c0_152, %c0_153] : memref<448x128xf32, #tpu.memory_space<vmem>>, vector<448x128xf32>
    %c2_154 = arith.constant 2 : index
    %c0_155 = arith.constant 0 : index
    %c0_156 = arith.constant 0 : index
    %157 = vector.load %arg5[%c2_154, %c0_155, %c0_156] : memref<4x128x128xbf16, #tpu.memory_space<vmem>>, vector<1x128x128xbf16>
    %158 = vector.shape_cast %157 : vector<1x128x128xbf16> to vector<128x128xbf16>
    %cst_157 = arith.constant dense<0.000000e+00> : vector<448x128xf32>
    %159 = tpu.matmul %155, %158, %cst_157 {dimension_numbers = #tpu.dot_dimension_numbers<[1], [0], [0], [1], [0, 0, 1, 1], [], []>} : vector<448x128xbf16>, vector<128x128xbf16>, vector<448x128xf32> -> vector<448x128xf32>
    %160 = arith.addf %156, %159 : vector<448x128xf32>
    %c0_158 = arith.constant 0 : index
    %c0_159 = arith.constant 0 : index
    %161 = vector.load %arg8[%c0_158, %c0_159] : memref<448x128xf32, #tpu.memory_space<vmem>>, vector<448x128xf32>
    tpu.vector_store %arg8[%c0_158, %c0_159], %160 {strides = array<i32>} : memref<448x128xf32, #tpu.memory_space<vmem>>, vector<448x128xf32>,
    %c0_160 = arith.constant 0 : index
    %c0_161 = arith.constant 0 : index
    %c0_162 = arith.constant 0 : index
    %162 = vector.load %arg1[%c0_160, %c0_161, %c0_162] : memref<1x796x32xbf16, #tpu.memory_space<vmem>>, vector<1x448x32xbf16>
    %163 = vector.shape_cast %162 : vector<1x448x32xbf16> to vector<448x32xbf16>
    %c2_163 = arith.constant 2 : index
    %c0_164 = arith.constant 0 : index
    %c0_165 = arith.constant 0 : index
    %c0_166 = arith.constant 0 : index
    %164 = vector.load %arg3[%c2_163, %c0_164, %c0_165, %c0_166] : memref<3x9x32x128xbf16, #tpu.memory_space<vmem>>, vector<1x1x32x128xbf16>
    %165 = vector.shape_cast %164 : vector<1x1x32x128xbf16> to vector<32x128xbf16>
    %cst_167 = arith.constant dense<0.000000e+00> : vector<448x128xf32>
    %166 = tpu.matmul %163, %165, %cst_167 {dimension_numbers = #tpu.dot_dimension_numbers<[1], [0], [0], [1], [0, 0, 1, 1], [], []>} : vector<448x32xbf16>, vector<32x128xbf16>, vector<448x128xf32> -> vector<448x128xf32>
    %c0_168 = arith.constant 0 : index
    %c6_169 = arith.constant 6 : index
    %c0_170 = arith.constant 0 : index
    %167 = vector.load %arg1[%c0_168, %c6_169, %c0_170] : memref<1x796x32xbf16, #tpu.memory_space<vmem>>, vector<1x448x32xbf16>
    %168 = vector.shape_cast %167 : vector<1x448x32xbf16> to vector<448x32xbf16>
    %c2_171 = arith.constant 2 : index
    %c1_172 = arith.constant 1 : index
    %c0_173 = arith.constant 0 : index
    %c0_174 = arith.constant 0 : index
    %169 = vector.load %arg3[%c2_171, %c1_172, %c0_173, %c0_174] : memref<3x9x32x128xbf16, #tpu.memory_space<vmem>>, vector<1x1x32x128xbf16>
    %170 = vector.shape_cast %169 : vector<1x1x32x128xbf16> to vector<32x128xbf16>
    %cst_175 = arith.constant dense<0.000000e+00> : vector<448x128xf32>
    %171 = tpu.matmul %168, %170, %cst_175 {dimension_numbers = #tpu.dot_dimension_numbers<[1], [0], [0], [1], [0, 0, 1, 1], [], []>} : vector<448x32xbf16>, vector<32x128xbf16>, vector<448x128xf32> -> vector<448x128xf32>
    %172 = arith.addf %166, %171 : vector<448x128xf32>
    %c0_176 = arith.constant 0 : index
    %c12 = arith.constant 12 : index
    %c0_177 = arith.constant 0 : index
    %173 = vector.load %arg1[%c0_176, %c12, %c0_177] : memref<1x796x32xbf16, #tpu.memory_space<vmem>>, vector<1x448x32xbf16>
    %174 = vector.shape_cast %173 : vector<1x448x32xbf16> to vector<448x32xbf16>
    %c2_178 = arith.constant 2 : index
    %c2_179 = arith.constant 2 : index
    %c0_180 = arith.constant 0 : index
    %c0_181 = arith.constant 0 : index
    %175 = vector.load %arg3[%c2_178, %c2_179, %c0_180, %c0_181] : memref<3x9x32x128xbf16, #tpu.memory_space<vmem>>, vector<1x1x32x128xbf16>
    %176 = vector.shape_cast %175 : vector<1x1x32x128xbf16> to vector<32x128xbf16>
    %cst_182 = arith.constant dense<0.000000e+00> : vector<448x128xf32>
    %177 = tpu.matmul %174, %176, %cst_182 {dimension_numbers = #tpu.dot_dimension_numbers<[1], [0], [0], [1], [0, 0, 1, 1], [], []>} : vector<448x32xbf16>, vector<32x128xbf16>, vector<448x128xf32> -> vector<448x128xf32>
    %178 = arith.addf %172, %177 : vector<448x128xf32>
    %c0_183 = arith.constant 0 : index
    %c168 = arith.constant 168 : index
    %c0_184 = arith.constant 0 : index
    %179 = vector.load %arg1[%c0_183, %c168, %c0_184] : memref<1x796x32xbf16, #tpu.memory_space<vmem>>, vector<1x448x32xbf16>
    %180 = vector.shape_cast %179 : vector<1x448x32xbf16> to vector<448x32xbf16>
    %c2_185 = arith.constant 2 : index
    %c3_186 = arith.constant 3 : index
    %c0_187 = arith.constant 0 : index
    %c0_188 = arith.constant 0 : index
    %181 = vector.load %arg3[%c2_185, %c3_186, %c0_187, %c0_188] : memref<3x9x32x128xbf16, #tpu.memory_space<vmem>>, vector<1x1x32x128xbf16>
    %182 = vector.shape_cast %181 : vector<1x1x32x128xbf16> to vector<32x128xbf16>
    %cst_189 = arith.constant dense<0.000000e+00> : vector<448x128xf32>
    %183 = tpu.matmul %180, %182, %cst_189 {dimension_numbers = #tpu.dot_dimension_numbers<[1], [0], [0], [1], [0, 0, 1, 1], [], []>} : vector<448x32xbf16>, vector<32x128xbf16>, vector<448x128xf32> -> vector<448x128xf32>
    %184 = arith.addf %178, %183 : vector<448x128xf32>
    %c0_190 = arith.constant 0 : index
    %c174_191 = arith.constant 174 : index
    %c0_192 = arith.constant 0 : index
    %185 = vector.load %arg1[%c0_190, %c174_191, %c0_192] : memref<1x796x32xbf16, #tpu.memory_space<vmem>>, vector<1x448x32xbf16>
    %186 = vector.shape_cast %185 : vector<1x448x32xbf16> to vector<448x32xbf16>
    %c2_193 = arith.constant 2 : index
    %c4_194 = arith.constant 4 : index
    %c0_195 = arith.constant 0 : index
    %c0_196 = arith.constant 0 : index
    %187 = vector.load %arg3[%c2_193, %c4_194, %c0_195, %c0_196] : memref<3x9x32x128xbf16, #tpu.memory_space<vmem>>, vector<1x1x32x128xbf16>
    %188 = vector.shape_cast %187 : vector<1x1x32x128xbf16> to vector<32x128xbf16>
    %cst_197 = arith.constant dense<0.000000e+00> : vector<448x128xf32>
    %189 = tpu.matmul %186, %188, %cst_197 {dimension_numbers = #tpu.dot_dimension_numbers<[1], [0], [0], [1], [0, 0, 1, 1], [], []>} : vector<448x32xbf16>, vector<32x128xbf16>, vector<448x128xf32> -> vector<448x128xf32>
    %190 = arith.addf %184, %189 : vector<448x128xf32>
    %c0_198 = arith.constant 0 : index
    %c180 = arith.constant 180 : index
    %c0_199 = arith.constant 0 : index
    %191 = vector.load %arg1[%c0_198, %c180, %c0_199] : memref<1x796x32xbf16, #tpu.memory_space<vmem>>, vector<1x448x32xbf16>
    %192 = vector.shape_cast %191 : vector<1x448x32xbf16> to vector<448x32xbf16>
    %c2_200 = arith.constant 2 : index
    %c5_201 = arith.constant 5 : index
    %c0_202 = arith.constant 0 : index
    %c0_203 = arith.constant 0 : index
    %193 = vector.load %arg3[%c2_200, %c5_201, %c0_202, %c0_203] : memref<3x9x32x128xbf16, #tpu.memory_space<vmem>>, vector<1x1x32x128xbf16>
    %194 = vector.shape_cast %193 : vector<1x1x32x128xbf16> to vector<32x128xbf16>
    %cst_204 = arith.constant dense<0.000000e+00> : vector<448x128xf32>
    %195 = tpu.matmul %192, %194, %cst_204 {dimension_numbers = #tpu.dot_dimension_numbers<[1], [0], [0], [1], [0, 0, 1, 1], [], []>} : vector<448x32xbf16>, vector<32x128xbf16>, vector<448x128xf32> -> vector<448x128xf32>
    %196 = arith.addf %190, %195 : vector<448x128xf32>
    %c0_205 = arith.constant 0 : index
    %c336 = arith.constant 336 : index
    %c0_206 = arith.constant 0 : index
    %197 = vector.load %arg1[%c0_205, %c336, %c0_206] : memref<1x796x32xbf16, #tpu.memory_space<vmem>>, vector<1x448x32xbf16>
    %198 = vector.shape_cast %197 : vector<1x448x32xbf16> to vector<448x32xbf16>
    %c2_207 = arith.constant 2 : index
    %c6_208 = arith.constant 6 : index
    %c0_209 = arith.constant 0 : index
    %c0_210 = arith.constant 0 : index
    %199 = vector.load %arg3[%c2_207, %c6_208, %c0_209, %c0_210] : memref<3x9x32x128xbf16, #tpu.memory_space<vmem>>, vector<1x1x32x128xbf16>
    %200 = vector.shape_cast %199 : vector<1x1x32x128xbf16> to vector<32x128xbf16>
    %cst_211 = arith.constant dense<0.000000e+00> : vector<448x128xf32>
    %201 = tpu.matmul %198, %200, %cst_211 {dimension_numbers = #tpu.dot_dimension_numbers<[1], [0], [0], [1], [0, 0, 1, 1], [], []>} : vector<448x32xbf16>, vector<32x128xbf16>, vector<448x128xf32> -> vector<448x128xf32>
    %202 = arith.addf %196, %201 : vector<448x128xf32>
    %c0_212 = arith.constant 0 : index
    %c342 = arith.constant 342 : index
    %c0_213 = arith.constant 0 : index
    %203 = vector.load %arg1[%c0_212, %c342, %c0_213] : memref<1x796x32xbf16, #tpu.memory_space<vmem>>, vector<1x448x32xbf16>
    %204 = vector.shape_cast %203 : vector<1x448x32xbf16> to vector<448x32xbf16>
    %c2_214 = arith.constant 2 : index
    %c7_215 = arith.constant 7 : index
    %c0_216 = arith.constant 0 : index
    %c0_217 = arith.constant 0 : index
    %205 = vector.load %arg3[%c2_214, %c7_215, %c0_216, %c0_217] : memref<3x9x32x128xbf16, #tpu.memory_space<vmem>>, vector<1x1x32x128xbf16>
    %206 = vector.shape_cast %205 : vector<1x1x32x128xbf16> to vector<32x128xbf16>
    %cst_218 = arith.constant dense<0.000000e+00> : vector<448x128xf32>
    %207 = tpu.matmul %204, %206, %cst_218 {dimension_numbers = #tpu.dot_dimension_numbers<[1], [0], [0], [1], [0, 0, 1, 1], [], []>} : vector<448x32xbf16>, vector<32x128xbf16>, vector<448x128xf32> -> vector<448x128xf32>
    %208 = arith.addf %202, %207 : vector<448x128xf32>
    %c0_219 = arith.constant 0 : index
    %c348 = arith.constant 348 : index
    %c0_220 = arith.constant 0 : index
    %209 = vector.load %arg1[%c0_219, %c348, %c0_220] : memref<1x796x32xbf16, #tpu.memory_space<vmem>>, vector<1x448x32xbf16>
    %210 = vector.shape_cast %209 : vector<1x448x32xbf16> to vector<448x32xbf16>
    %c2_221 = arith.constant 2 : index
    %c8_222 = arith.constant 8 : index
    %c0_223 = arith.constant 0 : index
    %c0_224 = arith.constant 0 : index
    %211 = vector.load %arg3[%c2_221, %c8_222, %c0_223, %c0_224] : memref<3x9x32x128xbf16, #tpu.memory_space<vmem>>, vector<1x1x32x128xbf16>
    %212 = vector.shape_cast %211 : vector<1x1x32x128xbf16> to vector<32x128xbf16>
    %cst_225 = arith.constant dense<0.000000e+00> : vector<448x128xf32>
    %213 = tpu.matmul %210, %212, %cst_225 {dimension_numbers = #tpu.dot_dimension_numbers<[1], [0], [0], [1], [0, 0, 1, 1], [], []>} : vector<448x32xbf16>, vector<32x128xbf16>, vector<448x128xf32> -> vector<448x128xf32>
    %214 = arith.addf %208, %213 : vector<448x128xf32>
    %c3_226 = arith.constant 3 : index
    %c0_227 = arith.constant 0 : index
    %215 = vector.load %arg4[%c3_226, %c0_227] : memref<4x128xf32, #tpu.memory_space<vmem>>, vector<1x128xf32>
    %216 = vector.broadcast %215 : vector<1x128xf32> to vector<448x128xf32>
    %217 = arith.addf %214, %216 : vector<448x128xf32>
    %cst_228 = arith.constant 5.000000e-01 : f32
    %218 = vector.broadcast %cst_228 : f32 to vector<448x128xf32>
    %219 = arith.mulf %218, %217 : vector<448x128xf32>
    %cst_229 = arith.constant 0.707106769 : f32
    %220 = vector.broadcast %cst_229 : f32 to vector<448x128xf32>
    %221 = arith.mulf %217, %220 : vector<448x128xf32>
    %222 = math.erf %221 : vector<448x128xf32>
    %cst_230 = arith.constant 1.000000e+00 : f32
    %223 = vector.broadcast %cst_230 : f32 to vector<448x128xf32>
    %224 = arith.addf %223, %222 : vector<448x128xf32>
    %225 = arith.mulf %219, %224 : vector<448x128xf32>
    %226 = arith.truncf %225 : vector<448x128xf32> to vector<448x128xbf16>
    %c0_231 = arith.constant 0 : index
    %c0_232 = arith.constant 0 : index
    %227 = vector.load %arg8[%c0_231, %c0_232] : memref<448x128xf32, #tpu.memory_space<vmem>>, vector<448x128xf32>
    %c3_233 = arith.constant 3 : index
    %c0_234 = arith.constant 0 : index
    %c0_235 = arith.constant 0 : index
    %228 = vector.load %arg5[%c3_233, %c0_234, %c0_235] : memref<4x128x128xbf16, #tpu.memory_space<vmem>>, vector<1x128x128xbf16>
    %229 = vector.shape_cast %228 : vector<1x128x128xbf16> to vector<128x128xbf16>
    %cst_236 = arith.constant dense<0.000000e+00> : vector<448x128xf32>
    %230 = tpu.matmul %226, %229, %cst_236 {dimension_numbers = #tpu.dot_dimension_numbers<[1], [0], [0], [1], [0, 0, 1, 1], [], []>} : vector<448x128xbf16>, vector<128x128xbf16>, vector<448x128xf32> -> vector<448x128xf32>
    %231 = arith.addf %227, %230 : vector<448x128xf32>
    %c0_237 = arith.constant 0 : index
    %c0_238 = arith.constant 0 : index
    %232 = vector.load %arg8[%c0_237, %c0_238] : memref<448x128xf32, #tpu.memory_space<vmem>>, vector<448x128xf32>
    tpu.vector_store %arg8[%c0_237, %c0_238], %231 {strides = array<i32>} : memref<448x128xf32, #tpu.memory_space<vmem>>, vector<448x128xf32>,
    %c0_239 = arith.constant 0 : index
    %c0_240 = arith.constant 0 : index
    %233 = vector.load %arg8[%c0_239, %c0_240] : memref<448x128xf32, #tpu.memory_space<vmem>>, vector<448x128xf32>
    %c0_241 = arith.constant 0 : index
    %c0_242 = arith.constant 0 : index
    %c0_243 = arith.constant 0 : index
    %234 = vector.load %arg6[%c0_241, %c0_242, %c0_243] : memref<1x1x128xf32, #tpu.memory_space<vmem>>, vector<1x1x128xf32>
    %235 = vector.shape_cast %234 : vector<1x1x128xf32> to vector<1x128xf32>
    %236 = vector.broadcast %235 : vector<1x128xf32> to vector<448x128xf32>
    %237 = arith.addf %233, %236 : vector<448x128xf32>
    %cst_244 = arith.constant 5.000000e-01 : f32
    %238 = vector.broadcast %cst_244 : f32 to vector<448x128xf32>
    %239 = arith.mulf %238, %237 : vector<448x128xf32>
    %cst_245 = arith.constant 0.707106769 : f32
    %240 = vector.broadcast %cst_245 : f32 to vector<448x128xf32>
    %241 = arith.mulf %237, %240 : vector<448x128xf32>
    %242 = math.erf %241 : vector<448x128xf32>
    %cst_246 = arith.constant 1.000000e+00 : f32
    %243 = vector.broadcast %cst_246 : f32 to vector<448x128xf32>
    %244 = arith.addf %243, %242 : vector<448x128xf32>
    %245 = arith.mulf %239, %244 : vector<448x128xf32>
    %c0_247 = arith.constant 0 : index
    %c0_248 = arith.constant 0 : index
    %246 = vector.load %arg7[%c0_247, %c0_248] : memref<448x128xf32, #tpu.memory_space<vmem>>, vector<448x128xf32>
    tpu.vector_store %arg7[%c0_247, %c0_248], %245 {strides = array<i32>} : memref<448x128xf32, #tpu.memory_space<vmem>>, vector<448x128xf32>,
    return
  }
  func.func @transform_0(%arg0: i32) -> (i32, i32, i32) {
    %c0_i32 = arith.constant 0 : i32
    %c0_i32_0 = arith.constant 0 : i32
    %c0_i32_1 = arith.constant 0 : i32
    return %arg0, %c0_i32, %c0_i32_0 : i32, i32, i32
  }
  func.func @transform_1(%arg0: i32) -> (i32, i32) {
    %c0_i32 = arith.constant 0 : i32
    %c0_i32_0 = arith.constant 0 : i32
    %c0_i32_1 = arith.constant 0 : i32
    return %c0_i32, %c0_i32_0 : i32, i32
  }
  func.func @transform_2(%arg0: i32) -> (i32, i32, i32, i32) {
    %c0_i32 = arith.constant 0 : i32
    %c0_i32_0 = arith.constant 0 : i32
    %c0_i32_1 = arith.constant 0 : i32
    %c0_i32_2 = arith.constant 0 : i32
    %c0_i32_3 = arith.constant 0 : i32
    return %c0_i32, %c0_i32_0, %c0_i32_1, %c0_i32_2 : i32, i32, i32, i32
  }
  func.func @transform_3(%arg0: i32) -> (i32, i32) {
    %c0_i32 = arith.constant 0 : i32
    %c0_i32_0 = arith.constant 0 : i32
    %c0_i32_1 = arith.constant 0 : i32
    return %c0_i32, %c0_i32_0 : i32, i32
  }
  func.func @transform_4(%arg0: i32) -> (i32, i32, i32) {
    %c0_i32 = arith.constant 0 : i32
    %c0_i32_0 = arith.constant 0 : i32
    %c0_i32_1 = arith.constant 0 : i32
    %c0_i32_2 = arith.constant 0 : i32
    return %c0_i32, %c0_i32_0, %c0_i32_1 : i32, i32, i32
  }
  func.func @transform_5(%arg0: i32) -> (i32, i32, i32) {
    %c0_i32 = arith.constant 0 : i32
    %c0_i32_0 = arith.constant 0 : i32
    %c0_i32_1 = arith.constant 0 : i32
    return %arg0, %c0_i32, %c0_i32_0 : i32, i32, i32
  }
  func.func @transform_6(%arg0: i32) -> (i32, i32) {
    %c0_i32 = arith.constant 0 : i32
    %c0_i32_0 = arith.constant 0 : i32
    return %arg0, %c0_i32 : i32, i32
  }
}

</mosaic_0001>

<bundles_post_ra>
// kernel: aspp_forward.1
= control target key start
LH: loop header
LB: loop body
LE: loop exit
PB: predicated region body
PF: predicated region fallthrough
CT: control target
= control target key end

     0   :  { %s27762_s21 = smov 0   ;;  %s33237_s0 = inlined_call_operand.vmem [shape: bf16[2,796,32], index: 0, kind: input, shape index: {}]   ;;  %s33238_s1 = inlined_call_operand.vmem [shape: bf16[32,128], index: 1, kind: input, shape index: {}]   ;;  %s33239_s2 = inlined_call_operand.vmem [shape: bf16[3,9,32,128], index: 2, kind: input, shape index: {}]   ;;  %s33240_s3 = inlined_call_operand.vmem [shape: f32[4,128], index: 3, kind: input, shape index: {}]   ;;  %s33241_s4 = inlined_call_operand.vmem [shape: bf16[4,128,128], index: 4, kind: input, shape index: {}]   ;;  %s33242_s5 = inlined_call_operand.vmem [shape: f32[2,1,128], index: 5, kind: input, shape index: {}]   ;;  %s33243_s6 = inlined_call_operand.vmem [shape: f32[896,128], index: 6, kind: output, shape index: {}]  }
   0x1 LB: > { %s27768_s22 = sadd.s32 4294967295, %s27725_s21   ;;  %p20252_p0 = scmp.ge.s32.totalorder %s27725_s21, 1  ;;  %s27725_s21 = sphi %s27762_s21, %s16_s21  }
   0x2   : > { %p220_p1 = scmp.lt.s32.totalorder %s27725_s21, 3 }
   0x4   : > { %p221_p2 = pnand %p20252_p0, %p220_p1 }
   0x6   : > { %224 = sbr.rel (%p221_p2) target bundleno = 2631 (0xa47), region = 44 }
   0xd   : > { %v26376_v0 = vld [vmem:[%s33239_s2 + $0x20] sm:$0xff]   ;;  %p253_p3 = scmp.lt.s32.totalorder %s27768_s22, 1  ;;  %v26377_v1 = vld [vmem:[%s33239_s2 + $0x28] sm:$0xff]   ;;  %v26384_v2 = vld [vmem:[%s33239_s2 + $0x30] sm:$0xff]   ;;  %vm547_vm0 = vcmask 261120   ;;  %vm477_vm1 = vcmask 1044480  }
   0xe   : > { %23139 = vmatprep.subr.bf16.mxu0 %v26376_v0  ;;  %v26429_v3 = vld [vmem:[%s33238_s1] sm:$0xff]   ;;  %v26430_v4 = vld [vmem:[%s33238_s1 + $0x8] sm:$0xff]   ;;  %v26412_v16 = vld [vmem:[%s33239_s2 + $0x38] sm:$0xff]   ;;  %vm2201_vm2 = vcmask 1045504   ;;  %vm7734_vm3 = vcmask 1046528   ;;  %s261_s19 = smul.u32 56, %s27768_s22 }
   0xf   : > { %s27780_s27 = scalar_select %p253_p3, %s27768_s22, 1  ;;  %23140 = vmatpush3.bf16.msra.mxu0 %v26376_v0  ;;  %22887 = vmatprep.subr.bf16.mxu1 %v26429_v3  ;;  %v27820_v21 = vld [vmem:[%s33239_s2 + $0x40] sm:$0xff]  }
  0x10   : > { %23141 = vmatprep.subr.bf16.mxu0 %v26377_v1  ;;  %22888 = vmatpush3.bf16.msra.mxu1 %v26429_v3  ;;  %p262_p4 = scmp.lt.s32.totalorder %s261_s19, 111 }
  0x11   : > { %s26367_s30 = smul.u32 400, %s27780_s27  ;;  %22889 = vmatprep.subr.bf16.mxu1 %v26430_v4  ;;  %s260_s18 = scalar_lea.vmem %s33242_s5, %s27780_s27 }
  0x12   : > { %s33608_s19 = smov (!%p262_p4, %s261_s19), 111 }
  0x13   : > { %s27795_s13 = scalar_lea.vmem %s33237_s0, %s26367_s30  ;;  %23142 = vmatpush3.bf16.msra.mxu0 %v26377_v1  ;;  %s20254_s22 = sshll.u32 %s33608_s19, 3 }
  0x14   : > { %v1575_v5 = vld [vmem:[%s27795_s13 + $0x3c] sm:$0xf]  ;;  %v1576_v6 = vld [vmem:[%s27795_s13 + $0x40] sm:$0xf]  ;;  %v1577_v7 = vld [vmem:[%s27795_s13 + $0x44] sm:$0xf]  ;;  %23199 = vmatprep.subr.bf16.mxu0 %v26384_v2  ;;  %22890 = vmatpush3.bf16.msra.mxu1 %v26430_v4  ;;  %s32968_s23 = scalar_lea.vmem %s33243_s6, %s20254_s22 }
  0x15   : > { %v1578_v8 = vld [vmem:[%s27795_s13 + $0x48] sm:$0xf]  ;;  %v1579_v9 = vld [vmem:[%s27795_s13 + $0x4c] sm:$0xf]  ;;  %v20422_v10 = vcombine.low %v1575_v5, %v1576_v6  ;;  %v27802_v11 = vcombine.low %v1576_v6, %v1577_v7  ;;  %v1580_v14 = vld [vmem:[%s27795_s13 + $0x50] sm:$0xf] }
  0x16   : > { %v27804_v12 = vcombine.low %v1578_v8, %v1579_v9  ;;  %v20423_v13 = vcombine.low %v1577_v7, %v1578_v8  ;;  %v1581_v15 = vld [vmem:[%s27795_s13 + $0x54] sm:$0xf]  ;;  %v20424_v17 = vcombine.low %v1579_v9, %v1580_v14  ;;  %v1582_v19 = vld [vmem:[%s27795_s13 + $0x58] sm:$0xf]  ;;  %v1583_v20 = vld [vmem:[%s27795_s13 + $0x5c] sm:$0xf] }
  0x17   : > { %23143 = vmatprep.mubr.msk.bf16.mxu0 %vm547_vm0, %v20422_v10  ;;  %v27812_v18 = vcombine.low %v1580_v14, %v1581_v15  ;;  %v1584_v22 = vld [vmem:[%s27795_s13 + $0x60] sm:$0xf]  ;;  %v27824_v23 = vcombine.low %v1582_v19, %v1583_v20  ;;  %v27827_v24 = vld [vmem:[%s27795_s13 + $0x64] sm:$0xf]  ;;  %v27830_v25 = vld [vmem:[%s27795_s13 + $0x68] sm:$0xf]  ;;  %v20425_v35 = vcombine.low %v1581_v15, %v1582_v19 }
  0x18   : > { %23144 = vmatmul.mubr.msk.bf16.vlgmr.msra.gmra.mrb[0].mxu0 %vm547_vm0, %v20423_v13  ;;  %v27833_v26 = vcombine.low %v1584_v22, %v27827_v24  ;;  %v27836_v27 = vld [vmem:[%s27795_s13 + $0x6c] sm:$0xf]  ;;  %v27839_v28 = vld [vmem:[%s27795_s13 + $0x70] sm:$0xf]  ;;  %v27842_v29 = vld [vmem:[%s27795_s13 + $0x74] sm:$0xf]  ;;  %v20426_v40 = vcombine.low %v1583_v20, %v1584_v22  ;;  %v20427_v13 = vcombine.low %v27827_v24, %v27830_v25 }
  0x19   : > { %23200 = vmatpush3.bf16.msra.mxu0 %v26384_v2  ;;  %23147 = vmatprep.mubr.msk.bf16.mxu0 %vm547_vm0, %v20424_v17  ;;  %v27846_v30 = vcombine.low %v27830_v25, %v27836_v27  ;;  %v27849_v31 = vld [vmem:[%s27795_s13 + $0x78] sm:$0xf]  ;;  %v27853_v32 = vcombine.low %v27839_v28, %v27842_v29  ;;  %v27856_v33 = vld [vmem:[%s27795_s13 + $0x7c] sm:$0xf]  ;;  %v27859_v34 = vld [vmem:[%s27795_s13 + $0x80] sm:$0xf]  ;;  %v20428_v19 = vcombine.low %v27836_v27, %v27839_v28 }
  0x1a   : > { %23201 = vmatprep.subr.bf16.mxu0 %v26412_v16  ;;  %v27863_v36 = vcombine.low %v27849_v31, %v27856_v33  ;;  %v27866_v37 = vld [vmem:[%s27795_s13 + $0x84] sm:$0xf]  ;;  %v27869_v38 = vld [vmem:[%s27795_s13 + $0x88] sm:$0xf]  ;;  %v27872_v39 = vld [vmem:[%s27795_s13 + $0x8c] sm:$0xf] }
  0x1b   : > { %v27876_v41 = vcombine.low %v27859_v34, %v27866_v37  ;;  %v27879_v42 = vld [vmem:[%s27795_s13 + $0x90] sm:$0xf]  ;;  %v27883_v43 = vcombine.low %v27869_v38, %v27872_v39  ;;  %v27886_v44 = vld [vmem:[%s27795_s13 + $0x94] sm:$0xf]  ;;  %v27889_v45 = vld [vmem:[%s27795_s13 + $0x98] sm:$0xf] }
  0x1c   : > { %v27893_v46 = vcombine.low %v27879_v42, %v27886_v44  ;;  %v27896_v47 = vld [vmem:[%s27795_s13 + $0x9c] sm:$0xf]  ;;  %v27899_v48 = vld [vmem:[%s27795_s13 + $0xa0] sm:$0xf]  ;;  %v27902_v49 = vld [vmem:[%s27795_s13 + $0xa4] sm:$0xf] }
  0x1d   : > { %23202 = vmatpush3.bf16.msra.mxu0 %v26412_v16  ;;  %v27907_v50 = vcombine.low %v27889_v45, %v27896_v47  ;;  %v27910_v51 = vld [vmem:[%s27795_s13 + $0xa8] sm:$0xf]  ;;  %v27914_v52 = vcombine.low %v27899_v48, %v27902_v49  ;;  %v27917_v53 = vld [vmem:[%s27795_s13 + $0xac] sm:$0xf]  ;;  %v27920_v54 = vld [vmem:[%s27795_s13 + $0xb0] sm:$0xf] }
  0x1e   : > { %33331 = vst [vmem:[#allocation3_spill] sm:$0xff] %v27893_v46  ;;  %23259 = vmatprep.subr.bf16.mxu0 %v27820_v21  ;;  %v27925_v55 = vcombine.low %v27910_v51, %v27917_v53  ;;  %v27928_v56 = vld [vmem:[%s27795_s13 + $0xb4] sm:$0xf]  ;;  %v27931_v57 = vld [vmem:[%s27795_s13 + $0xb8] sm:$0xf]  ;;  %v26434_v4 = vld [vmem:[%s27795_s13 + $0x5c] sm:$0xff]   ;;  %v20430_v46 = vcombine.low %v27856_v33, %v27859_v34 }
  0x1f   : > { %33332 = vst [vmem:[#allocation4_spill] sm:$0xff] %v27907_v50  ;;  %33333 = vst [vmem:[#allocation5_spill] sm:$0xff] %v27914_v52  ;;  %v27934_v58 = vld [vmem:[%s27795_s13 + $0xbc] sm:$0xf]  ;;  %v27939_v59 = vcombine.low %v27920_v54, %v27928_v56  ;;  %v27942_v60 = vld [vmem:[%s27795_s13 + $0xc0] sm:$0xf] }
  0x20   : > { %23148 = vmatmul.mubr.msk.bf16.gmra.mrb[4].mxu0 %vm547_vm0, %v20425_v35  ;;  %33334 = vst [vmem:[#allocation6_spill] sm:$0xff] %v27925_v55  ;;  %v27946_v61 = vcombine.low %v27931_v57, %v27934_v58  ;;  %v27949_v62 = vld [vmem:[%s27795_s13 + $0xc4] sm:$0xf]  ;;  %v27952_v63 = vld [vmem:[%s27795_s13 + $0xc8] sm:$0xf]  ;;  %v26443_v50 = vld [vmem:[%s27795_s13 + $0x74] sm:$0xff]  }
  0x21   : > { %23151 = vmatprep.mubr.msk.bf16.mxu0 %vm547_vm0, %v20426_v40  ;;  %33335 = vst [vmem:[#allocation7_spill] sm:$0xff] %v27939_v59  ;;  %v27956_v0 = vcombine.low %v27942_v60, %v27949_v62  ;;  %v27959_v1 = vld [vmem:[%s27795_s13 + $0xcc] sm:$0xf]  ;;  %v27962_v2 = vld [vmem:[%s27795_s13 + $0xd0] sm:$0xf]  ;;  %v26437_v5 = vld [vmem:[%s27795_s13 + $0x64] sm:$0xff]  }
  0x22   : > { %33336 = vst [vmem:[#allocation8_spill] sm:$0xff] %v27946_v61  ;;  %v27965_v3 = vld [vmem:[%s27795_s13 + $0xd4] sm:$0xf]  ;;  %v27971_v6 = vcombine.low %v27952_v63, %v27959_v1  ;;  %v27974_v7 = vld [vmem:[%s27795_s13 + $0xd8] sm:$0xf] }
  0x23   : > { %33337 = vst [vmem:[#allocation9_spill] sm:$0xff] %v27956_v0  ;;  %v27978_v8 = vcombine.low %v27962_v2, %v27965_v3  ;;  %v27981_v9 = vld [vmem:[%s27795_s13 + $0xdc] sm:$0xf]  ;;  %v27984_v10 = vld [vmem:[%s27795_s13 + $0xe0] sm:$0xf] }
  0x24   : > { %33338 = vst [vmem:[#allocation10_spill] sm:$0xff] %v27971_v6  ;;  %v27990_v14 = vcombine.low %v27974_v7, %v27981_v9  ;;  %v27993_v15 = vld [vmem:[%s27795_s13 + $0xe4] sm:$0xf]  ;;  %v27996_v16 = vld [vmem:[%s27795_s13 + $0xe8] sm:$0xf]  ;;  %v481_v6 = vrot.slane %v26437_v5, 3 }
  0x25   : > { %33339 = vst [vmem:[#allocation11_spill] sm:$0xff] %v27978_v8  ;;  %v27999_v17 = vld [vmem:[%s27795_s13 + $0xec] sm:$0xf]  ;;  %v28005_v20 = vcombine.low %v27984_v10, %v27993_v15  ;;  %v28008_v22 = vld [vmem:[%s27795_s13 + $0xf0] sm:$0xf] }
  0x26   : > { %33340 = vst [vmem:[#allocation12_spill] sm:$0xff] %v27990_v14  ;;  %v28012_v24 = vcombine.low %v27996_v16, %v27999_v17  ;;  %v28015_v25 = vld [vmem:[%s27795_s13 + $0xf4] sm:$0xf]  ;;  %v28018_v35 = vld [vmem:[%s27795_s13 + $0xf8] sm:$0xf]  ;;  %v479_v14 = vrot.slane %v26434_v4, 3 }
  0x27   : > { %33341 = vst [vmem:[#allocation13_spill] sm:$0xff] %v28005_v20  ;;  %v28022_v27 = vcombine.low %v28008_v22, %v28015_v25  ;;  %v28025_v28 = vld [vmem:[%s27795_s13 + $0xfc] sm:$0xf]  ;;  %v28028_v40 = vld [vmem:[%s27795_s13 + $0x100] sm:$0xf] }
  0x28   : > { %33342 = vst [vmem:[#allocation14_spill] sm:$0xff] %v28012_v24  ;;  %v28032_v20 = vcombine.low %v28018_v35, %v28025_v28  ;;  %23152 = vmatmul.mubr.msk.bf16.gmra.mrb[8].mxu0 %vm547_vm0, %v20427_v13  ;;  %v26433_v24 = vld [vmem:[%s27795_s13 + $0x54] sm:$0xf8]   ;;  %v28037_v8 = vld [vmem:[%s27795_s13 + $0x104] sm:$0xf]  ;;  %v26440_v13 = vld [vmem:[%s27795_s13 + $0x6c] sm:$0xff]   ;;  %v482_v4 = vsel %vm477_vm1, %v479_v14, %v481_v6 }
  0x29   : > { %33343 = vst [vmem:[#allocation15_spill] sm:$0xff] %v28022_v27  ;;  %23155 = vmatprep.mubr.msk.bf16.mxu0 %vm547_vm0, %v20428_v19  ;;  %v28041_v27 = vld [vmem:[%s27795_s13 + $0x108] sm:$0xf]  ;;  %v28045_v0 = vcombine.low %v28028_v40, %v28037_v8  ;;  %v478_v61 = vrot.slane %v26433_v24, 3  ;;  %v28048_v59 = vld [vmem:[%s27795_s13 + $0x10c] sm:$0xf] }
  0x2a   : > { %33344 = vst [vmem:[#allocation16_spill] sm:$0xff] %v28032_v20  ;;  %v28051_v20 = vld [vmem:[%s27795_s13 + $0x110] sm:$0xf]  ;;  %v28057_v5 = vcombine.low %v28041_v27, %v28048_v59  ;;  %v28060_v19 = vld [vmem:[%s27795_s13 + $0x114] sm:$0xf]  ;;  %v483_v55 = vrot.slane %v26440_v13, 3 }
  0x2b   : > { %33345 = vst [vmem:[#allocation17_spill] sm:$0xff] %v28045_v0  ;;  %v20429_v0 = vcombine.low %v27842_v29, %v27849_v31  ;;  %v480_v24 = vsel %vm477_vm1, %v478_v61, %v479_v14  ;;  %v28067_v52 = vcombine.low %v28051_v20, %v28060_v19  ;;  %v485_v29 = vrot.slane %v26443_v50, 3  ;;  %v26448_v31 = vld [vmem:[%s27795_s13 + $0x7c] sm:$0xff]   ;;  %v28081_v14 = vld [vmem:[%s27795_s13 + $0x64] sm:$0xf] }
  0x2c   : > { %33346 = vst [vmem:[#allocation18_spill] sm:$0xff] %v28057_v5  ;;  %22891 = vmatprep.mubr.msk.bf16.mxu1 %vm547_vm0, %v480_v24  ;;  %v484_v5 = vsel %vm477_vm1, %v481_v6, %v483_v55  ;;  %v28078_v61 = vld [vmem:[%s27795_s13 + $0x60] sm:$0xf]  ;;  %v487_v34 = vrot.slane %v26448_v31, 3  ;;  %v26450_v50 = vld [vmem:[%s27795_s13 + $0x84] sm:$0xff]   ;;  %v20431_v6 = vcombine.low %v27866_v37, %v27869_v38  ;;  %v26454_v37 = vld [vmem:[%s27795_s13 + $0x94] sm:$0xff]   ;;  %v20433_v38 = vcombine.low %v27886_v44, %v27889_v45 }
  0x2d   : > { %22892 = vmatmul.mubr.msk.bf16.vlgmr.msra.gmra.mrb[0].mxu1 %vm547_vm0, %v482_v4  ;;  %v486_v13 = vsel %vm477_vm1, %v483_v55, %v485_v29  ;;  %v489_v24 = vrot.slane %v26450_v50, 3  ;;  %v493_v31 = vrot.slane %v26454_v37, 3  ;;  %v26458_v44 = vld [vmem:[%s27795_s13 + $0xa4] sm:$0xff]   ;;  %v20435_v45 = vcombine.low %v27902_v49, %v27910_v51  ;;  %v26462_v49 = vld [vmem:[%s27795_s13 + $0xb4] sm:$0xff]  }
  0x2e   : > { %22895 = vmatprep.mubr.msk.bf16.mxu1 %vm547_vm0, %v484_v5  ;;  %v488_v4 = vsel %vm477_vm1, %v485_v29, %v487_v34  ;;  %v26452_v5 = vld [vmem:[%s27795_s13 + $0x8c] sm:$0xff]   ;;  %v20434_v29 = vcombine.low %v27896_v47, %v27899_v48  ;;  %v20436_v50 = vcombine.low %v27917_v53, %v27920_v54  ;;  %v20437_v51 = vcombine.low %v27928_v56, %v27931_v57  ;;  %v26464_v54 = vld [vmem:[%s27795_s13 + $0xbc] sm:$0xff]   ;;  %v26466_v57 = vld [vmem:[%s27795_s13 + $0xc4] sm:$0xff]  }
  0x2f   : > { %v490_v55 = vsel %vm477_vm1, %v487_v34, %v489_v24  ;;  %v26460_v48 = vld [vmem:[%s27795_s13 + $0xac] sm:$0xff]   ;;  %v20440_v37 = vcombine.low %v27959_v1, %v27962_v2  ;;  %v20442_v2 = vcombine.low %v27981_v9, %v27984_v10 }
  0x30   : > { %23156 = vmatmul.mubr.msk.bf16.gmra.mrb[12].mxu0 %vm547_vm0, %v20429_v0  ;;  %v20432_v0 = vcombine.low %v27872_v39, %v27879_v42  ;;  %v26456_v42 = vld [vmem:[%s27795_s13 + $0x9c] sm:$0xff]  }
  0x31   : > { %23159 = vmatprep.mubr.msk.bf16.mxu0 %vm547_vm0, %v20430_v46  ;;  %v491_v46 = vrot.slane %v26452_v5, 3  ;;  %v495_v34 = vrot.slane %v26456_v42, 3  ;;  %v26470_v42 = vld [vmem:[%s27795_s13 + $0xd4] sm:$0xff]  }
  0x33   : > { %v492_v39 = vsel %vm477_vm1, %v489_v24, %v491_v46  ;;  %v496_v47 = vsel %vm477_vm1, %v493_v31, %v495_v34  ;;  %v501_v24 = vrot.slane %v26462_v49, 3  ;;  %v26481_v49 = vld [vmem:[%s27795_s13 + $0xfc] sm:$0xff]  }
  0x35   : > { %22896 = vmatmul.mubr.msk.bf16.gmra.mrb[4].mxu1 %vm547_vm0, %v486_v13  ;;  %v494_v13 = vsel %vm477_vm1, %v491_v46, %v493_v31  ;;  %v503_v46 = vrot.slane %v26464_v54, 3  ;;  %v509_v31 = vrot.slane %v26470_v42, 3  ;;  %v26483_v54 = vld [vmem:[%s27795_s13 + $0x104] sm:$0xff]   ;;  %v3063_v42 = vld [vmem:[%s27795_s13 + $0x6c] sm:$0xf] }
  0x36   : > { %22899 = vmatprep.mubr.msk.bf16.mxu1 %vm547_vm0, %v488_v4  ;;  %v499_v4 = vrot.slane %v26460_v48, 3  ;;  %v3057_v48 = vld [vmem:[%s27795_s13 + $0x54] sm:$0xc] }
  0x38   : > { %23160 = vmatmul.mubr.msk.bf16.gmra.mrb[16].mxu0 %vm547_vm0, %v20431_v6  ;;  %v497_v6 = vrot.slane %v26458_v44, 3  ;;  %v502_v56 = vsel %vm477_vm1, %v499_v4, %v501_v24  ;;  %v26476_v44 = vld [vmem:[%s27795_s13 + $0xec] sm:$0xff]  }
  0x39   : > { %23163 = vmatprep.mubr.msk.bf16.mxu0 %vm547_vm0, %v20432_v0  ;;  %v20438_v0 = vcombine.low %v27934_v58, %v27942_v60  ;;  %v504_v58 = vsel %vm477_vm1, %v501_v24, %v503_v46  ;;  %v26468_v60 = vld [vmem:[%s27795_s13 + $0xcc] sm:$0xff]  }
  0x3a   : > { %v498_v5 = vsel %vm477_vm1, %v495_v34, %v497_v6  ;;  %v500_v53 = vsel %vm477_vm1, %v497_v6, %v499_v4  ;;  %v3062_v6 = vld [vmem:[%s27795_s13 + $0x68] sm:$0xf] }
  0x3b   : > { %v28189_v24 = vcombine.low %v28081_v14, %v3062_v6 }
  0x3d   : > { %22900 = vmatmul.mubr.msk.bf16.gmra.mrb[8].mxu1 %vm547_vm0, %v490_v55  ;;  %v20439_v55 = vcombine.low %v27949_v62, %v27952_v63  ;;  %v26472_v63 = vld [vmem:[%s27795_s13 + $0xdc] sm:$0xff]  }
  0x3e   : > { %22903 = vmatprep.mubr.msk.bf16.mxu1 %vm547_vm0, %v492_v39  ;;  %v507_v39 = vrot.slane %v26468_v60, 3  ;;  %v511_v34 = vrot.slane %v26472_v63, 3  ;;  %v20447_v60 = vcombine.low %v28037_v8, %v28041_v27  ;;  %v3065_v8 = vld [vmem:[%s27795_s13 + $0x74] sm:$0xf]  ;;  %v3066_v27 = vld [vmem:[%s27795_s13 + $0x78] sm:$0xf] }
  0x40   : > { %23164 = vmatmul.mubr.msk.bf16.gmra.mrb[20].mxu0 %vm547_vm0, %v20433_v38  ;;  %v505_v38 = vrot.slane %v26466_v57, 3  ;;  %v512_v9 = vsel %vm477_vm1, %v509_v31, %v511_v34  ;;  %v521_v57 = vrot.slane %v26483_v54, 3  ;;  %v3072_v54 = vld [vmem:[%s27795_s13 + $0x90] sm:$0xf] }
  0x41   : > { %23167 = vmatprep.mubr.msk.bf16.mxu0 %vm547_vm0, %v20434_v29  ;;  %v20441_v29 = vcombine.low %v27965_v3, %v27974_v7  ;;  %v510_v3 = vsel %vm477_vm1, %v507_v39, %v509_v31  ;;  %v20443_v7 = vcombine.low %v27993_v15, %v27996_v16  ;;  %v3058_v15 = vld [vmem:[%s27795_s13 + $0x58] sm:$0xf]  ;;  %v3059_v16 = vld [vmem:[%s27795_s13 + $0x5c] sm:$0xf]  ;;  %v26491_v31 = vld [vmem:[%s27795_s13 + $0x124] sm:$0xff]  }
  0x42   : > { %v506_v62 = vsel %vm477_vm1, %v503_v46, %v505_v38  ;;  %v508_v1 = vsel %vm477_vm1, %v505_v38, %v507_v39  ;;  %v26485_v46 = vld [vmem:[%s27795_s13 + $0x10c] sm:$0xff]   ;;  %v20448_v38 = vcombine.low %v28048_v59, %v28051_v20  ;;  %v2612_v39 = vld [vmem:[%s27795_s13 + $0x118] sm:$0xf]  ;;  %v3265_v59 = vrot.slane %v28189_v24, 2 }
  0x45   : > { %22904 = vmatmul.mubr.msk.bf16.gmra.mrb[12].mxu1 %vm547_vm0, %v494_v13  ;;  %v26474_v13 = vld [vmem:[%s27795_s13 + $0xe4] sm:$0xff]  }
  0x46   : > { %22907 = vmatprep.mubr.msk.bf16.mxu1 %vm547_vm0, %v496_v47  ;;  %v513_v10 = vrot.slane %v26474_v13, 3  ;;  %v26479_v47 = vld [vmem:[%s27795_s13 + $0xf4] sm:$0xff]  }
  0x48   : > { %23168 = vmatmul.mubr.msk.bf16.gmra.mrb[24].mxu0 %vm547_vm0, %v20435_v45  ;;  %v20444_v45 = vcombine.low %v27999_v17, %v28008_v22  ;;  %v514_v4 = vsel %vm477_vm1, %v511_v34, %v513_v10  ;;  %v20445_v17 = vcombine.low %v28015_v25, %v28018_v35  ;;  %v519_v25 = vrot.slane %v26481_v49, 3 }
  0x49   : > { %23171 = vmatprep.mubr.msk.bf16.mxu0 %vm547_vm0, %v20436_v50  ;;  %v515_v50 = vrot.slane %v26476_v44, 3  ;;  %v20449_v34 = vcombine.low %v28060_v19, %v2612_v39  ;;  %v3068_v44 = vld [vmem:[%s27795_s13 + $0x80] sm:$0xf] }
  0x4b   : > { %v516_v22 = vsel %vm477_vm1, %v513_v10, %v515_v50  ;;  %v3067_v10 = vld [vmem:[%s27795_s13 + $0x7c] sm:$0xf] }
  0x4c   : > { %v28243_v6 = vcombine.low %v3067_v10, %v3068_v44  ;;  %v3079_v10 = vld [vmem:[%s27795_s13 + $0xac] sm:$0xf]  ;;  %v3080_v44 = vld [vmem:[%s27795_s13 + $0xb0] sm:$0xf] }
  0x4d   : > { %22908 = vmatmul.mubr.msk.bf16.gmra.mrb[16].mxu1 %vm547_vm0, %v498_v5  ;;  %v517_v5 = vrot.slane %v26479_v47, 3 }
  0x4e   : > { %22911 = vmatprep.mubr.msk.bf16.mxu1 %vm547_vm0, %v500_v53  ;;  %v20484_v53 = vcombine.low %v3057_v48, %v3058_v15  ;;  %v529_v48 = vrot.slane %v26491_v31, 3 }
  0x50   : > { %23172 = vmatmul.mubr.msk.bf16.gmra.mrb[28].mxu0 %vm547_vm0, %v20437_v51  ;;  %v20446_v51 = vcombine.low %v28025_v28, %v28028_v40  ;;  %v3262_v28 = vrot.slane %v20484_v53, 2  ;;  %v3744_v40 = vrot.slane %v28189_v24, 3  ;;  %v3071_v53 = vld [vmem:[%s27795_s13 + $0x8c] sm:$0xf]  ;;  %v28483_v24 = vld [vmem:[%s33240_s3] ss:$0 sm:$0xff] }
  0x51   : > { %23175 = vmatprep.mubr.msk.bf16.mxu0 %vm547_vm0, %v20438_v0  ;;  %v28185_v0 = vcombine.low %v3059_v16, %v28078_v61  ;;  %v26495_v16 = vld [vmem:[%s27795_s13 + $0x134] ss:$0 sps:$4 sm:$0x77]  }
  0x53   : > { %v3742_v35 = vrot.slane %v28185_v0, 3  ;;  %v3263_v63 = vrot.slane %v28185_v0, 2  ;;  %v26513_v0 = vld [vmem:[%s33239_s2 + $0x60] sm:$0xff]  }
  0x55   : > { %22912 = vmatmul.mubr.msk.bf16.gmra.mrb[20].mxu1 %vm547_vm0, %v502_v56  ;;  %v518_v56 = vsel %vm477_vm1, %v515_v50, %v517_v5  ;;  %v26493_v50 = vld [vmem:[%s27795_s13 + $0x12c] sm:$0xff]   ;;  %v3266_v49 = vsel %vm2201_vm2, %v3263_v63, %v3265_v59 }
  0x56   : > { %22915 = vmatprep.mubr.msk.bf16.mxu1 %vm547_vm0, %v504_v58  ;;  %v28204_v58 = vsel %vm477_vm1, %v3742_v35, %v3744_v40 }
  0x58   : > { %23176 = vmatmul.mubr.msk.bf16.gmra.mrb[32].mxu0 %vm547_vm0, %v20439_v55  ;;  %v26487_v55 = vld [vmem:[%s27795_s13 + $0x114] sm:$0xff]  }
  0x59   : > { %23179 = vmatprep.mubr.msk.bf16.mxu0 %vm547_vm0, %v20440_v37  ;;  %v520_v37 = vsel %vm477_vm1, %v517_v5, %v519_v25  ;;  %v525_v20 = vrot.slane %v26487_v55, 3  ;;  %v531_v55 = vrot.slane %v26493_v50, 3 }
  0x5d   : > { %22916 = vmatmul.mubr.msk.bf16.gmra.mrb[24].mxu1 %vm547_vm0, %v506_v62  ;;  %v3064_v62 = vld [vmem:[%s27795_s13 + $0x70] sm:$0xf] }
  0x5e   : > { %22919 = vmatprep.mubr.msk.bf16.mxu1 %vm547_vm0, %v508_v1  ;;  %v26489_v1 = vld [vmem:[%s27795_s13 + $0x11c] sm:$0xff]   ;;  %v28226_v13 = vcombine.low %v3063_v42, %v3064_v62  ;;  %v28273_v42 = vcombine.low %v3071_v53, %v3072_v54  ;;  %v532_v62 = vsel %vm477_vm1, %v529_v48, %v531_v55 }
  0x60   : > { %23180 = vmatmul.mubr.msk.bf16.gmra.mrb[36].mxu0 %vm547_vm0, %v20441_v29  ;;  %v523_v29 = vrot.slane %v26485_v46, 3  ;;  %v3267_v19 = vrot.slane %v28226_v13, 2  ;;  %v3074_v46 = vld [vmem:[%s27795_s13 + $0x98] sm:$0xf] }
  0x61   : > { %23183 = vmatprep.mubr.msk.bf16.mxu0 %vm547_vm0, %v20442_v2  ;;  %v522_v2 = vsel %vm477_vm1, %v519_v25, %v521_v57  ;;  %v3271_v25 = vrot.slane %v28243_v6, 2 }
  0x62   : > { %v526_v15 = vsel %vm477_vm1, %v523_v29, %v525_v20 }
  0x65   : > { %22920 = vmatmul.mubr.msk.bf16.gmra.mrb[28].mxu1 %vm547_vm0, %v510_v3  ;;  %v524_v3 = vsel %vm477_vm1, %v521_v57, %v523_v29  ;;  %v3076_v57 = vld [vmem:[%s27795_s13 + $0xa0] sm:$0xf] }
  0x66   : > { %22923 = vmatprep.mubr.msk.bf16.mxu1 %vm547_vm0, %v512_v9  ;;  %v3264_v9 = vsel %vm2201_vm2, %v3262_v28, %v3263_v63  ;;  %v3073_v28 = vld [vmem:[%s27795_s13 + $0x94] sm:$0xf] }
  0x68   : > { %23184 = vmatmul.mubr.msk.bf16.gmra.mrb[40].mxu0 %vm547_vm0, %v20443_v7  ;;  %v28229_v7 = vcombine.low %v3065_v8, %v3066_v27 }
  0x69   : > { %23187 = vmatprep.mubr.msk.bf16.mxu0 %vm547_vm0, %v20444_v45  ;;  %v527_v45 = vrot.slane %v26489_v1, 3 }
  0x6a   : > { %v3269_v47 = vrot.slane %v28229_v7, 2 }
  0x6b   : > { %v528_v5 = vsel %vm477_vm1, %v525_v20, %v527_v45 }
  0x6c   : > { %v3270_v63 = vsel %vm2201_vm2, %v3267_v19, %v3269_v47  ;;  %v3272_v27 = vsel %vm2201_vm2, %v3269_v47, %v3271_v25  ;;  %v3083_v47 = vld [vmem:[%s27795_s13 + $0xbc] sm:$0xf] }
  0x6d   : > { %22924 = vmatmul.mubr.msk.bf16.gmra.mrb[32].mxu1 %vm547_vm0, %v514_v4  ;;  %v26478_v4 = vld [vmem:[%s33239_s2 + $0x48] sm:$0xff]  }
  0x6e   : > { %22927 = vmatprep.mubr.msk.bf16.mxu1 %vm547_vm0, %v516_v22  ;;  %v3069_v22 = vld [vmem:[%s27795_s13 + $0x84] sm:$0xf] }
  0x70   : > { %23188 = vmatmul.mubr.msk.bf16.gmra.mrb[44].mxu0 %vm547_vm0, %v20445_v17  ;;  %v3268_v17 = vsel %vm2201_vm2, %v3265_v59, %v3267_v19  ;;  %v3275_v59 = vrot.slane %v28273_v42, 2  ;;  %v3081_v19 = vld [vmem:[%s27795_s13 + $0xb4] sm:$0xf] }
  0x71   : > { %23191 = vmatprep.mubr.msk.bf16.mxu0 %vm547_vm0, %v20446_v51  ;;  %v3070_v51 = vld [vmem:[%s27795_s13 + $0x88] sm:$0xf] }
  0x72   : > { %v28271_v39 = vcombine.low %v3069_v22, %v3070_v51 }
  0x74   : > { %v3273_v29 = vrot.slane %v28271_v39, 2 }
  0x75   : > { %22928 = vmatmul.mubr.msk.bf16.gmra.mrb[36].mxu1 %vm547_vm0, %v518_v56  ;;  %v3075_v56 = vld [vmem:[%s27795_s13 + $0x9c] sm:$0xf] }
  0x76   : > { %22931 = vmatprep.mubr.msk.bf16.mxu1 %vm547_vm0, %v520_v37  ;;  %v28268_v37 = vld [vmem:[%s33239_s2 + $0x50] sm:$0xff]   ;;  %v28279_v8 = vcombine.low %v3075_v56, %v3076_v57  ;;  %v3274_v31 = vsel %vm2201_vm2, %v3271_v25, %v3273_v29  ;;  %v3087_v56 = vld [vmem:[%s27795_s13 + $0xcc] sm:$0xf] }
  0x77   : > { %v3088_v57 = vld [vmem:[%s27795_s13 + $0xd0] sm:$0xf] }
  0x78   : > { %23192 = vmatmul.mubr.msk.bf16.gmra.mrb[48].mxu0 %vm547_vm0, %v20447_v60  ;;  %v533_v60 = vrot.slane %v26495_v16, 3  ;;  %v3279_v1 = vrot.slane %v28279_v8, 2 }
  0x79   : > { %23195 = vmatprep.mubr.msk.bf16.mxu0 %vm547_vm0, %v20448_v38  ;;  %v530_v38 = vsel %vm477_vm1, %v527_v45, %v529_v48  ;;  %v3082_v45 = vld [vmem:[%s27795_s13 + $0xb8] sm:$0xf]  ;;  %v3084_v48 = vld [vmem:[%s27795_s13 + $0xc0] sm:$0xf] }
  0x7d   : > { %22932 = vmatmul.mubr.msk.bf16.gmra.mrb[40].mxu1 %vm547_vm0, %v522_v2  ;;  %v534_v2 = vsel %vm477_vm1, %v531_v55, %v533_v60  ;;  %v3089_v55 = vld [vmem:[%s27795_s13 + $0xd4] sm:$0xf]  ;;  %v3090_v60 = vld [vmem:[%s27795_s13 + $0xd8] sm:$0xf] }
  0x7e   : > { %22935 = vmatprep.mubr.msk.bf16.mxu1 %vm547_vm0, %v524_v3  ;;  %v3077_v3 = vld [vmem:[%s27795_s13 + $0xa4] sm:$0xf] }
  0x80   : > { %23196 = vmatmul.mubr.msk.bf16.gmra.mrb[52].mxu0 %vm547_vm0, %v20449_v34  ;;  %v3276_v34 = vsel %vm2201_vm2, %v3273_v29, %v3275_v59 }
  0x81   : > { %23203 = vmatprep.mubr.msk.bf16.mxu0 %vm547_vm0, %v3264_v9  ;;  %v3078_v9 = vld [vmem:[%s27795_s13 + $0xa8] sm:$0xf] }
  0x82   : > { %v28305_v50 = vcombine.low %v3077_v3, %v3078_v9 }
  0x85   : > { %22936 = vmatmul.mubr.msk.bf16.gmra.mrb[44].mxu1 %vm547_vm0, %v526_v15  ;;  %v28307_v15 = vcombine.low %v3079_v10, %v3080_v44  ;;  %v3093_v44 = vld [vmem:[%s27795_s13 + $0xe4] sm:$0xf] }
  0x86   : > { %22939 = vmatprep.mubr.msk.bf16.mxu1 %vm547_vm0, %v528_v5  ;;  %v28312_v5 = vcombine.low %v3083_v47, %v3084_v48  ;;  %v3096_v47 = vld [vmem:[%s27795_s13 + $0xf0] sm:$0xf] }
  0x87   : > { %v3283_v22 = vrot.slane %v28307_v15, 2 }
  0x88   : > { %23204 = vmatmul.mubr.msk.bf16.vlgmr.msra.gmra.mrb[0].mxu0 %vm547_vm0, %v3266_v49  ;;  %v3287_v53 = vrot.slane %v28312_v5, 2 }
  0x89   : > { %23260 = vmatpush3.bf16.msra.mxu0 %v27820_v21  ;;  %23207 = vmatprep.mubr.msk.bf16.mxu0 %vm547_vm0, %v3268_v17  ;;  %v28277_v21 = vcombine.low %v3073_v28, %v3074_v46  ;;  %v3281_v17 = vrot.slane %v28305_v50, 2  ;;  %v3085_v28 = vld [vmem:[%s27795_s13 + $0xc4] sm:$0xf]  ;;  %v3086_v46 = vld [vmem:[%s27795_s13 + $0xc8] sm:$0xf] }
  0x8a   : > { %23261 = vmatprep.subr.bf16.mxu0 %v26478_v4 }
  0x8b   : > { %v3277_v20 = vrot.slane %v28277_v21, 2  ;;  %v3282_v54 = vsel %vm2201_vm2, %v3279_v1, %v3281_v17  ;;  %v3284_v25 = vsel %vm2201_vm2, %v3281_v17, %v3283_v22 }
  0x8d   : > { %23262 = vmatpush3.bf16.msra.mxu0 %v26478_v4  ;;  %22940 = vmatmul.mubr.msk.bf16.gmra.mrb[48].mxu1 %vm547_vm0, %v530_v38  ;;  %v3278_v16 = vsel %vm2201_vm2, %v3275_v59, %v3277_v20  ;;  %v28310_v4 = vcombine.low %v3081_v19, %v3082_v45  ;;  %v3280_v49 = vsel %vm2201_vm2, %v3277_v20, %v3279_v1  ;;  %v3091_v38 = vld [vmem:[%s27795_s13 + $0xdc] sm:$0xf]  ;;  %v3094_v19 = vld [vmem:[%s27795_s13 + $0xe8] sm:$0xf]  ;;  %v3095_v45 = vld [vmem:[%s27795_s13 + $0xec] sm:$0xf] }
  0x8e   : > { %23319 = vmatprep.subr.bf16.mxu0 %v28268_v37  ;;  %22943 = vmatprep.mubr.msk.bf16.mxu1 %vm547_vm0, %v532_v62  ;;  %v3092_v62 = vld [vmem:[%s27795_s13 + $0xe0] sm:$0xf]  ;;  %v28338_v59 = vcombine.low %v3089_v55, %v3090_v60 }
  0x8f   : > { %v3285_v51 = vrot.slane %v28310_v4, 2  ;;  %v28340_v20 = vcombine.low %v3091_v38, %v3092_v62  ;;  %v3101_v38 = vld [vmem:[%s27795_s13 + $0x104] sm:$0xf]  ;;  %v3102_v62 = vld [vmem:[%s27795_s13 + $0x108] sm:$0xf] }
  0x90   : > { %23208 = vmatmul.mubr.msk.bf16.gmra.mrb[4].mxu0 %vm547_vm0, %v3270_v63  ;;  %v28333_v63 = vcombine.low %v3085_v28, %v3086_v46 }
  0x91   : > { %23211 = vmatprep.mubr.msk.bf16.mxu0 %vm547_vm0, %v3272_v27  ;;  %v28335_v27 = vcombine.low %v3087_v56, %v3088_v57  ;;  %v3286_v29 = vsel %vm2201_vm2, %v3283_v22, %v3285_v51  ;;  %v3288_v1 = vsel %vm2201_vm2, %v3285_v51, %v3287_v53  ;;  %v3295_v3 = vrot.slane %v28340_v20, 2  ;;  %v3097_v22 = vld [vmem:[%s27795_s13 + $0xf4] sm:$0xf]  ;;  %v3098_v51 = vld [vmem:[%s27795_s13 + $0xf8] sm:$0xf] }
  0x92   : > { %v28374_v56 = vcombine.low %v3097_v22, %v3098_v51  ;;  %v3107_v51 = vld [vmem:[%s27795_s13 + $0x11c] sm:$0xf] }
  0x95   : > { %22944 = vmatmul.mubr.msk.bf16.gmra.mrb[52].mxu1 %vm547_vm0, %v534_v2  ;;  %v3289_v2 = vrot.slane %v28333_v63, 2 }
  0x97   : > { %v3290_v9 = vsel %vm2201_vm2, %v3287_v53, %v3289_v2  ;;  %v3099_v53 = vld [vmem:[%s27795_s13 + $0xfc] sm:$0xf] }
  0x98   : > { %23212 = vmatmul.mubr.msk.bf16.gmra.mrb[8].mxu0 %vm547_vm0, %v3274_v31  ;;  %v3291_v31 = vrot.slane %v28335_v27, 2 }
  0x99   : > { %23215 = vmatprep.mubr.msk.bf16.mxu0 %vm547_vm0, %v3276_v34  ;;  %v3293_v34 = vrot.slane %v28338_v59, 2 }
  0x9a   : > { %v3292_v10 = vsel %vm2201_vm2, %v3289_v2, %v3291_v31 }
  0x9b   : > { %v3294_v48 = vsel %vm2201_vm2, %v3291_v31, %v3293_v34  ;;  %v3296_v17 = vsel %vm2201_vm2, %v3293_v34, %v3295_v3  ;;  %v3103_v31 = vld [vmem:[%s27795_s13 + $0x10c] sm:$0xf]  ;;  %v26505_v34 = vld [vmem:[%s33241_s4 + $0x10] sm:$0xff]  }
  0xa0   : > { %23216 = vmatmul.mubr.msk.bf16.gmra.mrb[12].mxu0 %vm547_vm0, %v3278_v16  ;;  %v28358_v16 = vcombine.low %v3093_v44, %v3094_v19 }
  0xa1   : > { %23219 = vmatprep.mubr.msk.bf16.mxu0 %vm547_vm0, %v3280_v49  ;;  %v28360_v49 = vcombine.low %v3095_v45, %v3096_v47  ;;  %v3105_v47 = vld [vmem:[%s27795_s13 + $0x114] sm:$0xf] }
  0xa2   : > { %v3297_v28 = vrot.slane %v28358_v16, 2 }
  0xa3   : > { %v3299_v46 = vrot.slane %v28360_v49, 2 }
  0xa4   : > { %v3298_v55 = vsel %vm2201_vm2, %v3295_v3, %v3297_v28  ;;  %v3104_v3 = vld [vmem:[%s27795_s13 + $0x110] sm:$0xf] }
  0xa5   : > { %v3300_v60 = vsel %vm2201_vm2, %v3297_v28, %v3299_v46  ;;  %v3111_v28 = vld [vmem:[%s27795_s13 + $0x12c] sm:$0xf] }
  0xa8   : > { %23220 = vmatmul.mubr.msk.bf16.gmra.mrb[16].mxu0 %vm547_vm0, %v3282_v54  ;;  %v3100_v54 = vld [vmem:[%s27795_s13 + $0x100] sm:$0xf] }
  0xa9   : > { %23223 = vmatprep.mubr.msk.bf16.mxu0 %vm547_vm0, %v3284_v25  ;;  %v26503_v25 = vld [vmem:[%s33241_s4] sm:$0xff]   ;;  %v28376_v57 = vcombine.low %v3099_v53, %v3100_v54 }
  0xaa   : > { %22947 = vmatprep.subr.bf16.mxu1 %v26503_v25  ;;  %v3108_v53 = vld [vmem:[%s27795_s13 + $0x120] sm:$0xf]  ;;  %v3109_v54 = vld [vmem:[%s27795_s13 + $0x124] sm:$0xf] }
  0xab   : > { %22948 = vmatpush3.bf16.msra.mxu1 %v26503_v25  ;;  %v3303_v2 = vrot.slane %v28376_v57, 2  ;;  %v3110_v25 = vld [vmem:[%s27795_s13 + $0x128] sm:$0xf] }
  0xb0   : > { %23224 = vmatmul.mubr.msk.bf16.gmra.mrb[20].mxu0 %vm547_vm0, %v3286_v29  ;;  %v3301_v29 = vrot.slane %v28374_v56, 2 }
  0xb1   : > { %23227 = vmatprep.mubr.msk.bf16.mxu0 %vm547_vm0, %v3288_v1  ;;  %v26504_v1 = vld [vmem:[%s33241_s4 + $0x8] sm:$0xff]  }
  0xb2   : > { %22949 = vmatprep.subr.bf16.mxu1 %v26504_v1  ;;  %v3302_v44 = vsel %vm2201_vm2, %v3299_v46, %v3301_v29  ;;  %v3304_v19 = vsel %vm2201_vm2, %v3301_v29, %v3303_v2  ;;  %v26507_v46 = vld [vmem:[%s33241_s4 + $0x20] sm:$0xff]  }
  0xb3   : > { %22950 = vmatpush3.bf16.msra.mxu1 %v26504_v1  ;;  %v28423_v1 = vcombine.low %v3107_v51, %v3108_v53 }
  0xb4   : > { %22951 = vmatprep.subr.bf16.mxu1 %v26505_v34 }
  0xb7   : > { %22952 = vmatpush3.bf16.msra.mxu1 %v26505_v34 }
  0xb8   : > { %23228 = vmatmul.mubr.msk.bf16.gmra.mrb[24].mxu0 %vm547_vm0, %v3290_v9  ;;  %v28394_v9 = vcombine.low %v3101_v38, %v3102_v62  ;;  %v26499_v38 = vld [vmem:[%s27795_s13 + $0x134] ss:$0 sps:$4 sm:$0x33]  }
  0xb9   : > { %23231 = vmatprep.mubr.msk.bf16.mxu0 %vm547_vm0, %v3292_v10  ;;  %v28396_v10 = vcombine.low %v3103_v31, %v3104_v3  ;;  %v28425_v31 = vcombine.low %v3109_v54, %v3110_v25  ;;  %v3317_v53 = vrot.slane %v26499_v38, 2  ;;  %v3746_v25 = vrot.slane %v28226_v13, 3 }
  0xba   : > { %v3305_v45 = vrot.slane %v28394_v9, 2 }
  0xbb   : > { %v3307_v22 = vrot.slane %v28396_v10, 2 }
  0xbc   : > { %v3306_v29 = vsel %vm2201_vm2, %v3303_v2, %v3305_v45 }
  0xbd   : > { %v3308_v3 = vsel %vm2201_vm2, %v3305_v45, %v3307_v22  ;;  %v3311_v45 = vrot.slane %v28423_v1, 2 }
  0xc0   : > { %23232 = vmatmul.mubr.msk.bf16.gmra.mrb[28].mxu0 %vm547_vm0, %v3294_v48  ;;  %v3106_v48 = vld [vmem:[%s27795_s13 + $0x118] sm:$0xf] }
  0xc1   : > { %23235 = vmatprep.mubr.msk.bf16.mxu0 %vm547_vm0, %v3296_v17  ;;  %v26506_v17 = vld [vmem:[%s33241_s4 + $0x18] sm:$0xff]   ;;  %v28420_v62 = vcombine.low %v3105_v47, %v3106_v48  ;;  %v26508_v47 = vld [vmem:[%s33241_s4 + $0x28] sm:$0xff]   ;;  %v26509_v48 = vld [vmem:[%s33241_s4 + $0x30] sm:$0xff]  }
  0xc2   : > { %22953 = vmatprep.subr.bf16.mxu1 %v26506_v17 }
  0xc3   : > { %22954 = vmatpush3.bf16.msra.mxu1 %v26506_v17  ;;  %v3309_v2 = vrot.slane %v28420_v62, 2  ;;  %v3313_v17 = vrot.slane %v28425_v31, 2 }
  0xc4   : > { %22955 = vmatprep.subr.bf16.mxu1 %v26507_v46 }
  0xc7   : > { %22956 = vmatpush3.bf16.msra.mxu1 %v26507_v46  ;;  %v3312_v46 = vsel %vm2201_vm2, %v3309_v2, %v3311_v45 }
  0xc8   : > { %23236 = vmatmul.mubr.msk.bf16.gmra.mrb[32].mxu0 %vm547_vm0, %v3298_v55  ;;  %v3112_v55 = vld [vmem:[%s27795_s13 + $0x130] sm:$0xf]  ;;  %22957 = vmatprep.subr.bf16.mxu1 %v26508_v47 }
  0xc9   : > { %23239 = vmatprep.mubr.msk.bf16.mxu0 %vm547_vm0, %v3300_v60  ;;  %v3728_v60 = vld [vmem:[%s27795_s13 + $0x54] sm:$0x8]  ;;  %v28427_v34 = vcombine.low %v3111_v28, %v3112_v55  ;;  %v3310_v28 = vsel %vm2201_vm2, %v3307_v22, %v3309_v2  ;;  %v3748_v55 = vrot.slane %v28229_v7, 3  ;;  %v3750_v22 = vrot.slane %v28243_v6, 3 }
  0xca   : > { %v3752_v7 = vrot.slane %v28271_v39, 3  ;;  %v3747_v6 = vsel %vm477_vm1, %v3744_v40, %v3746_v25 }
  0xcb   : > { %v3315_v51 = vrot.slane %v28427_v34, 2  ;;  %22958 = vmatpush3.bf16.msra.mxu1 %v26508_v47  ;;  %v3749_v39 = vsel %vm477_vm1, %v3746_v25, %v3748_v55  ;;  %v3751_v40 = vsel %vm477_vm1, %v3748_v55, %v3750_v22  ;;  %v3756_v25 = vrot.slane %v28277_v21, 3 }
  0xcc   : > { %22959 = vmatprep.subr.bf16.mxu1 %v26509_v48 }
  0xcd   : > { %v3316_v13 = vsel %vm2201_vm2, %v3313_v17, %v3315_v51  ;;  %v3318_v38 = vsel %vm2201_vm2, %v3315_v51, %v3317_v53 }
  0xcf   : > { %22960 = vmatpush3.bf16.msra.mxu1 %v26509_v48 }
  0xd0   : > { %23240 = vmatmul.mubr.msk.bf16.gmra.mrb[36].mxu0 %vm547_vm0, %v3302_v44 }
  0xd1   : > { %23243 = vmatprep.mubr.msk.bf16.mxu0 %vm547_vm0, %v3304_v19  ;;  %v27641_v19 = vld [vmem:[%s27795_s13 + $0x58] sm:$0xf] }
  0xd2   : > { %v20547_v33 = vcombine.low %v3728_v60, %v27641_v19  ;;  %v26511_v60 = vld [vmem:[%s33241_s4 + $0x38] sm:$0xff]  }
  0xd3   : > { %22961 = vmatprep.subr.bf16.mxu1 %v26511_v60 }
  0xd4   : > { %v3741_v54 = vrot.slane %v20547_v33, 3  ;;  %22962 = vmatpush3.bf16.msra.mxu1 %v26511_v60  ;;  %v3314_v33 = vsel %vm2201_vm2, %v3311_v45, %v3313_v17  ;;  %v3758_v60 = vrot.slane %v28279_v8, 3 }
  0xd8   : > { %23244 = vmatmul.mubr.msk.bf16.gmra.mrb[40].mxu0 %vm547_vm0, %v3306_v29  ;;  %v3743_v29 = vsel %vm477_vm1, %v3741_v54, %v3742_v35  ;;  %v1635_v35 = vld [vmem:[%s27795_s13 + $0x38] sm:$0x8]  ;;  %v3753_v54 = vsel %vm477_vm1, %v3750_v22, %v3752_v7 }
  0xd9   : > { %23247 = vmatprep.mubr.msk.bf16.mxu0 %vm547_vm0, %v3308_v3  ;;  %v26502_v3 = vld [vmem:[%s33239_s2 + $0x58] sm:$0xff]  }
  0xe0   : > { %23248 = vmatmul.mubr.msk.bf16.gmra.mrb[44].mxu0 %vm547_vm0, %v3310_v28 }
  0xe1   : > { %23251 = vmatprep.mubr.msk.bf16.mxu0 %vm547_vm0, %v3312_v46 }
  0xe8   : > { %23252 = vmatmul.mubr.msk.bf16.gmra.mrb[48].mxu0 %vm547_vm0, %v3314_v33 }
  0xe9   : > { %23255 = vmatprep.mubr.msk.bf16.mxu0 %vm547_vm0, %v3316_v13 }
  0xf0   : > { %23256 = vmatmul.mubr.msk.bf16.gmra.mrb[52].mxu0 %vm547_vm0, %v3318_v38  ;;  %v3760_v38 = vrot.slane %v28305_v50, 3 }
  0xf1   : > { %23263 = vmatprep.mubr.msk.bf16.mxu0 %vm547_vm0, %v3743_v29  ;;  %v3762_v29 = vrot.slane %v28307_v15, 3 }
  0xf8   : > { %23264 = vmatmul.mubr.msk.bf16.vlgmr.msra.gmra.mrb[0].mxu0 %vm547_vm0, %v28204_v58  ;;  %v27642_v58 = vld [vmem:[%s27795_s13 + $0x3c] sm:$0xf] }
  0xf9   : > { %23320 = vmatpush3.bf16.msra.mxu0 %v28268_v37  ;;  %23267 = vmatprep.mubr.msk.bf16.mxu0 %vm547_vm0, %v3747_v6  ;;  %v20327_v19 = vcombine.low %v1635_v35, %v27642_v58  ;;  %v3754_v37 = vrot.slane %v28273_v42, 3 }
  0xfa   : > { %23321 = vmatprep.subr.bf16.mxu0 %v26502_v3 }
  0xfb   : > { %v28492_v17 = vrot.slane %v20327_v19, 3  ;;  %v3755_v42 = vsel %vm477_vm1, %v3752_v7, %v3754_v37 }
  0xfd   : > { %23322 = vmatpush3.bf16.msra.mxu0 %v26502_v3 }
  0xfe   : > { %23379 = vmatprep.subr.bf16.mxu0 %v26513_v0 }
 0x100   : > { %23268 = vmatmul.mubr.msk.bf16.gmra.mrb[4].mxu0 %vm547_vm0, %v3749_v39  ;;  %v22893_v47 = vpop.f32.mrb[0].mxu1 }
 0x101   : > { %23271 = vmatprep.mubr.msk.bf16.mxu0 %vm547_vm0, %v3751_v40  ;;  %v675_v48 = vadd.f32 %v22893_v47, %v28483_v24  ;;  %v666_v45 = vpop.f32.mrb[1].mxu1  ;;  %v3757_v40 = vsel %vm477_vm1, %v3754_v37, %v3756_v25 }
 0x102   : > { %v667_v51 = vadd.f32 %v28483_v24, %v666_v45  ;;  %v22894_v53 = vpop.f32.mrb[2].mxu1  ;;  %v3759_v45 = vsel %vm477_vm1, %v3756_v25, %v3758_v60 }
 0x103   : > { %v947_v28 = vmul.f32 0.70710677, %v675_v48  ;;  %v678_v46 = vadd.f32 %v22894_v53, %v28483_v24  ;;  %v669_v55 = vpop.f32.mrb[3].mxu1 }
 0x104   : > { %v945_v33 = vmul.f32 0.70710677, %v667_v51  ;;  %v670_v13 = vadd.f32 %v28483_v24, %v669_v55 }
 0x105   : > { %27081 = verf.f32 %v947_v28  ;;  %v948_v3 = vmul.f32 0.70710677, %v678_v46  ;;  %v892_v2 = vmul.f32 0.5, %v678_v46  ;;  %v3761_v46 = vsel %vm477_vm1, %v3758_v60, %v3760_v38 }
 0x106   : > { %27083 = verf.f32 %v945_v33  ;;  %v946_v6 = vmul.f32 0.70710677, %v670_v13  ;;  %v890_v44 = vmul.f32 0.5, %v670_v13  ;;  %v3763_v60 = vsel %vm477_vm1, %v3760_v38, %v3762_v29 }
 0x107   : > { %27085 = verf.f32 %v948_v3 }
 0x108   : > { %23272 = vmatmul.mubr.msk.bf16.gmra.mrb[8].mxu0 %vm547_vm0, %v3753_v54  ;;  %27087 = verf.f32 %v946_v6  ;;  %v22897_v7 = vpop.f32.mrb[4].mxu1  ;;  %v891_v6 = vmul.f32 0.5, %v675_v48 }
 0x109   : > { %23275 = vmatprep.mubr.msk.bf16.mxu0 %vm547_vm0, %v3755_v42  ;;  %v691_v35 = vadd.f32 %v22897_v7, %v28483_v24  ;;  %v682_v39 = vpop.f32.mrb[5].mxu1  ;;  %v889_v7 = vmul.f32 0.5, %v667_v51 }
 0x10a   : > { %v683_v19 = vadd.f32 %v28483_v24, %v682_v39  ;;  %v22898_v47 = vpop.f32.mrb[6].mxu1 }
 0x10b   : > { %v951_v54 = vmul.f32 0.70710677, %v691_v35  ;;  %v694_v28 = vadd.f32 %v22898_v47, %v28483_v24  ;;  %v685_v55 = vpop.f32.mrb[7].mxu1  ;;  %v895_v21 = vmul.f32 0.5, %v691_v35 }
 0x10c   : > { %v949_v3 = vmul.f32 0.70710677, %v683_v19  ;;  %v686_v37 = vadd.f32 %v28483_v24, %v685_v55 }
 0x10d   : > { %27089 = verf.f32 %v951_v54  ;;  %v952_v39 = vmul.f32 0.70710677, %v694_v28  ;;  %v896_v35 = vmul.f32 0.5, %v694_v28  ;;  %v33347_v28 = vrot.slane %v28310_v4, 3 }
 0x10e   : > { %27091 = verf.f32 %v949_v3  ;;  %v950_v25 = vmul.f32 0.70710677, %v686_v37 }
 0x10f   : > { %v27082_v53 = vpop.eup %27081  ;;  %27093 = verf.f32 %v952_v39 }
 0x110   : > { %23276 = vmatmul.mubr.msk.bf16.gmra.mrb[12].mxu0 %vm547_vm0, %v3757_v40  ;;  %v27084_v47 = vpop.eup %27083  ;;  %v1059_v42 = vadd.f32 1.0, %v27082_v53  ;;  %27095 = verf.f32 %v950_v25  ;;  %v22901_v33 = vpop.f32.mrb[8].mxu1 }
 0x111   : > { %23279 = vmatprep.mubr.msk.bf16.mxu0 %vm547_vm0, %v3759_v45  ;;  %v27086_v58 = vpop.eup %27085  ;;  %v1057_v55 = vadd.f32 1.0, %v27084_v47  ;;  %v707_v48 = vadd.f32 %v22901_v33, %v28483_v24  ;;  %v698_v51 = vpop.f32.mrb[9].mxu1  ;;  %v3780_v45 = vrot.slane %v28374_v56, 3 }
 0x112   : > { %v27088_v54 = vpop.eup %27087  ;;  %v1115_v13 = vmul.f32 %v1059_v42, %v891_v6  ;;  %v1060_v3 = vadd.f32 1.0, %v27086_v58  ;;  %v699_v40 = vadd.f32 %v28483_v24, %v698_v51  ;;  %v22902_v39 = vpop.f32.mrb[10].mxu1  ;;  %v894_v51 = vmul.f32 0.5, %v686_v37 }
 0x113   : > { %v1113_v53 = vmul.f32 %v1057_v55, %v889_v7  ;;  %v1058_v25 = vadd.f32 1.0, %v27088_v54  ;;  %v955_v0 = vmul.f32 0.70710677, %v707_v48  ;;  %v701_v8 = vpop.f32.mrb[11].mxu1  ;;  %v710_v22 = vadd.f32 %v22902_v39, %v28483_v24 }
 0x114   : > { %v1116_v47 = vmul.f32 %v1060_v3, %v892_v2  ;;  %v953_v33 = vmul.f32 0.70710677, %v699_v40  ;;  %v28534_v42 = vadd.f32 %v28483_v24, %v701_v8  ;;  %v893_v7 = vmul.f32 0.5, %v683_v19 }
 0x115   : > { %v1114_v58 = vmul.f32 %v1058_v25, %v890_v44  ;;  %27097 = verf.f32 %v955_v0  ;;  %v956_v55 = vmul.f32 0.70710677, %v710_v22  ;;  %v3765_v37 = vsel %vm477_vm1, %v3762_v29, %v33347_v28 }
 0x116   : > { %v1170_v6 = vpack.c.bf16 %v1116_v47, %v1115_v13  ;;  %27099 = verf.f32 %v953_v33  ;;  %v954_v54 = vmul.f32 0.70710677, %v28534_v42  ;;  %v3782_v33 = vrot.slane %v28376_v57, 3 }
 0x117   : > { %v27090_v2 = vpop.eup %27089  ;;  %v1169_v3 = vpack.c.bf16 %v1114_v58, %v1113_v53  ;;  %27101 = verf.f32 %v956_v55  ;;  %v33348_v29 = vrot.slane %v28312_v5, 3 }
 0x118   : > { %23280 = vmatmul.mubr.msk.bf16.gmra.mrb[16].mxu0 %vm547_vm0, %v3761_v46  ;;  %v27092_v50 = vpop.eup %27091  ;;  %v1063_v44 = vadd.f32 1.0, %v27090_v2  ;;  %v22905_v38 = vpop.f32.mrb[12].mxu1  ;;  %27103 = verf.f32 %v954_v54  ;;  %v3784_v54 = vrot.slane %v28394_v9, 3 }
 0x119   : > { %23283 = vmatprep.mubr.msk.bf16.mxu0 %vm547_vm0, %v3763_v60  ;;  %v27094_v8 = vpop.eup %27093  ;;  %v1061_v0 = vadd.f32 1.0, %v27092_v50  ;;  %v28540_v19 = vadd.f32 %v22905_v38, %v28483_v24  ;;  %v714_v13 = vpop.f32.mrb[13].mxu1  ;;  %22963 = vmatprep.mubr.bf16.mxu1 %v1169_v3  ;;  %v899_v38 = vmul.f32 0.5, %v707_v48 }
 0x11a   : > { %v27096_v46 = vpop.eup %27095  ;;  %v1119_v39 = vmul.f32 %v1063_v44, %v895_v21  ;;  %v1064_v53 = vadd.f32 1.0, %v27094_v8  ;;  %v715_v25 = vadd.f32 %v28483_v24, %v714_v13  ;;  %v22906_v47 = vpop.f32.mrb[14].mxu1  ;;  %22964 = vmatmul.mubr.bf16.vlgmr.msra.gmra.mrb[56].mxu1 %v1170_v6  ;;  %v33349_v21 = vmov %v33347_v28 }
 0x11b   : > { %v1117_v60 = vmul.f32 %v1061_v0, %v893_v7  ;;  %v1062_v58 = vadd.f32 1.0, %v27096_v46  ;;  %v959_v55 = vmul.f32 0.70710677, %v28540_v19  ;;  %v717_v2 = vpop.f32.mrb[15].mxu1  ;;  %v726_v15 = vadd.f32 %v22906_v47, %v28483_v24 }
 0x11c   : > { %v1120_v3 = vmul.f32 %v1064_v53, %v896_v35  ;;  %v957_v50 = vmul.f32 0.70710677, %v715_v25  ;;  %v3767_v44 = vsel %vm477_vm1, %v33349_v21, %v33348_v29  ;;  %v28558_v7 = vadd.f32 %v28483_v24, %v717_v2 }
 0x11d   : > { %v1118_v6 = vmul.f32 %v1062_v58, %v894_v51  ;;  %27105 = verf.f32 %v959_v55  ;;  %v960_v8 = vmul.f32 0.70710677, %v726_v15  ;;  %v897_v35 = vmul.f32 0.5, %v699_v40 }
 0x11e   : > { %27107 = verf.f32 %v957_v50  ;;  %v1172_v0 = vpack.c.bf16 %v1120_v3, %v1119_v39  ;;  %v900_v46 = vmul.f32 0.5, %v710_v22  ;;  %v958_v28 = vmul.f32 0.70710677, %v28558_v7 }
 0x11f   : > { %v27098_v13 = vpop.eup %27097  ;;  %v1171_v53 = vpack.c.bf16 %v1118_v6, %v1117_v60  ;;  %27109 = verf.f32 %v960_v8  ;;  %v33350_v40 = vrot.slane %v28333_v63, 3  ;;  %v33351_v22 = vmov %v33348_v29 }
 0x120   : > { %23284 = vmatmul.mubr.msk.bf16.gmra.mrb[20].mxu0 %vm547_vm0, %v3765_v37  ;;  %v27100_v4 = vpop.eup %27099  ;;  %v1067_v51 = vadd.f32 1.0, %v27098_v13  ;;  %v22909_v47 = vpop.f32.mrb[16].mxu1  ;;  %27111 = verf.f32 %v958_v28  ;;  %v898_v60 = vmul.f32 0.5, %v28534_v42  ;;  %v3786_v29 = vrot.slane %v28396_v10, 3 }
 0x121   : > { %23287 = vmatprep.mubr.msk.bf16.mxu0 %vm547_vm0, %v3767_v44  ;;  %v1065_v58 = vadd.f32 1.0, %v27100_v4  ;;  %v28564_v48 = vadd.f32 %v22909_v47, %v28483_v24  ;;  %v730_v39 = vpop.f32.mrb[17].mxu1  ;;  %22967 = vmatprep.mubr.bf16.mxu1 %v1171_v53  ;;  %v27102_v55 = vpop.eup %27101  ;;  %v3769_v37 = vsel %vm477_vm1, %v33351_v22, %v33350_v40  ;;  %v33352_v42 = vrot.slane %v28335_v27, 3 }
 0x122   : > { %v28573_v2 = vadd.f32 %v28483_v24, %v730_v39  ;;  %v22910_v3 = vpop.f32.mrb[18].mxu1  ;;  %22968 = vmatmul.mubr.bf16.gmra.mrb[60].mxu1 %v1172_v0  ;;  %v27104_v50 = vpop.eup %27103  ;;  %v1123_v21 = vmul.f32 %v1067_v51, %v899_v38  ;;  %v1068_v44 = vadd.f32 1.0, %v27102_v55  ;;  %v33353_v4 = vmov %v33350_v40 }
 0x123   : > { %v963_v6 = vmul.f32 0.70710677, %v28564_v48  ;;  %v733_v8 = vpop.f32.mrb[19].mxu1  ;;  %v1121_v13 = vmul.f32 %v1065_v58, %v897_v35  ;;  %v1066_v28 = vadd.f32 1.0, %v27104_v50  ;;  %v742_v53 = vadd.f32 %v22910_v3, %v28483_v24 }
 0x124   : > { %v961_v5 = vmul.f32 0.70710677, %v28573_v2  ;;  %v3771_v0 = vsel %vm477_vm1, %v33353_v4, %v33352_v42  ;;  %v1124_v47 = vmul.f32 %v1068_v44, %v900_v46  ;;  %v28585_v38 = vadd.f32 %v28483_v24, %v733_v8 }
 0x125   : > { %27113 = verf.f32 %v963_v6  ;;  %v1122_v51 = vmul.f32 %v1066_v28, %v898_v60  ;;  %v903_v39 = vmul.f32 0.5, %v28540_v19  ;;  %v964_v35 = vmul.f32 0.70710677, %v742_v53 }
 0x126   : > { %27115 = verf.f32 %v961_v5  ;;  %v901_v55 = vmul.f32 0.5, %v715_v25  ;;  %v904_v40 = vmul.f32 0.5, %v726_v15  ;;  %v962_v22 = vmul.f32 0.70710677, %v28585_v38 }
 0x127   : > { %v27106_v58 = vpop.eup %27105  ;;  %v1174_v63 = vpack.c.bf16 %v1124_v47, %v1123_v21  ;;  %27117 = verf.f32 %v964_v35  ;;  %v1173_v44 = vpack.c.bf16 %v1122_v51, %v1121_v13  ;;  %v33354_v25 = vrot.slane %v28338_v59, 3 }
 0x128   : > { %23288 = vmatmul.mubr.msk.bf16.gmra.mrb[24].mxu0 %vm547_vm0, %v3769_v37  ;;  %v27108_v3 = vpop.eup %27107  ;;  %v1071_v46 = vadd.f32 1.0, %v27106_v58  ;;  %v22913_v50 = vpop.f32.mrb[20].mxu1  ;;  %27119 = verf.f32 %v962_v22  ;;  %v33355_v15 = vmov %v33352_v42  ;;  %v902_v21 = vmul.f32 0.5, %v28558_v7 }
 0x129   : > { %23291 = vmatprep.mubr.msk.bf16.mxu0 %vm547_vm0, %v3771_v0  ;;  %v1069_v60 = vadd.f32 1.0, %v27108_v3  ;;  %v28592_v19 = vadd.f32 %v22913_v50, %v28483_v24  ;;  %v746_v6 = vpop.f32.mrb[21].mxu1  ;;  %v27110_v8 = vpop.eup %27109  ;;  %v3773_v37 = vsel %vm477_vm1, %v33355_v15, %v33354_v25  ;;  %22971 = vmatprep.mubr.bf16.mxu1 %v1173_v44  ;;  %v3788_v42 = vrot.slane %v28420_v62, 3 }
 0x12a   : > { %v28601_v28 = vadd.f32 %v28483_v24, %v746_v6  ;;  %v22914_v13 = vpop.f32.mrb[22].mxu1  ;;  %v27112_v5 = vpop.eup %27111  ;;  %v1127_v4 = vmul.f32 %v1071_v46, %v903_v39  ;;  %v1072_v0 = vadd.f32 1.0, %v27110_v8  ;;  %22972 = vmatmul.mubr.bf16.gmra.mrb[64].mxu1 %v1174_v63  ;;  %v33356_v22 = vrot.slane %v28340_v20, 3 }
 0x12b   : > { %v967_v47 = vmul.f32 0.70710677, %v28592_v19  ;;  %v749_v51 = vpop.f32.mrb[23].mxu1  ;;  %v1125_v35 = vmul.f32 %v1069_v60, %v901_v55  ;;  %v1070_v27 = vadd.f32 1.0, %v27112_v5  ;;  %v758_v7 = vadd.f32 %v22914_v13, %v28483_v24 }
 0x12c   : > { %v965_v58 = vmul.f32 0.70710677, %v28601_v28  ;;  %v33357_v3 = vmov %v33354_v25  ;;  %v1128_v44 = vmul.f32 %v1072_v0, %v904_v40  ;;  %v28613_v39 = vadd.f32 %v28483_v24, %v749_v51 }
 0x12d   : > { %v3775_v50 = vsel %vm477_vm1, %v33357_v3, %v33356_v22  ;;  %27121 = verf.f32 %v967_v47  ;;  %v1126_v46 = vmul.f32 %v1070_v27, %v902_v21  ;;  %v907_v63 = vmul.f32 0.5, %v28564_v48 }
 0x12e   : > { %27123 = verf.f32 %v965_v58  ;;  %v968_v55 = vmul.f32 0.70710677, %v758_v7  ;;  %v905_v6 = vmul.f32 0.5, %v28573_v2  ;;  %v908_v8 = vmul.f32 0.5, %v742_v53 }
 0x12f   : > { %v27114_v60 = vpop.eup %27113  ;;  %v966_v59 = vmul.f32 0.70710677, %v28613_v39  ;;  %v1176_v25 = vpack.c.bf16 %v1128_v44, %v1127_v4  ;;  %v1175_v21 = vpack.c.bf16 %v1126_v46, %v1125_v35  ;;  %v33358_v2 = vrot.slane %v28358_v16, 3 }
 0x130   : > { %23292 = vmatmul.mubr.msk.bf16.gmra.mrb[28].mxu0 %vm547_vm0, %v3773_v37  ;;  %v27116_v15 = vpop.eup %27115  ;;  %v1075_v40 = vadd.f32 1.0, %v27114_v60  ;;  %27125 = verf.f32 %v968_v55  ;;  %v22917_v13 = vpop.f32.mrb[24].mxu1  ;;  %v33359_v53 = vmov %v33356_v22  ;;  %v906_v47 = vmul.f32 0.5, %v28585_v38 }
 0x131   : > { %23295 = vmatprep.mubr.msk.bf16.mxu0 %vm547_vm0, %v3775_v50  ;;  %v1073_v5 = vadd.f32 1.0, %v27116_v15  ;;  %27127 = verf.f32 %v966_v59  ;;  %v28621_v48 = vadd.f32 %v22917_v13, %v28483_v24  ;;  %v762_v0 = vpop.f32.mrb[25].mxu1  ;;  %v27118_v37 = vpop.eup %27117  ;;  %v3777_v4 = vsel %vm477_vm1, %v33359_v53, %v33358_v2  ;;  %22975 = vmatprep.mubr.bf16.mxu1 %v1175_v21 }
 0x132   : > { %v28630_v51 = vadd.f32 %v28483_v24, %v762_v0  ;;  %v22918_v35 = vpop.f32.mrb[26].mxu1  ;;  %v27120_v27 = vpop.eup %27119  ;;  %v3790_v58 = vrot.slane %v28423_v1, 3  ;;  %v1131_v22 = vmul.f32 %v1075_v40, %v907_v63  ;;  %v1076_v3 = vadd.f32 1.0, %v27118_v37  ;;  %22976 = vmatmul.mubr.bf16.gmra.mrb[68].mxu1 %v1176_v25 }
 0x133   : > { %v971_v50 = vmul.f32 0.70710677, %v28621_v48  ;;  %v765_v44 = vpop.f32.mrb[27].mxu1  ;;  %v1129_v46 = vmul.f32 %v1073_v5, %v905_v6  ;;  %v1074_v20 = vadd.f32 1.0, %v27120_v27  ;;  %v774_v38 = vadd.f32 %v22918_v35, %v28483_v24 }
 0x134   : > { %v969_v55 = vmul.f32 0.70710677, %v28630_v51  ;;  %v33360_v60 = vrot.slane %v28360_v49, 3  ;;  %v33361_v59 = vmov %v33358_v2  ;;  %v1132_v13 = vmul.f32 %v1076_v3, %v908_v8 }
 0x135   : > { %27129 = verf.f32 %v971_v50  ;;  %v28642_v63 = vadd.f32 %v28483_v24, %v765_v44  ;;  %v1130_v40 = vmul.f32 %v1074_v20, %v906_v47  ;;  %v911_v25 = vmul.f32 0.5, %v28592_v19 }
 0x136   : > { %v3779_v15 = vsel %vm477_vm1, %v33361_v59, %v33360_v60  ;;  %27131 = verf.f32 %v969_v55  ;;  %v972_v6 = vmul.f32 0.70710677, %v774_v38  ;;  %v909_v5 = vmul.f32 0.5, %v28601_v28 }
 0x137   : > { %v27122_v21 = vpop.eup %27121  ;;  %v912_v0 = vmul.f32 0.5, %v758_v7  ;;  %v970_v16 = vmul.f32 0.70710677, %v28642_v63  ;;  %v1178_v37 = vpack.c.bf16 %v1132_v13, %v1131_v22  ;;  %v1177_v47 = vpack.c.bf16 %v1130_v40, %v1129_v46 }
 0x138   : > { %23296 = vmatmul.mubr.msk.bf16.gmra.mrb[32].mxu0 %vm547_vm0, %v3777_v4  ;;  %v27124_v2 = vpop.eup %27123  ;;  %v1079_v8 = vadd.f32 1.0, %v27122_v21  ;;  %27133 = verf.f32 %v972_v6  ;;  %v22921_v53 = vpop.f32.mrb[28].mxu1  ;;  %v33362_v28 = vmov %v33360_v60  ;;  %v910_v22 = vmul.f32 0.5, %v28613_v39 }
 0x139   : > { %23299 = vmatprep.mubr.msk.bf16.mxu0 %vm547_vm0, %v3779_v15  ;;  %v1077_v35 = vadd.f32 1.0, %v27124_v2  ;;  %27135 = verf.f32 %v970_v16  ;;  %v28650_v19 = vadd.f32 %v22921_v53, %v28483_v24  ;;  %v778_v27 = vpop.f32.mrb[29].mxu1  ;;  %v3781_v7 = vsel %vm477_vm1, %v33362_v28, %v3780_v45  ;;  %22979 = vmatprep.mubr.bf16.mxu1 %v1177_v47 }
 0x13a   : > { %v27126_v4 = vpop.eup %27125  ;;  %v28659_v3 = vadd.f32 %v28483_v24, %v778_v27  ;;  %v22922_v50 = vpop.f32.mrb[30].mxu1  ;;  %v3792_v46 = vrot.slane %v28425_v31, 3  ;;  %v1135_v20 = vmul.f32 %v1079_v8, %v911_v25  ;;  %22980 = vmatmul.mubr.bf16.gmra.mrb[72].mxu1 %v1178_v37  ;;  %v3783_v40 = vsel %vm477_vm1, %v3780_v45, %v3782_v33 }
 0x13b   : > { %v27128_v44 = vpop.eup %27127  ;;  %v1080_v55 = vadd.f32 1.0, %v27126_v4  ;;  %v975_v60 = vmul.f32 0.70710677, %v28650_v19  ;;  %v781_v59 = vpop.f32.mrb[31].mxu1  ;;  %v1133_v15 = vmul.f32 %v1077_v35, %v909_v5  ;;  %v790_v39 = vadd.f32 %v22922_v50, %v28483_v24 }
 0x13c   : > { %v1078_v49 = vadd.f32 1.0, %v27128_v44  ;;  %v973_v13 = vmul.f32 0.70710677, %v28659_v3  ;;  %v28671_v25 = vadd.f32 %v28483_v24, %v781_v59  ;;  %v915_v16 = vmul.f32 0.5, %v28621_v48 }
 0x13d   : > { %v1136_v6 = vmul.f32 %v1080_v55, %v912_v0  ;;  %27137 = verf.f32 %v975_v60  ;;  %v976_v5 = vmul.f32 0.70710677, %v790_v39  ;;  %v913_v2 = vmul.f32 0.5, %v28630_v51 }
 0x13e   : > { %v1134_v21 = vmul.f32 %v1078_v49, %v910_v22  ;;  %27139 = verf.f32 %v973_v13  ;;  %v916_v8 = vmul.f32 0.5, %v774_v38  ;;  %v974_v56 = vmul.f32 0.70710677, %v28671_v25 }
 0x13f   : > { %v27130_v37 = vpop.eup %27129  ;;  %v1180_v53 = vpack.c.bf16 %v1136_v6, %v1135_v20  ;;  %27141 = verf.f32 %v976_v5  ;;  %v3785_v51 = vsel %vm477_vm1, %v3782_v33, %v3784_v54  ;;  %v914_v38 = vmul.f32 0.5, %v28642_v63 }
 0x140   : > { %23300 = vmatmul.mubr.msk.bf16.gmra.mrb[36].mxu0 %vm547_vm0, %v3781_v7  ;;  %v27132_v45 = vpop.eup %27131  ;;  %v1083_v0 = vadd.f32 1.0, %v27130_v37  ;;  %v22925_v47 = vpop.f32.mrb[32].mxu1  ;;  %v1179_v35 = vpack.c.bf16 %v1134_v21, %v1133_v15  ;;  %27143 = verf.f32 %v974_v56  ;;  %v3794_v44 = vrot.slane %v28427_v34, 3 }
 0x141   : > { %23303 = vmatprep.mubr.msk.bf16.mxu0 %vm547_vm0, %v3783_v40  ;;  %v1081_v27 = vadd.f32 1.0, %v27132_v45  ;;  %v803_v48 = vadd.f32 %v22925_v47, %v28483_v24  ;;  %v794_v4 = vpop.f32.mrb[33].mxu1  ;;  %v3787_v63 = vsel %vm477_vm1, %v3784_v54, %v3786_v29  ;;  %v919_v21 = vmul.f32 0.5, %v28650_v19  ;;  %v26539_v54 = vld [vmem:[%s33239_s2 + $0x10] sm:$0xff]  }
 0x142   : > { %v27134_v28 = vpop.eup %27133  ;;  %v28686_v7 = vadd.f32 %v28483_v24, %v794_v4  ;;  %22983 = vmatprep.mubr.bf16.mxu1 %v1179_v35  ;;  %v22926_v22 = vpop.f32.mrb[34].mxu1  ;;  %v1139_v20 = vmul.f32 %v1083_v0, %v915_v16  ;;  %v917_v37 = vmul.f32 0.5, %v28659_v3  ;;  %23019 = vmatprep.subr.bf16.mxu1 %v26539_v54  ;;  %v918_v4 = vmul.f32 0.5, %v28671_v25 }
 0x143   : > { %v27136_v50 = vpop.eup %27135  ;;  %v1084_v55 = vadd.f32 1.0, %v27134_v28  ;;  %v979_v60 = vmul.f32 0.70710677, %v803_v48  ;;  %22984 = vmatmul.mubr.bf16.gmra.mrb[76].mxu1 %v1180_v53  ;;  %v797_v59 = vpop.f32.mrb[35].mxu1  ;;  %v1137_v15 = vmul.f32 %v1081_v27, %v913_v2  ;;  %v806_v33 = vadd.f32 %v22926_v22, %v28483_v24 }
 0x144   : > { %v1082_v49 = vadd.f32 1.0, %v27136_v50  ;;  %v977_v57 = vmul.f32 0.70710677, %v28686_v7  ;;  %v28697_v40 = vadd.f32 %v28483_v24, %v797_v59  ;;  %v920_v53 = vmul.f32 0.5, %v790_v39  ;;  %23020 = vmatpush3.bf16.msra.mxu1 %v26539_v54 }
 0x145   : > { %v1140_v13 = vmul.f32 %v1084_v55, %v916_v8  ;;  %27145 = verf.f32 %v979_v60  ;;  %v980_v16 = vmul.f32 0.70710677, %v806_v33  ;;  %v3789_v27 = vsel %vm477_vm1, %v3786_v29, %v3788_v42 }
 0x146   : > { %v1138_v6 = vmul.f32 %v1082_v49, %v914_v38  ;;  %27147 = verf.f32 %v977_v57  ;;  %v978_v2 = vmul.f32 0.70710677, %v28697_v40  ;;  %v923_v50 = vmul.f32 0.5, %v803_v48 }
 0x147   : > { %v27138_v5 = vpop.eup %27137  ;;  %v1182_v9 = vpack.c.bf16 %v1140_v13, %v1139_v20  ;;  %27149 = verf.f32 %v980_v16  ;;  %v3791_v59 = vsel %vm477_vm1, %v3788_v42, %v3790_v58  ;;  %v921_v57 = vmul.f32 0.5, %v28686_v7  ;;  %v26542_v13 = vld [vmem:[%s33239_s2 + $0x18] sm:$0xff]  }
 0x148   : > { %23304 = vmatmul.mubr.msk.bf16.gmra.mrb[40].mxu0 %vm547_vm0, %v3785_v51  ;;  %v27140_v8 = vpop.eup %27139  ;;  %v1087_v56 = vadd.f32 1.0, %v27138_v5  ;;  %v22929_v19 = vpop.f32.mrb[36].mxu1  ;;  %v1181_v45 = vpack.c.bf16 %v1138_v6, %v1137_v15  ;;  %27151 = verf.f32 %v978_v2  ;;  %v924_v62 = vmul.f32 0.5, %v806_v33  ;;  %v26510_v5 = vld [vmem:[%s27795_s13 + $0x134] ss:$0 sps:$4 sm:$0x77]   ;;  %23021 = vmatprep.subr.bf16.mxu1 %v26542_v13 }
 0x149   : > { %23307 = vmatprep.mubr.msk.bf16.mxu0 %vm547_vm0, %v3787_v63  ;;  %v1085_v0 = vadd.f32 1.0, %v27140_v8  ;;  %v28708_v47 = vadd.f32 %v22929_v19, %v28483_v24  ;;  %v810_v3 = vpop.f32.mrb[37].mxu1  ;;  %v27142_v35 = vpop.eup %27141  ;;  %v33364_v33 = vrot.slane %v27804_v12, 3  ;;  %23022 = vmatpush3.bf16.msra.mxu1 %v26542_v13  ;;  %v3795_v1 = vsel %vm477_vm1, %v3792_v46, %v3794_v44 }
 0x14a   : > { %v28717_v39 = vadd.f32 %v28483_v24, %v810_v3  ;;  %22987 = vmatprep.mubr.bf16.mxu1 %v1181_v45  ;;  %v22930_v28 = vpop.f32.mrb[38].mxu1  ;;  %v27144_v51 = vpop.eup %27143  ;;  %v1143_v38 = vmul.f32 %v1087_v56, %v919_v21  ;;  %v1088_v22 = vadd.f32 1.0, %v27142_v35  ;;  %v28757_v56 = vld [vmem:[%s33240_s3] ss:$0 sm:$0xff]  ;;  %v28763_v45 = vld [vmem:[%s27795_s13 + $0x7c] sm:$0xf] }
 0x14b   : > { %v983_v20 = vmul.f32 0.70710677, %v28708_v47  ;;  %22988 = vmatmul.mubr.bf16.gmra.mrb[80].mxu1 %v1182_v9  ;;  %v813_v55 = vpop.f32.mrb[39].mxu1  ;;  %v1141_v60 = vmul.f32 %v1085_v0, %v917_v37  ;;  %v1086_v10 = vadd.f32 1.0, %v27144_v51  ;;  %v28722_v25 = vadd.f32 %v22930_v28, %v28483_v24  ;;  %v28766_v0 = vld [vmem:[%s27795_s13 + $0x80] sm:$0xf] }
 0x14c   : > { %v981_v29 = vmul.f32 0.70710677, %v28717_v39  ;;  %v1144_v15 = vmul.f32 %v1088_v22, %v920_v53  ;;  %v28730_v48 = vadd.f32 %v28483_v24, %v813_v55  ;;  %v33363_v24 = vrot.slane %v27802_v11, 3 }
 0x14d   : > { %27153 = verf.f32 %v983_v20  ;;  %v1142_v49 = vmul.f32 %v1086_v10, %v918_v4  ;;  %v984_v63 = vmul.f32 0.70710677, %v28722_v25  ;;  %v922_v35 = vmul.f32 0.5, %v28697_v40 }
 0x14e   : > { %27155 = verf.f32 %v981_v29  ;;  %v982_v42 = vmul.f32 0.70710677, %v28730_v48  ;;  %v1184_v21 = vpack.c.bf16 %v1144_v15, %v1143_v38  ;;  %v28743_v16 = vsel %vm477_vm1, %v28492_v17, %v33363_v24 }
 0x14f   : > { %v27146_v6 = vpop.eup %27145  ;;  %27157 = verf.f32 %v984_v63  ;;  %v1183_v9 = vpack.c.bf16 %v1142_v49, %v1141_v60  ;;  %v33365_v54 = vmov %v33363_v24  ;;  %v3793_v38 = vsel %vm477_vm1, %v3790_v58, %v3792_v46 }
 0x150   : > { %23308 = vmatmul.mubr.msk.bf16.gmra.mrb[44].mxu0 %vm547_vm0, %v3789_v27  ;;  %v27148_v7 = vpop.eup %27147  ;;  %v1091_v37 = vadd.f32 1.0, %v27146_v6  ;;  %v22933_v2 = vpop.f32.mrb[40].mxu1  ;;  %v28752_v8 = vsel %vm477_vm1, %v33365_v54, %v33364_v33  ;;  %27159 = verf.f32 %v982_v42  ;;  %v3796_v15 = vrot.slane %v26510_v5, 3 }
 0x151   : > { %23311 = vmatprep.mubr.msk.bf16.mxu0 %vm547_vm0, %v3791_v59  ;;  %v1089_v17 = vadd.f32 1.0, %v27148_v7  ;;  %v28760_v53 = vadd.f32 %v28757_v56, %v22933_v2  ;;  %v826_v19 = vpop.f32.mrb[41].mxu1  ;;  %v27150_v3 = vpop.eup %27149  ;;  %22991 = vmatprep.mubr.bf16.mxu1 %v1183_v9  ;;  %v927_v13 = vmul.f32 0.5, %v28708_v47  ;;  %v928_v5 = vmul.f32 0.5, %v28722_v25  ;;  %v27645_v25 = vld [vmem:[%s27795_s13 + $0x5c] sm:$0xf] }
 0x152   : > { %v28770_v27 = vadd.f32 %v28757_v56, %v826_v19  ;;  %v22934_v4 = vpop.f32.mrb[42].mxu1  ;;  %v27152_v51 = vpop.eup %27151  ;;  %v1147_v22 = vmul.f32 %v1091_v37, %v923_v50  ;;  %v1092_v20 = vadd.f32 1.0, %v27150_v3  ;;  %v3797_v9 = vsel %vm477_vm1, %v3794_v44, %v3796_v15  ;;  %v27644_v19 = vld [vmem:[%s27795_s13 + $0x58] sm:$0xf] }
 0x153   : > { %v987_v55 = vmul.f32 0.70710677, %v28760_v53  ;;  %22992 = vmatmul.mubr.bf16.gmra.mrb[84].mxu1 %v1184_v21  ;;  %v829_v40 = vpop.f32.mrb[43].mxu1  ;;  %v1145_v60 = vmul.f32 %v1089_v17, %v921_v57  ;;  %v1090_v10 = vadd.f32 1.0, %v27152_v51  ;;  %v28782_v59 = vadd.f32 %v28757_v56, %v22934_v4 }
 0x154   : > { %v985_v29 = vmul.f32 0.70710677, %v28770_v27  ;;  %v1148_v58 = vmul.f32 %v1092_v20, %v924_v62  ;;  %v28790_v50 = vadd.f32 %v28757_v56, %v829_v40  ;;  %v925_v62 = vmul.f32 0.5, %v28717_v39 }
 0x155   : > { %27161 = verf.f32 %v987_v55  ;;  %v1146_v49 = vmul.f32 %v1090_v10, %v922_v35  ;;  %v988_v57 = vmul.f32 0.70710677, %v28782_v59  ;;  %v926_v39 = vmul.f32 0.5, %v28730_v48 }
 0x156   : > { %27163 = verf.f32 %v985_v29  ;;  %v986_v6 = vmul.f32 0.70710677, %v28790_v50  ;;  %v1186_v31 = vpack.c.bf16 %v1148_v58, %v1147_v22  ;;  %v20583_v3 = vcombine.low %v27644_v19, %v27645_v25 }
 0x157   : > { %v27154_v63 = vpop.eup %27153  ;;  %27165 = verf.f32 %v988_v57  ;;  %v1185_v24 = vpack.c.bf16 %v1146_v49, %v1145_v60  ;;  %v931_v29 = vmul.f32 0.5, %v28760_v53  ;;  %v929_v57 = vmul.f32 0.5, %v28770_v27 }
 0x158   : > { %23312 = vmatmul.mubr.msk.bf16.gmra.mrb[48].mxu0 %vm547_vm0, %v3793_v38  ;;  %v27156_v42 = vpop.eup %27155  ;;  %v1095_v46 = vadd.f32 1.0, %v27154_v63  ;;  %v22937_v21 = vpop.f32.mrb[44].mxu1  ;;  %27167 = verf.f32 %v986_v6 }
 0x159   : > { %23315 = vmatprep.mubr.msk.bf16.mxu0 %vm547_vm0, %v3795_v1  ;;  %v1093_v7 = vadd.f32 1.0, %v27156_v42  ;;  %v28800_v47 = vadd.f32 %v28757_v56, %v22937_v21  ;;  %v842_v37 = vpop.f32.mrb[45].mxu1  ;;  %v27158_v2 = vpop.eup %27157  ;;  %22995 = vmatprep.mubr.bf16.mxu1 %v1185_v24 }
 0x15a   : > { %v28807_v33 = vadd.f32 %v28757_v56, %v842_v37  ;;  %v22938_v54 = vpop.f32.mrb[46].mxu1  ;;  %v27160_v17 = vpop.eup %27159  ;;  %v1151_v35 = vmul.f32 %v1095_v46, %v927_v13  ;;  %v1096_v4 = vadd.f32 1.0, %v27158_v2 }
 0x15b   : > { %v991_v51 = vmul.f32 0.70710677, %v28800_v47  ;;  %22996 = vmatmul.mubr.bf16.gmra.mrb[88].mxu1 %v1186_v31  ;;  %v845_v38 = vpop.f32.mrb[47].mxu1  ;;  %v1149_v34 = vmul.f32 %v1093_v7, %v925_v62  ;;  %v1094_v22 = vadd.f32 1.0, %v27160_v17  ;;  %v28814_v48 = vadd.f32 %v28757_v56, %v22938_v54  ;;  %v27646_v7 = vld [vmem:[%s27795_s13 + $0x68] sm:$0xf] }
 0x15c   : > { %v989_v44 = vmul.f32 0.70710677, %v28807_v33  ;;  %v1152_v20 = vmul.f32 %v1096_v4, %v928_v5  ;;  %v28817_v55 = vadd.f32 %v28757_v56, %v845_v38  ;;  %v932_v31 = vmul.f32 0.5, %v28782_v59  ;;  %v27647_v5 = vld [vmem:[%s27795_s13 + $0x6c] sm:$0xf] }
 0x15d   : > { %27169 = verf.f32 %v991_v51  ;;  %v1150_v40 = vmul.f32 %v1094_v22, %v926_v39  ;;  %v992_v60 = vmul.f32 0.70710677, %v28814_v48  ;;  %v930_v62 = vmul.f32 0.5, %v28790_v50 }
 0x15e   : > { %27171 = verf.f32 %v989_v44  ;;  %v990_v1 = vmul.f32 0.70710677, %v28817_v55  ;;  %v1188_v58 = vpack.c.bf16 %v1152_v20, %v1151_v35  ;;  %v20585_v37 = vcombine.low %v27646_v7, %v27647_v5 }
 0x15f   : > { %v27162_v10 = vpop.eup %27161  ;;  %27173 = verf.f32 %v992_v60  ;;  %v1187_v13 = vpack.c.bf16 %v1150_v40, %v1149_v34  ;;  %v33366_v34 = vcombine.low %v28078_v61, %v28081_v14  ;;  %v935_v22 = vmul.f32 0.5, %v28800_v47  ;;  %v27648_v60 = vld [vmem:[%s33239_s2 + $0x60] sm:$0xff]  }
 0x160   : > { %23316 = vmatmul.mubr.msk.bf16.gmra.mrb[52].mxu0 %vm547_vm0, %v3797_v9  ;;  %v27164_v15 = vpop.eup %27163  ;;  %v1099_v49 = vadd.f32 1.0, %v27162_v10  ;;  %v22941_v63 = vpop.f32.mrb[48].mxu1  ;;  %27175 = verf.f32 %v990_v1  ;;  %v933_v61 = vmul.f32 0.5, %v28807_v33  ;;  %v936_v1 = vmul.f32 0.5, %v28814_v48 }
 0x161   : > { %23323 = vmatprep.mubr.msk.bf16.mxu0 %vm547_vm0, %v20583_v3  ;;  %v1097_v6 = vadd.f32 1.0, %v27164_v15  ;;  %v28827_v53 = vadd.f32 %v28757_v56, %v22941_v63  ;;  %v858_v42 = vpop.f32.mrb[49].mxu1  ;;  %v27166_v46 = vpop.eup %27165  ;;  %22999 = vmatprep.mubr.bf16.mxu1 %v1187_v13  ;;  %v26528_v3 = vld [vmem:[%s33239_s2 + $0x68] sm:$0xff]   ;;  %v27650_v63 = vld [vmem:[%s27795_s13 + $0x74] sm:$0xf] }
 0x162   : > { %v28831_v21 = vadd.f32 %v28757_v56, %v858_v42  ;;  %v22942_v27 = vpop.f32.mrb[50].mxu1  ;;  %v27168_v24 = vpop.eup %27167  ;;  %v1155_v2 = vmul.f32 %v1099_v49, %v931_v29  ;;  %v1100_v9 = vadd.f32 1.0, %v27166_v46  ;;  %v28865_v49 = vld [vmem:[%s33239_s2 + $0x70] sm:$0xff]   ;;  %v27651_v46 = vld [vmem:[%s27795_s13 + $0x78] sm:$0xf] }
 0x163   : > { %v995_v59 = vmul.f32 0.70710677, %v28827_v53  ;;  %23000 = vmatmul.mubr.bf16.gmra.mrb[92].mxu1 %v1188_v58  ;;  %v861_v39 = vpop.f32.mrb[51].mxu1  ;;  %v1153_v54 = vmul.f32 %v1097_v6, %v929_v57  ;;  %v1098_v17 = vadd.f32 1.0, %v27168_v24  ;;  %v28838_v50 = vadd.f32 %v28757_v56, %v22942_v27  ;;  %v27649_v57 = vld [vmem:[%s27795_s13 + $0x70] sm:$0xf] }
 0x164   : > { %v993_v19 = vmul.f32 0.70710677, %v28831_v21  ;;  %v1156_v25 = vmul.f32 %v1100_v9, %v932_v31  ;;  %v28844_v35 = vadd.f32 %v28757_v56, %v861_v39  ;;  %v20586_v13 = vcombine.low %v27649_v57, %v27650_v63 }
 0x165   : > { %27177 = verf.f32 %v995_v59  ;;  %v1154_v4 = vmul.f32 %v1098_v17, %v930_v62  ;;  %v996_v51 = vmul.f32 0.70710677, %v28838_v50  ;;  %v934_v6 = vmul.f32 0.5, %v28817_v55  ;;  %v27652_v62 = vld [vmem:[%s27795_s13 + $0x7c] sm:$0xf] }
 0x166   : > { %27179 = verf.f32 %v993_v19  ;;  %v994_v44 = vmul.f32 0.70710677, %v28844_v35  ;;  %v1190_v20 = vpack.c.bf16 %v1156_v25, %v1155_v2  ;;  %v20587_v27 = vcombine.low %v27651_v46, %v27652_v62 }
 0x167   : > { %v27170_v38 = vpop.eup %27169  ;;  %27181 = verf.f32 %v996_v51  ;;  %v1189_v29 = vpack.c.bf16 %v1154_v4, %v1153_v54  ;;  %v939_v4 = vmul.f32 0.5, %v28827_v53  ;;  %v938_v53 = vmul.f32 0.5, %v28844_v35 }
 0x168   : > { %23324 = vmatmul.mubr.msk.bf16.vlgmr.msra.gmra.mrb[0].mxu0 %vm547_vm0, %v33366_v34  ;;  %v27172_v40 = vpop.eup %27171  ;;  %v1103_v10 = vadd.f32 1.0, %v27170_v38  ;;  %v22945_v14 = vpop.f32.mrb[52].mxu1  ;;  %27183 = verf.f32 %v994_v44 }
 0x169   : > { %23380 = vmatpush3.bf16.msra.mxu0 %v27648_v60  ;;  %23327 = vmatprep.mubr.msk.bf16.mxu0 %vm547_vm0, %v20585_v37  ;;  %v1101_v47 = vadd.f32 1.0, %v27172_v40  ;;  %v28860_v58 = vadd.f32 %v28757_v56, %v22945_v14  ;;  %v874_v15 = vpop.f32.mrb[53].mxu1  ;;  %v27174_v33 = vpop.eup %27173 }
 0x16a   : > { %23381 = vmatprep.subr.bf16.mxu0 %v26528_v3  ;;  %v875_v31 = vadd.f32 %v28757_v56, %v874_v15  ;;  %23003 = vmatprep.mubr.bf16.mxu1 %v1189_v29  ;;  %v22946_v48 = vpop.f32.mrb[54].mxu1  ;;  %v27176_v42 = vpop.eup %27175  ;;  %v1159_v24 = vmul.f32 %v1103_v10, %v935_v22  ;;  %v1104_v7 = vadd.f32 1.0, %v27174_v33  ;;  %v27653_v10 = vld [vmem:[%s27795_s13 + $0x80] sm:$0xf] }
 0x16b   : > { %v999_v5 = vmul.f32 0.70710677, %v28860_v58  ;;  %23004 = vmatmul.mubr.bf16.gmra.mrb[96].mxu1 %v1190_v20  ;;  %v877_v37 = vpop.f32.mrb[55].mxu1  ;;  %v1157_v2 = vmul.f32 %v1101_v47, %v933_v61  ;;  %v1102_v9 = vadd.f32 1.0, %v27176_v42  ;;  %v886_v55 = vadd.f32 %v28757_v56, %v22946_v48  ;;  %v27654_v61 = vld [vmem:[%s27795_s13 + $0x84] sm:$0xf] }
 0x16c   : > { %v997_v59 = vmul.f32 0.70710677, %v875_v31  ;;  %v1160_v39 = vmul.f32 %v1104_v7, %v936_v1  ;;  %v878_v54 = vadd.f32 %v28757_v56, %v877_v37  ;;  %v937_v56 = vmul.f32 0.5, %v28831_v21  ;;  %v27655_v21 = vld [vmem:[%s27795_s13 + $0x88] sm:$0xf] }
 0x16d   : > { %23382 = vmatpush3.bf16.msra.mxu0 %v26528_v3  ;;  %27185 = verf.f32 %v999_v5  ;;  %v1158_v17 = vmul.f32 %v1102_v9, %v934_v6  ;;  %v1000_v19 = vmul.f32 0.70710677, %v886_v55  ;;  %v940_v20 = vmul.f32 0.5, %v28838_v50  ;;  %v27656_v1 = vld [vmem:[%s27795_s13 + $0x8c] sm:$0xf] }
 0x16e   : > { %23439 = vmatprep.subr.bf16.mxu0 %v28865_v49  ;;  %27187 = verf.f32 %v997_v59  ;;  %v998_v3 = vmul.f32 0.70710677, %v878_v54  ;;  %v1192_v51 = vpack.c.bf16 %v1160_v39, %v1159_v24  ;;  %v20588_v14 = vcombine.low %v27653_v10, %v27654_v61  ;;  %v27658_v9 = vld [vmem:[%s27795_s13 + $0x94] sm:$0xf]  ;;  %v27665_v10 = vld [vmem:[%s27795_s13 + $0xb0] sm:$0xf] }
 0x16f   : > { %v27178_v25 = vpop.eup %27177  ;;  %27189 = verf.f32 %v1000_v19  ;;  %v1191_v22 = vpack.c.bf16 %v1158_v17, %v1157_v2  ;;  %v20589_v15 = vcombine.low %v27655_v21, %v27656_v1  ;;  %v943_v35 = vmul.f32 0.5, %v28860_v58  ;;  %v27657_v2 = vld [vmem:[%s27795_s13 + $0x90] sm:$0xf]  ;;  %v27659_v17 = vld [vmem:[%s27795_s13 + $0x98] sm:$0xf] }
 0x170   : > { %23328 = vmatmul.mubr.msk.bf16.gmra.mrb[4].mxu0 %vm547_vm0, %v20586_v13  ;;  %v27180_v38 = vpop.eup %27179  ;;  %v1107_v34 = vadd.f32 1.0, %v27178_v25  ;;  %27191 = verf.f32 %v998_v3  ;;  %v941_v46 = vmul.f32 0.5, %v875_v31  ;;  %v944_v24 = vmul.f32 0.5, %v886_v55  ;;  %v27660_v19 = vld [vmem:[%s27795_s13 + $0x9c] sm:$0xf] }
 0x171   : > { %23331 = vmatprep.mubr.msk.bf16.mxu0 %vm547_vm0, %v20587_v27  ;;  %v1105_v44 = vadd.f32 1.0, %v27180_v38  ;;  %v27182_v40 = vpop.eup %27181  ;;  %23007 = vmatprep.mubr.bf16.mxu1 %v1191_v22  ;;  %v942_v5 = vmul.f32 0.5, %v878_v54  ;;  %v20590_v59 = vcombine.low %v27657_v2, %v27658_v9  ;;  %v20591_v25 = vcombine.low %v27659_v17, %v27660_v19  ;;  %v27661_v38 = vld [vmem:[%s27795_s13 + $0xa0] sm:$0xf]  ;;  %v27666_v61 = vld [vmem:[%s27795_s13 + $0xb4] sm:$0xf] }
 0x172   : > { %v27184_v60 = vpop.eup %27183  ;;  %v1163_v29 = vmul.f32 %v1107_v34, %v939_v4  ;;  %v1108_v47 = vadd.f32 1.0, %v27182_v40  ;;  %v27662_v34 = vld [vmem:[%s27795_s13 + $0xa4] sm:$0xf]  ;;  %v1790_v22 = vrot.slane %v27812_v18, 3  ;;  %v27668_v21 = vld [vmem:[%s27795_s13 + $0xbc] sm:$0xf] }
 0x173   : > { %23008 = vmatmul.mubr.bf16.gmra.mrb[100].mxu1 %v1192_v51  ;;  %v1161_v33 = vmul.f32 %v1105_v44, %v937_v56  ;;  %v1106_v57 = vadd.f32 1.0, %v27184_v60  ;;  %v20592_v56 = vcombine.low %v27661_v38, %v27662_v34  ;;  %v27663_v44 = vld [vmem:[%s27795_s13 + $0xa8] sm:$0xf]  ;;  %v27676_v2 = vld [vmem:[%s27795_s13 + $0xdc] sm:$0xf] }
 0x174   : > { %v1164_v63 = vmul.f32 %v1108_v47, %v940_v20  ;;  %v27664_v20 = vld [vmem:[%s27795_s13 + $0xac] sm:$0xf]  ;;  %v27667_v47 = vld [vmem:[%s27795_s13 + $0xb8] sm:$0xf]  ;;  %v27678_v17 = vld [vmem:[%s27795_s13 + $0xe4] sm:$0xf] }
 0x175   : > { %v1162_v13 = vmul.f32 %v1106_v57, %v938_v53  ;;  %v20593_v40 = vcombine.low %v27663_v44, %v27664_v20  ;;  %v33367_v53 = vrot.slane %v27804_v12, 3  ;;  %v20595_v1 = vcombine.low %v27667_v47, %v27668_v21  ;;  %v27670_v57 = vld [vmem:[%s27795_s13 + $0xc4] sm:$0xf]  ;;  %v27681_v34 = vld [vmem:[%s27795_s13 + $0xf0] sm:$0xf]  ;;  %v33369_v44 = vld [vmem:[#allocation4_spill] sm:$0xff] }
 0x176   : > { %v1194_v6 = vpack.c.bf16 %v1164_v63, %v1163_v29  ;;  %v1792_v29 = vrot.slane %v27824_v23, 3  ;;  %v1808_v20 = vrot.slane %v33369_v44, 3  ;;  %v27685_v47 = vld [vmem:[%s27795_s13 + $0x3c] sm:$0xf] }
 0x177   : > { %v27186_v50 = vpop.eup %27185  ;;  %v1193_v62 = vpack.c.bf16 %v1162_v13, %v1161_v33  ;;  %v1791_v60 = vsel %vm477_vm1, %v33367_v53, %v1790_v22  ;;  %v27669_v33 = vld [vmem:[%s27795_s13 + $0xc0] sm:$0xf]  ;;  %v1796_v13 = vrot.slane %v27846_v30, 3 }
 0x178   : > { %23332 = vmatmul.mubr.msk.bf16.gmra.mrb[8].mxu0 %vm547_vm0, %v20588_v14  ;;  %v27188_v48 = vpop.eup %27187  ;;  %v1111_v42 = vadd.f32 1.0, %v27186_v50  ;;  %v20594_v14 = vcombine.low %v27665_v10, %v27666_v61  ;;  %v20596_v63 = vcombine.low %v27669_v33, %v27670_v57  ;;  %v1798_v50 = vrot.slane %v27853_v32, 3  ;;  %v27684_v10 = vld [vmem:[%s27795_s13 + $0xfc] sm:$0xf] }
 0x179   : > { %23335 = vmatprep.mubr.msk.bf16.mxu0 %vm547_vm0, %v20589_v15  ;;  %v1109_v27 = vadd.f32 1.0, %v27188_v48  ;;  %v27190_v7 = vpop.eup %27189  ;;  %23011 = vmatprep.mubr.bf16.mxu1 %v1193_v62  ;;  %v1793_v15 = vsel %vm477_vm1, %v1790_v22, %v1792_v29  ;;  %v27673_v62 = vld [vmem:[%s27795_s13 + $0xd0] sm:$0xf]  ;;  %v33371_v33 = vld [vmem:[#allocation6_spill] sm:$0xff] }
 0x17a   : > { %v27192_v37 = vpop.eup %27191  ;;  %v1167_v58 = vmul.f32 %v1111_v42, %v943_v35  ;;  %v1112_v39 = vadd.f32 1.0, %v27190_v7  ;;  %v27671_v35 = vld [vmem:[%s27795_s13 + $0xc8] sm:$0xf]  ;;  %v1800_v7 = vrot.slane %v27863_v36, 3  ;;  %v1812_v57 = vrot.slane %v33371_v33, 3 }
 0x17b   : > { %23012 = vmatmul.mubr.bf16.gmra.mrb[104].mxu1 %v1194_v6  ;;  %v1165_v31 = vmul.f32 %v1109_v27, %v941_v46  ;;  %v1110_v4 = vadd.f32 1.0, %v27192_v37  ;;  %v27672_v6 = vld [vmem:[%s27795_s13 + $0xcc] sm:$0xf]  ;;  %v1799_v46 = vsel %vm477_vm1, %v1796_v13, %v1798_v50  ;;  %v27674_v27 = vld [vmem:[%s27795_s13 + $0xd4] sm:$0xf] }
 0x17c   : > { %v1168_v55 = vmul.f32 %v1112_v39, %v944_v24  ;;  %v20597_v48 = vcombine.low %v27671_v35, %v27672_v6  ;;  %v20598_v24 = vcombine.low %v27673_v62, %v27674_v27  ;;  %v27675_v37 = vld [vmem:[%s27795_s13 + $0xd8] sm:$0xf]  ;;  %v27677_v39 = vld [vmem:[%s27795_s13 + $0xe0] sm:$0xf]  ;;  %v27689_v35 = vld [vmem:[%s27795_s13 + $0x10c] sm:$0xf] }
 0x17d   : > { %v1166_v3 = vmul.f32 %v1110_v4, %v942_v5  ;;  %v1802_v5 = vrot.slane %v27876_v41, 3  ;;  %v20599_v9 = vcombine.low %v27675_v37, %v27676_v2  ;;  %v20600_v19 = vcombine.low %v27677_v39, %v27678_v17  ;;  %v26574_v62 = vld [vmem:[%s33239_s2] sm:$0xff]   ;;  %v4652_v27 = vld [vmem:[%s27795_s13 + $0x70] sm:$0xc]  ;;  %v33373_v39 = vld [vmem:[#allocation8_spill] sm:$0xff] }
 0x17e   : > { %v1196_v54 = vpack.c.bf16 %v1168_v55, %v1167_v58  ;;  %v27679_v55 = vld [vmem:[%s27795_s13 + $0xe8] sm:$0xf]  ;;  %v4657_v37 = vld [vmem:[%s27795_s13 + $0x84] sm:$0xf]  ;;  %23079 = vmatprep.subr.bf16.mxu1 %v26574_v62  ;;  %v27690_v2 = vld [vmem:[%s27795_s13 + $0x110] sm:$0xf] }
 0x17f   : > { %v1195_v51 = vpack.c.bf16 %v1166_v3, %v1165_v31  ;;  %v1803_v58 = vsel %vm477_vm1, %v1800_v7, %v1802_v5  ;;  %v33368_v31 = vld [vmem:[#allocation3_spill] sm:$0xff]  ;;  %v27680_v3 = vld [vmem:[%s27795_s13 + $0xec] sm:$0xf]  ;;  %v1816_v17 = vrot.slane %v33373_v39, 3 }
 0x180   : > { %23336 = vmatmul.mubr.msk.bf16.gmra.mrb[12].mxu0 %vm547_vm0, %v20590_v59  ;;  %v1801_v59 = vsel %vm477_vm1, %v1798_v50, %v1800_v7  ;;  %v1806_v4 = vrot.slane %v33368_v31, 3  ;;  %v27688_v50 = vld [vmem:[%s27795_s13 + $0x108] sm:$0xf] }
 0x181   : > { %23339 = vmatprep.mubr.msk.bf16.mxu0 %vm547_vm0, %v20591_v25  ;;  %23015 = vmatprep.mubr.bf16.mxu1 %v1195_v51  ;;  %v1804_v25 = vrot.slane %v27883_v43, 3  ;;  %v20605_v6 = vcombine.low %v27688_v50, %v27689_v35  ;;  %v4658_v50 = vld [vmem:[%s27795_s13 + $0x88] sm:$0xf]  ;;  %v4659_v35 = vld [vmem:[%s27795_s13 + $0x8c] sm:$0xf] }
 0x183   : > { %23016 = vmatmul.mubr.bf16.gmra.mrb[108].mxu1 %v1196_v54  ;;  %v20601_v54 = vcombine.low %v27679_v55, %v27680_v3  ;;  %v1805_v51 = vsel %vm477_vm1, %v1802_v5, %v1804_v25  ;;  %v1807_v38 = vsel %vm477_vm1, %v1804_v25, %v1806_v4  ;;  %v4654_v5 = vld [vmem:[%s27795_s13 + $0x78] sm:$0xf]  ;;  %v27693_v55 = vld [vmem:[%s27795_s13 + $0x11c] sm:$0xf] }
 0x184   : > { %23023 = vmatprep.mubr.msk.bf16.mxu1 %vm547_vm0, %v28743_v16  ;;  %v1794_v16 = vrot.slane %v27833_v26, 3 }
 0x186   : > { %v1797_v42 = vsel %vm477_vm1, %v1794_v16, %v1796_v13 }
 0x188   : > { %23340 = vmatmul.mubr.msk.bf16.gmra.mrb[16].mxu0 %vm547_vm0, %v20592_v56  ;;  %v27682_v56 = vld [vmem:[%s27795_s13 + $0xf4] sm:$0xf] }
 0x189   : > { %23343 = vmatprep.mubr.msk.bf16.mxu0 %vm547_vm0, %v20593_v40  ;;  %v20602_v22 = vcombine.low %v27681_v34, %v27682_v56  ;;  %v33370_v40 = vld [vmem:[#allocation5_spill] sm:$0xff] }
 0x18a   : > { %v1810_v53 = vrot.slane %v33370_v40, 3 }
 0x18b   : > { %23024 = vmatmul.mubr.msk.bf16.vlgmr.msra.gmra.mrb[112].mxu1 %vm547_vm0, %v28752_v8  ;;  %v1795_v8 = vsel %vm477_vm1, %v1792_v29, %v1794_v16  ;;  %v1809_v29 = vsel %vm477_vm1, %v1806_v4, %v1808_v20  ;;  %v27692_v4 = vld [vmem:[%s27795_s13 + $0x118] sm:$0xf] }
 0x18c   : > { %23027 = vmatprep.mubr.msk.bf16.mxu1 %vm547_vm0, %v1791_v60  ;;  %v27683_v60 = vld [vmem:[%s27795_s13 + $0xf8] sm:$0xf]  ;;  %v1811_v16 = vsel %vm477_vm1, %v1808_v20, %v1810_v53  ;;  %v1813_v7 = vsel %vm477_vm1, %v1810_v53, %v1812_v57  ;;  %23080 = vmatpush3.bf16.msra.mxu1 %v26574_v62  ;;  %v20607_v3 = vcombine.low %v27692_v4, %v27693_v55  ;;  %v33377_v62 = vld [vmem:[#allocation12_spill] sm:$0xff]  ;;  %v4663_v55 = vld [vmem:[%s27795_s13 + $0x9c] sm:$0xf] }
 0x18d   : > { %v20603_v61 = vcombine.low %v27683_v60, %v27684_v10 }
 0x190   : > { %23344 = vmatmul.mubr.msk.bf16.gmra.mrb[20].mxu0 %vm547_vm0, %v20594_v14  ;;  %v1574_v14 = vld [vmem:[%s27795_s13 + $0x38] sm:$0xc] }
 0x191   : > { %23347 = vmatprep.mubr.msk.bf16.mxu0 %vm547_vm0, %v20595_v1  ;;  %v20386_v21 = vcombine.low %v1574_v14, %v27685_v47  ;;  %v27686_v1 = vld [vmem:[%s27795_s13 + $0x100] sm:$0xf] }
 0x192   : > { %v27694_v47 = vld [vmem:[%s27795_s13 + $0x120] sm:$0xf] }
 0x193   : > { %23028 = vmatmul.mubr.msk.bf16.gmra.mrb[116].mxu1 %vm547_vm0, %v1793_v15  ;;  %v27687_v15 = vld [vmem:[%s27795_s13 + $0x104] sm:$0xf] }
 0x194   : > { %23031 = vmatprep.mubr.msk.bf16.mxu1 %vm547_vm0, %v1795_v8  ;;  %v20604_v8 = vcombine.low %v27686_v1, %v27687_v15  ;;  %v27696_v15 = vld [vmem:[%s27795_s13 + $0x128] sm:$0xf] }
 0x198   : > { %23348 = vmatmul.mubr.msk.bf16.gmra.mrb[24].mxu0 %vm547_vm0, %v20596_v63  ;;  %v33372_v63 = vld [vmem:[#allocation7_spill] sm:$0xff] }
 0x199   : > { %23351 = vmatprep.mubr.msk.bf16.mxu0 %vm547_vm0, %v20597_v48  ;;  %v1814_v13 = vrot.slane %v33372_v63, 3  ;;  %v2202_v48 = vrot.slane %v20386_v21, 2  ;;  %v27695_v21 = vld [vmem:[%s27795_s13 + $0x124] sm:$0xf] }
 0x19a   : > { %v20608_v1 = vcombine.low %v27694_v47, %v27695_v21  ;;  %v26562_v21 = vld [vmem:[%s33239_s2 + $0x78] sm:$0xff]  }
 0x19b   : > { %23032 = vmatmul.mubr.msk.bf16.gmra.mrb[120].mxu1 %vm547_vm0, %v1797_v42  ;;  %v2203_v42 = vrot.slane %v27802_v11, 2  ;;  %v1815_v11 = vsel %vm477_vm1, %v1812_v57, %v1814_v13  ;;  %v1817_v60 = vsel %vm477_vm1, %v1814_v13, %v1816_v17  ;;  %v4207_v13 = vld [vmem:[%s27795_s13 + $0x134] sm:$0xf] }
 0x19c   : > { %23035 = vmatprep.mubr.msk.bf16.mxu1 %vm547_vm0, %v1799_v46  ;;  %v33260_v46 = vrot.slane %v27804_v12, 2 }
 0x19d   : > { %v29014_v56 = vsel %vm2201_vm2, %v2202_v48, %v2203_v42  ;;  %v4661_v48 = vld [vmem:[%s27795_s13 + $0x94] sm:$0xf] }
 0x1a0   : > { %23352 = vmatmul.mubr.msk.bf16.gmra.mrb[28].mxu0 %vm547_vm0, %v20598_v24  ;;  %v28988_v24 = vld [vmem:[%s27795_s13 + $0x74] sm:$0xf] }
 0x1a1   : > { %23355 = vmatprep.mubr.msk.bf16.mxu0 %vm547_vm0, %v20599_v9  ;;  %v27691_v9 = vld [vmem:[%s27795_s13 + $0x114] sm:$0xf] }
 0x1a3   : > { %23036 = vmatmul.mubr.msk.bf16.gmra.mrb[124].mxu1 %vm547_vm0, %v1801_v59  ;;  %v20606_v59 = vcombine.low %v27690_v2, %v27691_v9  ;;  %v29046_v9 = vcombine.low %v4658_v50, %v4659_v35  ;;  %v29078_v50 = vld [vmem:[%s27795_s13 + $0xac] sm:$0xf] }
 0x1a4   : > { %23039 = vmatprep.mubr.msk.bf16.mxu1 %vm547_vm0, %v1803_v58  ;;  %v20645_v58 = vcombine.low %v4652_v27, %v28988_v24  ;;  %v1824_v27 = vrot.slane %v33377_v62, 3  ;;  %v33381_v35 = vld [vmem:[#allocation16_spill] sm:$0xff] }
 0x1a6   : > { %v4857_v34 = vrot.slane %v20645_v58, 2 }
 0x1a8   : > { %23356 = vmatmul.mubr.msk.bf16.gmra.mrb[32].mxu0 %vm547_vm0, %v20600_v19  ;;  %v33374_v19 = vld [vmem:[#allocation9_spill] sm:$0xff] }
 0x1a9   : > { %23359 = vmatprep.mubr.msk.bf16.mxu0 %vm547_vm0, %v20601_v54  ;;  %v1818_v25 = vrot.slane %v33374_v19, 3  ;;  %v29003_v54 = vcombine.low %v4654_v5, %v28763_v45 }
 0x1ab   : > { %23040 = vmatmul.mubr.msk.bf16.gmra.mrb[128].mxu1 %vm547_vm0, %v1805_v51  ;;  %v29006_v51 = vcombine.low %v28766_v0, %v4657_v37  ;;  %v4858_v20 = vrot.slane %v29003_v54, 2  ;;  %v1819_v10 = vsel %vm477_vm1, %v1816_v17, %v1818_v25  ;;  %v4662_v17 = vld [vmem:[%s27795_s13 + $0x98] sm:$0xf] }
 0x1ac   : > { %23043 = vmatprep.mubr.msk.bf16.mxu1 %vm547_vm0, %v1807_v38  ;;  %v26577_v38 = vld [vmem:[%s33239_s2 + $0x8] sm:$0xff]   ;;  %v29063_v47 = vcombine.low %v4662_v17, %v4663_v55  ;;  %v29108_v17 = vld [vmem:[%s27795_s13 + $0xb8] sm:$0xf]  ;;  %v29111_v55 = vld [vmem:[%s27795_s13 + $0xbc] sm:$0xf] }
 0x1ad   : > { %v4860_v53 = vrot.slane %v29006_v51, 2  ;;  %23081 = vmatprep.subr.bf16.mxu1 %v26577_v38  ;;  %v4859_v58 = vsel %vm2201_vm2, %v4857_v34, %v4858_v20  ;;  %33384 = vst [vmem:[#allocation4_spill] sm:$0xff] %v29108_v17  ;;  %33385 = vst [vmem:[#allocation5_spill] sm:$0xff] %v29111_v55 }
 0x1ae   : > { %23082 = vmatpush3.bf16.msra.mxu1 %v26577_v38  ;;  %v33379_v38 = vld [vmem:[#allocation14_spill] sm:$0xff] }
 0x1b0   : > { %23360 = vmatmul.mubr.msk.bf16.gmra.mrb[36].mxu0 %vm547_vm0, %v20602_v22  ;;  %v29019_v22 = vsel %vm2201_vm2, %v2203_v42, %v33260_v46 }
 0x1b1   : > { %23363 = vmatprep.mubr.msk.bf16.mxu0 %vm547_vm0, %v20603_v61  ;;  %v33375_v61 = vld [vmem:[#allocation10_spill] sm:$0xff] }
 0x1b2   : > { %v1820_v14 = vrot.slane %v33375_v61, 3 }
 0x1b3   : > { %23044 = vmatmul.mubr.msk.bf16.gmra.mrb[132].mxu1 %vm547_vm0, %v1809_v29  ;;  %v33376_v29 = vld [vmem:[#allocation11_spill] sm:$0xff] }
 0x1b4   : > { %23047 = vmatprep.mubr.msk.bf16.mxu1 %vm547_vm0, %v1811_v16  ;;  %v1822_v16 = vrot.slane %v33376_v29, 3  ;;  %v1821_v42 = vsel %vm477_vm1, %v1818_v25, %v1820_v14  ;;  %v4862_v25 = vrot.slane %v29046_v9, 2 }
 0x1b6   : > { %v1823_v37 = vsel %vm477_vm1, %v1820_v14, %v1822_v16 }
 0x1b8   : > { %23364 = vmatmul.mubr.msk.bf16.gmra.mrb[40].mxu0 %vm547_vm0, %v20604_v8  ;;  %v27697_v8 = vld [vmem:[%s27795_s13 + $0x12c] sm:$0xf] }
 0x1b9   : > { %23367 = vmatprep.mubr.msk.bf16.mxu0 %vm547_vm0, %v20605_v6  ;;  %v20609_v57 = vcombine.low %v27696_v15, %v27697_v8  ;;  %v4660_v6 = vld [vmem:[%s27795_s13 + $0x90] sm:$0xf]  ;;  %v4664_v15 = vld [vmem:[%s27795_s13 + $0xa0] sm:$0xf]  ;;  %v4665_v8 = vld [vmem:[%s27795_s13 + $0xa4] sm:$0xf] }
 0x1bb   : > { %23048 = vmatmul.mubr.msk.bf16.gmra.mrb[136].mxu1 %vm547_vm0, %v1813_v7  ;;  %v33378_v7 = vld [vmem:[#allocation13_spill] sm:$0xff] }
 0x1bc   : > { %23051 = vmatprep.mubr.msk.bf16.mxu1 %vm547_vm0, %v1815_v11  ;;  %v1826_v5 = vrot.slane %v33378_v7, 3  ;;  %v27698_v11 = vld [vmem:[%s27795_s13 + $0x130] sm:$0xf] }
 0x1bd   : > { %v20610_v2 = vcombine.low %v27698_v11, %v4207_v13  ;;  %v4866_v13 = vrot.slane %v29063_v47, 2 }
 0x1be   : > { %v1827_v14 = vsel %vm477_vm1, %v1824_v27, %v1826_v5 }
 0x1c0   : > { %23368 = vmatmul.mubr.msk.bf16.gmra.mrb[44].mxu0 %vm547_vm0, %v20606_v59  ;;  %v29048_v59 = vcombine.low %v4660_v6, %v4661_v48  ;;  %v1832_v6 = vrot.slane %v33381_v35, 3 }
 0x1c1   : > { %23371 = vmatprep.mubr.msk.bf16.mxu0 %vm547_vm0, %v20607_v3  ;;  %v1825_v3 = vsel %vm477_vm1, %v1822_v16, %v1824_v27  ;;  %v4863_v16 = vsel %vm2201_vm2, %v4860_v53, %v4862_v25 }
 0x1c2   : > { %v4864_v4 = vrot.slane %v29048_v59, 2 }
 0x1c3   : > { %23052 = vmatmul.mubr.msk.bf16.gmra.mrb[140].mxu1 %vm547_vm0, %v1817_v60  ;;  %v1828_v60 = vrot.slane %v33379_v38, 3 }
 0x1c4   : > { %23055 = vmatprep.mubr.msk.bf16.mxu1 %vm547_vm0, %v1819_v10  ;;  %v33380_v10 = vld [vmem:[#allocation15_spill] sm:$0xff]  ;;  %v4867_v11 = vsel %vm2201_vm2, %v4864_v4, %v4866_v13 }
 0x1c5   : > { %v1830_v34 = vrot.slane %v33380_v10, 3 }
 0x1c7   : > { %v1831_v27 = vsel %vm477_vm1, %v1828_v60, %v1830_v34 }
 0x1c8   : > { %23372 = vmatmul.mubr.msk.bf16.gmra.mrb[48].mxu0 %vm547_vm0, %v20608_v1  ;;  %v4861_v1 = vsel %vm2201_vm2, %v4858_v20, %v4860_v53  ;;  %v1829_v20 = vsel %vm477_vm1, %v1826_v5, %v1828_v60  ;;  %v33382_v53 = vld [vmem:[#allocation17_spill] sm:$0xff]  ;;  %v4865_v5 = vsel %vm2201_vm2, %v4862_v25, %v4864_v4  ;;  %v29117_v60 = vld [vmem:[%s27795_s13 + $0xc0] sm:$0xf]  ;;  %v29120_v4 = vld [vmem:[%s27795_s13 + $0xc4] sm:$0xf] }
 0x1c9   : > { %23375 = vmatprep.mubr.msk.bf16.mxu0 %vm547_vm0, %v20609_v57  ;;  %v4666_v57 = vld [vmem:[%s27795_s13 + $0xa8] sm:$0xf]  ;;  %v1834_v48 = vrot.slane %v33382_v53, 3  ;;  %33386 = vst [vmem:[#allocation6_spill] sm:$0xff] %v29117_v60  ;;  %33387 = vst [vmem:[#allocation7_spill] sm:$0xff] %v29120_v4 }
 0x1cb   : > { %23056 = vmatmul.mubr.msk.bf16.gmra.mrb[144].mxu1 %vm547_vm0, %v1821_v42  ;;  %v29088_v42 = vld [vmem:[%s33239_s2 + $0x80] sm:$0xff]  }
 0x1cc   : > { %23059 = vmatprep.mubr.msk.bf16.mxu1 %vm547_vm0, %v1823_v37  ;;  %v29091_v37 = vcombine.low %v4664_v15, %v4665_v8  ;;  %v1835_v15 = vsel %vm477_vm1, %v1832_v6, %v1834_v48  ;;  %v26573_v8 = vld [vmem:[%s27795_s13 + $0x118] ss:$0 sps:$4 sm:$0x77]  }
 0x1ce   : > { %v4868_v25 = vrot.slane %v29091_v37, 2 }
 0x1d0   : > { %23376 = vmatmul.mubr.msk.bf16.gmra.mrb[52].mxu0 %vm547_vm0, %v20610_v2  ;;  %v29102_v2 = vld [vmem:[%s27795_s13 + $0xb0] sm:$0xf] }
 0x1d1   : > { %23383 = vmatprep.mubr.msk.bf16.mxu0 %vm547_vm0, %v4859_v58  ;;  %v29105_v58 = vld [vmem:[%s27795_s13 + $0xb4] sm:$0xf] }
 0x1d2   : > { %33383 = vst [vmem:[#allocation3_spill] sm:$0xff] %v29105_v58 }
 0x1d3   : > { %23060 = vmatmul.mubr.msk.bf16.gmra.mrb[148].mxu1 %vm547_vm0, %v1825_v3 }
 0x1d4   : > { %23063 = vmatprep.mubr.msk.bf16.mxu1 %vm547_vm0, %v1827_v14  ;;  %v1833_v14 = vsel %vm477_vm1, %v1830_v34, %v1832_v6  ;;  %v4869_v34 = vsel %vm2201_vm2, %v4866_v13, %v4868_v25  ;;  %v29151_v13 = vld [vmem:[%s27795_s13 + $0xcc] sm:$0xf] }
 0x1d5   : > { %33390 = vst [vmem:[#allocation9_spill] sm:$0xff] %v29151_v13 }
 0x1d8   : > { %23384 = vmatmul.mubr.msk.bf16.vlgmr.msra.gmra.mrb[0].mxu0 %vm547_vm0, %v4861_v1 }
 0x1d9   : > { %23440 = vmatpush3.bf16.msra.mxu0 %v28865_v49  ;;  %23387 = vmatprep.mubr.msk.bf16.mxu0 %vm547_vm0, %v4863_v16  ;;  %v29094_v49 = vcombine.low %v4666_v57, %v29078_v50  ;;  %v1838_v16 = vrot.slane %v28067_v52, 3  ;;  %v29130_v57 = vcombine.low %v29102_v2, %v29105_v58 }
 0x1da   : > { %23441 = vmatprep.subr.bf16.mxu0 %v26562_v21 }
 0x1db   : > { %23064 = vmatmul.mubr.msk.bf16.gmra.mrb[152].mxu1 %vm547_vm0, %v1829_v20  ;;  %v4870_v3 = vrot.slane %v29094_v49, 2  ;;  %v29134_v20 = vcombine.low %v29108_v17, %v29111_v55  ;;  %v29166_v55 = vld [vmem:[%s27795_s13 + $0xd0] sm:$0xf] }
 0x1dc   : > { %23067 = vmatprep.mubr.msk.bf16.mxu1 %vm547_vm0, %v1831_v27  ;;  %v29140_v27 = vcombine.low %v29117_v60, %v29120_v4  ;;  %v29169_v60 = vld [vmem:[%s27795_s13 + $0xd4] sm:$0xf] }
 0x1dd   : > { %23442 = vmatpush3.bf16.msra.mxu0 %v26562_v21  ;;  %v33388_v21 = vld [vmem:[#allocation18_spill] sm:$0xff]  ;;  %v4871_v6 = vsel %vm2201_vm2, %v4868_v25, %v4870_v3  ;;  %v29196_v58 = vcombine.low %v29166_v55, %v29169_v60 }
 0x1de   : > { %23499 = vmatprep.subr.bf16.mxu0 %v29088_v42  ;;  %v1836_v1 = vrot.slane %v33388_v21, 3  ;;  %v4876_v25 = vrot.slane %v29140_v27, 2 }
 0x1e0   : > { %23388 = vmatmul.mubr.msk.bf16.gmra.mrb[4].mxu0 %vm547_vm0, %v4865_v5  ;;  %v4872_v5 = vrot.slane %v29130_v57, 2  ;;  %v1839_v28 = vsel %vm477_vm1, %v1836_v1, %v1838_v16 }
 0x1e1   : > { %23391 = vmatprep.mubr.msk.bf16.mxu0 %vm547_vm0, %v4867_v11  ;;  %v4874_v11 = vrot.slane %v29134_v20, 2 }
 0x1e2   : > { %v4873_v46 = vsel %vm2201_vm2, %v4870_v3, %v4872_v5  ;;  %v29185_v3 = vld [vmem:[%s27795_s13 + $0xe8] sm:$0xf] }
 0x1e3   : > { %23068 = vmatmul.mubr.msk.bf16.gmra.mrb[156].mxu1 %vm547_vm0, %v1833_v14  ;;  %v29148_v14 = vld [vmem:[%s27795_s13 + $0xc8] sm:$0xf]  ;;  %33394 = vst [vmem:[#allocation13_spill] sm:$0xff] %v29185_v3 }
 0x1e4   : > { %23071 = vmatprep.mubr.msk.bf16.mxu1 %vm547_vm0, %v1835_v15  ;;  %33389 = vst [vmem:[#allocation8_spill] sm:$0xff] %v29148_v14  ;;  %v1837_v15 = vsel %vm477_vm1, %v1834_v48, %v1836_v1  ;;  %v29161_v4 = vcombine.low %v29148_v14, %v29151_v13  ;;  %v29172_v48 = vld [vmem:[%s27795_s13 + $0xd8] sm:$0xf]  ;;  %v29178_v1 = vld [vmem:[%s27795_s13 + $0xe0] sm:$0xf]  ;;  %v2207_v14 = vrot.slane %v27812_v18, 2  ;;  %v4877_v18 = vsel %vm2201_vm2, %v4874_v11, %v4876_v25 }
 0x1e5   : > { %33392 = vst [vmem:[#allocation11_spill] sm:$0xff] %v29178_v1  ;;  %v29188_v13 = vld [vmem:[%s27795_s13 + $0xec] sm:$0xf] }
 0x1e6   : > { %33395 = vst [vmem:[#allocation14_spill] sm:$0xff] %v29188_v13 }
 0x1e8   : > { %23392 = vmatmul.mubr.msk.bf16.gmra.mrb[8].mxu0 %vm547_vm0, %v4869_v34  ;;  %v1840_v34 = vrot.slane %v26573_v8, 3  ;;  %v29175_v8 = vld [vmem:[%s27795_s13 + $0xdc] sm:$0xf] }
 0x1e9   : > { %23395 = vmatprep.mubr.msk.bf16.mxu0 %vm547_vm0, %v4871_v6  ;;  %v4875_v6 = vsel %vm2201_vm2, %v4872_v5, %v4874_v11  ;;  %33391 = vst [vmem:[#allocation10_spill] sm:$0xff] %v29175_v8  ;;  %v29200_v17 = vcombine.low %v29172_v48, %v29175_v8  ;;  %v2209_v11 = vrot.slane %v27824_v23, 2  ;;  %v29239_v23 = vld [vmem:[%s27795_s13 + $0xf8] sm:$0xf] }
 0x1ea   : > { %v1841_v5 = vsel %vm477_vm1, %v1838_v16, %v1840_v34  ;;  %v4880_v34 = vrot.slane %v29196_v58, 2 }
 0x1eb   : > { %23072 = vmatmul.mubr.msk.bf16.gmra.mrb[160].mxu1 %vm547_vm0, %v1837_v15  ;;  %v29181_v15 = vld [vmem:[%s27795_s13 + $0xe4] sm:$0xf] }
 0x1ec   : > { %23075 = vmatprep.mubr.msk.bf16.mxu1 %vm547_vm0, %v1839_v28  ;;  %33393 = vst [vmem:[#allocation12_spill] sm:$0xff] %v29181_v15  ;;  %v4878_v28 = vrot.slane %v29161_v4, 2 }
 0x1ee   : > { %v4879_v16 = vsel %vm2201_vm2, %v4876_v25, %v4878_v28  ;;  %v33396_v25 = vrot.slane %v27804_v12, 2  ;;  %v29242_v12 = vld [vmem:[%s27795_s13 + $0xfc] sm:$0xf] }
 0x1ef   : > { %33398 = vst [vmem:[#allocation16_spill] sm:$0xff] %v29242_v12 }
 0x1f0   : > { %23396 = vmatmul.mubr.msk.bf16.gmra.mrb[12].mxu0 %vm547_vm0, %v4873_v46  ;;  %v29204_v46 = vcombine.low %v29178_v1, %v29181_v15  ;;  %v29232_v1 = vld [vmem:[%s27795_s13 + $0xf0] sm:$0xf] }
 0x1f1   : > { %23399 = vmatprep.mubr.msk.bf16.mxu0 %vm547_vm0, %v4875_v6  ;;  %v29208_v6 = vcombine.low %v29185_v3, %v29188_v13  ;;  %v4882_v13 = vrot.slane %v29200_v17, 2  ;;  %v4881_v3 = vsel %vm2201_vm2, %v4878_v28, %v4880_v34  ;;  %v2215_v28 = vrot.slane %v27853_v32, 2 }
 0x1f2   : > { %v4884_v15 = vrot.slane %v29204_v46, 2 }
 0x1f3   : > { %23076 = vmatmul.mubr.msk.bf16.gmra.mrb[164].mxu1 %vm547_vm0, %v1841_v5  ;;  %v4886_v5 = vrot.slane %v29208_v6, 2  ;;  %v4883_v8 = vsel %vm2201_vm2, %v4880_v34, %v4882_v13 }
 0x1f4   : > { %23083 = vmatprep.mubr.msk.bf16.mxu1 %vm547_vm0, %v29014_v56  ;;  %v2211_v56 = vrot.slane %v27833_v26, 2  ;;  %v2210_v26 = vsel %vm2201_vm2, %v2207_v14, %v2209_v11 }
 0x1f6   : > { %v2212_v34 = vsel %vm2201_vm2, %v2209_v11, %v2211_v56  ;;  %v29265_v11 = vld [vmem:[%s27795_s13 + $0x100] sm:$0xf] }
 0x1f7   : > { %33399 = vst [vmem:[#allocation17_spill] sm:$0xff] %v29265_v11 }
 0x1f8   : > { %23400 = vmatmul.mubr.msk.bf16.gmra.mrb[16].mxu0 %vm547_vm0, %v4877_v18  ;;  %v2208_v18 = vsel %vm2201_vm2, %v33396_v25, %v2207_v14  ;;  %v29255_v25 = vcombine.low %v29239_v23, %v29242_v12  ;;  %v4885_v14 = vsel %vm2201_vm2, %v4882_v13, %v4884_v15  ;;  %v29272_v12 = vld [vmem:[%s27795_s13 + $0x108] sm:$0xf] }
 0x1f9   : > { %23403 = vmatprep.mubr.msk.bf16.mxu0 %vm547_vm0, %v4879_v16  ;;  %v29235_v16 = vld [vmem:[%s27795_s13 + $0xf4] sm:$0xf]  ;;  %33401 = vst [vmem:[#allocation19_spill] sm:$0xff] %v29272_v12 }
 0x1fa   : > { %33397 = vst [vmem:[#allocation15_spill] sm:$0xff] %v29235_v16 }
 0x1fb   : > { %23084 = vmatmul.mubr.msk.bf16.vlgmr.msra.gmra.mrb[112].mxu1 %vm547_vm0, %v29019_v22  ;;  %v2213_v22 = vrot.slane %v27846_v30, 2  ;;  %v4887_v30 = vsel %vm2201_vm2, %v4884_v15, %v4886_v5  ;;  %v2217_v15 = vrot.slane %v27863_v36, 2 }
 0x1fc   : > { %23087 = vmatprep.mubr.msk.bf16.mxu1 %vm547_vm0, %v2208_v18  ;;  %v29268_v18 = vld [vmem:[%s27795_s13 + $0x104] sm:$0xf] }
 0x1fd   : > { %33400 = vst [vmem:[#allocation18_spill] sm:$0xff] %v29268_v18  ;;  %v2214_v13 = vsel %vm2201_vm2, %v2211_v56, %v2213_v22 }
 0x200   : > { %23404 = vmatmul.mubr.msk.bf16.gmra.mrb[20].mxu0 %vm547_vm0, %v4881_v3  ;;  %v29251_v3 = vcombine.low %v29232_v1, %v29235_v16  ;;  %v29285_v16 = vcombine.low %v29265_v11, %v29268_v18  ;;  %v29302_v18 = vld [vmem:[%s27795_s13 + $0x114] sm:$0xf]  ;;  %v2235_v11 = vrot.slane %v33374_v19, 2  ;;  %v2237_v19 = vrot.slane %v33375_v61, 2 }
 0x201   : > { %23407 = vmatprep.mubr.msk.bf16.mxu0 %vm547_vm0, %v4883_v8  ;;  %v4890_v8 = vrot.slane %v29255_v25, 2  ;;  %33404 = vst [vmem:[#allocation22_spill] sm:$0xff] %v29302_v18 }
 0x202   : > { %v4888_v32 = vrot.slane %v29251_v3, 2 }
 0x203   : > { %23088 = vmatmul.mubr.msk.bf16.gmra.mrb[116].mxu1 %vm547_vm0, %v2210_v26  ;;  %v29275_v26 = vld [vmem:[%s27795_s13 + $0x10c] sm:$0xf] }
 0x204   : > { %23091 = vmatprep.mubr.msk.bf16.mxu1 %vm547_vm0, %v2212_v34  ;;  %33402 = vst [vmem:[#allocation20_spill] sm:$0xff] %v29275_v26  ;;  %v2219_v34 = vrot.slane %v27876_v41, 2  ;;  %v4891_v56 = vsel %vm2201_vm2, %v4888_v32, %v4890_v8  ;;  %v29291_v36 = vcombine.low %v29272_v12, %v29275_v26  ;;  %v4892_v41 = vrot.slane %v29285_v16, 2  ;;  %v29309_v26 = vld [vmem:[%s27795_s13 + $0x11c] sm:$0xf] }
 0x205   : > { %33406 = vst [vmem:[#allocation24_spill] sm:$0xff] %v29309_v26 }
 0x208   : > { %23408 = vmatmul.mubr.msk.bf16.gmra.mrb[24].mxu0 %vm547_vm0, %v4885_v14  ;;  %v2216_v14 = vsel %vm2201_vm2, %v2213_v22, %v2215_v28  ;;  %v4894_v22 = vrot.slane %v29291_v36, 2 }
 0x209   : > { %23411 = vmatprep.mubr.msk.bf16.mxu0 %vm547_vm0, %v4887_v30  ;;  %v4889_v30 = vsel %vm2201_vm2, %v4886_v5, %v4888_v32  ;;  %v2218_v5 = vsel %vm2201_vm2, %v2215_v28, %v2217_v15  ;;  %v2220_v32 = vsel %vm2201_vm2, %v2217_v15, %v2219_v34  ;;  %v2221_v15 = vrot.slane %v27883_v43, 2  ;;  %v29334_v43 = vld [vmem:[%s27795_s13 + $0x124] sm:$0xf] }
 0x20a   : > { %33408 = vst [vmem:[#allocation26_spill] sm:$0xff] %v29334_v43 }
 0x20b   : > { %23092 = vmatmul.mubr.msk.bf16.gmra.mrb[120].mxu1 %vm547_vm0, %v2214_v13  ;;  %v29299_v13 = vld [vmem:[%s27795_s13 + $0x110] sm:$0xf] }
 0x20c   : > { %23095 = vmatprep.mubr.msk.bf16.mxu1 %vm547_vm0, %v2216_v14  ;;  %33403 = vst [vmem:[#allocation21_spill] sm:$0xff] %v29299_v13  ;;  %v29306_v14 = vld [vmem:[%s27795_s13 + $0x118] sm:$0xf]  ;;  %v29315_v28 = vcombine.low %v29299_v13, %v29302_v18  ;;  %v2222_v18 = vsel %vm2201_vm2, %v2219_v34, %v2221_v15  ;;  %v29331_v13 = vld [vmem:[%s27795_s13 + $0x120] sm:$0xf] }
 0x20d   : > { %33405 = vst [vmem:[#allocation23_spill] sm:$0xff] %v29306_v14  ;;  %v29322_v12 = vcombine.low %v29306_v14, %v29309_v26  ;;  %33407 = vst [vmem:[#allocation25_spill] sm:$0xff] %v29331_v13  ;;  %v29338_v26 = vld [vmem:[%s27795_s13 + $0x128] sm:$0xf]  ;;  %v29347_v34 = vcombine.low %v29331_v13, %v29334_v43  ;;  %v29363_v13 = vld [vmem:[%s27795_s13 + $0x130] sm:$0xf] }
 0x20e   : > { %33409 = vst [vmem:[#allocation27_spill] sm:$0xff] %v29338_v26  ;;  %33411 = vst [vmem:[#allocation29_spill] sm:$0xff] %v29363_v13 }
 0x210   : > { %23412 = vmatmul.mubr.msk.bf16.gmra.mrb[28].mxu0 %vm547_vm0, %v4889_v30  ;;  %v4893_v30 = vsel %vm2201_vm2, %v4890_v8, %v4892_v41  ;;  %v4896_v8 = vrot.slane %v29315_v28, 2 }
 0x211   : > { %23415 = vmatprep.mubr.msk.bf16.mxu0 %vm547_vm0, %v4891_v56  ;;  %v4895_v56 = vsel %vm2201_vm2, %v4892_v41, %v4894_v22 }
 0x213   : > { %23096 = vmatmul.mubr.msk.bf16.gmra.mrb[124].mxu1 %vm547_vm0, %v2218_v5  ;;  %v2223_v5 = vrot.slane %v33368_v31, 2  ;;  %v29341_v31 = vld [vmem:[%s27795_s13 + $0x12c] sm:$0xf] }
 0x214   : > { %23099 = vmatprep.mubr.msk.bf16.mxu1 %vm547_vm0, %v2220_v32  ;;  %v4898_v32 = vrot.slane %v29322_v12, 2  ;;  %33410 = vst [vmem:[#allocation28_spill] sm:$0xff] %v29341_v31  ;;  %v29354_v14 = vcombine.low %v29338_v26, %v29341_v31  ;;  %v29370_v31 = vld [vmem:[%s27795_s13 + $0x138] sm:$0xf] }
 0x215   : > { %v2224_v41 = vsel %vm2201_vm2, %v2221_v15, %v2223_v5  ;;  %v2225_v15 = vrot.slane %v33369_v44, 2  ;;  %v29366_v44 = vld [vmem:[%s27795_s13 + $0x134] sm:$0xf]  ;;  %33413 = vst [vmem:[#allocation31_spill] sm:$0xff] %v29370_v31 }
 0x216   : > { %33412 = vst [vmem:[#allocation30_spill] sm:$0xff] %v29366_v44 }
 0x217   : > { %v2226_v43 = vsel %vm2201_vm2, %v2223_v5, %v2225_v15  ;;  %v29379_v5 = vcombine.low %v29363_v13, %v29366_v44  ;;  %v29395_v13 = vld [vmem:[%s27795_s13 + $0x140] sm:$0xf] }
 0x218   : > { %23416 = vmatmul.mubr.msk.bf16.gmra.mrb[32].mxu0 %vm547_vm0, %v4893_v30  ;;  %v4897_v30 = vsel %vm2201_vm2, %v4894_v22, %v4896_v8  ;;  %v4900_v22 = vrot.slane %v29347_v34, 2 }
 0x219   : > { %23419 = vmatprep.mubr.msk.bf16.mxu0 %vm547_vm0, %v4895_v56  ;;  %v4899_v56 = vsel %vm2201_vm2, %v4896_v8, %v4898_v32 }
 0x21b   : > { %23100 = vmatmul.mubr.msk.bf16.gmra.mrb[128].mxu1 %vm547_vm0, %v2222_v18  ;;  %v2227_v18 = vrot.slane %v33370_v40, 2  ;;  %v29373_v40 = vld [vmem:[%s27795_s13 + $0x13c] sm:$0xf] }
 0x21c   : > { %23103 = vmatprep.mubr.msk.bf16.mxu1 %vm547_vm0, %v2224_v41  ;;  %v4902_v41 = vrot.slane %v29354_v14, 2  ;;  %33414 = vst [vmem:[#allocation32_spill] sm:$0xff] %v29373_v40  ;;  %v29386_v26 = vcombine.low %v29370_v31, %v29373_v40  ;;  %v29402_v40 = vld [vmem:[%s27795_s13 + $0x148] sm:$0xf] }
 0x21d   : > { %v2228_v8 = vsel %vm2201_vm2, %v2225_v15, %v2227_v18  ;;  %v2229_v15 = vrot.slane %v33371_v33, 2  ;;  %v29398_v33 = vld [vmem:[%s27795_s13 + $0x144] sm:$0xf]  ;;  %33416 = vst [vmem:[#allocation34_spill] sm:$0xff] %v29402_v40 }
 0x21e   : > { %33415 = vst [vmem:[#allocation33_spill] sm:$0xff] %v29398_v33 }
 0x21f   : > { %v2230_v44 = vsel %vm2201_vm2, %v2227_v18, %v2229_v15  ;;  %v29411_v18 = vcombine.low %v29395_v13, %v29398_v33  ;;  %v5323_v33 = vld [vmem:[%s27795_s13 + $0x70] sm:$0x8] }
 0x220   : > { %23420 = vmatmul.mubr.msk.bf16.gmra.mrb[36].mxu0 %vm547_vm0, %v4897_v30  ;;  %v4901_v30 = vsel %vm2201_vm2, %v4898_v32, %v4900_v22  ;;  %v4904_v32 = vrot.slane %v29379_v5, 2 }
 0x221   : > { %23423 = vmatprep.mubr.msk.bf16.mxu0 %vm547_vm0, %v4899_v56  ;;  %v4903_v56 = vsel %vm2201_vm2, %v4900_v22, %v4902_v41 }
 0x223   : > { %23104 = vmatmul.mubr.msk.bf16.gmra.mrb[132].mxu1 %vm547_vm0, %v2226_v43  ;;  %v2231_v43 = vrot.slane %v33372_v63, 2  ;;  %v29405_v63 = vld [vmem:[%s27795_s13 + $0x14c] sm:$0xf] }
 0x224   : > { %23107 = vmatprep.mubr.msk.bf16.mxu1 %vm547_vm0, %v2228_v8  ;;  %v4906_v8 = vrot.slane %v29386_v26, 2  ;;  %33417 = vst [vmem:[#allocation35_spill] sm:$0xff] %v29405_v63  ;;  %v29418_v31 = vcombine.low %v29402_v40, %v29405_v63  ;;  %v26576_v63 = vld [vmem:[%s27795_s13 + $0x150] ss:$0 sps:$4 sm:$0x33]  }
 0x225   : > { %v2232_v22 = vsel %vm2201_vm2, %v2229_v15, %v2231_v43 }
 0x226   : > { %v4907_v15 = vsel %vm2201_vm2, %v4904_v32, %v4906_v8 }
 0x228   : > { %23424 = vmatmul.mubr.msk.bf16.gmra.mrb[40].mxu0 %vm547_vm0, %v4901_v30  ;;  %v4905_v30 = vsel %vm2201_vm2, %v4902_v41, %v4904_v32  ;;  %v4908_v41 = vrot.slane %v29411_v18, 2 }
 0x229   : > { %23427 = vmatprep.mubr.msk.bf16.mxu0 %vm547_vm0, %v4903_v56  ;;  %v2233_v56 = vrot.slane %v33373_v39, 2 }
 0x22a   : > { %v4909_v32 = vsel %vm2201_vm2, %v4906_v8, %v4908_v41  ;;  %v5337_v8 = vrot.slane %v29003_v54, 3  ;;  %v5339_v54 = vrot.slane %v29006_v51, 3  ;;  %v26580_v51 = vld [vmem:[%s33239_s2 + $0x88] sm:$0xff]  }
 0x22b   : > { %23108 = vmatmul.mubr.msk.bf16.gmra.mrb[136].mxu1 %vm547_vm0, %v2230_v44  ;;  %v2234_v44 = vsel %vm2201_vm2, %v2231_v43, %v2233_v56  ;;  %v2236_v39 = vsel %vm2201_vm2, %v2233_v56, %v2235_v11  ;;  %v2239_v43 = vrot.slane %v33376_v29, 2  ;;  %v4912_v56 = vrot.slane %v26576_v63, 2 }
 0x22c   : > { %23111 = vmatprep.mubr.msk.bf16.mxu1 %vm547_vm0, %v2232_v22  ;;  %v4910_v22 = vrot.slane %v29418_v31, 2  ;;  %v5341_v63 = vrot.slane %v29046_v9, 3  ;;  %v5343_v9 = vrot.slane %v29048_v59, 3  ;;  %v2251_v59 = vrot.slane %v33382_v53, 2 }
 0x22d   : > { %v2253_v53 = vrot.slane %v33388_v21, 2 }
 0x22e   : > { %v4913_v61 = vsel %vm2201_vm2, %v4910_v22, %v4912_v56 }
 0x230   : > { %23428 = vmatmul.mubr.msk.bf16.gmra.mrb[44].mxu0 %vm547_vm0, %v4905_v30  ;;  %v4911_v30 = vsel %vm2201_vm2, %v4908_v41, %v4910_v22  ;;  %v2247_v22 = vrot.slane %v33380_v10, 2  ;;  %v2249_v10 = vrot.slane %v33381_v35, 2 }
 0x231   : > { %23431 = vmatprep.mubr.msk.bf16.mxu0 %vm547_vm0, %v4907_v15  ;;  %v20708_v15 = vcombine.low %v5323_v33, %v28988_v24  ;;  %v2241_v24 = vrot.slane %v33377_v62, 2  ;;  %v2243_v33 = vrot.slane %v33378_v7, 2  ;;  %v5340_v62 = vsel %vm477_vm1, %v5337_v8, %v5339_v54 }
 0x232   : > { %v2245_v7 = vrot.slane %v33379_v38, 2  ;;  %v5345_v38 = vrot.slane %v29063_v47, 3  ;;  %v5347_v47 = vrot.slane %v29091_v37, 3  ;;  %v2252_v56 = vsel %vm2201_vm2, %v2249_v10, %v2251_v59 }
 0x233   : > { %23112 = vmatmul.mubr.msk.bf16.gmra.mrb[140].mxu1 %vm547_vm0, %v2234_v44  ;;  %v2238_v44 = vsel %vm2201_vm2, %v2235_v11, %v2237_v19  ;;  %v5336_v40 = vrot.slane %v20708_v15, 3  ;;  %v2242_v11 = vsel %vm2201_vm2, %v2239_v43, %v2241_v24  ;;  %v2244_v41 = vsel %vm2201_vm2, %v2241_v24, %v2243_v33 }
 0x234   : > { %23115 = vmatprep.mubr.msk.bf16.mxu1 %vm547_vm0, %v2236_v39  ;;  %v2240_v39 = vsel %vm2201_vm2, %v2237_v19, %v2239_v43  ;;  %v2248_v19 = vsel %vm2201_vm2, %v2245_v7, %v2247_v22  ;;  %v2250_v15 = vsel %vm2201_vm2, %v2247_v22, %v2249_v10  ;;  %v5349_v43 = vrot.slane %v29094_v49, 3 }
 0x235   : > { %v5338_v29 = vsel %vm477_vm1, %v5336_v40, %v5337_v8  ;;  %v5342_v40 = vsel %vm477_vm1, %v5339_v54, %v5341_v63  ;;  %v5348_v35 = vsel %vm477_vm1, %v5345_v38, %v5347_v47  ;;  %v2255_v8 = vrot.slane %v28067_v52, 2 }
 0x236   : > { %v5351_v37 = vrot.slane %v29130_v57, 3  ;;  %v2254_v49 = vsel %vm2201_vm2, %v2251_v59, %v2253_v53  ;;  %v5355_v57 = vrot.slane %v29140_v27, 3 }
 0x237   : > { %v2256_v24 = vsel %vm2201_vm2, %v2253_v53, %v2255_v8  ;;  %v27699_v53 = vld [vmem:[%s27795_s13 + $0x74] sm:$0xf] }
 0x238   : > { %23432 = vmatmul.mubr.msk.bf16.gmra.mrb[48].mxu0 %vm547_vm0, %v4909_v32  ;;  %v2246_v32 = vsel %vm2201_vm2, %v2243_v33, %v2245_v7  ;;  %v5352_v21 = vsel %vm477_vm1, %v5349_v43, %v5351_v37  ;;  %v5365_v7 = vrot.slane %v29208_v6, 3  ;;  %v5373_v6 = vrot.slane %v29291_v36, 3 }
 0x239   : > { %23435 = vmatprep.mubr.msk.bf16.mxu0 %vm547_vm0, %v4911_v30  ;;  %v5344_v30 = vsel %vm477_vm1, %v5341_v63, %v5343_v9  ;;  %v5359_v63 = vrot.slane %v29196_v58, 3  ;;  %v5367_v58 = vrot.slane %v29251_v3, 3  ;;  %v5375_v3 = vrot.slane %v29315_v28, 3 }
 0x23a   : > { %v5381_v36 = vrot.slane %v29354_v14, 3  ;;  %v5385_v28 = vrot.slane %v29386_v26, 3  ;;  %v26610_v14 = vld [vmem:[%s33239_s2 + $0x130] sm:$0xff]  }
 0x23b   : > { %23116 = vmatmul.mubr.msk.bf16.gmra.mrb[144].mxu1 %vm547_vm0, %v2238_v44  ;;  %v5350_v44 = vsel %vm477_vm1, %v5347_v47, %v5349_v43  ;;  %v5368_v22 = vsel %vm477_vm1, %v5365_v7, %v5367_v58  ;;  %v5387_v47 = vrot.slane %v29411_v18, 3 }
 0x23c   : > { %23119 = vmatprep.mubr.msk.bf16.mxu1 %vm547_vm0, %v2240_v39  ;;  %v26581_v39 = vld [vmem:[%s27795_s13 + $0x118] ss:$0 sps:$4 sm:$0x33]  }
 0x23d   : > { %v2257_v52 = vrot.slane %v26581_v39, 2  ;;  %v5388_v26 = vsel %vm477_vm1, %v5385_v28, %v5387_v47  ;;  %v26611_v39 = vld [vmem:[%s33239_s2 + $0x138] sm:$0xff]  }
 0x23f   : > { %v2258_v33 = vsel %vm2201_vm2, %v2255_v8, %v2257_v52  ;;  %v27701_v8 = vld [vmem:[%s27795_s13 + $0x84] sm:$0xf] }
 0x240   : > { %23436 = vmatmul.mubr.msk.bf16.gmra.mrb[52].mxu0 %vm547_vm0, %v4913_v61  ;;  %v5353_v61 = vrot.slane %v29134_v20, 3  ;;  %v5357_v20 = vrot.slane %v29161_v4, 3  ;;  %v5363_v4 = vrot.slane %v29204_v46, 3  ;;  %v5371_v46 = vrot.slane %v29285_v16, 3 }
 0x241   : > { %23443 = vmatprep.mubr.msk.bf16.mxu0 %vm547_vm0, %v5338_v29  ;;  %v5379_v16 = vrot.slane %v29347_v34, 3 }
 0x242   : > { %v5354_v29 = vsel %vm477_vm1, %v5351_v37, %v5353_v61  ;;  %v5356_v54 = vsel %vm477_vm1, %v5353_v61, %v5355_v57  ;;  %v5360_v27 = vsel %vm477_vm1, %v5357_v20, %v5359_v63  ;;  %v27702_v37 = vld [vmem:[%s27795_s13 + $0x88] sm:$0xf]  ;;  %v33418_v61 = vcombine.low %v28763_v45, %v28766_v0  ;;  %v27707_v0 = vld [vmem:[%s27795_s13 + $0x9c] sm:$0xf] }
 0x243   : > { %23120 = vmatmul.mubr.msk.bf16.gmra.mrb[148].mxu1 %vm547_vm0, %v2242_v11  ;;  %v5358_v11 = vsel %vm477_vm1, %v5355_v57, %v5357_v20  ;;  %v27706_v57 = vld [vmem:[%s27795_s13 + $0x98] sm:$0xf]  ;;  %v26622_v45 = vld [vmem:[%s33241_s4 + $0x48] sm:$0xff]   ;;  %v27708_v20 = vld [vmem:[%s27795_s13 + $0xa0] sm:$0xf] }
 0x244   : > { %23123 = vmatprep.mubr.msk.bf16.mxu1 %vm547_vm0, %v2244_v41  ;;  %v5361_v41 = vrot.slane %v29200_v17, 3  ;;  %v5369_v17 = vrot.slane %v29255_v25, 3  ;;  %v5377_v25 = vrot.slane %v29322_v12, 3  ;;  %v5383_v12 = vrot.slane %v29379_v5, 3 }
 0x245   : > { %v5389_v5 = vrot.slane %v29418_v31, 3  ;;  %v26617_v31 = vld [vmem:[%s33241_s4 + $0x40] sm:$0xff]  }
 0x246   : > { %v5380_v10 = vsel %vm477_vm1, %v5377_v25, %v5379_v16  ;;  %v5384_v59 = vsel %vm477_vm1, %v5381_v36, %v5383_v12  ;;  %v5386_v34 = vsel %vm477_vm1, %v5383_v12, %v5385_v28  ;;  %23559 = vmatprep.subr.bf16.mxu1 %v26617_v31  ;;  %v26632_v12 = vld [vmem:[%s33241_s4 + $0x58] sm:$0xff]  }
 0x247   : > { %v5390_v43 = vsel %vm477_vm1, %v5387_v47, %v5389_v5  ;;  %23560 = vmatpush3.bf16.msra.mxu1 %v26617_v31 }
 0x248   : > { %23444 = vmatmul.mubr.msk.bf16.vlgmr.msra.gmra.mrb[0].mxu0 %vm547_vm0, %v5340_v62  ;;  %v5362_v62 = vsel %vm477_vm1, %v5359_v63, %v5361_v41  ;;  %23561 = vmatprep.subr.bf16.mxu1 %v26622_v45  ;;  %v27710_v63 = vld [vmem:[%s27795_s13 + $0xa8] sm:$0xf] }
 0x249   : > { %23500 = vmatpush3.bf16.msra.mxu0 %v29088_v42  ;;  %23447 = vmatprep.mubr.msk.bf16.mxu0 %vm547_vm0, %v5342_v40  ;;  %v5346_v42 = vsel %vm477_vm1, %v5343_v9, %v5345_v38  ;;  %v5364_v40 = vsel %vm477_vm1, %v5361_v41, %v5363_v4  ;;  %v5370_v9 = vsel %vm477_vm1, %v5367_v58, %v5369_v17  ;;  %v26627_v58 = vld [vmem:[%s33241_s4 + $0x50] sm:$0xff]  }
 0x24a   : > { %23501 = vmatprep.subr.bf16.mxu0 %v26580_v51  ;;  %v5374_v38 = vsel %vm477_vm1, %v5371_v46, %v5373_v6 }
 0x24b   : > { %23124 = vmatmul.mubr.msk.bf16.gmra.mrb[152].mxu1 %vm547_vm0, %v2246_v32  ;;  %v5372_v32 = vsel %vm477_vm1, %v5369_v17, %v5371_v46  ;;  %v33423_v46 = vld [vmem:[#allocation8_spill] sm:$0xff] }
 0x24c   : > { %23127 = vmatprep.mubr.msk.bf16.mxu1 %vm547_vm0, %v2248_v19  ;;  %v5376_v19 = vsel %vm477_vm1, %v5373_v6, %v5375_v3  ;;  %23562 = vmatpush3.bf16.msra.mxu1 %v26622_v45  ;;  %v33424_v6 = vld [vmem:[#allocation7_spill] sm:$0xff] }
 0x24d   : > { %23502 = vmatpush3.bf16.msra.mxu0 %v26580_v51  ;;  %v5366_v51 = vsel %vm477_vm1, %v5363_v4, %v5365_v7  ;;  %v33420_v4 = vld [vmem:[#allocation3_spill] sm:$0xff]  ;;  %23563 = vmatprep.subr.bf16.mxu1 %v26627_v58 }
 0x24e   : > { %24243 = vmatprep.subr.bf16.mxu0 %v26610_v14 }
 0x250   : > { %23448 = vmatmul.mubr.msk.bf16.gmra.mrb[4].mxu0 %vm547_vm0, %v5344_v30  ;;  %v5378_v30 = vsel %vm477_vm1, %v5375_v3, %v5377_v25  ;;  %23564 = vmatpush3.bf16.msra.mxu1 %v26627_v58  ;;  %v33440_v58 = vld [vmem:[#allocation25_spill] sm:$0xff] }
 0x251   : > { %23451 = vmatprep.mubr.msk.bf16.mxu0 %vm547_vm0, %v5346_v42  ;;  %v5382_v42 = vsel %vm477_vm1, %v5379_v16, %v5381_v36  ;;  %v20756_v36 = vcombine.low %v29169_v60, %v29172_v48  ;;  %23565 = vmatprep.subr.bf16.mxu1 %v26632_v12  ;;  %v33427_v60 = vld [vmem:[#allocation10_spill] sm:$0xff] }
 0x253   : > { %23128 = vmatmul.mubr.msk.bf16.gmra.mrb[156].mxu1 %vm547_vm0, %v2250_v15  ;;  %v26582_v15 = vld [vmem:[%s27795_s13 + $0x150] ss:$0 sps:$4 sm:$0x77]  }
 0x254   : > { %23131 = vmatprep.mubr.msk.bf16.mxu1 %vm547_vm0, %v2252_v56  ;;  %v5391_v56 = vrot.slane %v26582_v15, 3  ;;  %23566 = vmatpush3.bf16.msra.mxu1 %v26632_v12  ;;  %v26635_v15 = vld [vmem:[%s33241_s4 + $0x60] sm:$0xff]   ;;  %v33444_v12 = vld [vmem:[#allocation29_spill] sm:$0xff] }
 0x255   : > { %23567 = vmatprep.subr.bf16.mxu1 %v26635_v15 }
 0x258   : > { %23452 = vmatmul.mubr.msk.bf16.gmra.mrb[8].mxu0 %vm547_vm0, %v5348_v35  ;;  %v5392_v35 = vsel %vm477_vm1, %v5389_v5, %v5391_v56  ;;  %23568 = vmatpush3.bf16.msra.mxu1 %v26635_v15 }
 0x259   : > { %23455 = vmatprep.mubr.msk.bf16.mxu0 %vm547_vm0, %v5350_v44  ;;  %v27700_v44 = vld [vmem:[%s27795_s13 + $0x78] sm:$0xf] }
 0x25a   : > { %v20744_v18 = vcombine.low %v27699_v53, %v27700_v44  ;;  %v33431_v44 = vld [vmem:[#allocation15_spill] sm:$0xff] }
 0x25b   : > { %23132 = vmatmul.mubr.msk.bf16.gmra.mrb[160].mxu1 %vm547_vm0, %v2254_v49  ;;  %v20746_v49 = vcombine.low %v27701_v8, %v27702_v37 }
 0x25c   : > { %23135 = vmatprep.mubr.msk.bf16.mxu1 %vm547_vm0, %v2256_v24  ;;  %v27703_v24 = vld [vmem:[%s27795_s13 + $0x8c] sm:$0xf] }
 0x260   : > { %23456 = vmatmul.mubr.msk.bf16.gmra.mrb[12].mxu0 %vm547_vm0, %v5352_v21  ;;  %v27704_v21 = vld [vmem:[%s27795_s13 + $0x90] sm:$0xf] }
 0x261   : > { %23459 = vmatprep.mubr.msk.bf16.mxu0 %vm547_vm0, %v5354_v29  ;;  %v20747_v52 = vcombine.low %v27703_v24, %v27704_v21  ;;  %v27705_v29 = vld [vmem:[%s27795_s13 + $0x94] sm:$0xf]  ;;  %v33434_v21 = vld [vmem:[#allocation19_spill] sm:$0xff] }
 0x263   : > { %23136 = vmatmul.mubr.msk.bf16.gmra.mrb[164].mxu1 %vm547_vm0, %v2258_v33  ;;  %v20748_v33 = vcombine.low %v27705_v29, %v27706_v57  ;;  %v26640_v57 = vld [vmem:[%s33241_s4 + $0x68] sm:$0xff]  }
 0x264   : > { %23569 = vmatprep.subr.bf16.mxu1 %v26640_v57 }
 0x265   : > { %23570 = vmatpush3.bf16.msra.mxu1 %v26640_v57 }
 0x268   : > { %23460 = vmatmul.mubr.msk.bf16.gmra.mrb[16].mxu0 %vm547_vm0, %v5356_v54  ;;  %v20749_v54 = vcombine.low %v27707_v0, %v27708_v20  ;;  %v33436_v0 = vld [vmem:[#allocation21_spill] sm:$0xff]  ;;  %v33437_v20 = vld [vmem:[#allocation20_spill] sm:$0xff] }
 0x269   : > { %23463 = vmatprep.mubr.msk.bf16.mxu0 %vm547_vm0, %v5358_v11  ;;  %v27709_v11 = vld [vmem:[%s27795_s13 + $0xa4] sm:$0xf] }
 0x26a   : > { %v20750_v41 = vcombine.low %v27709_v11, %v27710_v63  ;;  %v33438_v11 = vld [vmem:[#allocation23_spill] sm:$0xff]  ;;  %v33439_v63 = vld [vmem:[#allocation22_spill] sm:$0xff] }
 0x270   : > { %23464 = vmatmul.mubr.msk.bf16.gmra.mrb[20].mxu0 %vm547_vm0, %v5360_v27  ;;  %v20751_v27 = vcombine.low %v29078_v50, %v29102_v2  ;;  %v33421_v50 = vld [vmem:[#allocation6_spill] sm:$0xff]  ;;  %v33422_v2 = vld [vmem:[#allocation5_spill] sm:$0xff] }
 0x271   : > { %23467 = vmatprep.mubr.msk.bf16.mxu0 %vm547_vm0, %v5362_v62  ;;  %v33419_v62 = vld [vmem:[#allocation4_spill] sm:$0xff] }
 0x272   : > { %v20752_v7 = vcombine.low %v33420_v4, %v33419_v62 }
 0x278   : > { %23468 = vmatmul.mubr.msk.bf16.gmra.mrb[24].mxu0 %vm547_vm0, %v5364_v40 }
 0x279   : > { %23471 = vmatprep.mubr.msk.bf16.mxu0 %vm547_vm0, %v5366_v51 }
 0x280   : > { %23472 = vmatmul.mubr.msk.bf16.gmra.mrb[28].mxu0 %vm547_vm0, %v5368_v22 }
 0x281   : > { %23475 = vmatprep.mubr.msk.bf16.mxu0 %vm547_vm0, %v5370_v9  ;;  %v20753_v9 = vcombine.low %v33422_v2, %v33421_v50  ;;  %v33441_v50 = vld [vmem:[#allocation24_spill] sm:$0xff] }
 0x282   : > { %v20765_v2 = vcombine.low %v33441_v50, %v33440_v58  ;;  %v33459_v50 = vld [vmem:[#allocation35_spill] sm:$0xff] }
 0x288   : > { %23476 = vmatmul.mubr.msk.bf16.gmra.mrb[32].mxu0 %vm547_vm0, %v5372_v32  ;;  %v20754_v32 = vcombine.low %v33424_v6, %v33423_v46  ;;  %v33443_v46 = vld [vmem:[#allocation26_spill] sm:$0xff] }
 0x289   : > { %23479 = vmatprep.mubr.msk.bf16.mxu0 %vm547_vm0, %v5374_v38 }
 0x290   : > { %23480 = vmatmul.mubr.msk.bf16.gmra.mrb[36].mxu0 %vm547_vm0, %v5376_v19 }
 0x291   : > { %23483 = vmatprep.mubr.msk.bf16.mxu0 %vm547_vm0, %v5378_v30  ;;  %v33425_v30 = vld [vmem:[#allocation9_spill] sm:$0xff] }
 0x292   : > { %v20755_v16 = vcombine.low %v33425_v30, %v29166_v55  ;;  %v33426_v55 = vld [vmem:[#allocation11_spill] sm:$0xff] }
 0x293   : > { %v20757_v48 = vcombine.low %v33427_v60, %v33426_v55  ;;  %v33445_v55 = vld [vmem:[#allocation28_spill] sm:$0xff] }
 0x294   : > { %v20767_v60 = vcombine.low %v33445_v55, %v33444_v12  ;;  %v29767_v12 = vld [vmem:[%s27795_s13 + $0x18] sm:$0xff]  }
 0x298   : > { %23484 = vmatmul.mubr.msk.bf16.gmra.mrb[40].mxu0 %vm547_vm0, %v5380_v10 }
 0x299   : > { %23487 = vmatprep.mubr.msk.bf16.mxu0 %vm547_vm0, %v5382_v42 }
 0x2a0   : > { %23488 = vmatmul.mubr.msk.bf16.gmra.mrb[44].mxu0 %vm547_vm0, %v5384_v59 }
 0x2a1   : > { %23491 = vmatprep.mubr.msk.bf16.mxu0 %vm547_vm0, %v5386_v34  ;;  %v33428_v34 = vld [vmem:[#allocation13_spill] sm:$0xff] }
 0x2a8   : > { %23492 = vmatmul.mubr.msk.bf16.gmra.mrb[48].mxu0 %vm547_vm0, %v5388_v26 }
 0x2a9   : > { %23495 = vmatprep.mubr.msk.bf16.mxu0 %vm547_vm0, %v5390_v43 }
 0x2b0   : > { %23496 = vmatmul.mubr.msk.bf16.gmra.mrb[52].mxu0 %vm547_vm0, %v5392_v35  ;;  %v33430_v35 = vld [vmem:[#allocation14_spill] sm:$0xff] }
 0x2b1   : > { %23503 = vmatprep.mubr.msk.bf16.mxu0 %vm547_vm0, %v20744_v18  ;;  %v20759_v53 = vcombine.low %v33430_v35, %v29232_v1  ;;  %v20760_v18 = vcombine.low %v33431_v44, %v29239_v23  ;;  %v33435_v1 = vld [vmem:[#allocation18_spill] sm:$0xff] }
 0x2b8   : > { %23504 = vmatmul.mubr.msk.bf16.vlgmr.msra.gmra.mrb[0].mxu0 %vm547_vm0, %v33418_v61  ;;  %v33433_v61 = vld [vmem:[#allocation16_spill] sm:$0xff] }
 0x2b9   : > { %23507 = vmatprep.mubr.msk.bf16.mxu0 %vm547_vm0, %v20746_v49  ;;  %24244 = vmatpush3.bf16.msra.mxu0 %v26610_v14  ;;  %v33429_v14 = vld [vmem:[#allocation12_spill] sm:$0xff] }
 0x2ba   : > { %24245 = vmatprep.subr.bf16.mxu0 %v26611_v39  ;;  %v20758_v47 = vcombine.low %v33429_v14, %v33428_v34  ;;  %v33447_v34 = vld [vmem:[#allocation30_spill] sm:$0xff] }
 0x2bd   : > { %24246 = vmatpush3.bf16.msra.mxu0 %v26611_v39  ;;  %v33432_v39 = vld [vmem:[#allocation17_spill] sm:$0xff] }
 0x2be   : > { %v20761_v24 = vcombine.low %v33433_v61, %v33432_v39  ;;  %v13378_v39 = vld [vmem:[%s27795_s13] sm:$0x8]  ;;  %v33452_v61 = vld [vmem:[#allocation32_spill] sm:$0xff] }
 0x2c0   : > { %23508 = vmatmul.mubr.msk.bf16.gmra.mrb[4].mxu0 %vm547_vm0, %v20747_v52  ;;  %v20762_v52 = vcombine.low %v33435_v1, %v33434_v21  ;;  %v33453_v21 = vld [vmem:[#allocation34_spill] sm:$0xff]  ;;  %v33454_v1 = vld [vmem:[#allocation33_spill] sm:$0xff] }
 0x2c1   : > { %23511 = vmatprep.mubr.msk.bf16.mxu0 %vm547_vm0, %v20748_v33 }
 0x2c8   : > { %23512 = vmatmul.mubr.msk.bf16.gmra.mrb[8].mxu0 %vm547_vm0, %v20749_v54  ;;  %v20763_v54 = vcombine.low %v33437_v20, %v33436_v0  ;;  %v29744_v0 = vld [vmem:[%s27795_s13 + $0x8] sm:$0xff]  }
 0x2c9   : > { %23515 = vmatprep.mubr.msk.bf16.mxu0 %vm547_vm0, %v20750_v41  ;;  %v20764_v41 = vcombine.low %v33439_v63, %v33438_v11  ;;  %v5802_v11 = vld [vmem:[%s27795_s13 + $0x150] sm:$0xf] }
 0x2ce   : > { %v29597_v40 = vpop.f32.mrb[112].mxu1 }
 0x2cf   : > { %v29600_v51 = vpop.f32.mrb[113].mxu1 }
 0x2d0   : > { %23516 = vmatmul.mubr.msk.bf16.gmra.mrb[12].mxu0 %vm547_vm0, %v20751_v27  ;;  %v29606_v17 = vpop.f32.mrb[114].mxu1 }
 0x2d1   : > { %23519 = vmatprep.mubr.msk.bf16.mxu0 %vm547_vm0, %v20752_v7  ;;  %v29608_v22 = vpop.f32.mrb[115].mxu1 }
 0x2d6   : > { %v29614_v38 = vpop.f32.mrb[116].mxu1 }
 0x2d7   : > { %v29617_v3 = vpop.f32.mrb[117].mxu1 }
 0x2d8   : > { %23520 = vmatmul.mubr.msk.bf16.gmra.mrb[16].mxu0 %vm547_vm0, %v20753_v9  ;;  %v29620_v25 = vpop.f32.mrb[118].mxu1  ;;  %v33442_v9 = vld [vmem:[#allocation27_spill] sm:$0xff] }
 0x2d9   : > { %23523 = vmatprep.mubr.msk.bf16.mxu0 %vm547_vm0, %v20754_v32  ;;  %v29622_v19 = vpop.f32.mrb[119].mxu1  ;;  %v20766_v6 = vcombine.low %v33443_v46, %v33442_v9  ;;  %v29760_v9 = vld [vmem:[%s27795_s13 + $0x10] sm:$0xff]  }
 0x2da   : > { %v26645_v46 = vld [vmem:[%s33241_s4 + $0x70] sm:$0xff]  }
 0x2db   : > { %23571 = vmatprep.subr.bf16.mxu1 %v26645_v46 }
 0x2dc   : > { %23572 = vmatpush3.bf16.msra.mxu1 %v26645_v46 }
 0x2de   : > { %v29628_v10 = vpop.f32.mrb[120].mxu1 }
 0x2df   : > { %v29631_v42 = vpop.f32.mrb[121].mxu1 }
 0x2e0   : > { %23524 = vmatmul.mubr.msk.bf16.gmra.mrb[20].mxu0 %vm547_vm0, %v20755_v16  ;;  %v29637_v28 = vpop.f32.mrb[122].mxu1 }
 0x2e1   : > { %23527 = vmatprep.mubr.msk.bf16.mxu0 %vm547_vm0, %v20756_v36  ;;  %v29639_v59 = vpop.f32.mrb[123].mxu1 }
 0x2e6   : > { %v29645_v5 = vpop.f32.mrb[124].mxu1 }
 0x2e7   : > { %v29648_v26 = vpop.f32.mrb[125].mxu1 }
 0x2e8   : > { %23528 = vmatmul.mubr.msk.bf16.gmra.mrb[24].mxu0 %vm547_vm0, %v20757_v48  ;;  %v29654_v43 = vpop.f32.mrb[126].mxu1  ;;  %v33446_v48 = vld [vmem:[#allocation31_spill] sm:$0xff] }
 0x2e9   : > { %23531 = vmatprep.mubr.msk.bf16.mxu0 %vm547_vm0, %v20758_v47  ;;  %v29656_v56 = vpop.f32.mrb[127].mxu1  ;;  %v20768_v14 = vcombine.low %v33447_v34, %v33446_v48  ;;  %v26648_v47 = vld [vmem:[%s33239_s2 + $0x120] sm:$0xff]   ;;  %v13531_v48 = vrot.slane %v29760_v9, 3 }
 0x2ea   : > { %24303 = vmatprep.subr.bf16.mxu0 %v26648_v47 }
 0x2ee   : > { %v29662_v31 = vpop.f32.mrb[128].mxu1 }
 0x2ef   : > { %v29665_v8 = vpop.f32.mrb[129].mxu1 }
 0x2f0   : > { %23532 = vmatmul.mubr.msk.bf16.gmra.mrb[28].mxu0 %vm547_vm0, %v20759_v53  ;;  %v29668_v37 = vpop.f32.mrb[130].mxu1 }
 0x2f1   : > { %23535 = vmatprep.mubr.msk.bf16.mxu0 %vm547_vm0, %v20760_v18  ;;  %v29670_v49 = vpop.f32.mrb[131].mxu1  ;;  %v29735_v18 = vld [vmem:[%s27795_s13 + $0x4] sm:$0xf] }
 0x2f2   : > { %v21346_v57 = vcombine.low %v13378_v39, %v29735_v18  ;;  %v13533_v39 = vrot.slane %v29767_v12, 3 }
 0x2f6   : > { %v29676_v29 = vpop.f32.mrb[132].mxu1 }
 0x2f7   : > { %v29679_v23 = vpop.f32.mrb[133].mxu1 }
 0x2f8   : > { %23536 = vmatmul.mubr.msk.bf16.gmra.mrb[32].mxu0 %vm547_vm0, %v20761_v24  ;;  %v29685_v33 = vpop.f32.mrb[134].mxu1  ;;  %v20769_v24 = vcombine.low %v33452_v61, %v29395_v13  ;;  %v13528_v13 = vrot.slane %v21346_v57, 3  ;;  %v26649_v57 = vld [vmem:[%s33239_s2 + $0x128] sm:$0xff]  }
 0x2f9   : > { %23539 = vmatprep.mubr.msk.bf16.mxu0 %vm547_vm0, %v20762_v52  ;;  %v29687_v45 = vpop.f32.mrb[135].mxu1  ;;  %v20770_v52 = vcombine.low %v33454_v1, %v33453_v21  ;;  %v29786_v21 = vld [vmem:[%s27795_s13 + $0x20] sm:$0xff]   ;;  %v13534_v1 = vsel %vm477_vm1, %v13531_v48, %v13533_v39 }
 0x2fe   : > { %v29693_v27 = vpop.f32.mrb[136].mxu1 }
 0x2ff   : > { %v29696_v62 = vpop.f32.mrb[137].mxu1 }
 0x300   : > { %23540 = vmatmul.mubr.msk.bf16.gmra.mrb[36].mxu0 %vm547_vm0, %v20763_v54  ;;  %v29699_v4 = vpop.f32.mrb[138].mxu1 }
 0x301   : > { %23543 = vmatprep.mubr.msk.bf16.mxu0 %vm547_vm0, %v20764_v41  ;;  %v29701_v7 = vpop.f32.mrb[139].mxu1  ;;  %v13529_v41 = vrot.slane %v29744_v0, 3 }
 0x306   : > { %v29707_v32 = vpop.f32.mrb[140].mxu1 }
 0x307   : > { %v29710_v30 = vpop.f32.mrb[141].mxu1 }
 0x308   : > { %23544 = vmatmul.mubr.msk.bf16.gmra.mrb[40].mxu0 %vm547_vm0, %v20765_v2  ;;  %v29713_v16 = vpop.f32.mrb[142].mxu1  ;;  %v20771_v2 = vcombine.low %v33459_v50, %v5802_v11 }
 0x309   : > { %23547 = vmatprep.mubr.msk.bf16.mxu0 %vm547_vm0, %v20766_v6  ;;  %v29715_v36 = vpop.f32.mrb[143].mxu1  ;;  %v13530_v6 = vsel %vm477_vm1, %v13528_v13, %v13529_v41 }
 0x30e   : > { %v29724_v15 = vpop.f32.mrb[144].mxu1 }
 0x30f   : > { %33448 = vst [vmem:[#allocation4_spill] sm:$0xff] %v29724_v15  ;;  %v29727_v35 = vpop.f32.mrb[145].mxu1 }
 0x310   : > { %23548 = vmatmul.mubr.msk.bf16.gmra.mrb[44].mxu0 %vm547_vm0, %v20767_v60  ;;  %33449 = vst [vmem:[#allocation3_spill] sm:$0xff] %v29727_v35  ;;  %v29730_v53 = vpop.f32.mrb[146].mxu1 }
 0x311   : > { %23551 = vmatprep.mubr.msk.bf16.mxu0 %vm547_vm0, %v20768_v14  ;;  %33450 = vst [vmem:[#allocation6_spill] sm:$0xff] %v29730_v53  ;;  %v29732_v44 = vpop.f32.mrb[147].mxu1  ;;  %v26651_v14 = vld [vmem:[%s33241_s4 + $0x78] sm:$0xff]   ;;  %v29958_v53 = vld [vmem:[%s33240_s3 + $0x1] ss:$0 sm:$0xff] }
 0x312   : > { %33451 = vst [vmem:[#allocation5_spill] sm:$0xff] %v29732_v44  ;;  %23573 = vmatprep.subr.bf16.mxu1 %v26651_v14 }
 0x313   : > { %23574 = vmatpush3.bf16.msra.mxu1 %v26651_v14 }
 0x316   : > { %v29746_v20 = vpop.f32.mrb[148].mxu1 }
 0x317   : > { %33455 = vst [vmem:[#allocation8_spill] sm:$0xff] %v29746_v20  ;;  %v29749_v54 = vpop.f32.mrb[149].mxu1  ;;  %v29903_v20 = vld [vmem:[%s27795_s13 + $0x90] sm:$0xff]  }
 0x318   : > { %23552 = vmatmul.mubr.msk.bf16.gmra.mrb[48].mxu0 %vm547_vm0, %v20769_v24  ;;  %33456 = vst [vmem:[#allocation7_spill] sm:$0xff] %v29749_v54  ;;  %v29753_v63 = vpop.f32.mrb[150].mxu1  ;;  %v13532_v24 = vsel %vm477_vm1, %v13529_v41, %v13531_v48  ;;  %v13535_v41 = vrot.slane %v29786_v21, 3  ;;  %v29809_v48 = vld [vmem:[%s27795_s13 + $0x30] sm:$0xff]   ;;  %v29895_v54 = vld [vmem:[%s27795_s13 + $0x88] sm:$0xff]   ;;  %33481 = vst [vmem:[#allocation32_spill] sm:$0xff] %v29903_v20 }
 0x319   : > { %23555 = vmatprep.mubr.msk.bf16.mxu0 %vm547_vm0, %v20770_v52  ;;  %33457 = vst [vmem:[#allocation9_spill] sm:$0xff] %v29753_v63  ;;  %v29756_v58 = vpop.f32.mrb[151].mxu1  ;;  %v29790_v52 = vld [vmem:[%s27795_s13 + $0x28] sm:$0xff]   ;;  %v29891_v63 = vld [vmem:[%s27795_s13 + $0x80] sm:$0xff]   ;;  %33480 = vst [vmem:[#allocation30_spill] sm:$0xff] %v29895_v54 }
 0x31a   : > { %33458 = vst [vmem:[#allocation11_spill] sm:$0xff] %v29756_v58  ;;  %v29883_v58 = vld [vmem:[%s27795_s13 + $0x78] sm:$0xff]   ;;  %33479 = vst [vmem:[#allocation31_spill] sm:$0xff] %v29891_v63 }
 0x31b   : > { %33478 = vst [vmem:[#allocation28_spill] sm:$0xff] %v29883_v58 }
 0x31e   : > { %v29769_v55 = vpop.f32.mrb[152].mxu1 }
 0x31f   : > { %33460 = vst [vmem:[#allocation10_spill] sm:$0xff] %v29769_v55  ;;  %v29772_v60 = vpop.f32.mrb[153].mxu1  ;;  %v29879_v55 = vld [vmem:[%s27795_s13 + $0x70] sm:$0xff]  }
 0x320   : > { %23556 = vmatmul.mubr.msk.bf16.gmra.mrb[52].mxu0 %vm547_vm0, %v20771_v2  ;;  %33461 = vst [vmem:[#allocation13_spill] sm:$0xff] %v29772_v60  ;;  %v29776_v34 = vpop.f32.mrb[154].mxu1  ;;  %v13537_v2 = vrot.slane %v29790_v52, 3  ;;  %v29871_v60 = vld [vmem:[%s27795_s13 + $0x68] sm:$0xff]   ;;  %33477 = vst [vmem:[#allocation29_spill] sm:$0xff] %v29879_v55 }
 0x321   : > { %24247 = vmatprep.mubr.msk.bf16.mxu0 %vm547_vm0, %v13530_v6  ;;  %33462 = vst [vmem:[#allocation12_spill] sm:$0xff] %v29776_v34  ;;  %v29782_v61 = vpop.f32.mrb[155].mxu1  ;;  %v13536_v6 = vsel %vm477_vm1, %v13533_v39, %v13535_v41  ;;  %v29867_v34 = vld [vmem:[%s27795_s13 + $0x60] sm:$0xff]   ;;  %33476 = vst [vmem:[#allocation26_spill] sm:$0xff] %v29871_v60 }
 0x322   : > { %33463 = vst [vmem:[#allocation14_spill] sm:$0xff] %v29782_v61  ;;  %v13538_v14 = vsel %vm477_vm1, %v13535_v41, %v13537_v2  ;;  %v29829_v41 = vld [vmem:[%s27795_s13 + $0x40] sm:$0xff]   ;;  %v29859_v61 = vld [vmem:[%s27795_s13 + $0x58] sm:$0xff]  }
 0x326   : > { %v29795_v11 = vpop.f32.mrb[156].mxu1 }
 0x327   : > { %33464 = vst [vmem:[#allocation15_spill] sm:$0xff] %v29795_v11  ;;  %v29798_v13 = vpop.f32.mrb[157].mxu1 }
 0x328   : > { %24248 = vmatmul.mubr.msk.bf16.vlgmr.msra.gmra.mrb[56].mxu0 %vm547_vm0, %v13532_v24  ;;  %33465 = vst [vmem:[#allocation17_spill] sm:$0xff] %v29798_v13  ;;  %v29802_v50 = vpop.f32.mrb[158].mxu1  ;;  %v29813_v24 = vld [vmem:[%s27795_s13 + $0x38] sm:$0xff]  }
 0x329   : > { %24251 = vmatprep.mubr.msk.bf16.mxu0 %vm547_vm0, %v13534_v1  ;;  %33466 = vst [vmem:[#allocation16_spill] sm:$0xff] %v29802_v50  ;;  %24304 = vmatpush3.bf16.msra.mxu0 %v26648_v47  ;;  %v29805_v46 = vpop.f32.mrb[159].mxu1  ;;  %v13541_v39 = vrot.slane %v29813_v24, 3 }
 0x32a   : > { %33467 = vst [vmem:[#allocation19_spill] sm:$0xff] %v29805_v46  ;;  %24305 = vmatprep.subr.bf16.mxu0 %v26649_v57  ;;  %v13539_v46 = vrot.slane %v29809_v48, 3 }
 0x32d   : > { %24306 = vmatpush3.bf16.msra.mxu0 %v26649_v57  ;;  %v13540_v57 = vsel %vm477_vm1, %v13537_v2, %v13539_v46  ;;  %v13543_v2 = vrot.slane %v29829_v41, 3 }
 0x32e   : > { %v29815_v1 = vpop.f32.mrb[160].mxu1 }
 0x32f   : > { %33468 = vst [vmem:[#allocation18_spill] sm:$0xff] %v29815_v1  ;;  %v29818_v47 = vpop.f32.mrb[161].mxu1  ;;  %v29833_v1 = vld [vmem:[%s27795_s13 + $0x48] sm:$0xff]  }
 0x330   : > { %24252 = vmatmul.mubr.msk.bf16.gmra.mrb[60].mxu0 %vm547_vm0, %v13536_v6  ;;  %33469 = vst [vmem:[#allocation21_spill] sm:$0xff] %v29818_v47  ;;  %v29822_v50 = vpop.f32.mrb[162].mxu1  ;;  %v13542_v6 = vsel %vm477_vm1, %v13539_v46, %v13541_v39 }
 0x331   : > { %24255 = vmatprep.mubr.msk.bf16.mxu0 %vm547_vm0, %v13538_v14  ;;  %33470 = vst [vmem:[#allocation20_spill] sm:$0xff] %v29822_v50  ;;  %v29825_v13 = vpop.f32.mrb[163].mxu1  ;;  %v13545_v50 = vrot.slane %v29833_v1, 3 }
 0x332   : > { %33471 = vst [vmem:[#allocation23_spill] sm:$0xff] %v29825_v13  ;;  %v29843_v13 = vld [vmem:[%s33239_s2 + $0xa0] sm:$0xff]  }
 0x333   : > { %23631 = vmatprep.subr.bf16.mxu1 %v29843_v13  ;;  %v13546_v11 = vsel %vm477_vm1, %v13543_v2, %v13545_v50 }
 0x336   : > { %v29835_v47 = vpop.f32.mrb[164].mxu1 }
 0x337   : > { %33472 = vst [vmem:[#allocation22_spill] sm:$0xff] %v29835_v47  ;;  %v29838_v14 = vpop.f32.mrb[165].mxu1 }
 0x338   : > { %24256 = vmatmul.mubr.msk.bf16.gmra.mrb[64].mxu0 %vm547_vm0, %v13540_v57  ;;  %33473 = vst [vmem:[#allocation25_spill] sm:$0xff] %v29838_v14  ;;  %v29847_v46 = vpop.f32.mrb[166].mxu1  ;;  %v13544_v57 = vsel %vm477_vm1, %v13541_v39, %v13543_v2  ;;  %v29855_v14 = vld [vmem:[%s27795_s13 + $0x50] sm:$0xff]   ;;  %v13553_v2 = vrot.slane %v29871_v60, 3 }
 0x339   : > { %24259 = vmatprep.mubr.msk.bf16.mxu0 %vm547_vm0, %v13542_v6  ;;  %33474 = vst [vmem:[#allocation24_spill] sm:$0xff] %v29847_v46  ;;  %v29850_v47 = vpop.f32.mrb[167].mxu1  ;;  %v13547_v6 = vrot.slane %v29855_v14, 3 }
 0x33a   : > { %33475 = vst [vmem:[#allocation27_spill] sm:$0xff] %v29850_v47  ;;  %v13549_v47 = vrot.slane %v29859_v61, 3 }
 0x33b   : > { %v13548_v46 = vsel %vm477_vm1, %v13545_v50, %v13547_v6 }
 0x33c   : > { %v13550_v39 = vsel %vm477_vm1, %v13547_v6, %v13549_v47  ;;  %v13557_v6 = vrot.slane %v29883_v58, 3  ;;  %v29907_v58 = vld [vmem:[%s27795_s13 + $0x98] sm:$0xff]  }
 0x33d   : > { %33482 = vst [vmem:[#allocation34_spill] sm:$0xff] %v29907_v58 }
 0x340   : > { %24260 = vmatmul.mubr.msk.bf16.gmra.mrb[68].mxu0 %vm547_vm0, %v13544_v57 }
 0x341   : > { %24263 = vmatprep.mubr.msk.bf16.mxu0 %vm547_vm0, %v13546_v11  ;;  %v13551_v11 = vrot.slane %v29867_v34, 3 }
 0x343   : > { %v13552_v57 = vsel %vm477_vm1, %v13549_v47, %v13551_v11  ;;  %v13554_v50 = vsel %vm477_vm1, %v13551_v11, %v13553_v2  ;;  %v13559_v11 = vrot.slane %v29891_v63, 3  ;;  %v29919_v63 = vld [vmem:[%s27795_s13 + $0xa8] sm:$0xff]  }
 0x344   : > { %33484 = vst [vmem:[#allocation35_spill] sm:$0xff] %v29919_v63 }
 0x348   : > { %24264 = vmatmul.mubr.msk.bf16.gmra.mrb[72].mxu0 %vm547_vm0, %v13548_v46  ;;  %v13555_v46 = vrot.slane %v29879_v55, 3 }
 0x349   : > { %24267 = vmatprep.mubr.msk.bf16.mxu0 %vm547_vm0, %v13550_v39 }
 0x34a   : > { %v13556_v39 = vsel %vm477_vm1, %v13553_v2, %v13555_v46  ;;  %v13558_v47 = vsel %vm477_vm1, %v13555_v46, %v13557_v6  ;;  %v13563_v46 = vrot.slane %v29903_v20, 3  ;;  %v26641_v20 = vld [vmem:[%s27795_s13 + $0xb8] sm:$0xff]  }
 0x350   : > { %24268 = vmatmul.mubr.msk.bf16.gmra.mrb[76].mxu0 %vm547_vm0, %v13552_v57  ;;  %v13561_v57 = vrot.slane %v29895_v54, 3  ;;  %v29915_v54 = vld [vmem:[%s27795_s13 + $0xa0] sm:$0xff]  }
 0x351   : > { %24271 = vmatprep.mubr.msk.bf16.mxu0 %vm547_vm0, %v13554_v50  ;;  %v13560_v50 = vsel %vm477_vm1, %v13557_v6, %v13559_v11  ;;  %33483 = vst [vmem:[#allocation33_spill] sm:$0xff] %v29915_v54 }
 0x352   : > { %v13562_v2 = vsel %vm477_vm1, %v13559_v11, %v13561_v57  ;;  %v13567_v11 = vrot.slane %v29915_v54, 3  ;;  %v26642_v54 = vld [vmem:[%s27795_s13 + $0xc0] sm:$0xff]  }
 0x358   : > { %24272 = vmatmul.mubr.msk.bf16.gmra.mrb[80].mxu0 %vm547_vm0, %v13556_v39  ;;  %v13565_v39 = vrot.slane %v29907_v58, 3  ;;  %v29927_v58 = vld [vmem:[%s27795_s13 + $0xb0] sm:$0xff]  }
 0x359   : > { %24275 = vmatprep.mubr.msk.bf16.mxu0 %vm547_vm0, %v13558_v47  ;;  %v13564_v47 = vsel %vm477_vm1, %v13561_v57, %v13563_v46  ;;  %33485 = vst [vmem:[#allocation36_spill] sm:$0xff] %v29927_v58 }
 0x35a   : > { %v13566_v6 = vsel %vm477_vm1, %v13563_v46, %v13565_v39  ;;  %v13571_v46 = vrot.slane %v29927_v58, 3 }
 0x360   : > { %24276 = vmatmul.mubr.msk.bf16.gmra.mrb[84].mxu0 %vm547_vm0, %v13560_v50  ;;  %v13569_v50 = vrot.slane %v29919_v63, 3 }
 0x361   : > { %24279 = vmatprep.mubr.msk.bf16.mxu0 %vm547_vm0, %v13562_v2  ;;  %v13568_v2 = vsel %vm477_vm1, %v13565_v39, %v13567_v11  ;;  %v26643_v39 = vld [vmem:[%s27795_s13 + $0xc8] sm:$0xff]  }
 0x362   : > { %v13570_v57 = vsel %vm477_vm1, %v13567_v11, %v13569_v50  ;;  %v13575_v11 = vrot.slane %v26642_v54, 3  ;;  %v13577_v44 = vrot.slane %v26643_v39, 3 }
 0x364   : > { %v13578_v58 = vsel %vm477_vm1, %v13575_v11, %v13577_v44 }
 0x368   : > { %24280 = vmatmul.mubr.msk.bf16.gmra.mrb[88].mxu0 %vm547_vm0, %v13564_v47  ;;  %v13573_v47 = vrot.slane %v26641_v20, 3  ;;  %v26646_v20 = vld [vmem:[%s27795_s13 + $0xd8] sm:$0xff]  }
 0x369   : > { %24283 = vmatprep.mubr.msk.bf16.mxu0 %vm547_vm0, %v13566_v6  ;;  %v13572_v6 = vsel %vm477_vm1, %v13569_v50, %v13571_v46  ;;  %v26654_v50 = vld [vmem:[%s33239_s2 + $0x140] sm:$0xff]  }
 0x36a   : > { %v13574_v63 = vsel %vm477_vm1, %v13571_v46, %v13573_v47  ;;  %24363 = vmatprep.subr.bf16.mxu0 %v26654_v50 }
 0x370   : > { %24284 = vmatmul.mubr.msk.bf16.gmra.mrb[92].mxu0 %vm547_vm0, %v13568_v2  ;;  %v13576_v2 = vsel %vm477_vm1, %v13573_v47, %v13575_v11  ;;  %v13317_v11 = vld [vmem:[%s27795_s13] sm:$0xf] }
 0x371   : > { %24287 = vmatprep.mubr.msk.bf16.mxu0 %vm547_vm0, %v13570_v57  ;;  %v26644_v57 = vld [vmem:[%s27795_s13 + $0xd0] sm:$0xff]  }
 0x372   : > { %v13579_v46 = vrot.slane %v26644_v57, 3 }
 0x374   : > { %v13580_v54 = vsel %vm477_vm1, %v13577_v44, %v13579_v46 }
 0x378   : > { %24288 = vmatmul.mubr.msk.bf16.gmra.mrb[96].mxu0 %vm547_vm0, %v13572_v6  ;;  %v13581_v6 = vrot.slane %v26646_v20, 3 }
 0x379   : > { %24291 = vmatprep.mubr.msk.bf16.mxu0 %vm547_vm0, %v13574_v63  ;;  %v26647_v63 = vld [vmem:[%s27795_s13 + $0xe0] ss:$0 sps:$4 sm:$0x77]  }
 0x37a   : > { %v13582_v47 = vsel %vm477_vm1, %v13579_v46, %v13581_v6  ;;  %v13583_v39 = vrot.slane %v26647_v63, 3 }
 0x37c   : > { %v13584_v46 = vsel %vm477_vm1, %v13581_v6, %v13583_v39 }
 0x380   : > { %24292 = vmatmul.mubr.msk.bf16.gmra.mrb[100].mxu0 %vm547_vm0, %v13576_v2 }
 0x381   : > { %24295 = vmatprep.mubr.msk.bf16.mxu0 %vm547_vm0, %v13578_v58 }
 0x388   : > { %24296 = vmatmul.mubr.msk.bf16.gmra.mrb[104].mxu0 %vm547_vm0, %v13580_v54  ;;  %v21405_v54 = vcombine.low %v13317_v11, %v29735_v18 }
 0x389   : > { %24299 = vmatprep.mubr.msk.bf16.mxu0 %vm547_vm0, %v13582_v47 }
 0x38b   : > { %v23505_v2 = vpop.f32.mrb[0].mxu0 }
 0x38c   : > { %v24855_v58 = vadd.f32 %v23505_v2, %v29597_v40  ;;  %v5968_v57 = vpop.f32.mrb[1].mxu0 }
 0x38d   : > { %v24856_v44 = vadd.f32 %v5968_v57, %v29600_v51  ;;  %v23506_v20 = vpop.f32.mrb[2].mxu0 }
 0x38e   : > { %v6254_v47 = vadd.f32 %v24855_v58, %v29958_v53  ;;  %v24857_v63 = vadd.f32 %v23506_v20, %v29606_v17  ;;  %v5971_v35 = vpop.f32.mrb[3].mxu0 }
 0x38f   : > { %v29967_v15 = vadd.f32 %v24856_v44, %v29958_v53  ;;  %v24858_v55 = vadd.f32 %v5971_v35, %v29608_v22 }
 0x390   : > { %v6366_v60 = vmul.f32 0.70710677, %v6254_v47  ;;  %v6255_v40 = vadd.f32 %v24857_v63, %v29958_v53  ;;  %24300 = vmatmul.mubr.msk.bf16.gmra.mrb[108].mxu0 %vm547_vm0, %v13584_v46 }
 0x391   : > { %v6364_v51 = vmul.f32 0.70710677, %v29967_v15  ;;  %v6253_v6 = vadd.f32 %v24858_v55, %v29958_v53  ;;  %24307 = vmatprep.mubr.msk.bf16.mxu0 %vm547_vm0, %v21405_v54 }
 0x392   : > { %27193 = verf.f32 %v6366_v60  ;;  %v6367_v18 = vmul.f32 0.70710677, %v6255_v40  ;;  %v26655_v60 = vld [vmem:[%s33239_s2 + $0x148] sm:$0xff]  }
 0x393   : > { %27195 = verf.f32 %v6364_v51  ;;  %v6365_v17 = vmul.f32 0.70710677, %v6253_v6  ;;  %v23509_v39 = vpop.f32.mrb[4].mxu0 }
 0x394   : > { %27197 = verf.f32 %v6367_v18  ;;  %v24859_v11 = vadd.f32 %v23509_v39, %v29614_v38  ;;  %v5984_v22 = vpop.f32.mrb[5].mxu0 }
 0x395   : > { %27199 = verf.f32 %v6365_v17  ;;  %v24860_v35 = vadd.f32 %v5984_v22, %v29617_v3  ;;  %v23510_v2 = vpop.f32.mrb[6].mxu0  ;;  %v6310_v22 = vmul.f32 0.5, %v6254_v47 }
 0x396   : > { %v29978_v58 = vadd.f32 %v24859_v11, %v29958_v53  ;;  %v24861_v55 = vadd.f32 %v23510_v2, %v29620_v25  ;;  %v5987_v57 = vpop.f32.mrb[7].mxu0 }
 0x397   : > { %v6256_v44 = vadd.f32 %v24860_v35, %v29958_v53  ;;  %v24862_v20 = vadd.f32 %v5987_v57, %v29622_v19 }
 0x398   : > { %v6370_v38 = vmul.f32 0.70710677, %v29978_v58  ;;  %v29988_v46 = vadd.f32 %v24861_v55, %v29958_v53  ;;  %24308 = vmatmul.mubr.msk.bf16.vlgmr.msra.gmra.mrb[56].mxu0 %vm547_vm0, %v29744_v0 }
 0x399   : > { %v6368_v3 = vmul.f32 0.70710677, %v6256_v44  ;;  %v29993_v25 = vadd.f32 %v24862_v20, %v29958_v53  ;;  %24311 = vmatprep.mubr.msk.bf16.mxu0 %vm547_vm0, %v29760_v9  ;;  %24364 = vmatpush3.bf16.msra.mxu0 %v26654_v50  ;;  %v6311_v20 = vmul.f32 0.5, %v6255_v40 }
 0x39a   : > { %27201 = verf.f32 %v6370_v38  ;;  %v6371_v54 = vmul.f32 0.70710677, %v29988_v46  ;;  %24365 = vmatprep.subr.bf16.mxu0 %v26655_v60 }
 0x39b   : > { %27203 = verf.f32 %v6368_v3  ;;  %v6369_v19 = vmul.f32 0.70710677, %v29993_v25  ;;  %v23513_v63 = vpop.f32.mrb[8].mxu0 }
 0x39c   : > { %v27194_v51 = vpop.eup %27193  ;;  %27205 = verf.f32 %v6371_v54  ;;  %v24863_v0 = vadd.f32 %v23513_v63, %v29628_v10  ;;  %v6000_v18 = vpop.f32.mrb[9].mxu0 }
 0x39d   : > { %v27196_v17 = vpop.eup %27195  ;;  %v6478_v39 = vadd.f32 1.0, %v27194_v51  ;;  %27207 = verf.f32 %v6369_v19  ;;  %v24864_v11 = vadd.f32 %v6000_v18, %v29631_v42  ;;  %v23514_v9 = vpop.f32.mrb[10].mxu0  ;;  %24366 = vmatpush3.bf16.msra.mxu0 %v26655_v60  ;;  %v6309_v51 = vmul.f32 0.5, %v6253_v6 }
 0x39e   : > { %v27198_v50 = vpop.eup %27197  ;;  %v30002_v35 = vadd.f32 %v24863_v0, %v29958_v53  ;;  %v24865_v2 = vadd.f32 %v23514_v9, %v29637_v28  ;;  %v6003_v55 = vpop.f32.mrb[11].mxu0  ;;  %v6476_v54 = vadd.f32 1.0, %v27196_v17 }
 0x39f   : > { %v27200_v57 = vpop.eup %27199  ;;  %v6479_v38 = vadd.f32 1.0, %v27198_v50  ;;  %v30006_v10 = vadd.f32 %v24864_v11, %v29958_v53  ;;  %v24866_v3 = vadd.f32 %v6003_v55, %v29639_v59  ;;  %v6534_v28 = vmul.f32 %v6478_v39, %v6310_v22 }
 0x3a0   : > { %v6477_v42 = vadd.f32 1.0, %v27200_v57  ;;  %v6374_v60 = vmul.f32 0.70710677, %v30002_v35  ;;  %v30011_v47 = vadd.f32 %v24865_v2, %v29958_v53  ;;  %24312 = vmatmul.mubr.msk.bf16.gmra.mrb[60].mxu0 %vm547_vm0, %v29767_v12  ;;  %v6308_v59 = vmul.f32 0.5, %v29967_v15 }
 0x3a1   : > { %v6535_v19 = vmul.f32 %v6479_v38, %v6311_v20  ;;  %v6372_v40 = vmul.f32 0.70710677, %v30006_v10  ;;  %v30017_v63 = vadd.f32 %v24866_v3, %v29958_v53  ;;  %24315 = vmatprep.mubr.msk.bf16.mxu0 %vm547_vm0, %v29786_v21  ;;  %v6312_v21 = vmul.f32 0.5, %v6256_v44 }
 0x3a2   : > { %27209 = verf.f32 %v6374_v60  ;;  %v6375_v0 = vmul.f32 0.70710677, %v30011_v47  ;;  %v6532_v50 = vmul.f32 %v6476_v54, %v6308_v59  ;;  %v6533_v22 = vmul.f32 %v6477_v42, %v6309_v51 }
 0x3a3   : > { %v6589_v18 = vpack.c.bf16 %v6535_v19, %v6534_v28  ;;  %27211 = verf.f32 %v6372_v40  ;;  %v6373_v12 = vmul.f32 0.70710677, %v30017_v63  ;;  %v23517_v17 = vpop.f32.mrb[12].mxu0  ;;  %v6313_v42 = vmul.f32 0.5, %v29993_v25 }
 0x3a4   : > { %v27202_v39 = vpop.eup %27201  ;;  %27213 = verf.f32 %v6375_v0  ;;  %v24867_v11 = vadd.f32 %v23517_v17, %v29645_v5  ;;  %v6016_v9 = vpop.f32.mrb[13].mxu0  ;;  %v6588_v60 = vpack.c.bf16 %v6533_v22, %v6532_v50  ;;  %v6314_v51 = vmul.f32 0.5, %v29978_v58 }
 0x3a5   : > { %v27204_v2 = vpop.eup %27203  ;;  %27215 = verf.f32 %v6373_v12  ;;  %v24868_v15 = vadd.f32 %v6016_v9, %v29648_v26  ;;  %v23518_v6 = vpop.f32.mrb[14].mxu0  ;;  %v6482_v5 = vadd.f32 1.0, %v27202_v39  ;;  %v26653_v26 = vld [vmem:[%s33239_s2 + $0xa8] sm:$0xff]  }
 0x3a6   : > { %v27206_v55 = vpop.eup %27205  ;;  %v6480_v57 = vadd.f32 1.0, %v27204_v2  ;;  %v30027_v20 = vadd.f32 %v24867_v11, %v29958_v53  ;;  %v24869_v38 = vadd.f32 %v23518_v6, %v29654_v43  ;;  %v6019_v3 = vpop.f32.mrb[15].mxu0  ;;  %23575 = vmatprep.mubr.bf16.mxu1 %v6588_v60 }
 0x3a7   : > { %v27208_v28 = vpop.eup %27207  ;;  %v6483_v19 = vadd.f32 1.0, %v27206_v55  ;;  %v30031_v54 = vadd.f32 %v24868_v15, %v29958_v53  ;;  %v24870_v44 = vadd.f32 %v6019_v3, %v29656_v56  ;;  %v6315_v56 = vmul.f32 0.5, %v29988_v46  ;;  %23576 = vmatmul.mubr.bf16.vlgmr.msra.gmra.mrb[56].mxu1 %v6589_v18  ;;  %v26664_v18 = vld [vmem:[%s33239_s2 + $0x90] sm:$0xff]  }
 0x3a8   : > { %v6481_v40 = vadd.f32 1.0, %v27208_v28  ;;  %v6378_v59 = vmul.f32 0.70710677, %v30027_v20  ;;  %v30040_v43 = vadd.f32 %v24869_v38, %v29958_v53  ;;  %24316 = vmatmul.mubr.msk.bf16.gmra.mrb[64].mxu0 %vm547_vm0, %v29790_v52  ;;  %23632 = vmatpush3.bf16.msra.mxu1 %v29843_v13  ;;  %v6536_v17 = vmul.f32 %v6480_v57, %v6312_v21 }
 0x3a9   : > { %v6376_v0 = vmul.f32 0.70710677, %v30031_v54  ;;  %v30048_v12 = vadd.f32 %v24870_v44, %v29958_v53  ;;  %24319 = vmatprep.mubr.msk.bf16.mxu0 %vm547_vm0, %v29809_v48  ;;  %v6538_v39 = vmul.f32 %v6482_v5, %v6314_v51  ;;  %v6539_v11 = vmul.f32 %v6483_v19, %v6315_v56  ;;  %23633 = vmatprep.subr.bf16.mxu1 %v26653_v26 }
 0x3aa   : > { %27217 = verf.f32 %v6378_v59  ;;  %v6379_v25 = vmul.f32 0.70710677, %v30040_v43  ;;  %v6537_v52 = vmul.f32 %v6481_v40, %v6313_v42  ;;  %v6316_v55 = vmul.f32 0.5, %v30006_v10 }
 0x3ab   : > { %27219 = verf.f32 %v6376_v0  ;;  %v6377_v58 = vmul.f32 0.70710677, %v30048_v12  ;;  %v23521_v46 = vpop.f32.mrb[16].mxu0  ;;  %v6591_v15 = vpack.c.bf16 %v6539_v11, %v6538_v39  ;;  %v6317_v10 = vmul.f32 0.5, %v30017_v63 }
 0x3ac   : > { %v27210_v9 = vpop.eup %27209  ;;  %27221 = verf.f32 %v6379_v25  ;;  %v24871_v48 = vadd.f32 %v23521_v46, %v29662_v31  ;;  %v6032_v50 = vpop.f32.mrb[17].mxu0  ;;  %v6590_v22 = vpack.c.bf16 %v6537_v52, %v6536_v17  ;;  %23634 = vmatpush3.bf16.msra.mxu1 %v26653_v26  ;;  %v6319_v26 = vmul.f32 0.5, %v30011_v47 }
 0x3ad   : > { %v27212_v13 = vpop.eup %27211  ;;  %27223 = verf.f32 %v6377_v58  ;;  %v24872_v2 = vadd.f32 %v6032_v50, %v29665_v8  ;;  %v23522_v21 = vpop.f32.mrb[18].mxu0  ;;  %v6486_v28 = vadd.f32 1.0, %v27210_v9  ;;  %23691 = vmatprep.subr.bf16.mxu1 %v26664_v18  ;;  %v6320_v9 = vmul.f32 0.5, %v30031_v54 }
 0x3ae   : > { %v27214_v6 = vpop.eup %27213  ;;  %v6484_v57 = vadd.f32 1.0, %v27212_v13  ;;  %v30062_v38 = vadd.f32 %v24871_v48, %v29958_v53  ;;  %v24873_v3 = vadd.f32 %v23522_v21, %v29668_v37  ;;  %v6035_v60 = vpop.f32.mrb[19].mxu0  ;;  %23579 = vmatprep.mubr.bf16.mxu1 %v6590_v22  ;;  %v6318_v37 = vmul.f32 0.5, %v30002_v35 }
 0x3af   : > { %v27216_v31 = vpop.eup %27215  ;;  %v6487_v5 = vadd.f32 1.0, %v27214_v6  ;;  %v30066_v19 = vadd.f32 %v24872_v2, %v29958_v53  ;;  %v24874_v8 = vadd.f32 %v6035_v60, %v29670_v49  ;;  %23580 = vmatmul.mubr.bf16.gmra.mrb[60].mxu1 %v6591_v15  ;;  %v6321_v6 = vmul.f32 0.5, %v30048_v12 }
 0x3b0   : > { %v6485_v44 = vadd.f32 1.0, %v27216_v31  ;;  %v6382_v42 = vmul.f32 0.70710677, %v30062_v38  ;;  %v30072_v40 = vadd.f32 %v24873_v3, %v29958_v53  ;;  %24320 = vmatmul.mubr.msk.bf16.gmra.mrb[68].mxu0 %vm547_vm0, %v29813_v24  ;;  %v6540_v51 = vmul.f32 %v6484_v57, %v6316_v55 }
 0x3b1   : > { %v6380_v59 = vmul.f32 0.70710677, %v30066_v19  ;;  %v30080_v49 = vadd.f32 %v24874_v8, %v29958_v53  ;;  %24323 = vmatprep.mubr.msk.bf16.mxu0 %vm547_vm0, %v29829_v41  ;;  %v6542_v0 = vmul.f32 %v6486_v28, %v6318_v37  ;;  %v6543_v47 = vmul.f32 %v6487_v5, %v6319_v26 }
 0x3b2   : > { %27225 = verf.f32 %v6382_v42  ;;  %v6383_v63 = vmul.f32 0.70710677, %v30072_v40  ;;  %v6541_v56 = vmul.f32 %v6485_v44, %v6317_v10  ;;  %v6323_v3 = vmul.f32 0.5, %v30040_v43 }
 0x3b3   : > { %27227 = verf.f32 %v6380_v59  ;;  %v6381_v24 = vmul.f32 0.70710677, %v30080_v49  ;;  %v23525_v35 = vpop.f32.mrb[20].mxu0  ;;  %v6593_v11 = vpack.c.bf16 %v6543_v47, %v6542_v0 }
 0x3b4   : > { %v27218_v25 = vpop.eup %27217  ;;  %27229 = verf.f32 %v6383_v63  ;;  %v24875_v17 = vadd.f32 %v23525_v35, %v29676_v29  ;;  %v6048_v52 = vpop.f32.mrb[21].mxu0  ;;  %v6592_v58 = vpack.c.bf16 %v6541_v56, %v6540_v51  ;;  %v6324_v51 = vmul.f32 0.5, %v30066_v19 }
 0x3b5   : > { %v27220_v46 = vpop.eup %27219  ;;  %27231 = verf.f32 %v6381_v24  ;;  %v24876_v41 = vadd.f32 %v6048_v52, %v29679_v23  ;;  %v23526_v39 = vpop.f32.mrb[22].mxu0  ;;  %v6490_v2 = vadd.f32 1.0, %v27218_v25  ;;  %v6325_v52 = vmul.f32 0.5, %v30080_v49 }
 0x3b6   : > { %v27222_v18 = vpop.eup %27221  ;;  %v6488_v48 = vadd.f32 1.0, %v27220_v46  ;;  %v30090_v50 = vadd.f32 %v24875_v17, %v29958_v53  ;;  %v24877_v22 = vadd.f32 %v23526_v39, %v29685_v33  ;;  %v6051_v13 = vpop.f32.mrb[23].mxu0  ;;  %23583 = vmatprep.mubr.bf16.mxu1 %v6592_v58  ;;  %v6322_v33 = vmul.f32 0.5, %v30027_v20 }
 0x3b7   : > { %v27224_v29 = vpop.eup %27223  ;;  %v6491_v21 = vadd.f32 1.0, %v27222_v18  ;;  %v30094_v15 = vadd.f32 %v24876_v41, %v29958_v53  ;;  %v24878_v23 = vadd.f32 %v6051_v13, %v29687_v45  ;;  %23584 = vmatmul.mubr.bf16.gmra.mrb[64].mxu1 %v6593_v11  ;;  %v6327_v41 = vmul.f32 0.5, %v30072_v40 }
 0x3b8   : > { %v6489_v55 = vadd.f32 1.0, %v27224_v29  ;;  %v6386_v54 = vmul.f32 0.70710677, %v30090_v50  ;;  %v30100_v57 = vadd.f32 %v24877_v22, %v29958_v53  ;;  %24324 = vmatmul.mubr.msk.bf16.gmra.mrb[72].mxu0 %vm547_vm0, %v29833_v1  ;;  %v6544_v12 = vmul.f32 %v6488_v48, %v6320_v9 }
 0x3b9   : > { %v6384_v60 = vmul.f32 0.70710677, %v30094_v15  ;;  %v30108_v31 = vadd.f32 %v24878_v23, %v29958_v53  ;;  %24327 = vmatprep.mubr.msk.bf16.mxu0 %vm547_vm0, %v29855_v14  ;;  %v6546_v5 = vmul.f32 %v6490_v2, %v6322_v33  ;;  %v6547_v43 = vmul.f32 %v6491_v21, %v6323_v3 }
 0x3ba   : > { %27233 = verf.f32 %v6386_v54  ;;  %v6387_v45 = vmul.f32 0.70710677, %v30100_v57  ;;  %v6545_v28 = vmul.f32 %v6489_v55, %v6321_v6  ;;  %v6328_v55 = vmul.f32 0.5, %v30094_v15 }
 0x3bb   : > { %27235 = verf.f32 %v6384_v60  ;;  %v6385_v1 = vmul.f32 0.70710677, %v30108_v31  ;;  %v23529_v20 = vpop.f32.mrb[24].mxu0  ;;  %v6595_v59 = vpack.c.bf16 %v6547_v43, %v6546_v5  ;;  %v33486_v43 = vld [vmem:[#allocation26_spill] sm:$0xff] }
 0x3bc   : > { %v27226_v8 = vpop.eup %27225  ;;  %27237 = verf.f32 %v6387_v45  ;;  %v24879_v10 = vadd.f32 %v23529_v20, %v29693_v27  ;;  %v6064_v44 = vpop.f32.mrb[25].mxu0  ;;  %v6594_v42 = vpack.c.bf16 %v6545_v28, %v6544_v12 }
 0x3bd   : > { %v27228_v37 = vpop.eup %27227  ;;  %27239 = verf.f32 %v6385_v1  ;;  %v24880_v14 = vadd.f32 %v6064_v44, %v29696_v62  ;;  %v23530_v26 = vpop.f32.mrb[26].mxu0  ;;  %v6494_v47 = vadd.f32 1.0, %v27226_v8  ;;  %v6329_v1 = vmul.f32 0.5, %v30108_v31 }
 0x3be   : > { %v27230_v63 = vpop.eup %27229  ;;  %v6492_v56 = vadd.f32 1.0, %v27228_v37  ;;  %v30118_v24 = vadd.f32 %v24879_v10, %v29958_v53  ;;  %v24881_v35 = vadd.f32 %v23530_v26, %v29699_v4  ;;  %v6067_v0 = vpop.f32.mrb[27].mxu0  ;;  %23587 = vmatprep.mubr.bf16.mxu1 %v6594_v42  ;;  %v6326_v4 = vmul.f32 0.5, %v30062_v38 }
 0x3bf   : > { %v27232_v27 = vpop.eup %27231  ;;  %v6495_v25 = vadd.f32 1.0, %v27230_v63  ;;  %v30122_v17 = vadd.f32 %v24880_v14, %v29958_v53  ;;  %v24882_v62 = vadd.f32 %v6067_v0, %v29701_v7  ;;  %23588 = vmatmul.mubr.bf16.gmra.mrb[68].mxu1 %v6595_v59  ;;  %v6331_v8 = vmul.f32 0.5, %v30100_v57  ;;  %v33488_v63 = vld [vmem:[#allocation4_spill] sm:$0xff] }
 0x3c0   : > { %v6493_v58 = vadd.f32 1.0, %v27232_v27  ;;  %v6390_v19 = vmul.f32 0.70710677, %v30118_v24  ;;  %v30128_v46 = vadd.f32 %v24881_v35, %v29958_v53  ;;  %24328 = vmatmul.mubr.msk.bf16.gmra.mrb[76].mxu0 %vm547_vm0, %v29859_v61  ;;  %v6548_v49 = vmul.f32 %v6492_v56, %v6324_v51  ;;  %v33489_v27 = vld [vmem:[#allocation3_spill] sm:$0xff] }
 0x3c1   : > { %v6388_v39 = vmul.f32 0.70710677, %v30122_v17  ;;  %v30136_v11 = vadd.f32 %v24882_v62, %v29958_v53  ;;  %24331 = vmatprep.mubr.msk.bf16.mxu0 %vm547_vm0, %v29867_v34  ;;  %v6550_v9 = vmul.f32 %v6494_v47, %v6326_v4  ;;  %v6551_v40 = vmul.f32 %v6495_v25, %v6327_v41  ;;  %v33490_v41 = vld [vmem:[#allocation6_spill] sm:$0xff] }
 0x3c2   : > { %27241 = verf.f32 %v6390_v19  ;;  %v6391_v7 = vmul.f32 0.70710677, %v30128_v46  ;;  %v6549_v18 = vmul.f32 %v6493_v58, %v6325_v52  ;;  %v6332_v58 = vmul.f32 0.5, %v30122_v17 }
 0x3c3   : > { %27243 = verf.f32 %v6388_v39  ;;  %v6389_v61 = vmul.f32 0.70710677, %v30136_v11  ;;  %v23533_v38 = vpop.f32.mrb[28].mxu0  ;;  %v6597_v23 = vpack.c.bf16 %v6551_v40, %v6550_v9  ;;  %v33491_v9 = vld [vmem:[#allocation5_spill] sm:$0xff] }
 0x3c4   : > { %v27234_v48 = vpop.eup %27233  ;;  %27245 = verf.f32 %v6391_v7  ;;  %v24883_v22 = vadd.f32 %v23533_v38, %v29707_v32  ;;  %v6080_v13 = vpop.f32.mrb[29].mxu0  ;;  %v6596_v29 = vpack.c.bf16 %v6549_v18, %v6548_v49 }
 0x3c5   : > { %v27236_v2 = vpop.eup %27235  ;;  %27247 = verf.f32 %v6389_v61  ;;  %v24884_v34 = vadd.f32 %v6080_v13, %v29710_v30  ;;  %v23534_v21 = vpop.f32.mrb[30].mxu0  ;;  %v6498_v45 = vadd.f32 1.0, %v27234_v48  ;;  %v6333_v48 = vmul.f32 0.5, %v30136_v11  ;;  %v33493_v11 = vld [vmem:[#allocation31_spill] sm:$0xff] }
 0x3c6   : > { %v27238_v6 = vpop.eup %27237  ;;  %v6496_v54 = vadd.f32 1.0, %v27236_v2  ;;  %v30146_v33 = vadd.f32 %v24883_v22, %v29958_v53  ;;  %v24885_v3 = vadd.f32 %v23534_v21, %v29713_v16  ;;  %v6083_v60 = vpop.f32.mrb[31].mxu0  ;;  %23591 = vmatprep.mubr.bf16.mxu1 %v6596_v29  ;;  %v6330_v16 = vmul.f32 0.5, %v30090_v50  ;;  %v33492_v29 = vld [vmem:[#allocation28_spill] sm:$0xff] }
 0x3c7   : > { %v27240_v32 = vpop.eup %27239  ;;  %v6499_v12 = vadd.f32 1.0, %v27238_v6  ;;  %v30150_v28 = vadd.f32 %v24884_v34, %v29958_v53  ;;  %v24886_v30 = vadd.f32 %v6083_v60, %v29715_v36  ;;  %23592 = vmatmul.mubr.bf16.gmra.mrb[72].mxu1 %v6597_v23  ;;  %v33487_v36 = vld [vmem:[#allocation29_spill] sm:$0xff]  ;;  %v6334_v2 = vmul.f32 0.5, %v30118_v24 }
 0x3c8   : > { %v6497_v20 = vadd.f32 1.0, %v27240_v32  ;;  %v6394_v15 = vmul.f32 0.70710677, %v30146_v33  ;;  %v30156_v5 = vadd.f32 %v24885_v3, %v29958_v53  ;;  %24332 = vmatmul.mubr.msk.bf16.gmra.mrb[80].mxu0 %vm547_vm0, %v33486_v43  ;;  %v6552_v42 = vmul.f32 %v6496_v54, %v6328_v55 }
 0x3c9   : > { %v6392_v10 = vmul.f32 0.70710677, %v30150_v28  ;;  %v30164_v44 = vadd.f32 %v24886_v30, %v29958_v53  ;;  %24335 = vmatprep.mubr.msk.bf16.mxu0 %vm547_vm0, %v33487_v36  ;;  %v6554_v26 = vmul.f32 %v6498_v45, %v6330_v16  ;;  %v6555_v57 = vmul.f32 %v6499_v12, %v6331_v8  ;;  %v33494_v45 = vld [vmem:[#allocation8_spill] sm:$0xff] }
 0x3ca   : > { %27249 = verf.f32 %v6394_v15  ;;  %v6395_v31 = vmul.f32 0.70710677, %v30156_v5  ;;  %v6553_v37 = vmul.f32 %v6497_v20, %v6329_v1  ;;  %v6335_v34 = vmul.f32 0.5, %v30128_v46  ;;  %v33495_v15 = vld [vmem:[#allocation7_spill] sm:$0xff] }
 0x3cb   : > { %27251 = verf.f32 %v6392_v10  ;;  %v6393_v14 = vmul.f32 0.70710677, %v30164_v44  ;;  %v23537_v50 = vpop.f32.mrb[32].mxu0  ;;  %v6599_v62 = vpack.c.bf16 %v6555_v57, %v6554_v26  ;;  %v6336_v36 = vmul.f32 0.5, %v30150_v28 }
 0x3cc   : > { %v27242_v59 = vpop.eup %27241  ;;  %27253 = verf.f32 %v6395_v31  ;;  %v24887_v51 = vadd.f32 %v23537_v50, %v33488_v63  ;;  %v6096_v56 = vpop.f32.mrb[33].mxu0  ;;  %v6598_v35 = vpack.c.bf16 %v6553_v37, %v6552_v42  ;;  %v33496_v37 = vld [vmem:[#allocation9_spill] sm:$0xff] }
 0x3cd   : > { %v27244_v0 = vpop.eup %27243  ;;  %27255 = verf.f32 %v6393_v14  ;;  %v24888_v47 = vadd.f32 %v6096_v56, %v33489_v27  ;;  %v23538_v25 = vpop.f32.mrb[34].mxu0  ;;  %v6502_v18 = vadd.f32 1.0, %v27242_v59 }
 0x3ce   : > { %v27246_v52 = vpop.eup %27245  ;;  %v6500_v19 = vadd.f32 1.0, %v27244_v0  ;;  %v30174_v4 = vadd.f32 %v24887_v51, %v29958_v53  ;;  %v24889_v39 = vadd.f32 %v23538_v25, %v33490_v41  ;;  %v6099_v7 = vpop.f32.mrb[35].mxu0  ;;  %23595 = vmatprep.mubr.bf16.mxu1 %v6598_v35  ;;  %v33497_v51 = vld [vmem:[#allocation11_spill] sm:$0xff]  ;;  %v6337_v35 = vmul.f32 0.5, %v30164_v44  ;;  %v33499_v44 = vld [vmem:[#allocation32_spill] sm:$0xff] }
 0x3cf   : > { %v27248_v49 = vpop.eup %27247  ;;  %v6503_v61 = vadd.f32 1.0, %v27246_v52  ;;  %v30178_v38 = vadd.f32 %v24888_v47, %v29958_v53  ;;  %v24890_v40 = vadd.f32 %v6099_v7, %v33491_v9  ;;  %23596 = vmatmul.mubr.bf16.gmra.mrb[76].mxu1 %v6599_v62  ;;  %v6558_v60 = vmul.f32 %v6502_v18, %v6334_v2  ;;  %v33498_v47 = vld [vmem:[#allocation30_spill] sm:$0xff] }
 0x3d0   : > { %v6501_v22 = vadd.f32 1.0, %v27248_v49  ;;  %v6398_v17 = vmul.f32 0.70710677, %v30174_v4  ;;  %v30184_v13 = vadd.f32 %v24889_v39, %v29958_v53  ;;  %24336 = vmatmul.mubr.msk.bf16.gmra.mrb[84].mxu0 %vm547_vm0, %v33492_v29  ;;  %v6556_v55 = vmul.f32 %v6500_v19, %v6332_v58 }
 0x3d1   : > { %v6396_v21 = vmul.f32 0.70710677, %v30178_v38  ;;  %v30192_v23 = vadd.f32 %v24890_v40, %v29958_v53  ;;  %24339 = vmatprep.mubr.msk.bf16.mxu0 %vm547_vm0, %v33493_v11  ;;  %v6559_v46 = vmul.f32 %v6503_v61, %v6335_v34  ;;  %v6338_v25 = vmul.f32 0.5, %v30146_v33  ;;  %v33500_v61 = vld [vmem:[#allocation10_spill] sm:$0xff] }
 0x3d2   : > { %27257 = verf.f32 %v6398_v17  ;;  %v6399_v6 = vmul.f32 0.70710677, %v30184_v13  ;;  %v6557_v54 = vmul.f32 %v6501_v22, %v6333_v48  ;;  %v6339_v62 = vmul.f32 0.5, %v30156_v5  ;;  %v33501_v17 = vld [vmem:[#allocation13_spill] sm:$0xff] }
 0x3d3   : > { %27259 = verf.f32 %v6396_v21  ;;  %v6397_v3 = vmul.f32 0.70710677, %v30192_v23  ;;  %v23541_v24 = vpop.f32.mrb[36].mxu0  ;;  %v6601_v8 = vpack.c.bf16 %v6559_v46, %v6558_v60  ;;  %v6340_v11 = vmul.f32 0.5, %v30178_v38 }
 0x3d4   : > { %v27250_v32 = vpop.eup %27249  ;;  %27261 = verf.f32 %v6399_v6  ;;  %v24891_v12 = vadd.f32 %v23541_v24, %v33494_v45  ;;  %v6112_v30 = vpop.f32.mrb[37].mxu0  ;;  %v6600_v1 = vpack.c.bf16 %v6557_v54, %v6556_v55  ;;  %v33502_v54 = vld [vmem:[#allocation12_spill] sm:$0xff] }
 0x3d5   : > { %v27252_v20 = vpop.eup %27251  ;;  %27263 = verf.f32 %v6397_v3  ;;  %v24892_v43 = vadd.f32 %v6112_v30, %v33495_v15  ;;  %v23542_v16 = vpop.f32.mrb[38].mxu0  ;;  %v6506_v57 = vadd.f32 1.0, %v27250_v32 }
 0x3d6   : > { %v27254_v10 = vpop.eup %27253  ;;  %v6504_v31 = vadd.f32 1.0, %v27252_v20  ;;  %v30202_v42 = vadd.f32 %v24891_v12, %v29958_v53  ;;  %v24893_v14 = vadd.f32 %v23542_v16, %v33496_v37  ;;  %v6115_v50 = vpop.f32.mrb[39].mxu0  ;;  %23599 = vmatprep.mubr.bf16.mxu1 %v6600_v1  ;;  %v33503_v12 = vld [vmem:[#allocation14_spill] sm:$0xff]  ;;  %v6341_v1 = vmul.f32 0.5, %v30192_v23  ;;  %v33505_v23 = vld [vmem:[#allocation33_spill] sm:$0xff] }
 0x3d7   : > { %v27256_v26 = vpop.eup %27255  ;;  %v6507_v59 = vadd.f32 1.0, %v27254_v10  ;;  %v30206_v63 = vadd.f32 %v24892_v43, %v29958_v53  ;;  %v24894_v56 = vadd.f32 %v6115_v50, %v33497_v51  ;;  %23600 = vmatmul.mubr.bf16.gmra.mrb[80].mxu1 %v6601_v8  ;;  %v6562_v49 = vmul.f32 %v6506_v57, %v6338_v25  ;;  %v33504_v43 = vld [vmem:[#allocation34_spill] sm:$0xff] }
 0x3d8   : > { %v6505_v0 = vadd.f32 1.0, %v27256_v26  ;;  %v6402_v28 = vmul.f32 0.70710677, %v30202_v42  ;;  %v30212_v27 = vadd.f32 %v24893_v14, %v29958_v53  ;;  %24340 = vmatmul.mubr.msk.bf16.gmra.mrb[88].mxu0 %vm547_vm0, %v33498_v47  ;;  %v6560_v41 = vmul.f32 %v6504_v31, %v6336_v36 }
 0x3d9   : > { %v6400_v52 = vmul.f32 0.70710677, %v30206_v63  ;;  %v30220_v58 = vadd.f32 %v24894_v56, %v29958_v53  ;;  %24343 = vmatprep.mubr.msk.bf16.mxu0 %vm547_vm0, %v33499_v44  ;;  %v6563_v5 = vmul.f32 %v6507_v59, %v6339_v62  ;;  %v6342_v16 = vmul.f32 0.5, %v30174_v4  ;;  %v33506_v59 = vld [vmem:[#allocation15_spill] sm:$0xff] }
 0x3da   : > { %27265 = verf.f32 %v6402_v28  ;;  %v6403_v19 = vmul.f32 0.70710677, %v30212_v27  ;;  %v6561_v39 = vmul.f32 %v6505_v0, %v6337_v35  ;;  %v6343_v8 = vmul.f32 0.5, %v30184_v13  ;;  %v33507_v28 = vld [vmem:[#allocation17_spill] sm:$0xff] }
 0x3db   : > { %27267 = verf.f32 %v6400_v52  ;;  %v6401_v7 = vmul.f32 0.70710677, %v30220_v58  ;;  %v23545_v33 = vpop.f32.mrb[40].mxu0  ;;  %v6603_v34 = vpack.c.bf16 %v6563_v5, %v6562_v49  ;;  %v6344_v44 = vmul.f32 0.5, %v30206_v63 }
 0x3dc   : > { %v27258_v18 = vpop.eup %27257  ;;  %27269 = verf.f32 %v6403_v19  ;;  %v24895_v9 = vadd.f32 %v23545_v33, %v33500_v61  ;;  %v6128_v40 = vpop.f32.mrb[41].mxu0  ;;  %v6602_v48 = vpack.c.bf16 %v6561_v39, %v6560_v41  ;;  %v33508_v39 = vld [vmem:[#allocation16_spill] sm:$0xff] }
 0x3dd   : > { %v27260_v22 = vpop.eup %27259  ;;  %27271 = verf.f32 %v6401_v7  ;;  %v24896_v29 = vadd.f32 %v6128_v40, %v33501_v17  ;;  %v23546_v2 = vpop.f32.mrb[42].mxu0  ;;  %v6510_v46 = vadd.f32 1.0, %v27258_v18 }
 0x3de   : > { %v27262_v21 = vpop.eup %27261  ;;  %v6508_v6 = vadd.f32 1.0, %v27260_v22  ;;  %v30230_v55 = vadd.f32 %v24895_v9, %v29958_v53  ;;  %v24897_v3 = vadd.f32 %v23546_v2, %v33502_v54  ;;  %v6131_v24 = vpop.f32.mrb[43].mxu0  ;;  %23603 = vmatprep.mubr.bf16.mxu1 %v6602_v48  ;;  %v33509_v9 = vld [vmem:[#allocation19_spill] sm:$0xff]  ;;  %v6345_v48 = vmul.f32 0.5, %v30220_v58  ;;  %v33511_v58 = vld [vmem:[#allocation36_spill] sm:$0xff] }
 0x3df   : > { %v27264_v60 = vpop.eup %27263  ;;  %v6511_v32 = vadd.f32 1.0, %v27262_v21  ;;  %v30234_v45 = vadd.f32 %v24896_v29, %v29958_v53  ;;  %v24898_v30 = vadd.f32 %v6131_v24, %v33503_v12  ;;  %23604 = vmatmul.mubr.bf16.gmra.mrb[84].mxu1 %v6603_v34  ;;  %v6566_v26 = vmul.f32 %v6510_v46, %v6342_v16  ;;  %v33510_v29 = vld [vmem:[#allocation35_spill] sm:$0xff] }
 0x3e0   : > { %v6509_v20 = vadd.f32 1.0, %v27264_v60  ;;  %v6406_v38 = vmul.f32 0.70710677, %v30230_v55  ;;  %v30240_v15 = vadd.f32 %v24897_v3, %v29958_v53  ;;  %24344 = vmatmul.mubr.msk.bf16.gmra.mrb[92].mxu0 %vm547_vm0, %v33504_v43  ;;  %v6564_v37 = vmul.f32 %v6508_v6, %v6340_v11 }
 0x3e1   : > { %v6404_v10 = vmul.f32 0.70710677, %v30234_v45  ;;  %v30248_v36 = vadd.f32 %v24898_v30, %v29958_v53  ;;  %24347 = vmatprep.mubr.msk.bf16.mxu0 %vm547_vm0, %v33505_v23  ;;  %v6567_v13 = vmul.f32 %v6511_v32, %v6343_v8  ;;  %v6346_v2 = vmul.f32 0.5, %v30202_v42  ;;  %v33512_v32 = vld [vmem:[#allocation18_spill] sm:$0xff] }
 0x3e2   : > { %27273 = verf.f32 %v6406_v38  ;;  %v6407_v31 = vmul.f32 0.70710677, %v30240_v15  ;;  %v6565_v14 = vmul.f32 %v6509_v20, %v6341_v1  ;;  %v6347_v34 = vmul.f32 0.5, %v30212_v27  ;;  %v33513_v38 = vld [vmem:[#allocation21_spill] sm:$0xff] }
 0x3e3   : > { %27275 = verf.f32 %v6404_v10  ;;  %v6405_v50 = vmul.f32 0.70710677, %v30248_v36  ;;  %v23549_v4 = vpop.f32.mrb[44].mxu0  ;;  %v6605_v62 = vpack.c.bf16 %v6567_v13, %v6566_v26  ;;  %v6348_v23 = vmul.f32 0.5, %v30234_v45  ;;  %v30294_v45 = vld [vmem:[%s27795_s13 + $0x4] sm:$0xfc]  }
 0x3e4   : > { %v27266_v57 = vpop.eup %27265  ;;  %27277 = verf.f32 %v6407_v31  ;;  %v24899_v51 = vadd.f32 %v23549_v4, %v33506_v59  ;;  %v6144_v56 = vpop.f32.mrb[45].mxu0  ;;  %v6604_v35 = vpack.c.bf16 %v6565_v14, %v6564_v37  ;;  %v33514_v14 = vld [vmem:[#allocation20_spill] sm:$0xff] }
 0x3e5   : > { %v27268_v0 = vpop.eup %27267  ;;  %27279 = verf.f32 %v6405_v50  ;;  %v24900_v47 = vadd.f32 %v6144_v56, %v33507_v28  ;;  %v23550_v25 = vpop.f32.mrb[46].mxu0  ;;  %v6514_v5 = vadd.f32 1.0, %v27266_v57 }
 0x3e6   : > { %v27270_v52 = vpop.eup %27269  ;;  %v6512_v19 = vadd.f32 1.0, %v27268_v0  ;;  %v30258_v41 = vadd.f32 %v24899_v51, %v29958_v53  ;;  %v24901_v7 = vadd.f32 %v23550_v25, %v33508_v39  ;;  %v6147_v33 = vpop.f32.mrb[47].mxu0  ;;  %23607 = vmatprep.mubr.bf16.mxu1 %v6604_v35  ;;  %v33515_v51 = vld [vmem:[#allocation23_spill] sm:$0xff]  ;;  %v6349_v35 = vmul.f32 0.5, %v30248_v36  ;;  %v27711_v25 = vld [vmem:[%s27795_s13 + $0xb8] sm:$0xff]  }
 0x3e7   : > { %v27272_v49 = vpop.eup %27271  ;;  %v6515_v18 = vadd.f32 1.0, %v27270_v52  ;;  %v30262_v61 = vadd.f32 %v24900_v47, %v29958_v53  ;;  %v24902_v40 = vadd.f32 %v6147_v33, %v33509_v9  ;;  %23608 = vmatmul.mubr.bf16.gmra.mrb[88].mxu1 %v6605_v62  ;;  %v6570_v60 = vmul.f32 %v6514_v5, %v6346_v2  ;;  %v30306_v62 = vld [vmem:[%s33239_s2 + $0x150] sm:$0xff]   ;;  %v27712_v39 = vld [vmem:[%s27795_s13 + $0xc0] sm:$0xff]  }
 0x3e8   : > { %v6513_v22 = vadd.f32 1.0, %v27272_v49  ;;  %v6410_v63 = vmul.f32 0.70710677, %v30258_v41  ;;  %v30268_v17 = vadd.f32 %v24901_v7, %v29958_v53  ;;  %24348 = vmatmul.mubr.msk.bf16.gmra.mrb[96].mxu0 %vm547_vm0, %v33510_v29  ;;  %v6568_v54 = vmul.f32 %v6512_v19, %v6344_v44  ;;  %v30317_v7 = vld [vmem:[%s27795_s13 + $0xc] sm:$0xff]   ;;  %24423 = vmatprep.subr.bf16.mxu0 %v30306_v62 }
 0x3e9   : > { %v6408_v21 = vmul.f32 0.70710677, %v30262_v61  ;;  %v30276_v11 = vadd.f32 %v24902_v40, %v29958_v53  ;;  %24351 = vmatprep.mubr.msk.bf16.mxu0 %vm547_vm0, %v33511_v58  ;;  %v6571_v27 = vmul.f32 %v6515_v18, %v6347_v34  ;;  %v6350_v52 = vmul.f32 0.5, %v30230_v55  ;;  %v33516_v40 = vld [vmem:[#allocation22_spill] sm:$0xff]  ;;  %v33517_v34 = vld [vmem:[#allocation25_spill] sm:$0xff] }
 0x3ea   : > { %27281 = verf.f32 %v6410_v63  ;;  %v6411_v6 = vmul.f32 0.70710677, %v30268_v17  ;;  %v6569_v3 = vmul.f32 %v6513_v22, %v6345_v48  ;;  %v6351_v44 = vmul.f32 0.5, %v30240_v15 }
 0x3eb   : > { %27283 = verf.f32 %v6408_v21  ;;  %v6409_v24 = vmul.f32 0.70710677, %v30276_v11  ;;  %v23553_v42 = vpop.f32.mrb[48].mxu0  ;;  %v6607_v8 = vpack.c.bf16 %v6571_v27, %v6570_v60  ;;  %v14499_v29 = vrot.slane %v30294_v45, 2  ;;  %v27713_v60 = vld [vmem:[%s33240_s3 + $0x1] ss:$0 sm:$0xff] }
 0x3ec   : > { %v27274_v46 = vpop.eup %27273  ;;  %27285 = verf.f32 %v6411_v6  ;;  %v24903_v12 = vadd.f32 %v23553_v42, %v33512_v32  ;;  %v6160_v30 = vpop.f32.mrb[49].mxu0  ;;  %v6606_v1 = vpack.c.bf16 %v6569_v3, %v6568_v54  ;;  %v14500_v54 = vrot.slane %v30317_v7, 2  ;;  %v26713_v7 = vld [vmem:[%s33239_s2 + $0x158] sm:$0xff]  }
 0x3ed   : > { %v27276_v20 = vpop.eup %27275  ;;  %27287 = verf.f32 %v6409_v24  ;;  %v24904_v43 = vadd.f32 %v6160_v30, %v33513_v38  ;;  %v23554_v16 = vpop.f32.mrb[50].mxu0  ;;  %v6518_v13 = vadd.f32 1.0, %v27274_v46  ;;  %v6352_v24 = vmul.f32 0.5, %v30262_v61  ;;  %v33518_v46 = vld [vmem:[#allocation24_spill] sm:$0xff] }
 0x3ee   : > { %v27278_v10 = vpop.eup %27277  ;;  %v6516_v31 = vadd.f32 1.0, %v27276_v20  ;;  %v30286_v37 = vadd.f32 %v24903_v12, %v29958_v53  ;;  %v24905_v50 = vadd.f32 %v23554_v16, %v33514_v14  ;;  %v6163_v4 = vpop.f32.mrb[51].mxu0  ;;  %23611 = vmatprep.mubr.bf16.mxu1 %v6606_v1  ;;  %v6353_v16 = vmul.f32 0.5, %v30276_v11 }
 0x3ef   : > { %v27280_v26 = vpop.eup %27279  ;;  %v6519_v57 = vadd.f32 1.0, %v27278_v10  ;;  %v30290_v59 = vadd.f32 %v24904_v43, %v29958_v53  ;;  %v24906_v56 = vadd.f32 %v6163_v4, %v33515_v51  ;;  %23612 = vmatmul.mubr.bf16.gmra.mrb[92].mxu1 %v6607_v8  ;;  %v6574_v18 = vmul.f32 %v6518_v13, %v6350_v52  ;;  %v33519_v43 = vld [vmem:[#allocation27_spill] sm:$0xff]  ;;  %v27715_v13 = vld [vmem:[%s27795_s13 + $0xd0] sm:$0xff]  }
 0x3f0   : > { %v6517_v0 = vadd.f32 1.0, %v27280_v26  ;;  %v6414_v28 = vmul.f32 0.70710677, %v30286_v37  ;;  %v30299_v47 = vadd.f32 %v24905_v50, %v29958_v53  ;;  %24352 = vmatmul.mubr.msk.bf16.gmra.mrb[100].mxu0 %vm547_vm0, %v27711_v25  ;;  %v6572_v49 = vmul.f32 %v6516_v31, %v6348_v23  ;;  %v27714_v31 = vld [vmem:[%s27795_s13 + $0xc8] sm:$0xff]   ;;  %v26658_v52 = vld [vmem:[%s27795_s13 + $0x14] sm:$0xff]  }
 0x3f1   : > { %v6412_v36 = vmul.f32 0.70710677, %v30290_v59  ;;  %v30312_v19 = vadd.f32 %v24906_v56, %v29958_v53  ;;  %24355 = vmatprep.mubr.msk.bf16.mxu0 %vm547_vm0, %v27712_v39  ;;  %v6575_v53 = vmul.f32 %v6519_v57, %v6351_v44  ;;  %v6354_v14 = vmul.f32 0.5, %v30258_v41 }
 0x3f2   : > { %27289 = verf.f32 %v6414_v28  ;;  %v6415_v33 = vmul.f32 0.70710677, %v30299_v47  ;;  %v6573_v5 = vmul.f32 %v6517_v0, %v6349_v35  ;;  %v6355_v50 = vmul.f32 0.5, %v30268_v17 }
 0x3f3   : > { %27291 = verf.f32 %v6412_v36  ;;  %v6413_v55 = vmul.f32 0.70710677, %v30312_v19  ;;  %v23557_v15 = vpop.f32.mrb[52].mxu0  ;;  %v6609_v6 = vpack.c.bf16 %v6575_v53, %v6574_v18  ;;  %v14501_v39 = vsel %vm2201_vm2, %v14499_v29, %v14500_v54 }
 0x3f4   : > { %v27282_v9 = vpop.eup %27281  ;;  %27293 = verf.f32 %v6415_v33  ;;  %v24907_v48 = vadd.f32 %v23557_v15, %v33516_v40  ;;  %v6176_v22 = vpop.f32.mrb[53].mxu0  ;;  %v6608_v63 = vpack.c.bf16 %v6573_v5, %v6572_v49  ;;  %v26659_v33 = vld [vmem:[%s27795_s13 + $0x1c] sm:$0xff]   ;;  %v6358_v5 = vmul.f32 0.5, %v30286_v37 }
 0x3f5   : > { %v27284_v2 = vpop.eup %27283  ;;  %27295 = verf.f32 %v6413_v55  ;;  %v24908_v21 = vadd.f32 %v6176_v22, %v33517_v34  ;;  %v23558_v58 = vpop.f32.mrb[54].mxu0  ;;  %v6522_v1 = vadd.f32 1.0, %v27282_v9  ;;  %v6359_v55 = vmul.f32 0.5, %v30299_v47  ;;  %v27716_v40 = vld [vmem:[%s27795_s13 + $0xd8] sm:$0xff]  }
 0x3f6   : > { %v27286_v3 = vpop.eup %27285  ;;  %v6520_v42 = vadd.f32 1.0, %v27284_v2  ;;  %v30330_v27 = vadd.f32 %v27713_v60, %v24907_v48  ;;  %v24909_v32 = vadd.f32 %v23558_v58, %v33518_v46  ;;  %v6179_v12 = vpop.f32.mrb[55].mxu0  ;;  %23615 = vmatprep.mubr.bf16.mxu1 %v6608_v63  ;;  %v6356_v18 = vmul.f32 0.5, %v30290_v59 }
 0x3f7   : > { %v27288_v30 = vpop.eup %27287  ;;  %v6523_v20 = vadd.f32 1.0, %v27286_v3  ;;  %v30333_v38 = vadd.f32 %v27713_v60, %v24908_v21  ;;  %v24910_v61 = vadd.f32 %v6179_v12, %v33519_v43  ;;  %23616 = vmatmul.mubr.bf16.gmra.mrb[96].mxu1 %v6609_v6  ;;  %v6578_v56 = vmul.f32 %v6522_v1, %v6354_v14  ;;  %v7168_v21 = vld [vmem:[%s27795_s13 + $0x1c] sm:$0x8] }
 0x3f8   : > { %v6521_v8 = vadd.f32 1.0, %v27288_v30  ;;  %v6418_v10 = vmul.f32 0.70710677, %v30330_v27  ;;  %v30338_v23 = vadd.f32 %v27713_v60, %v24909_v32  ;;  %24356 = vmatmul.mubr.msk.bf16.gmra.mrb[104].mxu0 %vm547_vm0, %v27714_v31  ;;  %v6576_v57 = vmul.f32 %v6520_v42, %v6352_v24  ;;  %v26660_v24 = vld [vmem:[%s27795_s13 + $0x24] sm:$0xff]   ;;  %v26665_v32 = vld [vmem:[%s27795_s13 + $0x2c] sm:$0xff]  }
 0x3f9   : > { %v6416_v4 = vmul.f32 0.70710677, %v30333_v38  ;;  %v30345_v26 = vadd.f32 %v27713_v60, %v24910_v61  ;;  %24359 = vmatprep.mubr.msk.bf16.mxu0 %vm547_vm0, %v27715_v13  ;;  %v6579_v17 = vmul.f32 %v6523_v20, %v6355_v50  ;;  %v6357_v53 = vmul.f32 0.5, %v30312_v19  ;;  %v30364_v19 = vld [vmem:[%s27795_s13 + $0x20] sm:$0xf]  ;;  %v30377_v61 = vld [vmem:[%s27795_s13 + $0x24] sm:$0xff]  }
 0x3fa   : > { %27297 = verf.f32 %v6418_v10  ;;  %v6419_v11 = vmul.f32 0.70710677, %v30338_v23  ;;  %v6577_v51 = vmul.f32 %v6521_v8, %v6353_v16  ;;  %v14502_v37 = vrot.slane %v26658_v52, 2  ;;  %v26670_v52 = vld [vmem:[%s27795_s13 + $0x44] sm:$0xff]  }
 0x3fb   : > { %27299 = verf.f32 %v6416_v4  ;;  %v6417_v41 = vmul.f32 0.70710677, %v30345_v26  ;;  %v6611_v25 = vpack.c.bf16 %v6579_v17, %v6578_v56  ;;  %v14504_v29 = vrot.slane %v26659_v33, 2  ;;  %v26669_v56 = vld [vmem:[%s27795_s13 + $0x3c] sm:$0xff]   ;;  %v30397_v17 = vld [vmem:[%s27795_s13 + $0x34] sm:$0xff]   ;;  %v26673_v33 = vld [vmem:[%s27795_s13 + $0x4c] sm:$0xff]  }
 0x3fc   : > { %v27290_v45 = vpop.eup %27289  ;;  %27301 = verf.f32 %v6419_v11  ;;  %v6610_v35 = vpack.c.bf16 %v6577_v51, %v6576_v57  ;;  %v14503_v3 = vsel %vm2201_vm2, %v14500_v54, %v14502_v37  ;;  %v6362_v30 = vmul.f32 0.5, %v30330_v27  ;;  %v26666_v57 = vld [vmem:[%s27795_s13 + $0x34] sm:$0xff]   ;;  %v30391_v51 = vld [vmem:[%s27795_s13 + $0x2c] sm:$0xff]  }
 0x3fd   : > { %v27292_v0 = vpop.eup %27291  ;;  %v6526_v28 = vadd.f32 1.0, %v27290_v45  ;;  %27303 = verf.f32 %v6417_v41  ;;  %v14505_v46 = vsel %vm2201_vm2, %v14502_v37, %v14504_v29  ;;  %v6363_v1 = vmul.f32 0.5, %v30338_v23  ;;  %v26674_v37 = vld [vmem:[%s27795_s13 + $0x54] sm:$0xff]  }
 0x3fe   : > { %v27294_v44 = vpop.eup %27293  ;;  %v6524_v36 = vadd.f32 1.0, %v27292_v0  ;;  %23619 = vmatprep.mubr.bf16.mxu1 %v6610_v35  ;;  %v20835_v43 = vcombine.low %v7168_v21, %v30364_v19  ;;  %v6360_v54 = vmul.f32 0.5, %v30333_v38  ;;  %v6361_v16 = vmul.f32 0.5, %v30345_v26  ;;  %v30446_v21 = vld [vmem:[%s27795_s13 + $0x5c] sm:$0xff]  }
 0x3ff   : > { %v27296_v49 = vpop.eup %27295  ;;  %v6527_v15 = vadd.f32 1.0, %v27294_v44  ;;  %23620 = vmatmul.mubr.bf16.gmra.mrb[100].mxu1 %v6611_v25  ;;  %v6582_v48 = vmul.f32 %v6526_v28, %v6358_v5  ;;  %v14506_v23 = vrot.slane %v26660_v24, 2  ;;  %v14508_v50 = vrot.slane %v26665_v32, 2  ;;  %v30414_v5 = vld [vmem:[%s27795_s13 + $0x44] sm:$0xff]  }
 0x400   : > { %v6525_v9 = vadd.f32 1.0, %v27296_v49  ;;  %24360 = vmatmul.mubr.msk.bf16.gmra.mrb[108].mxu0 %vm547_vm0, %v27716_v40  ;;  %v6580_v63 = vmul.f32 %v6524_v36, %v6356_v18  ;;  %v7318_v4 = vrot.slane %v20835_v43, 3  ;;  %v7319_v26 = vrot.slane %v30377_v61, 3  ;;  %v30408_v36 = vld [vmem:[%s27795_s13 + $0x3c] sm:$0xff]   ;;  %v27717_v18 = vld [vmem:[%s33239_s2 + $0x90] sm:$0xff]   ;;  %v26678_v43 = vld [vmem:[%s27795_s13 + $0x64] sm:$0xff]  }
 0x401   : > { %v6583_v22 = vmul.f32 %v6527_v15, %v6359_v55  ;;  %24367 = vmatprep.mubr.msk.bf16.mxu0 %vm547_vm0, %v14501_v39  ;;  %v14507_v11 = vsel %vm2201_vm2, %v14504_v29, %v14506_v23  ;;  %v14509_v41 = vsel %vm2201_vm2, %v14506_v23, %v14508_v50  ;;  %v14510_v45 = vrot.slane %v26666_v57, 2  ;;  %v26693_v55 = vld [vmem:[%s33239_s2 + $0x98] sm:$0xff]  }
 0x402   : > { %v6581_v47 = vmul.f32 %v6525_v9, %v6357_v53  ;;  %v7321_v35 = vrot.slane %v30391_v51, 3  ;;  %v14512_v0 = vrot.slane %v26669_v56, 2  ;;  %v7323_v28 = vrot.slane %v30397_v17, 3  ;;  %v26682_v57 = vld [vmem:[%s27795_s13 + $0x74] sm:$0xff]  }
 0x403   : > { %v6613_v59 = vpack.c.bf16 %v6583_v22, %v6582_v48  ;;  %v14511_v25 = vsel %vm2201_vm2, %v14508_v50, %v14510_v45  ;;  %v14514_v15 = vrot.slane %v26670_v52, 2  ;;  %v7325_v53 = vrot.slane %v30408_v36, 3  ;;  %v30431_v48 = vld [vmem:[%s33239_s2 + $0xb0] sm:$0xff]  }
 0x404   : > { %v27298_v2 = vpop.eup %27297  ;;  %v6612_v34 = vpack.c.bf16 %v6581_v47, %v6580_v63  ;;  %v7322_v44 = vsel %vm477_vm1, %v7319_v26, %v7321_v35  ;;  %v14513_v39 = vsel %vm2201_vm2, %v14510_v45, %v14512_v0  ;;  %v7324_v49 = vsel %vm477_vm1, %v7321_v35, %v7323_v28  ;;  %v30437_v47 = vld [vmem:[%s27795_s13 + $0x4c] sm:$0xff]   ;;  %v26687_v35 = vld [vmem:[%s27795_s13 + $0x84] sm:$0xff]  }
 0x405   : > { %v27300_v58 = vpop.eup %27299  ;;  %v6530_v6 = vadd.f32 1.0, %v27298_v2  ;;  %v14516_v9 = vrot.slane %v26673_v33, 2  ;;  %v7327_v40 = vrot.slane %v30414_v5, 3  ;;  %v14515_v22 = vsel %vm2201_vm2, %v14512_v0, %v14514_v15  ;;  %v26688_v0 = vld [vmem:[%s27795_s13 + $0x8c] sm:$0xff]  }
 0x406   : > { %v27302_v42 = vpop.eup %27301  ;;  %v6528_v60 = vadd.f32 1.0, %v27300_v58  ;;  %23623 = vmatprep.mubr.bf16.mxu1 %v6612_v34  ;;  %v7326_v63 = vsel %vm477_vm1, %v7323_v28, %v7325_v53  ;;  %v30443_v34 = vld [vmem:[%s27795_s13 + $0x54] sm:$0xff]   ;;  %v26679_v58 = vld [vmem:[%s27795_s13 + $0x64] sm:$0xff]   ;;  %v7750_v24 = vrot.slane %v30446_v21, 1  ;;  %v14522_v23 = vrot.slane %v26678_v43, 2  ;;  %v26694_v43 = vld [vmem:[%s27795_s13 + $0x9c] sm:$0xff]  }
 0x407   : > { %v27304_v12 = vpop.eup %27303  ;;  %v6531_v20 = vadd.f32 1.0, %v27302_v42  ;;  %23624 = vmatmul.mubr.bf16.gmra.mrb[104].mxu1 %v6613_v59  ;;  %v6586_v27 = vmul.f32 %v6530_v6, %v6362_v30  ;;  %v14517_v29 = vsel %vm2201_vm2, %v14514_v15, %v14516_v9  ;;  %v26677_v59 = vld [vmem:[%s27795_s13 + $0x5c] sm:$0xff]   ;;  %v7328_v2 = vsel %vm477_vm1, %v7325_v53, %v7327_v40  ;;  %v26680_v6 = vld [vmem:[%s27795_s13 + $0x6c] sm:$0xff]  }
 0x408   : > { %v6529_v8 = vadd.f32 1.0, %v27304_v12  ;;  %24368 = vmatmul.mubr.msk.bf16.vlgmr.msra.gmra.mrb[56].mxu0 %vm547_vm0, %v14503_v3  ;;  %v6584_v31 = vmul.f32 %v6528_v60, %v6360_v54  ;;  %v14518_v3 = vrot.slane %v26674_v37, 2  ;;  %v7752_v42 = vrot.slane %v26679_v58, 1  ;;  %v26691_v37 = vld [vmem:[%s27795_s13 + $0x94] sm:$0xff]  }
 0x409   : > { %v6587_v10 = vmul.f32 %v6531_v20, %v6363_v1  ;;  %24371 = vmatprep.mubr.msk.bf16.mxu0 %vm547_vm0, %v14505_v46  ;;  %24424 = vmatpush3.bf16.msra.mxu0 %v30306_v62  ;;  %v7320_v62 = vsel %vm477_vm1, %v7318_v4, %v7319_v26  ;;  %v7329_v60 = vrot.slane %v30437_v47, 3  ;;  %v14520_v46 = vrot.slane %v26677_v59, 2 }
 0x40a   : > { %v6585_v14 = vmul.f32 %v6529_v8, %v6361_v16  ;;  %24425 = vmatprep.subr.bf16.mxu0 %v26713_v7  ;;  %v7754_v32 = vrot.slane %v26680_v6, 1  ;;  %v7331_v12 = vrot.slane %v30443_v34, 3  ;;  %v30461_v30 = vsel %vm7734_vm3, %v7750_v24, %v7752_v42  ;;  %v26681_v16 = vld [vmem:[%s27795_s13 + $0x6c] sm:$0xff]  }
 0x40b   : > { %v6615_v38 = vpack.c.bf16 %v6587_v10, %v6586_v27  ;;  %v14519_v20 = vsel %vm2201_vm2, %v14516_v9, %v14518_v3  ;;  %v14521_v54 = vsel %vm2201_vm2, %v14518_v3, %v14520_v46  ;;  %v26683_v27 = vld [vmem:[%s27795_s13 + $0x74] sm:$0xff]   ;;  %v26684_v10 = vld [vmem:[%s27795_s13 + $0x7c] sm:$0xff]   ;;  %v14524_v50 = vrot.slane %v26681_v16, 2  ;;  %v26697_v16 = vld [vmem:[%s27795_s13 + $0xac] sm:$0xff]  }
 0x40c   : > { %v6614_v13 = vpack.c.bf16 %v6585_v14, %v6584_v31  ;;  %v30464_v1 = vsel %vm7734_vm3, %v7752_v42, %v7754_v32  ;;  %v7332_v8 = vsel %vm477_vm1, %v7329_v60, %v7331_v12  ;;  %v7756_v31 = vrot.slane %v26683_v27, 1 }
 0x40d   : > { %24426 = vmatpush3.bf16.msra.mxu0 %v26713_v7  ;;  %v7330_v7 = vsel %vm477_vm1, %v7327_v40, %v7329_v60  ;;  %v7333_v14 = vrot.slane %v30446_v21, 3  ;;  %v7335_v4 = vrot.slane %v26679_v58, 3  ;;  %v14525_v56 = vsel %vm2201_vm2, %v14522_v23, %v14524_v50  ;;  %v26689_v40 = vld [vmem:[%s27795_s13 + $0x8c] sm:$0xff]  }
 0x40e   : > { %23627 = vmatprep.mubr.bf16.mxu1 %v6614_v13  ;;  %v30480_v26 = vsel %vm7734_vm3, %v7754_v32, %v7756_v31  ;;  %v14526_v28 = vrot.slane %v26682_v57, 2  ;;  %v7337_v52 = vrot.slane %v26680_v6, 3  ;;  %v7339_v33 = vrot.slane %v26683_v27, 3  ;;  %v26690_v32 = vld [vmem:[%s27795_s13 + $0x94] sm:$0xff]   ;;  %v26735_v21 = vld [vmem:[%s27795_s13 + $0xcc] sm:$0xff]  }
 0x40f   : > { %23628 = vmatmul.mubr.bf16.gmra.mrb[108].mxu1 %v6615_v38  ;;  %v7758_v38 = vrot.slane %v26684_v10, 1  ;;  %v7336_v45 = vsel %vm477_vm1, %v7333_v14, %v7335_v4  ;;  %v7764_v59 = vrot.slane %v26691_v37, 1  ;;  %v14532_v58 = vrot.slane %v26689_v40, 2 }
 0x410   : > { %24372 = vmatmul.mubr.msk.bf16.gmra.mrb[60].mxu0 %vm547_vm0, %v14507_v11  ;;  %23635 = vmatprep.mubr.msk.bf16.mxu1 %vm547_vm0, %v7320_v62  ;;  %v14523_v11 = vsel %vm2201_vm2, %v14520_v46, %v14522_v23  ;;  %v26685_v62 = vld [vmem:[%s27795_s13 + $0x7c] sm:$0xff]   ;;  %v14527_v15 = vsel %vm2201_vm2, %v14524_v50, %v14526_v28  ;;  %v7338_v53 = vsel %vm477_vm1, %v7335_v4, %v7337_v52  ;;  %v7343_v3 = vrot.slane %v26687_v35, 3 }
 0x411   : > { %24375 = vmatprep.mubr.msk.bf16.mxu0 %vm547_vm0, %v14509_v41  ;;  %v30483_v13 = vsel %vm7734_vm3, %v7756_v31, %v7758_v38  ;;  %v7334_v41 = vsel %vm477_vm1, %v7331_v12, %v7333_v14  ;;  %v14536_v23 = vrot.slane %v26694_v43, 2  ;;  %v7770_v31 = vrot.slane %v26697_v16, 1 }
 0x412   : > { %v7347_v14 = vrot.slane %v26691_v37, 3 }
 0x417   : > { %23636 = vmatmul.mubr.msk.bf16.vlgmr.msra.gmra.mrb[168].mxu1 %vm547_vm0, %v7322_v44  ;;  %v14528_v44 = vrot.slane %v26685_v62, 2 }
 0x418   : > { %24376 = vmatmul.mubr.msk.bf16.gmra.mrb[64].mxu0 %vm547_vm0, %v14511_v25  ;;  %23692 = vmatpush3.bf16.msra.mxu1 %v27717_v18  ;;  %v7760_v25 = vrot.slane %v26687_v35, 1  ;;  %v26686_v18 = vld [vmem:[%s27795_s13 + $0x84] sm:$0xff]   ;;  %v30548_v35 = vld [vmem:[%s27795_s13 + $0xbc] sm:$0xff]  }
 0x419   : > { %24379 = vmatprep.mubr.msk.bf16.mxu0 %vm547_vm0, %v14513_v39  ;;  %23639 = vmatprep.mubr.msk.bf16.mxu1 %vm547_vm0, %v7324_v49  ;;  %v7762_v39 = vrot.slane %v26688_v0, 1  ;;  %v14529_v9 = vsel %vm2201_vm2, %v14526_v28, %v14528_v44 }
 0x41a   : > { %23693 = vmatprep.subr.bf16.mxu1 %v26693_v55  ;;  %v30498_v49 = vsel %vm7734_vm3, %v7758_v38, %v7760_v25 }
 0x41b   : > { %v30516_v42 = vsel %vm7734_vm3, %v7762_v39, %v7764_v59 }
 0x41c   : > { %23694 = vmatpush3.bf16.msra.mxu1 %v26693_v55  ;;  %v30501_v55 = vsel %vm7734_vm3, %v7760_v25, %v7762_v39 }
 0x41d   : > { %23751 = vmatprep.subr.bf16.mxu1 %v30431_v48 }
 0x41f   : > { %23640 = vmatmul.mubr.msk.bf16.gmra.mrb[172].mxu1 %vm547_vm0, %v7326_v63  ;;  %v26692_v63 = vld [vmem:[%s27795_s13 + $0x9c] sm:$0xff]  }
 0x420   : > { %24380 = vmatmul.mubr.msk.bf16.gmra.mrb[68].mxu0 %vm547_vm0, %v14515_v22  ;;  %23643 = vmatprep.mubr.msk.bf16.mxu1 %vm547_vm0, %v7328_v2  ;;  %v7340_v22 = vsel %vm477_vm1, %v7337_v52, %v7339_v33  ;;  %v7341_v2 = vrot.slane %v26684_v10, 3  ;;  %v7766_v6 = vrot.slane %v26692_v63, 1  ;;  %v7345_v10 = vrot.slane %v26688_v0, 3 }
 0x421   : > { %24383 = vmatprep.mubr.msk.bf16.mxu0 %vm547_vm0, %v14517_v29  ;;  %v14530_v29 = vrot.slane %v26686_v18, 2  ;;  %v7349_v25 = vrot.slane %v26692_v63, 3 }
 0x422   : > { %v30519_v60 = vsel %vm7734_vm3, %v7764_v59, %v7766_v6  ;;  %v7342_v12 = vsel %vm477_vm1, %v7339_v33, %v7341_v2  ;;  %v7346_v57 = vsel %vm477_vm1, %v7343_v3, %v7345_v10  ;;  %v7348_v62 = vsel %vm477_vm1, %v7345_v10, %v7347_v14 }
 0x423   : > { %v14531_v46 = vsel %vm2201_vm2, %v14528_v44, %v14530_v29  ;;  %v7774_v44 = vrot.slane %v30548_v35, 1 }
 0x427   : > { %23644 = vmatmul.mubr.msk.bf16.gmra.mrb[176].mxu1 %vm547_vm0, %v7330_v7  ;;  %v7344_v7 = vsel %vm477_vm1, %v7341_v2, %v7343_v3 }
 0x428   : > { %24384 = vmatmul.mubr.msk.bf16.gmra.mrb[72].mxu0 %vm547_vm0, %v14519_v20  ;;  %23647 = vmatprep.mubr.msk.bf16.mxu1 %vm547_vm0, %v7332_v8  ;;  %v14533_v20 = vsel %vm2201_vm2, %v14530_v29, %v14532_v58  ;;  %v14534_v8 = vrot.slane %v26690_v32, 2  ;;  %v7353_v29 = vrot.slane %v26697_v16, 3  ;;  %v26706_v32 = vld [vmem:[%s27795_s13 + $0xcc] sm:$0xff]  }
 0x429   : > { %24387 = vmatprep.mubr.msk.bf16.mxu0 %vm547_vm0, %v14521_v54  ;;  %v26696_v54 = vld [vmem:[%s27795_s13 + $0xa4] sm:$0xff]  }
 0x42a   : > { %v7768_v27 = vrot.slane %v26696_v54, 1  ;;  %v14535_v4 = vsel %vm2201_vm2, %v14532_v58, %v14534_v8  ;;  %v7351_v39 = vrot.slane %v26696_v54, 3  ;;  %v14548_v54 = vrot.slane %v26706_v32, 2  ;;  %v7106_v32 = vld [vmem:[%s27795_s13 + $0x1c] sm:$0xe] }
 0x42c   : > { %v30534_v50 = vsel %vm7734_vm3, %v7766_v6, %v7768_v27  ;;  %v30537_v38 = vsel %vm7734_vm3, %v7768_v27, %v7770_v31  ;;  %v7352_v37 = vsel %vm477_vm1, %v7349_v25, %v7351_v39  ;;  %v26703_v6 = vld [vmem:[%s27795_s13 + $0xc4] sm:$0xff]   ;;  %v7354_v3 = vsel %vm477_vm1, %v7351_v39, %v7353_v29  ;;  %v26707_v27 = vld [vmem:[%s27795_s13 + $0xd4] sm:$0xff]  }
 0x42d   : > { %v14546_v43 = vrot.slane %v26703_v6, 2 }
 0x42f   : > { %23648 = vmatmul.mubr.msk.bf16.gmra.mrb[180].mxu1 %vm547_vm0, %v7334_v41  ;;  %v14537_v41 = vsel %vm2201_vm2, %v14534_v8, %v14536_v23 }
 0x430   : > { %24388 = vmatmul.mubr.msk.bf16.gmra.mrb[76].mxu0 %vm547_vm0, %v14523_v11  ;;  %23651 = vmatprep.mubr.msk.bf16.mxu1 %vm547_vm0, %v7336_v45  ;;  %v26695_v11 = vld [vmem:[%s27795_s13 + $0xa4] sm:$0xff]   ;;  %v26700_v45 = vld [vmem:[%s27795_s13 + $0xb4] sm:$0xff]  }
 0x431   : > { %24391 = vmatprep.mubr.msk.bf16.mxu0 %vm547_vm0, %v14525_v56  ;;  %v26698_v56 = vld [vmem:[%s27795_s13 + $0xac] sm:$0xff]   ;;  %v14538_v0 = vrot.slane %v26695_v11, 2  ;;  %v7772_v28 = vrot.slane %v26700_v45, 1  ;;  %v7355_v2 = vrot.slane %v26700_v45, 3  ;;  %v30597_v11 = vld [vmem:[%s27795_s13 + $0xd4] sm:$0xff]  }
 0x432   : > { %v14540_v52 = vrot.slane %v26698_v56, 2  ;;  %v7363_v45 = vrot.slane %v30597_v11, 3 }
 0x433   : > { %v30555_v33 = vsel %vm7734_vm3, %v7770_v31, %v7772_v28  ;;  %v14539_v18 = vsel %vm2201_vm2, %v14536_v23, %v14538_v0  ;;  %v30591_v23 = vld [vmem:[%s27795_s13 + $0xcc] sm:$0xff]   ;;  %v14549_v31 = vsel %vm2201_vm2, %v14546_v43, %v14548_v54 }
 0x434   : > { %v14541_v40 = vsel %vm2201_vm2, %v14538_v0, %v14540_v52  ;;  %v7361_v56 = vrot.slane %v30591_v23, 3 }
 0x437   : > { %23652 = vmatmul.mubr.msk.bf16.gmra.mrb[184].mxu1 %vm547_vm0, %v7338_v53  ;;  %v26699_v53 = vld [vmem:[%s27795_s13 + $0xb4] sm:$0xff]  }
 0x438   : > { %24392 = vmatmul.mubr.msk.bf16.gmra.mrb[80].mxu0 %vm547_vm0, %v14527_v15  ;;  %23655 = vmatprep.mubr.msk.bf16.mxu1 %vm547_vm0, %v7340_v22  ;;  %v30560_v15 = vsel %vm7734_vm3, %v7772_v28, %v7774_v44  ;;  %v26702_v22 = vld [vmem:[%s27795_s13 + $0xbc] sm:$0xff]   ;;  %v14542_v63 = vrot.slane %v26699_v53, 2  ;;  %v26711_v28 = vld [vmem:[%s27795_s13 + $0xe4] ss:$0 sps:$4 sm:$0x33]  }
 0x439   : > { %24395 = vmatprep.mubr.msk.bf16.mxu0 %vm547_vm0, %v14529_v9  ;;  %v7350_v9 = vsel %vm477_vm1, %v7347_v14, %v7349_v25  ;;  %v14544_v59 = vrot.slane %v26702_v22, 2  ;;  %v26710_v14 = vld [vmem:[%s27795_s13 + $0xdc] sm:$0xff]   ;;  %v30617_v53 = vld [vmem:[%s27795_s13 + $0xe4] sm:$0xff]  }
 0x43a   : > { %v14543_v58 = vsel %vm2201_vm2, %v14540_v52, %v14542_v63  ;;  %v30612_v52 = vld [vmem:[%s27795_s13 + $0xdc] sm:$0xff]   ;;  %v7367_v22 = vrot.slane %v30617_v53, 3 }
 0x43b   : > { %v14547_v8 = vsel %vm2201_vm2, %v14544_v59, %v14546_v43 }
 0x43f   : > { %23656 = vmatmul.mubr.msk.bf16.gmra.mrb[188].mxu1 %vm547_vm0, %v7342_v12  ;;  %v7356_v12 = vsel %vm477_vm1, %v7353_v29, %v7355_v2 }
 0x440   : > { %24396 = vmatmul.mubr.msk.bf16.gmra.mrb[84].mxu0 %vm547_vm0, %v14531_v46  ;;  %23659 = vmatprep.mubr.msk.bf16.mxu1 %vm547_vm0, %v7344_v7  ;;  %v14545_v46 = vsel %vm2201_vm2, %v14542_v63, %v14544_v59  ;;  %v7357_v7 = vrot.slane %v30548_v35, 3  ;;  %v26716_v63 = vld [vmem:[%s27795_s13 + $0x54] sm:$0xff]   ;;  %v30629_v59 = vld [vmem:[%s27795_s13 + $0xec] sm:$0xff]   ;;  %v7780_v35 = vrot.slane %v30597_v11, 1 }
 0x441   : > { %24399 = vmatprep.mubr.msk.bf16.mxu0 %vm547_vm0, %v14533_v20  ;;  %v30579_v20 = vld [vmem:[%s27795_s13 + $0xc4] sm:$0xff]   ;;  %v7369_v6 = vrot.slane %v30629_v59, 3 }
 0x442   : > { %v7359_v16 = vrot.slane %v30579_v20, 3  ;;  %v7358_v10 = vsel %vm477_vm1, %v7355_v2, %v7357_v7 }
 0x443   : > { %v7370_v43 = vsel %vm477_vm1, %v7367_v22, %v7369_v6 }
 0x444   : > { %v7362_v25 = vsel %vm477_vm1, %v7359_v16, %v7361_v56 }
 0x447   : > { %23660 = vmatmul.mubr.msk.bf16.gmra.mrb[192].mxu1 %vm547_vm0, %v7346_v57  ;;  %v26749_v57 = vld [vmem:[%s33239_s2 + $0x160] sm:$0xff]  }
 0x448   : > { %24400 = vmatmul.mubr.msk.bf16.gmra.mrb[88].mxu0 %vm547_vm0, %v14535_v4  ;;  %23663 = vmatprep.mubr.msk.bf16.mxu1 %vm547_vm0, %v7348_v62  ;;  %v7360_v4 = vsel %vm477_vm1, %v7357_v7, %v7359_v16  ;;  %v14552_v62 = vrot.slane %v26710_v14, 2  ;;  %v26719_v7 = vld [vmem:[%s27795_s13 + $0xfc] ss:$0 sps:$4 sm:$0x77]   ;;  %v20894_v16 = vcombine.low %v7106_v32, %v30364_v19  ;;  %v26721_v19 = vld [vmem:[%s27795_s13 + $0x6c] sm:$0xff]   ;;  %v26724_v14 = vld [vmem:[%s27795_s13 + $0x74] sm:$0xff]  }
 0x449   : > { %24403 = vmatprep.mubr.msk.bf16.mxu0 %vm547_vm0, %v14537_v41  ;;  %v14550_v41 = vrot.slane %v26707_v27, 2  ;;  %24483 = vmatprep.subr.bf16.mxu0 %v26749_v57  ;;  %v7373_v27 = vrot.slane %v26719_v7, 3  ;;  %v26751_v32 = vld [vmem:[%s27795_s13 + $0x54] sm:$0xf8]   ;;  %v7784_v7 = vrot.slane %v30617_v53, 1  ;;  %v7786_v53 = vrot.slane %v30629_v59, 1 }
 0x44a   : > { %v15780_v11 = vrot.slane %v26751_v32, 3  ;;  %v26809_v59 = vld [vmem:[%s33239_s2 + $0x178] sm:$0xff]  }
 0x44b   : > { %v14551_v0 = vsel %vm2201_vm2, %v14548_v54, %v14550_v41  ;;  %v14553_v39 = vsel %vm2201_vm2, %v14550_v41, %v14552_v62 }
 0x44f   : > { %23664 = vmatmul.mubr.msk.bf16.gmra.mrb[196].mxu1 %vm547_vm0, %v7350_v9  ;;  %v14554_v9 = vrot.slane %v26711_v28, 2  ;;  %v26738_v28 = vld [vmem:[%s33239_s2 + $0xb8] sm:$0xff]  }
 0x450   : > { %24404 = vmatmul.mubr.msk.bf16.gmra.mrb[92].mxu0 %vm547_vm0, %v14539_v18  ;;  %23667 = vmatprep.mubr.msk.bf16.mxu1 %vm547_vm0, %v7352_v37  ;;  %v7364_v18 = vsel %vm477_vm1, %v7361_v56, %v7363_v45  ;;  %v26725_v56 = vld [vmem:[%s27795_s13 + $0x7c] sm:$0xff]  }
 0x451   : > { %24407 = vmatprep.mubr.msk.bf16.mxu0 %vm547_vm0, %v14541_v40  ;;  %v7365_v40 = vrot.slane %v30612_v52, 3  ;;  %v14555_v37 = vsel %vm2201_vm2, %v14552_v62, %v14554_v9  ;;  %v26726_v62 = vld [vmem:[%s27795_s13 + $0x84] sm:$0xff]  }
 0x453   : > { %v7366_v29 = vsel %vm477_vm1, %v7363_v45, %v7365_v40  ;;  %v7368_v2 = vsel %vm477_vm1, %v7365_v40, %v7367_v22  ;;  %v26729_v40 = vld [vmem:[%s27795_s13 + $0x9c] sm:$0xff]   ;;  %v26730_v22 = vld [vmem:[%s27795_s13 + $0xa4] sm:$0xff]  }
 0x457   : > { %23668 = vmatmul.mubr.msk.bf16.gmra.mrb[200].mxu1 %vm547_vm0, %v7354_v3 }
 0x458   : > { %24408 = vmatmul.mubr.msk.bf16.gmra.mrb[96].mxu0 %vm547_vm0, %v14543_v58  ;;  %23671 = vmatprep.mubr.msk.bf16.mxu1 %vm547_vm0, %v7356_v12  ;;  %v30633_v58 = vld [vmem:[%s27795_s13 + $0xf4] sm:$0xff]   ;;  %v26720_v12 = vld [vmem:[%s27795_s13 + $0x64] sm:$0xff]  }
 0x459   : > { %24411 = vmatprep.mubr.msk.bf16.mxu0 %vm547_vm0, %v14545_v46  ;;  %v7371_v3 = vrot.slane %v30633_v58, 3  ;;  %v26717_v46 = vld [vmem:[%s27795_s13 + $0x5c] sm:$0xff]  }
 0x45b   : > { %v7372_v54 = vsel %vm477_vm1, %v7369_v6, %v7371_v3  ;;  %v26734_v6 = vld [vmem:[%s27795_s13 + $0xc4] sm:$0xff]  }
 0x45f   : > { %23672 = vmatmul.mubr.msk.bf16.gmra.mrb[204].mxu1 %vm547_vm0, %v7358_v10  ;;  %v7735_v10 = vrot.slane %v20894_v16, 1  ;;  %v26753_v16 = vld [vmem:[%s27795_s13 + $0x64] sm:$0xff]  }
 0x460   : > { %24412 = vmatmul.mubr.msk.bf16.gmra.mrb[100].mxu0 %vm547_vm0, %v14547_v8  ;;  %23675 = vmatprep.mubr.msk.bf16.mxu1 %vm547_vm0, %v7360_v4  ;;  %v26750_v8 = vld [vmem:[%s33239_s2 + $0x168] sm:$0xff]   ;;  %v7374_v4 = vsel %vm477_vm1, %v7371_v3, %v7373_v27 }
 0x461   : > { %24415 = vmatprep.mubr.msk.bf16.mxu0 %vm547_vm0, %v14549_v31  ;;  %v7736_v31 = vrot.slane %v30377_v61, 1  ;;  %v7740_v61 = vrot.slane %v30397_v17, 1  ;;  %v7744_v17 = vrot.slane %v30414_v5, 1  ;;  %v7748_v5 = vrot.slane %v30443_v34, 1  ;;  %v26732_v34 = vld [vmem:[%s27795_s13 + $0xb4] sm:$0xff]  }
 0x463   : > { %v7737_v41 = vsel %vm7734_vm3, %v7735_v10, %v7736_v31  ;;  %v26755_v10 = vld [vmem:[%s27795_s13 + $0x6c] sm:$0xff]  }
 0x467   : > { %23676 = vmatmul.mubr.msk.bf16.gmra.mrb[208].mxu1 %vm547_vm0, %v7362_v25  ;;  %v30683_v25 = vld [vmem:[%s33239_s2 + $0xc0] sm:$0xff]  }
 0x468   : > { %24416 = vmatmul.mubr.msk.bf16.gmra.mrb[104].mxu0 %vm547_vm0, %v14551_v0  ;;  %23679 = vmatprep.mubr.msk.bf16.mxu1 %vm547_vm0, %v7364_v18  ;;  %v26728_v18 = vld [vmem:[%s27795_s13 + $0x94] sm:$0xff]  }
 0x469   : > { %24419 = vmatprep.mubr.msk.bf16.mxu0 %vm547_vm0, %v14553_v39  ;;  %v26727_v39 = vld [vmem:[%s27795_s13 + $0x8c] sm:$0xff]  }
 0x46f   : > { %23680 = vmatmul.mubr.msk.bf16.gmra.mrb[212].mxu1 %vm547_vm0, %v7366_v29  ;;  %v7751_v29 = vsel %vm7734_vm3, %v7748_v5, %v7750_v24  ;;  %v26736_v24 = vld [vmem:[%s27795_s13 + $0xd4] sm:$0xff]  }
 0x470   : > { %24420 = vmatmul.mubr.msk.bf16.gmra.mrb[108].mxu0 %vm547_vm0, %v14555_v37  ;;  %23683 = vmatprep.mubr.msk.bf16.mxu1 %vm547_vm0, %v7368_v2  ;;  %v26733_v2 = vld [vmem:[%s27795_s13 + $0xbc] sm:$0xff]  }
 0x471   : > { %24427 = vmatprep.mubr.msk.bf16.mxu0 %vm547_vm0, %v26716_v63 }
 0x477   : > { %23684 = vmatmul.mubr.msk.bf16.gmra.mrb[216].mxu1 %vm547_vm0, %v7370_v43 }
 0x478   : > { %24428 = vmatmul.mubr.msk.bf16.vlgmr.msra.gmra.mrb[56].mxu0 %vm547_vm0, %v26717_v46  ;;  %23687 = vmatprep.mubr.msk.bf16.mxu1 %vm547_vm0, %v7372_v54  ;;  %v26748_v54 = vld [vmem:[%s27795_s13 + $0x12c] sm:$0xff]  }
 0x479   : > { %24431 = vmatprep.mubr.msk.bf16.mxu0 %vm547_vm0, %v26720_v12  ;;  %24484 = vmatpush3.bf16.msra.mxu0 %v26749_v57  ;;  %v7738_v57 = vrot.slane %v30391_v51, 1  ;;  %v7742_v51 = vrot.slane %v30408_v36, 1  ;;  %v7746_v36 = vrot.slane %v30437_v47, 1  ;;  %v26731_v47 = vld [vmem:[%s27795_s13 + $0xac] sm:$0xff]   ;;  %v26752_v12 = vld [vmem:[%s27795_s13 + $0x5c] sm:$0xff]  }
 0x47a   : > { %24485 = vmatprep.subr.bf16.mxu0 %v26750_v8  ;;  %v15781_v43 = vrot.slane %v26752_v12, 3  ;;  %v26771_v12 = vld [vmem:[%s27795_s13 + $0x58] sm:$0xff]  }
 0x47b   : > { %v7739_v45 = vsel %vm7734_vm3, %v7736_v31, %v7738_v57  ;;  %v7741_v0 = vsel %vm7734_vm3, %v7738_v57, %v7740_v61  ;;  %v7743_v9 = vsel %vm7734_vm3, %v7740_v61, %v7742_v51  ;;  %v7747_v37 = vsel %vm7734_vm3, %v7744_v17, %v7746_v36  ;;  %v26754_v61 = vld [vmem:[%s27795_s13 + $0xfc] ss:$0 sps:$4 sm:$0x11]  }
 0x47c   : > { %v7749_v63 = vsel %vm7734_vm3, %v7746_v36, %v7748_v5  ;;  %v15782_v27 = vsel %vm477_vm1, %v15780_v11, %v15781_v43  ;;  %v7787_v57 = vsel %vm7734_vm3, %v7784_v7, %v7786_v53  ;;  %v26759_v5 = vld [vmem:[%s27795_s13 + $0x30] sm:$0xff]  }
 0x47d   : > { %24486 = vmatpush3.bf16.msra.mxu0 %v26750_v8 }
 0x47f   : > { %23688 = vmatmul.mubr.msk.bf16.gmra.mrb[220].mxu1 %vm547_vm0, %v7374_v4 }
 0x480   : > { %24432 = vmatmul.mubr.msk.bf16.gmra.mrb[60].mxu0 %vm547_vm0, %v26721_v19  ;;  %23695 = vmatprep.mubr.msk.bf16.mxu1 %vm547_vm0, %v7737_v41  ;;  %v15785_v19 = vrot.slane %v26755_v10, 3  ;;  %v26756_v41 = vld [vmem:[%s27795_s13 + $0x74] sm:$0xff]   ;;  %v26777_v10 = vld [vmem:[%s27795_s13 + $0xbc] sm:$0xff]  }
 0x481   : > { %24435 = vmatprep.mubr.msk.bf16.mxu0 %vm547_vm0, %v26724_v14  ;;  %v7788_v14 = vrot.slane %v30633_v58, 1  ;;  %v15787_v58 = vrot.slane %v26756_v41, 3 }
 0x487   : > { %23696 = vmatmul.mubr.msk.bf16.vlgmr.msra.gmra.mrb[168].mxu1 %vm547_vm0, %v7739_v45  ;;  %v7789_v45 = vsel %vm7734_vm3, %v7786_v53, %v7788_v14 }
 0x488   : > { %24436 = vmatmul.mubr.msk.bf16.gmra.mrb[64].mxu0 %vm547_vm0, %v26725_v56  ;;  %23752 = vmatpush3.bf16.msra.mxu1 %v30431_v48  ;;  %v7745_v48 = vsel %vm7734_vm3, %v7742_v51, %v7744_v17  ;;  %v7790_v51 = vrot.slane %v26754_v61, 1 }
 0x489   : > { %24439 = vmatprep.mubr.msk.bf16.mxu0 %vm547_vm0, %v26726_v62  ;;  %23699 = vmatprep.mubr.msk.bf16.mxu1 %vm547_vm0, %v7741_v0  ;;  %v26761_v62 = vld [vmem:[%s27795_s13 + $0x7c] sm:$0xff]  }
 0x48a   : > { %23753 = vmatprep.subr.bf16.mxu1 %v26738_v28  ;;  %v26757_v0 = vld [vmem:[%s27795_s13 + $0x20] sm:$0xfe]   ;;  %v15789_v17 = vrot.slane %v26761_v62, 3  ;;  %v7791_v36 = vsel %vm7734_vm3, %v7788_v14, %v7790_v51  ;;  %v15805_v14 = vrot.slane %v26777_v10, 3 }
 0x48c   : > { %23754 = vmatpush3.bf16.msra.mxu1 %v26738_v28  ;;  %v26758_v28 = vld [vmem:[%s27795_s13 + $0x28] sm:$0xff]  }
 0x48d   : > { %23811 = vmatprep.subr.bf16.mxu1 %v30683_v25 }
 0x48f   : > { %23700 = vmatmul.mubr.msk.bf16.gmra.mrb[172].mxu1 %vm547_vm0, %v7743_v9  ;;  %v15788_v9 = vsel %vm477_vm1, %v15785_v19, %v15787_v58 }
 0x490   : > { %24440 = vmatmul.mubr.msk.bf16.gmra.mrb[68].mxu0 %vm547_vm0, %v26727_v39  ;;  %23703 = vmatprep.mubr.msk.bf16.mxu1 %vm547_vm0, %v7745_v48  ;;  %v8350_v39 = vrot.slane %v26757_v0, 1  ;;  %v26762_v48 = vld [vmem:[%s27795_s13 + $0x84] sm:$0xff]  }
 0x491   : > { %24443 = vmatprep.mubr.msk.bf16.mxu0 %vm547_vm0, %v26728_v18  ;;  %v8351_v18 = vrot.slane %v26758_v28, 1  ;;  %v26779_v28 = vld [vmem:[%s27795_s13 + $0x78] sm:$0xff]  }
 0x497   : > { %23704 = vmatmul.mubr.msk.bf16.gmra.mrb[176].mxu1 %vm547_vm0, %v7747_v37  ;;  %v8352_v37 = vsel %vm7734_vm3, %v8350_v39, %v8351_v18 }
 0x498   : > { %24444 = vmatmul.mubr.msk.bf16.gmra.mrb[72].mxu0 %vm547_vm0, %v26729_v40  ;;  %23707 = vmatprep.mubr.msk.bf16.mxu1 %vm547_vm0, %v7749_v63  ;;  %v15790_v40 = vsel %vm477_vm1, %v15787_v58, %v15789_v17  ;;  %v26763_v63 = vld [vmem:[%s27795_s13 + $0x38] sm:$0xff]  }
 0x499   : > { %24447 = vmatprep.mubr.msk.bf16.mxu0 %vm547_vm0, %v26730_v22  ;;  %v26765_v22 = vld [vmem:[%s27795_s13 + $0x8c] sm:$0xff]  }
 0x49f   : > { %23708 = vmatmul.mubr.msk.bf16.gmra.mrb[180].mxu1 %vm547_vm0, %v7751_v29  ;;  %v15793_v29 = vrot.slane %v26765_v22, 3  ;;  %v26783_v22 = vld [vmem:[%s27795_s13 + $0x88] sm:$0xff]  }
 0x4a0   : > { %24448 = vmatmul.mubr.msk.bf16.gmra.mrb[76].mxu0 %vm547_vm0, %v26731_v47  ;;  %23711 = vmatprep.mubr.msk.bf16.mxu1 %vm547_vm0, %v30461_v30  ;;  %v26737_v30 = vld [vmem:[%s27795_s13 + $0xdc] sm:$0xff]   ;;  %v15791_v47 = vrot.slane %v26762_v48, 3 }
 0x4a1   : > { %24451 = vmatprep.mubr.msk.bf16.mxu0 %vm547_vm0, %v26732_v34  ;;  %v8353_v34 = vrot.slane %v26759_v5, 1  ;;  %v26780_v48 = vld [vmem:[%s27795_s13 + $0x80] sm:$0xff]  }
 0x4a2   : > { %v26785_v5 = vld [vmem:[%s27795_s13 + $0xdc] sm:$0xff]  }
 0x4a7   : > { %23712 = vmatmul.mubr.msk.bf16.gmra.mrb[184].mxu1 %vm547_vm0, %v30464_v1  ;;  %v26739_v1 = vld [vmem:[%s27795_s13 + $0xe4] sm:$0xff]  }
 0x4a8   : > { %24452 = vmatmul.mubr.msk.bf16.gmra.mrb[80].mxu0 %vm547_vm0, %v26733_v2  ;;  %23715 = vmatprep.mubr.msk.bf16.mxu1 %vm547_vm0, %v30480_v26  ;;  %v26740_v26 = vld [vmem:[%s27795_s13 + $0xec] sm:$0xff]   ;;  %v8355_v2 = vrot.slane %v26763_v63, 1  ;;  %v8373_v63 = vrot.slane %v26780_v48, 1 }
 0x4a9   : > { %24455 = vmatprep.mubr.msk.bf16.mxu0 %vm547_vm0, %v26734_v6  ;;  %v15792_v6 = vsel %vm477_vm1, %v15789_v17, %v15791_v47  ;;  %v8371_v17 = vrot.slane %v26779_v28, 1 }
 0x4af   : > { %23716 = vmatmul.mubr.msk.bf16.gmra.mrb[188].mxu1 %vm547_vm0, %v30483_v13  ;;  %v26741_v13 = vld [vmem:[%s27795_s13 + $0xf4] sm:$0xff]  }
 0x4b0   : > { %24456 = vmatmul.mubr.msk.bf16.gmra.mrb[84].mxu0 %vm547_vm0, %v26735_v21  ;;  %23719 = vmatprep.mubr.msk.bf16.mxu1 %vm547_vm0, %v30498_v49  ;;  %v26742_v49 = vld [vmem:[%s27795_s13 + $0xfc] sm:$0xff]   ;;  %v26766_v21 = vld [vmem:[%s27795_s13 + $0x94] sm:$0xff]  }
 0x4b1   : > { %24459 = vmatprep.mubr.msk.bf16.mxu0 %vm547_vm0, %v26736_v24  ;;  %v8354_v24 = vsel %vm7734_vm3, %v8351_v18, %v8353_v34  ;;  %v26782_v18 = vld [vmem:[%s27795_s13 + $0xd4] sm:$0xff]  }
 0x4b7   : > { %23720 = vmatmul.mubr.msk.bf16.gmra.mrb[192].mxu1 %vm547_vm0, %v30501_v55  ;;  %v26743_v55 = vld [vmem:[%s27795_s13 + $0x104] sm:$0xff]  }
 0x4b8   : > { %24460 = vmatmul.mubr.msk.bf16.gmra.mrb[88].mxu0 %vm547_vm0, %v26737_v30  ;;  %23723 = vmatprep.mubr.msk.bf16.mxu1 %vm547_vm0, %v30516_v42  ;;  %v7776_v42 = vrot.slane %v30579_v20, 1  ;;  %v26747_v20 = vld [vmem:[%s27795_s13 + $0x124] sm:$0xff]  }
 0x4b9   : > { %24463 = vmatprep.mubr.msk.bf16.mxu0 %vm547_vm0, %v26739_v1  ;;  %v26764_v30 = vld [vmem:[%s27795_s13 + $0x40] sm:$0xff]   ;;  %v15794_v1 = vsel %vm477_vm1, %v15791_v47, %v15793_v29  ;;  %v15813_v47 = vrot.slane %v26785_v5, 3 }
 0x4ba   : > { %v7777_v3 = vsel %vm7734_vm3, %v7774_v44, %v7776_v42  ;;  %v26746_v44 = vld [vmem:[%s27795_s13 + $0x11c] sm:$0xff]  }
 0x4bb   : > { %v26870_v5 = vld [vmem:[%s33239_s2 + $0x180] sm:$0xff]  }
 0x4bf   : > { %23724 = vmatmul.mubr.msk.bf16.gmra.mrb[196].mxu1 %vm547_vm0, %v30519_v60  ;;  %v26744_v60 = vld [vmem:[%s27795_s13 + $0x10c] sm:$0xff]  }
 0x4c0   : > { %24464 = vmatmul.mubr.msk.bf16.gmra.mrb[92].mxu0 %vm547_vm0, %v26740_v26  ;;  %23727 = vmatprep.mubr.msk.bf16.mxu1 %vm547_vm0, %v30534_v50  ;;  %v26745_v50 = vld [vmem:[%s27795_s13 + $0x114] sm:$0xff]   ;;  %v26769_v26 = vld [vmem:[%s27795_s13 + $0x9c] sm:$0xff]  }
 0x4c1   : > { %24467 = vmatprep.mubr.msk.bf16.mxu0 %vm547_vm0, %v26741_v13  ;;  %v8356_v13 = vsel %vm7734_vm3, %v8353_v34, %v8355_v2  ;;  %v8375_v34 = vrot.slane %v26783_v22, 1 }
 0x4c7   : > { %23728 = vmatmul.mubr.msk.bf16.gmra.mrb[200].mxu1 %vm547_vm0, %v30537_v38  ;;  %v26808_v38 = vld [vmem:[%s33239_s2 + $0x170] sm:$0xff]  }
 0x4c8   : > { %24468 = vmatmul.mubr.msk.bf16.gmra.mrb[96].mxu0 %vm547_vm0, %v26742_v49  ;;  %23731 = vmatprep.mubr.msk.bf16.mxu1 %vm547_vm0, %v30555_v33  ;;  %v7778_v33 = vrot.slane %v30591_v23, 1  ;;  %v7782_v23 = vrot.slane %v30612_v52, 1  ;;  %v15783_v52 = vrot.slane %v26753_v16, 3  ;;  %v26767_v49 = vld [vmem:[%s27795_s13 + $0x48] sm:$0xff]  }
 0x4c9   : > { %24471 = vmatprep.mubr.msk.bf16.mxu0 %vm547_vm0, %v26743_v55  ;;  %24543 = vmatprep.subr.bf16.mxu0 %v26808_v38  ;;  %v26789_v55 = vld [vmem:[%s33239_s2 + $0xc8] sm:$0xff]  }
 0x4ca   : > { %v7779_v46 = vsel %vm7734_vm3, %v7776_v42, %v7778_v33  ;;  %v7783_v8 = vsel %vm7734_vm3, %v7780_v35, %v7782_v23  ;;  %v7785_v31 = vsel %vm7734_vm3, %v7782_v23, %v7784_v7  ;;  %v15784_v4 = vsel %vm477_vm1, %v15781_v43, %v15783_v52 }
 0x4cb   : > { %v15786_v56 = vsel %vm477_vm1, %v15783_v52, %v15785_v19  ;;  %v15795_v42 = vrot.slane %v26766_v21, 3  ;;  %v8363_v43 = vrot.slane %v26771_v12, 1  ;;  %v26775_v52 = vld [vmem:[%s27795_s13 + $0x68] sm:$0xff]   ;;  %v26784_v21 = vld [vmem:[%s27795_s13 + $0x90] sm:$0xff]  }
 0x4cf   : > { %23732 = vmatmul.mubr.msk.bf16.gmra.mrb[204].mxu1 %vm547_vm0, %v30560_v15  ;;  %v7781_v15 = vsel %vm7734_vm3, %v7778_v33, %v7780_v35  ;;  %v15796_v33 = vsel %vm477_vm1, %v15793_v29, %v15795_v42  ;;  %v26770_v35 = vld [vmem:[%s27795_s13 + $0xa4] sm:$0xff]  }
 0x4d0   : > { %24472 = vmatmul.mubr.msk.bf16.gmra.mrb[100].mxu0 %vm547_vm0, %v26744_v60  ;;  %23735 = vmatprep.mubr.msk.bf16.mxu1 %vm547_vm0, %v7777_v3  ;;  %v8357_v60 = vrot.slane %v26764_v30, 1  ;;  %v8359_v3 = vrot.slane %v26767_v49, 1  ;;  %v26790_v30 = vld [vmem:[%s27795_s13 + $0xec] sm:$0xff]   ;;  %v8377_v49 = vrot.slane %v26784_v21, 1  ;;  %v26812_v21 = vld [vmem:[%s27795_s13 + $0x58] sm:$0xfc]  }
 0x4d1   : > { %24475 = vmatprep.mubr.msk.bf16.mxu0 %vm547_vm0, %v26745_v50  ;;  %v15797_v50 = vrot.slane %v26769_v26, 3  ;;  %v26787_v26 = vld [vmem:[%s27795_s13 + $0x98] sm:$0xff]  }
 0x4d2   : > { %v8360_v32 = vsel %vm7734_vm3, %v8357_v60, %v8359_v3 }
 0x4d7   : > { %23736 = vmatmul.mubr.msk.bf16.gmra.mrb[208].mxu1 %vm547_vm0, %v7779_v46  ;;  %v26773_v46 = vld [vmem:[%s27795_s13 + $0xac] sm:$0xff]  }
 0x4d8   : > { %24476 = vmatmul.mubr.msk.bf16.gmra.mrb[104].mxu0 %vm547_vm0, %v26746_v44  ;;  %23739 = vmatprep.mubr.msk.bf16.mxu1 %vm547_vm0, %v7781_v15  ;;  %v8358_v44 = vsel %vm7734_vm3, %v8355_v2, %v8357_v60  ;;  %v15799_v15 = vrot.slane %v26770_v35, 3  ;;  %v15801_v11 = vrot.slane %v26773_v46, 3  ;;  %v26786_v2 = vld [vmem:[%s27795_s13 + $0xe4] sm:$0xff]  }
 0x4d9   : > { %24479 = vmatprep.mubr.msk.bf16.mxu0 %vm547_vm0, %v26747_v20  ;;  %v26768_v20 = vld [vmem:[%s27795_s13 + $0x50] sm:$0xff]  }
 0x4da   : > { %v8361_v23 = vrot.slane %v26768_v20, 1  ;;  %v15800_v7 = vsel %vm477_vm1, %v15797_v50, %v15799_v15 }
 0x4dc   : > { %v8362_v16 = vsel %vm7734_vm3, %v8359_v3, %v8361_v23  ;;  %v8378_v3 = vsel %vm7734_vm3, %v8375_v34, %v8377_v49 }
 0x4df   : > { %23740 = vmatmul.mubr.msk.bf16.gmra.mrb[212].mxu1 %vm547_vm0, %v7783_v8  ;;  %v26772_v8 = vld [vmem:[%s27795_s13 + $0x60] sm:$0xff]  }
 0x4e0   : > { %24480 = vmatmul.mubr.msk.bf16.gmra.mrb[108].mxu0 %vm547_vm0, %v26748_v54  ;;  %23743 = vmatprep.mubr.msk.bf16.mxu1 %vm547_vm0, %v7785_v31  ;;  %v26774_v54 = vld [vmem:[%s27795_s13 + $0xb4] sm:$0xff]   ;;  %v8364_v31 = vsel %vm7734_vm3, %v8361_v23, %v8363_v43  ;;  %v8365_v19 = vrot.slane %v26772_v8, 1 }
 0x4e1   : > { %24487 = vmatprep.mubr.msk.bf16.mxu0 %vm547_vm0, %v15782_v27  ;;  %v15802_v27 = vsel %vm477_vm1, %v15799_v15, %v15801_v11  ;;  %v15803_v53 = vrot.slane %v26774_v54, 3 }
 0x4e2   : > { %v8366_v61 = vsel %vm7734_vm3, %v8363_v43, %v8365_v19 }
 0x4e3   : > { %v15804_v41 = vsel %vm477_vm1, %v15801_v11, %v15803_v53  ;;  %v15806_v62 = vsel %vm477_vm1, %v15803_v53, %v15805_v14  ;;  %v26795_v11 = vld [vmem:[%s27795_s13 + $0x104] sm:$0xff]  }
 0x4e4   : > { %v15823_v10 = vrot.slane %v26795_v11, 3  ;;  %v30982_v11 = vld [vmem:[%s27795_s13 + $0x58] sm:$0xf] }
 0x4e7   : > { %23744 = vmatmul.mubr.msk.bf16.gmra.mrb[216].mxu1 %vm547_vm0, %v7787_v57  ;;  %v26778_v57 = vld [vmem:[%s27795_s13 + $0xc4] sm:$0xff]  }
 0x4e8   : > { %24488 = vmatmul.mubr.msk.bf16.vlgmr.msra.gmra.mrb[56].mxu0 %vm547_vm0, %v15784_v4  ;;  %23747 = vmatprep.mubr.msk.bf16.mxu1 %vm547_vm0, %v7789_v45  ;;  %v8367_v4 = vrot.slane %v26775_v52, 1  ;;  %v26781_v45 = vld [vmem:[%s27795_s13 + $0xcc] sm:$0xff]  }
 0x4e9   : > { %24491 = vmatprep.mubr.msk.bf16.mxu0 %vm547_vm0, %v15786_v56  ;;  %24544 = vmatpush3.bf16.msra.mxu0 %v26808_v38  ;;  %v30841_v38 = vld [vmem:[%s33239_s2 + $0xd0] sm:$0xff]   ;;  %v15809_v51 = vrot.slane %v26781_v45, 3 }
 0x4ea   : > { %24545 = vmatprep.subr.bf16.mxu0 %v26809_v59  ;;  %v26776_v56 = vld [vmem:[%s27795_s13 + $0x70] sm:$0xff]   ;;  %v8368_v0 = vsel %vm7734_vm3, %v8365_v19, %v8367_v4 }
 0x4eb   : > { %v8369_v58 = vrot.slane %v26776_v56, 1 }
 0x4ed   : > { %24546 = vmatpush3.bf16.msra.mxu0 %v26809_v59  ;;  %v15807_v59 = vrot.slane %v26778_v57, 3 }
 0x4ee   : > { %24603 = vmatprep.subr.bf16.mxu0 %v26870_v5 }
 0x4ef   : > { %23748 = vmatmul.mubr.msk.bf16.gmra.mrb[220].mxu1 %vm547_vm0, %v7791_v36  ;;  %v15808_v39 = vsel %vm477_vm1, %v15805_v14, %v15807_v59  ;;  %v15810_v36 = vsel %vm477_vm1, %v15807_v59, %v15809_v51  ;;  %v26799_v14 = vld [vmem:[%s27795_s13 + $0x114] sm:$0xff]  }
 0x4f0   : > { %24492 = vmatmul.mubr.msk.bf16.gmra.mrb[60].mxu0 %vm547_vm0, %v15788_v9  ;;  %23755 = vmatprep.mubr.msk.bf16.mxu1 %vm547_vm0, %v8352_v37  ;;  %v8370_v9 = vsel %vm7734_vm3, %v8367_v4, %v8369_v58  ;;  %v15811_v37 = vrot.slane %v26782_v18, 3  ;;  %v15827_v45 = vrot.slane %v26799_v14, 3 }
 0x4f1   : > { %24495 = vmatprep.mubr.msk.bf16.mxu0 %vm547_vm0, %v15790_v40  ;;  %v8372_v40 = vsel %vm7734_vm3, %v8369_v58, %v8371_v17 }
 0x4f2   : > { %v15812_v29 = vsel %vm477_vm1, %v15809_v51, %v15811_v37  ;;  %v26803_v51 = vld [vmem:[%s27795_s13 + $0x124] sm:$0xff]  }
 0x4f7   : > { %23756 = vmatmul.mubr.msk.bf16.vlgmr.msra.gmra.mrb[168].mxu1 %vm547_vm0, %v8354_v24  ;;  %v15814_v24 = vsel %vm477_vm1, %v15811_v37, %v15813_v47 }
 0x4f8   : > { %24496 = vmatmul.mubr.msk.bf16.gmra.mrb[64].mxu0 %vm547_vm0, %v15792_v6  ;;  %23812 = vmatpush3.bf16.msra.mxu1 %v30683_v25  ;;  %v15798_v25 = vsel %vm477_vm1, %v15795_v42, %v15797_v50  ;;  %v8374_v6 = vsel %vm7734_vm3, %v8371_v17, %v8373_v63  ;;  %v8379_v42 = vrot.slane %v26787_v26, 1  ;;  %v26791_v50 = vld [vmem:[%s27795_s13 + $0xf4] sm:$0xff]  }
 0x4f9   : > { %24499 = vmatprep.mubr.msk.bf16.mxu0 %vm547_vm0, %v15794_v1  ;;  %23759 = vmatprep.mubr.msk.bf16.mxu1 %vm547_vm0, %v8356_v13  ;;  %v8376_v1 = vsel %vm7734_vm3, %v8373_v63, %v8375_v34  ;;  %v15815_v13 = vrot.slane %v26786_v2, 3  ;;  %v15819_v46 = vrot.slane %v26791_v50, 3  ;;  %v26807_v34 = vld [vmem:[%s27795_s13 + $0x134] ss:$0 sps:$4 sm:$0x77]   ;;  %v26805_v2 = vld [vmem:[%s27795_s13 + $0xe0] sm:$0xff]  }
 0x4fa   : > { %23813 = vmatprep.subr.bf16.mxu1 %v26789_v55  ;;  %v8380_v20 = vsel %vm7734_vm3, %v8377_v49, %v8379_v42  ;;  %v15835_v26 = vrot.slane %v26807_v34, 3  ;;  %v16451_v49 = vrot.slane %v26812_v21, 2  ;;  %v26814_v50 = vld [vmem:[%s27795_s13 + $0x68] sm:$0xff]   ;;  %v31046_v21 = vld [vmem:[%s33239_s2 + $0xe0] sm:$0xff]  }
 0x4fb   : > { %v15816_v60 = vsel %vm477_vm1, %v15813_v47, %v15815_v13 }
 0x4fc   : > { %23814 = vmatpush3.bf16.msra.mxu1 %v26789_v55  ;;  %v15817_v55 = vrot.slane %v26790_v30, 3 }
 0x4fd   : > { %23871 = vmatprep.subr.bf16.mxu1 %v30841_v38 }
 0x4fe   : > { %v15818_v35 = vsel %vm477_vm1, %v15815_v13, %v15817_v55  ;;  %v15820_v23 = vsel %vm477_vm1, %v15817_v55, %v15819_v46  ;;  %v8397_v13 = vrot.slane %v26805_v2, 1 }
 0x4ff   : > { %23760 = vmatmul.mubr.msk.bf16.gmra.mrb[172].mxu1 %vm547_vm0, %v8358_v44  ;;  %v26794_v44 = vld [vmem:[%s27795_s13 + $0xfc] sm:$0xff]  }
 0x500   : > { %24500 = vmatmul.mubr.msk.bf16.gmra.mrb[68].mxu0 %vm547_vm0, %v15796_v33  ;;  %23763 = vmatprep.mubr.msk.bf16.mxu1 %vm547_vm0, %v8360_v32  ;;  %v26788_v33 = vld [vmem:[%s27795_s13 + $0xa0] sm:$0xff]   ;;  %v15821_v12 = vrot.slane %v26794_v44, 3  ;;  %v26817_v44 = vld [vmem:[%s27795_s13 + $0x70] sm:$0xff]  }
 0x501   : > { %24503 = vmatprep.mubr.msk.bf16.mxu0 %vm547_vm0, %v15798_v25  ;;  %v26792_v25 = vld [vmem:[%s27795_s13 + $0xa8] sm:$0xff]   ;;  %v8381_v32 = vrot.slane %v26788_v33, 1  ;;  %v26811_v33 = vld [vmem:[%s27795_s13 + $0xf0] sm:$0xff]  }
 0x502   : > { %v8383_v15 = vrot.slane %v26792_v25, 1  ;;  %v15822_v54 = vsel %vm477_vm1, %v15819_v46, %v15821_v12  ;;  %v15824_v19 = vsel %vm477_vm1, %v15821_v12, %v15823_v10  ;;  %v26815_v25 = vld [vmem:[%s27795_s13 + $0xf8] sm:$0xff]   ;;  %v16454_v46 = vrot.slane %v26814_v50, 2 }
 0x503   : > { %v8382_v43 = vsel %vm7734_vm3, %v8379_v42, %v8381_v32  ;;  %v16456_v12 = vrot.slane %v26817_v44, 2 }
 0x504   : > { %v8384_v8 = vsel %vm7734_vm3, %v8381_v32, %v8383_v15  ;;  %v8401_v32 = vrot.slane %v26811_v33, 1 }
 0x507   : > { %23764 = vmatmul.mubr.msk.bf16.gmra.mrb[176].mxu1 %vm547_vm0, %v8362_v16  ;;  %v26798_v16 = vld [vmem:[%s27795_s13 + $0x10c] sm:$0xff]  }
 0x508   : > { %24504 = vmatmul.mubr.msk.bf16.gmra.mrb[72].mxu0 %vm547_vm0, %v15800_v7  ;;  %23767 = vmatprep.mubr.msk.bf16.mxu1 %vm547_vm0, %v8364_v31  ;;  %v26793_v7 = vld [vmem:[%s27795_s13 + $0xb0] sm:$0xff]   ;;  %v15825_v52 = vrot.slane %v26798_v16, 3  ;;  %v26816_v16 = vld [vmem:[%s27795_s13 + $0x100] ss:$0 sps:$4 sm:$0x11]  }
 0x509   : > { %24507 = vmatprep.mubr.msk.bf16.mxu0 %vm547_vm0, %v15802_v27  ;;  %v26796_v27 = vld [vmem:[%s27795_s13 + $0xb8] sm:$0xff]   ;;  %v8385_v31 = vrot.slane %v26793_v7, 1  ;;  %v8405_v14 = vrot.slane %v26816_v16, 1  ;;  %v26840_v16 = vld [vmem:[%s27795_s13 + $0xc8] sm:$0xff]  }
 0x50a   : > { %v8387_v53 = vrot.slane %v26796_v27, 1  ;;  %v15826_v57 = vsel %vm477_vm1, %v15823_v10, %v15825_v52  ;;  %v15828_v58 = vsel %vm477_vm1, %v15825_v52, %v15827_v45  ;;  %v26818_v7 = vld [vmem:[%s27795_s13 + $0x78] sm:$0xff]   ;;  %v26823_v27 = vld [vmem:[%s27795_s13 + $0x80] sm:$0xff]  }
 0x50b   : > { %v8386_v4 = vsel %vm7734_vm3, %v8383_v15, %v8385_v31  ;;  %v8403_v15 = vrot.slane %v26815_v25, 1  ;;  %v30993_v52 = vld [vmem:[%s27795_s13 + $0x5c] sm:$0xff]  }
 0x50c   : > { %v8388_v56 = vsel %vm7734_vm3, %v8385_v31, %v8387_v53 }
 0x50d   : > { %v8404_v10 = vsel %vm7734_vm3, %v8401_v32, %v8403_v15 }
 0x50f   : > { %23768 = vmatmul.mubr.msk.bf16.gmra.mrb[180].mxu1 %vm547_vm0, %v8366_v61  ;;  %v26802_v61 = vld [vmem:[%s27795_s13 + $0x11c] sm:$0xff]  }
 0x510   : > { %24508 = vmatmul.mubr.msk.bf16.gmra.mrb[76].mxu0 %vm547_vm0, %v15804_v41  ;;  %23771 = vmatprep.mubr.msk.bf16.mxu1 %vm547_vm0, %v8368_v0  ;;  %v26797_v41 = vld [vmem:[%s27795_s13 + $0xc0] sm:$0xff]   ;;  %v15829_v28 = vrot.slane %v26802_v61, 3 }
 0x511   : > { %24511 = vmatprep.mubr.msk.bf16.mxu0 %vm547_vm0, %v15806_v62  ;;  %v26800_v62 = vld [vmem:[%s27795_s13 + $0xc8] sm:$0xff]   ;;  %v8389_v0 = vrot.slane %v26797_v41, 1 }
 0x512   : > { %v8391_v59 = vrot.slane %v26800_v62, 1  ;;  %v15830_v18 = vsel %vm477_vm1, %v15827_v45, %v15829_v28  ;;  %v8406_v62 = vsel %vm7734_vm3, %v8403_v15, %v8405_v14  ;;  %v31007_v45 = vld [vmem:[%s27795_s13 + $0x64] sm:$0xff]   ;;  %v16478_v14 = vrot.slane %v26840_v16, 2 }
 0x513   : > { %v8390_v17 = vsel %vm7734_vm3, %v8387_v53, %v8389_v0  ;;  %v26871_v53 = vld [vmem:[%s33239_s2 + $0x188] sm:$0xff]  }
 0x514   : > { %v8392_v48 = vsel %vm7734_vm3, %v8389_v0, %v8391_v59 }
 0x517   : > { %23772 = vmatmul.mubr.msk.bf16.gmra.mrb[184].mxu1 %vm547_vm0, %v8370_v9  ;;  %v26806_v9 = vld [vmem:[%s27795_s13 + $0x12c] sm:$0xff]  }
 0x518   : > { %24512 = vmatmul.mubr.msk.bf16.gmra.mrb[80].mxu0 %vm547_vm0, %v15808_v39  ;;  %23775 = vmatprep.mubr.msk.bf16.mxu1 %vm547_vm0, %v8372_v40  ;;  %v26801_v39 = vld [vmem:[%s27795_s13 + $0xd0] sm:$0xff]   ;;  %v15831_v40 = vrot.slane %v26803_v51, 3  ;;  %v15833_v37 = vrot.slane %v26806_v9, 3 }
 0x519   : > { %24515 = vmatprep.mubr.msk.bf16.mxu0 %vm547_vm0, %v15810_v36  ;;  %v26804_v36 = vld [vmem:[%s27795_s13 + $0xd8] sm:$0xff]   ;;  %v8393_v22 = vrot.slane %v26801_v39, 1 }
 0x51a   : > { %v8395_v63 = vrot.slane %v26804_v36, 1  ;;  %v15832_v47 = vsel %vm477_vm1, %v15829_v28, %v15831_v40  ;;  %v26827_v28 = vld [vmem:[%s27795_s13 + $0x90] sm:$0xff]  }
 0x51b   : > { %v16464_v39 = vrot.slane %v26827_v28, 2 }
 0x51c   : > { %v8396_v30 = vsel %vm7734_vm3, %v8393_v22, %v8395_v63 }
 0x51f   : > { %23776 = vmatmul.mubr.msk.bf16.gmra.mrb[188].mxu1 %vm547_vm0, %v8374_v6  ;;  %v15834_v6 = vsel %vm477_vm1, %v15831_v40, %v15833_v37 }
 0x520   : > { %24516 = vmatmul.mubr.msk.bf16.gmra.mrb[84].mxu0 %vm547_vm0, %v15812_v29  ;;  %23779 = vmatprep.mubr.msk.bf16.mxu1 %vm547_vm0, %v8376_v1  ;;  %v8394_v29 = vsel %vm7734_vm3, %v8391_v59, %v8393_v22  ;;  %v26810_v1 = vld [vmem:[%s27795_s13 + $0xe8] sm:$0xff]   ;;  %v26831_v22 = vld [vmem:[%s27795_s13 + $0xa0] sm:$0xff]  }
 0x521   : > { %24519 = vmatprep.mubr.msk.bf16.mxu0 %vm547_vm0, %v15814_v24  ;;  %v26813_v24 = vld [vmem:[%s27795_s13 + $0x60] sm:$0xff]   ;;  %v8399_v42 = vrot.slane %v26810_v1, 1  ;;  %v16468_v2 = vrot.slane %v26831_v22, 2 }
 0x522   : > { %v16452_v55 = vrot.slane %v26813_v24, 2 }
 0x527   : > { %23780 = vmatmul.mubr.msk.bf16.gmra.mrb[192].mxu1 %vm547_vm0, %v8378_v3  ;;  %v8398_v3 = vsel %vm7734_vm3, %v8395_v63, %v8397_v13  ;;  %v31031_v63 = vld [vmem:[%s27795_s13 + $0x7c] sm:$0xff]  }
 0x528   : > { %24520 = vmatmul.mubr.msk.bf16.gmra.mrb[88].mxu0 %vm547_vm0, %v15816_v60  ;;  %23783 = vmatprep.mubr.msk.bf16.mxu1 %vm547_vm0, %v8380_v20  ;;  %v15836_v60 = vsel %vm477_vm1, %v15833_v37, %v15835_v26  ;;  %v8400_v20 = vsel %vm7734_vm3, %v8397_v13, %v8399_v42  ;;  %v31052_v26 = vld [vmem:[%s27795_s13 + $0x84] sm:$0xff]   ;;  %v26835_v13 = vld [vmem:[%s27795_s13 + $0xb0] sm:$0xff]  }
 0x529   : > { %24523 = vmatprep.mubr.msk.bf16.mxu0 %vm547_vm0, %v15818_v35  ;;  %v16453_v35 = vsel %vm2201_vm2, %v16451_v49, %v16452_v55  ;;  %v16472_v50 = vrot.slane %v26835_v13, 2  ;;  %v26853_v13 = vld [vmem:[%s27795_s13 + $0xf8] sm:$0xff]  }
 0x52f   : > { %23784 = vmatmul.mubr.msk.bf16.gmra.mrb[196].mxu1 %vm547_vm0, %v8382_v43  ;;  %v16455_v43 = vsel %vm2201_vm2, %v16452_v55, %v16454_v46  ;;  %v31058_v55 = vld [vmem:[%s27795_s13 + $0x8c] sm:$0xff]  }
 0x530   : > { %24524 = vmatmul.mubr.msk.bf16.gmra.mrb[92].mxu0 %vm547_vm0, %v15820_v23  ;;  %23787 = vmatprep.mubr.msk.bf16.mxu1 %vm547_vm0, %v8384_v8  ;;  %v8816_v23 = vld [vmem:[%s27795_s13 + $0x54] sm:$0xe]  ;;  %v16457_v8 = vsel %vm2201_vm2, %v16454_v46, %v16456_v12  ;;  %v26839_v46 = vld [vmem:[%s27795_s13 + $0xc0] sm:$0xff]  }
 0x531   : > { %24527 = vmatprep.mubr.msk.bf16.mxu0 %vm547_vm0, %v15822_v54  ;;  %v8402_v54 = vsel %vm7734_vm3, %v8399_v42, %v8401_v32  ;;  %v20993_v31 = vcombine.low %v8816_v23, %v30982_v11 }
 0x533   : > { %v9021_v41 = vrot.slane %v20993_v31, 1  ;;  %v26843_v31 = vld [vmem:[%s27795_s13 + $0xd0] sm:$0xff]  }
 0x537   : > { %23788 = vmatmul.mubr.msk.bf16.gmra.mrb[200].mxu1 %vm547_vm0, %v8386_v4  ;;  %v16460_v4 = vrot.slane %v26823_v27, 2  ;;  %v31089_v27 = vld [vmem:[%s27795_s13 + $0xa4] sm:$0xff]  }
 0x538   : > { %24528 = vmatmul.mubr.msk.bf16.gmra.mrb[96].mxu0 %vm547_vm0, %v15824_v19  ;;  %23791 = vmatprep.mubr.msk.bf16.mxu1 %vm547_vm0, %v8388_v56  ;;  %v16458_v19 = vrot.slane %v26818_v7, 2  ;;  %v26824_v56 = vld [vmem:[%s27795_s13 + $0x88] sm:$0xff]  }
 0x539   : > { %24531 = vmatprep.mubr.msk.bf16.mxu0 %vm547_vm0, %v15826_v57  ;;  %v9022_v57 = vrot.slane %v30993_v52, 1  ;;  %v16462_v51 = vrot.slane %v26824_v56, 2  ;;  %v26844_v56 = vld [vmem:[%s27795_s13 + $0xd8] sm:$0xff]  }
 0x53a   : > { %v16459_v61 = vsel %vm2201_vm2, %v16456_v12, %v16458_v19  ;;  %v16461_v0 = vsel %vm2201_vm2, %v16458_v19, %v16460_v4  ;;  %v31077_v12 = vld [vmem:[%s27795_s13 + $0x9c] sm:$0xff]   ;;  %v31095_v19 = vld [vmem:[%s27795_s13 + $0xac] sm:$0xff]  }
 0x53b   : > { %v9023_v59 = vsel %vm7734_vm3, %v9021_v41, %v9022_v57  ;;  %v16463_v9 = vsel %vm2201_vm2, %v16460_v4, %v16462_v51  ;;  %v16465_v40 = vsel %vm2201_vm2, %v16462_v51, %v16464_v39  ;;  %v9038_v7 = vrot.slane %v31077_v12, 1 }
 0x53c   : > { %v9040_v4 = vrot.slane %v31089_v27, 1  ;;  %v16480_v41 = vrot.slane %v26843_v31, 2 }
 0x53e   : > { %v16481_v28 = vsel %vm2201_vm2, %v16478_v14, %v16480_v41 }
 0x53f   : > { %23792 = vmatmul.mubr.msk.bf16.gmra.mrb[204].mxu1 %vm547_vm0, %v8390_v17  ;;  %v9024_v17 = vrot.slane %v31007_v45, 1 }
 0x540   : > { %24532 = vmatmul.mubr.msk.bf16.gmra.mrb[100].mxu0 %vm547_vm0, %v15828_v58  ;;  %23795 = vmatprep.mubr.msk.bf16.mxu1 %vm547_vm0, %v8392_v48  ;;  %v31013_v58 = vld [vmem:[%s27795_s13 + $0x6c] sm:$0xff]   ;;  %v26828_v48 = vld [vmem:[%s27795_s13 + $0x98] sm:$0xff]  }
 0x541   : > { %24535 = vmatprep.mubr.msk.bf16.mxu0 %vm547_vm0, %v15830_v18  ;;  %v9026_v18 = vrot.slane %v31013_v58, 1  ;;  %v9025_v36 = vsel %vm7734_vm3, %v9022_v57, %v9024_v17  ;;  %v16466_v34 = vrot.slane %v26828_v48, 2  ;;  %v9042_v57 = vrot.slane %v31095_v19, 1 }
 0x543   : > { %v9027_v37 = vsel %vm7734_vm3, %v9024_v17, %v9026_v18  ;;  %v16467_v24 = vsel %vm2201_vm2, %v16464_v39, %v16466_v34  ;;  %v9043_v51 = vsel %vm7734_vm3, %v9040_v4, %v9042_v57  ;;  %v31113_v17 = vld [vmem:[%s27795_s13 + $0xbc] sm:$0xff]   ;;  %v16482_v39 = vrot.slane %v26844_v56, 2 }
 0x544   : > { %v9046_v48 = vrot.slane %v31113_v17, 1 }
 0x547   : > { %23796 = vmatmul.mubr.msk.bf16.gmra.mrb[208].mxu1 %vm547_vm0, %v8394_v29 }
 0x548   : > { %24536 = vmatmul.mubr.msk.bf16.gmra.mrb[104].mxu0 %vm547_vm0, %v15832_v47  ;;  %23799 = vmatprep.mubr.msk.bf16.mxu1 %vm547_vm0, %v8396_v30  ;;  %v26851_v47 = vld [vmem:[%s33239_s2 + $0xd8] sm:$0xff]   ;;  %v26832_v30 = vld [vmem:[%s27795_s13 + $0xa8] sm:$0xff]  }
 0x549   : > { %24539 = vmatprep.mubr.msk.bf16.mxu0 %vm547_vm0, %v15834_v6  ;;  %v9030_v6 = vrot.slane %v31031_v63, 1  ;;  %v16470_v42 = vrot.slane %v26832_v30, 2 }
 0x54b   : > { %v16471_v33 = vsel %vm2201_vm2, %v16468_v2, %v16470_v42  ;;  %v16473_v25 = vsel %vm2201_vm2, %v16470_v42, %v16472_v50  ;;  %v31143_v42 = vld [vmem:[%s27795_s13 + $0xd4] sm:$0xff]  }
 0x54f   : > { %23800 = vmatmul.mubr.msk.bf16.gmra.mrb[212].mxu1 %vm547_vm0, %v8398_v3  ;;  %v9034_v3 = vrot.slane %v31058_v55, 1 }
 0x550   : > { %24540 = vmatmul.mubr.msk.bf16.gmra.mrb[108].mxu0 %vm547_vm0, %v15836_v60  ;;  %23803 = vmatprep.mubr.msk.bf16.mxu1 %vm547_vm0, %v8400_v20  ;;  %v9032_v60 = vrot.slane %v31052_v26, 1  ;;  %v31071_v20 = vld [vmem:[%s27795_s13 + $0x94] sm:$0xff]  }
 0x551   : > { %24547 = vmatprep.mubr.msk.bf16.mxu0 %vm547_vm0, %v16453_v35  ;;  %v26836_v35 = vld [vmem:[%s27795_s13 + $0xb8] sm:$0xff]   ;;  %v9036_v23 = vrot.slane %v31071_v20, 1 }
 0x552   : > { %v9033_v44 = vsel %vm7734_vm3, %v9030_v6, %v9032_v60  ;;  %v9035_v32 = vsel %vm7734_vm3, %v9032_v60, %v9034_v3  ;;  %v16474_v15 = vrot.slane %v26836_v35, 2  ;;  %v16490_v35 = vrot.slane %v26853_v13, 2 }
 0x557   : > { %23804 = vmatmul.mubr.msk.bf16.gmra.mrb[216].mxu1 %vm547_vm0, %v8402_v54  ;;  %v16475_v54 = vsel %vm2201_vm2, %v16472_v50, %v16474_v15  ;;  %v26856_v50 = vld [vmem:[%s27795_s13 + $0x100] sm:$0xff]  }
 0x558   : > { %24548 = vmatmul.mubr.msk.bf16.vlgmr.msra.gmra.mrb[56].mxu0 %vm547_vm0, %v16455_v43  ;;  %23807 = vmatprep.mubr.msk.bf16.mxu1 %vm547_vm0, %v8404_v10  ;;  %v16476_v43 = vrot.slane %v26839_v46, 2 }
 0x559   : > { %24551 = vmatprep.mubr.msk.bf16.mxu0 %vm547_vm0, %v16457_v8  ;;  %24604 = vmatpush3.bf16.msra.mxu0 %v26870_v5  ;;  %v31025_v5 = vld [vmem:[%s27795_s13 + $0x74] sm:$0xff]   ;;  %v9037_v8 = vsel %vm7734_vm3, %v9034_v3, %v9036_v23 }
 0x55a   : > { %24605 = vmatprep.subr.bf16.mxu0 %v26871_v53  ;;  %v9028_v29 = vrot.slane %v31025_v5, 1  ;;  %v16477_v10 = vsel %vm2201_vm2, %v16474_v15, %v16476_v43  ;;  %v26857_v15 = vld [vmem:[%s27795_s13 + $0x108] sm:$0xff]  }
 0x55c   : > { %v9029_v1 = vsel %vm7734_vm3, %v9026_v18, %v9028_v29  ;;  %v9031_v49 = vsel %vm7734_vm3, %v9028_v29, %v9030_v6 }
 0x55d   : > { %24606 = vmatpush3.bf16.msra.mxu0 %v26871_v53  ;;  %v9039_v53 = vsel %vm7734_vm3, %v9036_v23, %v9038_v7 }
 0x55f   : > { %23808 = vmatmul.mubr.msk.bf16.gmra.mrb[220].mxu1 %vm547_vm0, %v8406_v62  ;;  %v9041_v62 = vsel %vm7734_vm3, %v9038_v7, %v9040_v4 }
 0x560   : > { %24552 = vmatmul.mubr.msk.bf16.gmra.mrb[60].mxu0 %vm547_vm0, %v16459_v61  ;;  %23815 = vmatprep.mubr.msk.bf16.mxu1 %vm547_vm0, %v9023_v59  ;;  %v16479_v61 = vsel %vm2201_vm2, %v16476_v43, %v16478_v14  ;;  %v26847_v59 = vld [vmem:[%s27795_s13 + $0xe0] sm:$0xff]  }
 0x561   : > { %24555 = vmatprep.mubr.msk.bf16.mxu0 %vm547_vm0, %v16461_v0  ;;  %v31107_v0 = vld [vmem:[%s27795_s13 + $0xb4] sm:$0xff]   ;;  %v31161_v43 = vld [vmem:[%s27795_s13 + $0xe4] sm:$0xff]  }
 0x562   : > { %v9044_v18 = vrot.slane %v31107_v0, 1  ;;  %v9056_v31 = vrot.slane %v31161_v43, 1 }
 0x564   : > { %v9045_v22 = vsel %vm7734_vm3, %v9042_v57, %v9044_v18  ;;  %v9047_v29 = vsel %vm7734_vm3, %v9044_v18, %v9046_v48 }
 0x567   : > { %23816 = vmatmul.mubr.msk.bf16.vlgmr.msra.gmra.mrb[168].mxu1 %vm547_vm0, %v9025_v36  ;;  %v16483_v36 = vsel %vm2201_vm2, %v16480_v41, %v16482_v39  ;;  %v26861_v41 = vld [vmem:[%s27795_s13 + $0x118] sm:$0xff]  }
 0x568   : > { %24556 = vmatmul.mubr.msk.bf16.gmra.mrb[64].mxu0 %vm547_vm0, %v16463_v9  ;;  %23872 = vmatpush3.bf16.msra.mxu1 %v30841_v38  ;;  %v16469_v38 = vsel %vm2201_vm2, %v16466_v34, %v16468_v2  ;;  %v16484_v9 = vrot.slane %v26847_v59, 2  ;;  %v26852_v34 = vld [vmem:[%s27795_s13 + $0xf0] sm:$0xff]   ;;  %v31185_v59 = vld [vmem:[%s27795_s13 + $0xfc] sm:$0xff]  }
 0x569   : > { %24559 = vmatprep.mubr.msk.bf16.mxu0 %vm547_vm0, %v16465_v40  ;;  %23819 = vmatprep.mubr.msk.bf16.mxu1 %vm547_vm0, %v9027_v37  ;;  %v26848_v40 = vld [vmem:[%s27795_s13 + $0xe8] sm:$0xff]   ;;  %v16488_v30 = vrot.slane %v26852_v34, 2  ;;  %v26868_v34 = vld [vmem:[%s27795_s13 + $0x130] sm:$0xff]  }
 0x56a   : > { %23873 = vmatprep.subr.bf16.mxu1 %v26851_v47  ;;  %v31125_v37 = vld [vmem:[%s27795_s13 + $0xc4] sm:$0xff]   ;;  %v31131_v2 = vld [vmem:[%s27795_s13 + $0xcc] sm:$0xff]   ;;  %v16486_v6 = vrot.slane %v26848_v40, 2 }
 0x56c   : > { %23874 = vmatpush3.bf16.msra.mxu1 %v26851_v47  ;;  %v16485_v47 = vsel %vm2201_vm2, %v16482_v39, %v16484_v9  ;;  %v16489_v60 = vsel %vm2201_vm2, %v16486_v6, %v16488_v30 }
 0x56d   : > { %23931 = vmatprep.subr.bf16.mxu1 %v31046_v21 }
 0x56f   : > { %23820 = vmatmul.mubr.msk.bf16.gmra.mrb[172].mxu1 %vm547_vm0, %v9029_v1  ;;  %v9050_v1 = vrot.slane %v31131_v2, 1 }
 0x570   : > { %24560 = vmatmul.mubr.msk.bf16.gmra.mrb[68].mxu0 %vm547_vm0, %v16467_v24  ;;  %23823 = vmatprep.mubr.msk.bf16.mxu1 %vm547_vm0, %v9031_v49  ;;  %v9048_v24 = vrot.slane %v31125_v37, 1 }
 0x571   : > { %24563 = vmatprep.mubr.msk.bf16.mxu0 %vm547_vm0, %v16469_v38  ;;  %v16487_v38 = vsel %vm2201_vm2, %v16484_v9, %v16486_v6  ;;  %v9062_v9 = vrot.slane %v31185_v59, 1  ;;  %v31203_v6 = vld [vmem:[%s27795_s13 + $0x10c] sm:$0xff]  }
 0x572   : > { %v9049_v49 = vsel %vm7734_vm3, %v9046_v48, %v9048_v24  ;;  %v9051_v3 = vsel %vm7734_vm3, %v9048_v24, %v9050_v1  ;;  %v26907_v24 = vld [vmem:[%s33239_s2 + $0x190] sm:$0xff]   ;;  %v9066_v13 = vrot.slane %v31203_v6, 1 }
 0x573   : > { %24663 = vmatprep.subr.bf16.mxu0 %v26907_v24 }
 0x577   : > { %23824 = vmatmul.mubr.msk.bf16.gmra.mrb[176].mxu1 %vm547_vm0, %v9033_v44  ;;  %v9052_v44 = vrot.slane %v31143_v42, 1 }
 0x578   : > { %24564 = vmatmul.mubr.msk.bf16.gmra.mrb[72].mxu0 %vm547_vm0, %v16471_v33  ;;  %23827 = vmatprep.mubr.msk.bf16.mxu1 %vm547_vm0, %v9035_v32  ;;  %v31149_v33 = vld [vmem:[%s27795_s13 + $0xdc] sm:$0xff]   ;;  %v16491_v32 = vsel %vm2201_vm2, %v16488_v30, %v16490_v35 }
 0x579   : > { %24567 = vmatprep.mubr.msk.bf16.mxu0 %vm547_vm0, %v16473_v25  ;;  %v16492_v25 = vrot.slane %v26856_v50, 2  ;;  %v9054_v46 = vrot.slane %v31149_v33, 1  ;;  %v9053_v23 = vsel %vm7734_vm3, %v9050_v1, %v9052_v44 }
 0x57b   : > { %v16493_v7 = vsel %vm2201_vm2, %v16490_v35, %v16492_v25  ;;  %v9055_v16 = vsel %vm7734_vm3, %v9052_v44, %v9054_v46  ;;  %v9057_v57 = vsel %vm7734_vm3, %v9054_v46, %v9056_v31 }
 0x57f   : > { %23828 = vmatmul.mubr.msk.bf16.gmra.mrb[180].mxu1 %vm547_vm0, %v9037_v8  ;;  %v31167_v8 = vld [vmem:[%s27795_s13 + $0xec] sm:$0xff]  }
 0x580   : > { %24568 = vmatmul.mubr.msk.bf16.gmra.mrb[76].mxu0 %vm547_vm0, %v16475_v54  ;;  %23831 = vmatprep.mubr.msk.bf16.mxu1 %vm547_vm0, %v9039_v53  ;;  %v26860_v54 = vld [vmem:[%s27795_s13 + $0x110] sm:$0xff]   ;;  %v9058_v14 = vrot.slane %v31167_v8, 1 }
 0x581   : > { %24571 = vmatprep.mubr.msk.bf16.mxu0 %vm547_vm0, %v16477_v10  ;;  %v16494_v10 = vrot.slane %v26857_v15, 2  ;;  %v16496_v53 = vrot.slane %v26860_v54, 2 }
 0x583   : > { %v16495_v4 = vsel %vm2201_vm2, %v16492_v25, %v16494_v10  ;;  %v16497_v56 = vsel %vm2201_vm2, %v16494_v10, %v16496_v53  ;;  %v31223_v25 = vld [vmem:[%s27795_s13 + $0x11c] sm:$0xff]  }
 0x584   : > { %v9070_v15 = vrot.slane %v31223_v25, 1 }
 0x587   : > { %23832 = vmatmul.mubr.msk.bf16.gmra.mrb[184].mxu1 %vm547_vm0, %v9041_v62  ;;  %v26864_v62 = vld [vmem:[%s27795_s13 + $0x120] sm:$0xff]  }
 0x588   : > { %24572 = vmatmul.mubr.msk.bf16.gmra.mrb[80].mxu0 %vm547_vm0, %v16479_v61  ;;  %23835 = vmatprep.mubr.msk.bf16.mxu1 %vm547_vm0, %v9043_v51  ;;  %v31179_v61 = vld [vmem:[%s27795_s13 + $0xf4] sm:$0xff]   ;;  %v16498_v51 = vrot.slane %v26861_v41, 2  ;;  %v16500_v18 = vrot.slane %v26864_v62, 2 }
 0x589   : > { %24575 = vmatprep.mubr.msk.bf16.mxu0 %vm547_vm0, %v16481_v28  ;;  %v9059_v28 = vsel %vm7734_vm3, %v9056_v31, %v9058_v14  ;;  %v9060_v39 = vrot.slane %v31179_v61, 1  ;;  %v31239_v31 = vld [vmem:[%s27795_s13 + $0x12c] sm:$0xff]   ;;  %v9487_v41 = vld [vmem:[%s27795_s13 + $0x54] sm:$0x8] }
 0x58a   : > { %v16499_v48 = vsel %vm2201_vm2, %v16496_v53, %v16498_v51  ;;  %v26877_v62 = vld [vmem:[%s27795_s13 + $0x134] ss:$0 sps:$4 sm:$0x11]  }
 0x58b   : > { %v9061_v40 = vsel %vm7734_vm3, %v9058_v14, %v9060_v39  ;;  %v9074_v14 = vrot.slane %v31239_v31, 1 }
 0x58f   : > { %23836 = vmatmul.mubr.msk.bf16.gmra.mrb[188].mxu1 %vm547_vm0, %v9045_v22  ;;  %v31197_v22 = vld [vmem:[%s27795_s13 + $0x104] sm:$0xff]  }
 0x590   : > { %24576 = vmatmul.mubr.msk.bf16.gmra.mrb[84].mxu0 %vm547_vm0, %v16483_v36  ;;  %23839 = vmatprep.mubr.msk.bf16.mxu1 %vm547_vm0, %v9047_v29  ;;  %v26865_v36 = vld [vmem:[%s27795_s13 + $0x128] sm:$0xff]   ;;  %v9063_v29 = vsel %vm7734_vm3, %v9060_v39, %v9062_v9  ;;  %v9064_v1 = vrot.slane %v31197_v22, 1  ;;  %v26908_v39 = vld [vmem:[%s33239_s2 + $0x198] sm:$0xff]  }
 0x591   : > { %24579 = vmatprep.mubr.msk.bf16.mxu0 %vm547_vm0, %v16485_v47  ;;  %v16501_v47 = vsel %vm2201_vm2, %v16498_v51, %v16500_v18  ;;  %v16502_v30 = vrot.slane %v26865_v36, 2  ;;  %v21056_v51 = vcombine.low %v9487_v41, %v30982_v11  ;;  %v26879_v11 = vld [vmem:[%s27795_s13 + $0xc0] sm:$0xff]   ;;  %v26882_v36 = vld [vmem:[%s27795_s13 + $0xc8] sm:$0xff]  }
 0x592   : > { %v9065_v50 = vsel %vm7734_vm3, %v9062_v9, %v9064_v1  ;;  %v9067_v44 = vsel %vm7734_vm3, %v9064_v1, %v9066_v13  ;;  %v26893_v41 = vld [vmem:[%s27795_s13 + $0x120] sm:$0xff]  }
 0x593   : > { %v9500_v9 = vrot.slane %v21056_v51, 3  ;;  %v26897_v51 = vld [vmem:[%s27795_s13 + $0x138] sm:$0xff]  }
 0x597   : > { %23840 = vmatmul.mubr.msk.bf16.gmra.mrb[192].mxu1 %vm547_vm0, %v9049_v49  ;;  %v16503_v49 = vsel %vm2201_vm2, %v16500_v18, %v16502_v30  ;;  %v9076_v18 = vrot.slane %v26877_v62, 1 }
 0x598   : > { %24580 = vmatmul.mubr.msk.bf16.gmra.mrb[88].mxu0 %vm547_vm0, %v16487_v38  ;;  %23843 = vmatprep.mubr.msk.bf16.mxu1 %vm547_vm0, %v9051_v3  ;;  %v16504_v38 = vrot.slane %v26868_v34, 2  ;;  %v31218_v3 = vld [vmem:[%s27795_s13 + $0x114] sm:$0xff]   ;;  %v9503_v34 = vrot.slane %v31007_v45, 3  ;;  %v9507_v45 = vrot.slane %v31025_v5, 3  ;;  %v9511_v5 = vrot.slane %v31052_v26, 3 }
 0x599   : > { %24583 = vmatprep.mubr.msk.bf16.mxu0 %vm547_vm0, %v16489_v60  ;;  %v26869_v60 = vld [vmem:[%s27795_s13 + $0x138] ss:$0 sps:$4 sm:$0x33]   ;;  %v9515_v26 = vrot.slane %v31071_v20, 3  ;;  %v9519_v20 = vrot.slane %v31089_v27, 3  ;;  %v9523_v27 = vrot.slane %v31107_v0, 3 }
 0x59a   : > { %v16505_v35 = vsel %vm2201_vm2, %v16502_v30, %v16504_v38  ;;  %v16506_v46 = vrot.slane %v26869_v60, 2  ;;  %v26886_v60 = vld [vmem:[%s27795_s13 + $0xe8] sm:$0xff]   ;;  %v9527_v0 = vrot.slane %v31125_v37, 3  ;;  %v9531_v37 = vrot.slane %v31143_v42, 3 }
 0x59b   : > { %v9535_v42 = vrot.slane %v31161_v43, 3  ;;  %v9539_v43 = vrot.slane %v31179_v61, 3  ;;  %v9543_v61 = vrot.slane %v31197_v22, 3  ;;  %v9547_v22 = vrot.slane %v31218_v3, 3 }
 0x59f   : > { %23844 = vmatmul.mubr.msk.bf16.gmra.mrb[196].mxu1 %vm547_vm0, %v9053_v23  ;;  %v16507_v23 = vsel %vm2201_vm2, %v16504_v38, %v16506_v46  ;;  %v26896_v38 = vld [vmem:[%s33239_s2 + $0xe8] sm:$0xff]  }
 0x5a0   : > { %24584 = vmatmul.mubr.msk.bf16.gmra.mrb[92].mxu0 %vm547_vm0, %v16491_v32  ;;  %23847 = vmatprep.mubr.msk.bf16.mxu1 %vm547_vm0, %v9055_v16  ;;  %v9068_v32 = vrot.slane %v31218_v3, 1  ;;  %v31235_v16 = vld [vmem:[%s27795_s13 + $0x124] sm:$0xff]  }
 0x5a1   : > { %24587 = vmatprep.mubr.msk.bf16.mxu0 %vm547_vm0, %v16493_v7  ;;  %v26874_v7 = vld [vmem:[%s27795_s13 + $0xa8] sm:$0xff]   ;;  %v9072_v53 = vrot.slane %v31235_v16, 1 }
 0x5a2   : > { %v9069_v54 = vsel %vm7734_vm3, %v9066_v13, %v9068_v32  ;;  %v9071_v10 = vsel %vm7734_vm3, %v9068_v32, %v9070_v15  ;;  %v31289_v13 = vld [vmem:[%s33239_s2 + $0xf0] sm:$0xff]  }
 0x5a7   : > { %23848 = vmatmul.mubr.msk.bf16.gmra.mrb[200].mxu1 %vm547_vm0, %v9057_v57  ;;  %v26878_v57 = vld [vmem:[%s27795_s13 + $0xb8] sm:$0xff]  }
 0x5a8   : > { %24588 = vmatmul.mubr.msk.bf16.gmra.mrb[96].mxu0 %vm547_vm0, %v16495_v4  ;;  %23851 = vmatprep.mubr.msk.bf16.mxu1 %vm547_vm0, %v9059_v28  ;;  %v26875_v4 = vld [vmem:[%s27795_s13 + $0xb0] sm:$0xff]   ;;  %v9075_v28 = vsel %vm7734_vm3, %v9072_v53, %v9074_v14 }
 0x5a9   : > { %24591 = vmatprep.mubr.msk.bf16.mxu0 %vm547_vm0, %v16497_v56  ;;  %v9073_v56 = vsel %vm7734_vm3, %v9070_v15, %v9072_v53  ;;  %v26889_v15 = vld [vmem:[%s27795_s13 + $0x100] sm:$0xff]   ;;  %v26892_v53 = vld [vmem:[%s27795_s13 + $0x118] sm:$0xff]  }
 0x5af   : > { %23852 = vmatmul.mubr.msk.bf16.gmra.mrb[204].mxu1 %vm547_vm0, %v9061_v40  ;;  %v9077_v40 = vsel %vm7734_vm3, %v9074_v14, %v9076_v18 }
 0x5b0   : > { %24592 = vmatmul.mubr.msk.bf16.gmra.mrb[100].mxu0 %vm547_vm0, %v16499_v48  ;;  %23855 = vmatprep.mubr.msk.bf16.mxu1 %vm547_vm0, %v9063_v29  ;;  %v9501_v48 = vrot.slane %v30993_v52, 3  ;;  %v9505_v52 = vrot.slane %v31013_v58, 3  ;;  %v26883_v29 = vld [vmem:[%s27795_s13 + $0xd0] sm:$0xff]   ;;  %v9509_v58 = vrot.slane %v31031_v63, 3  ;;  %v9513_v63 = vrot.slane %v31058_v55, 3 }
 0x5b1   : > { %24595 = vmatprep.mubr.msk.bf16.mxu0 %vm547_vm0, %v16501_v47  ;;  %v9517_v55 = vrot.slane %v31077_v12, 3  ;;  %v9521_v12 = vrot.slane %v31095_v19, 3  ;;  %v9525_v19 = vrot.slane %v31113_v17, 3  ;;  %v9529_v17 = vrot.slane %v31131_v2, 3 }
 0x5b2   : > { %v9502_v47 = vsel %vm477_vm1, %v9500_v9, %v9501_v48  ;;  %v9504_v30 = vsel %vm477_vm1, %v9501_v48, %v9503_v34  ;;  %v9506_v1 = vsel %vm477_vm1, %v9503_v34, %v9505_v52  ;;  %v9512_v46 = vsel %vm477_vm1, %v9509_v58, %v9511_v5  ;;  %v26898_v9 = vld [vmem:[%s27795_s13 + $0x140] sm:$0xff]   ;;  %v26899_v48 = vld [vmem:[%s27795_s13 + $0x148] sm:$0xff]  }
 0x5b3   : > { %v9514_v32 = vsel %vm477_vm1, %v9511_v5, %v9513_v63  ;;  %v9520_v14 = vsel %vm477_vm1, %v9517_v55, %v9519_v20  ;;  %v9526_v62 = vsel %vm477_vm1, %v9523_v27, %v9525_v19  ;;  %v9530_v18 = vsel %vm477_vm1, %v9527_v0, %v9529_v17 }
 0x5b4   : > { %v9533_v2 = vrot.slane %v31149_v33, 3  ;;  %v9537_v33 = vrot.slane %v31167_v8, 3  ;;  %v9541_v8 = vrot.slane %v31185_v59, 3  ;;  %v9545_v59 = vrot.slane %v31203_v6, 3 }
 0x5b6   : > { %v9536_v34 = vsel %vm477_vm1, %v9533_v2, %v9535_v42 }
 0x5b7   : > { %23856 = vmatmul.mubr.msk.bf16.gmra.mrb[208].mxu1 %vm547_vm0, %v9065_v50  ;;  %v9508_v50 = vsel %vm477_vm1, %v9505_v52, %v9507_v45  ;;  %v9538_v52 = vsel %vm477_vm1, %v9535_v42, %v9537_v33  ;;  %v26924_v42 = vld [vmem:[%s27795_s13 + $0xe8] sm:$0xff]  }
 0x5b8   : > { %24596 = vmatmul.mubr.msk.bf16.gmra.mrb[104].mxu0 %vm547_vm0, %v16503_v49  ;;  %23859 = vmatprep.mubr.msk.bf16.mxu1 %vm547_vm0, %v9067_v44  ;;  %v26885_v49 = vld [vmem:[%s27795_s13 + $0xe0] sm:$0xff]   ;;  %v26888_v44 = vld [vmem:[%s27795_s13 + $0xf8] sm:$0xff]  }
 0x5b9   : > { %24599 = vmatprep.mubr.msk.bf16.mxu0 %vm547_vm0, %v16505_v35  ;;  %v26887_v35 = vld [vmem:[%s27795_s13 + $0xf0] sm:$0xff]  }
 0x5bf   : > { %23860 = vmatmul.mubr.msk.bf16.gmra.mrb[212].mxu1 %vm547_vm0, %v9069_v54  ;;  %v9518_v54 = vsel %vm477_vm1, %v9515_v26, %v9517_v55 }
 0x5c0   : > { %24600 = vmatmul.mubr.msk.bf16.gmra.mrb[108].mxu0 %vm547_vm0, %v16507_v23  ;;  %23863 = vmatprep.mubr.msk.bf16.mxu1 %vm547_vm0, %v9071_v10  ;;  %v26890_v23 = vld [vmem:[%s27795_s13 + $0x108] sm:$0xff]   ;;  %v26891_v10 = vld [vmem:[%s27795_s13 + $0x110] sm:$0xff]  }
 0x5c1   : > { %24607 = vmatprep.mubr.msk.bf16.mxu0 %vm547_vm0, %v26874_v7  ;;  %v9516_v7 = vsel %vm477_vm1, %v9513_v63, %v9515_v26  ;;  %v9549_v63 = vrot.slane %v31223_v25, 3  ;;  %v26913_v26 = vld [vmem:[%s27795_s13 + $0xc0] sm:$0xff]   ;;  %v9551_v25 = vrot.slane %v31235_v16, 3  ;;  %v26967_v16 = vld [vmem:[%s33239_s2 + $0x1a8] sm:$0xff]  }
 0x5c3   : > { %v9550_v55 = vsel %vm477_vm1, %v9547_v22, %v9549_v63 }
 0x5c7   : > { %23864 = vmatmul.mubr.msk.bf16.gmra.mrb[216].mxu1 %vm547_vm0, %v9073_v56  ;;  %v9524_v56 = vsel %vm477_vm1, %v9521_v12, %v9523_v27  ;;  %v26916_v27 = vld [vmem:[%s27795_s13 + $0x60] sm:$0xff]  }
 0x5c8   : > { %24608 = vmatmul.mubr.msk.bf16.vlgmr.msra.gmra.mrb[56].mxu0 %vm547_vm0, %v26875_v4  ;;  %23867 = vmatprep.mubr.msk.bf16.mxu1 %vm547_vm0, %v9075_v28  ;;  %v9522_v4 = vsel %vm477_vm1, %v9519_v20, %v9521_v12  ;;  %v26895_v28 = vld [vmem:[%s27795_s13 + $0x130] sm:$0xff]   ;;  %v9552_v20 = vsel %vm477_vm1, %v9549_v63, %v9551_v25 }
 0x5c9   : > { %24611 = vmatprep.mubr.msk.bf16.mxu0 %vm547_vm0, %v26878_v57  ;;  %24664 = vmatpush3.bf16.msra.mxu0 %v26907_v24  ;;  %v26884_v24 = vld [vmem:[%s27795_s13 + $0xd8] sm:$0xff]   ;;  %v26894_v57 = vld [vmem:[%s27795_s13 + $0x128] sm:$0xff]   ;;  %v26912_v12 = vld [vmem:[%s27795_s13 + $0x134] ss:$0 sps:$4 sm:$0x77]  }
 0x5ca   : > { %24665 = vmatprep.subr.bf16.mxu0 %v26908_v39 }
 0x5cd   : > { %24666 = vmatpush3.bf16.msra.mxu0 %v26908_v39  ;;  %v9528_v39 = vsel %vm477_vm1, %v9525_v19, %v9527_v0  ;;  %v9555_v19 = vrot.slane %v26912_v12, 3  ;;  %v26920_v0 = vld [vmem:[%s27795_s13 + $0xd8] sm:$0xff]  }
 0x5cf   : > { %23868 = vmatmul.mubr.msk.bf16.gmra.mrb[220].mxu1 %vm547_vm0, %v9077_v40  ;;  %v26900_v40 = vld [vmem:[%s27795_s13 + $0x150] sm:$0xff]  }
 0x5d0   : > { %24612 = vmatmul.mubr.msk.bf16.gmra.mrb[60].mxu0 %vm547_vm0, %v26879_v11  ;;  %23875 = vmatprep.mubr.msk.bf16.mxu1 %vm547_vm0, %v9502_v47  ;;  %v9532_v11 = vsel %vm477_vm1, %v9529_v17, %v9531_v37  ;;  %v26901_v47 = vld [vmem:[%s27795_s13 + $0x158] sm:$0xff]  }
 0x5d1   : > { %24615 = vmatprep.mubr.msk.bf16.mxu0 %vm547_vm0, %v26882_v36  ;;  %v9534_v36 = vsel %vm477_vm1, %v9531_v37, %v9533_v2  ;;  %v26921_v37 = vld [vmem:[%s27795_s13 + $0x70] sm:$0xff]   ;;  %v17743_v2 = vrot.slane %v26920_v0, 3  ;;  %v26938_v0 = vld [vmem:[%s27795_s13 + $0xb8] sm:$0xff]  }
 0x5d7   : > { %23876 = vmatmul.mubr.msk.bf16.vlgmr.msra.gmra.mrb[168].mxu1 %vm547_vm0, %v9504_v30  ;;  %v9540_v30 = vsel %vm477_vm1, %v9537_v33, %v9539_v43 }
 0x5d8   : > { %24616 = vmatmul.mubr.msk.bf16.gmra.mrb[64].mxu0 %vm547_vm0, %v26883_v29  ;;  %23932 = vmatpush3.bf16.msra.mxu1 %v31046_v21  ;;  %v9510_v21 = vsel %vm477_vm1, %v9507_v45, %v9509_v58  ;;  %v26902_v29 = vld [vmem:[%s27795_s13 + $0x160] sm:$0xff]   ;;  %v26904_v45 = vld [vmem:[%s27795_s13 + $0x170] sm:$0xff]   ;;  %v26905_v58 = vld [vmem:[%s27795_s13 + $0x178] sm:$0xff]  }
 0x5d9   : > { %24619 = vmatprep.mubr.msk.bf16.mxu0 %vm547_vm0, %v26884_v24  ;;  %23879 = vmatprep.mubr.msk.bf16.mxu1 %vm547_vm0, %v9506_v1  ;;  %v26903_v24 = vld [vmem:[%s27795_s13 + $0x168] sm:$0xff]   ;;  %v9542_v1 = vsel %vm477_vm1, %v9539_v43, %v9541_v8  ;;  %v26925_v43 = vld [vmem:[%s27795_s13 + $0x80] sm:$0xff]  }
 0x5da   : > { %23933 = vmatprep.subr.bf16.mxu1 %v26896_v38 }
 0x5dc   : > { %23934 = vmatpush3.bf16.msra.mxu1 %v26896_v38  ;;  %v26966_v38 = vld [vmem:[%s33239_s2 + $0x1a0] sm:$0xff]  }
 0x5dd   : > { %23991 = vmatprep.subr.bf16.mxu1 %v31289_v13  ;;  %24723 = vmatprep.subr.bf16.mxu0 %v26966_v38 }
 0x5df   : > { %23880 = vmatmul.mubr.msk.bf16.gmra.mrb[172].mxu1 %vm547_vm0, %v9508_v50  ;;  %v26910_v50 = vld [vmem:[%s27795_s13 + $0xb0] sm:$0xff]  }
 0x5e0   : > { %24620 = vmatmul.mubr.msk.bf16.gmra.mrb[68].mxu0 %vm547_vm0, %v26885_v49  ;;  %23883 = vmatprep.mubr.msk.bf16.mxu1 %vm547_vm0, %v9510_v21  ;;  %v9544_v49 = vsel %vm477_vm1, %v9541_v8, %v9543_v61  ;;  %v9546_v21 = vsel %vm477_vm1, %v9543_v61, %v9545_v59  ;;  %v17733_v5 = vrot.slane %v26910_v50, 3  ;;  %v26947_v8 = vld [vmem:[%s33239_s2 + $0xf8] sm:$0xff]   ;;  %v26929_v50 = vld [vmem:[%s27795_s13 + $0x90] sm:$0xff]  }
 0x5e1   : > { %24623 = vmatprep.mubr.msk.bf16.mxu0 %vm547_vm0, %v26886_v60  ;;  %v26909_v60 = vld [vmem:[%s27795_s13 + $0xa8] sm:$0xf8]  }
 0x5e2   : > { %v17732_v6 = vrot.slane %v26909_v60, 3 }
 0x5e7   : > { %23884 = vmatmul.mubr.msk.bf16.gmra.mrb[176].mxu1 %vm547_vm0, %v9512_v46  ;;  %v9548_v46 = vsel %vm477_vm1, %v9545_v59, %v9547_v22  ;;  %v26928_v59 = vld [vmem:[%s27795_s13 + $0xf8] sm:$0xff]  }
 0x5e8   : > { %24624 = vmatmul.mubr.msk.bf16.gmra.mrb[72].mxu0 %vm547_vm0, %v26887_v35  ;;  %23887 = vmatprep.mubr.msk.bf16.mxu1 %vm547_vm0, %v9514_v32  ;;  %v26906_v35 = vld [vmem:[%s27795_s13 + $0x180] sm:$0xff]   ;;  %v17734_v32 = vsel %vm477_vm1, %v17732_v6, %v17733_v5 }
 0x5e9   : > { %24627 = vmatprep.mubr.msk.bf16.mxu0 %vm547_vm0, %v26888_v44  ;;  %v26911_v44 = vld [vmem:[%s27795_s13 + $0xb8] sm:$0xff]  }
 0x5ea   : > { %v17735_v3 = vrot.slane %v26911_v44, 3 }
 0x5ef   : > { %23888 = vmatmul.mubr.msk.bf16.gmra.mrb[180].mxu1 %vm547_vm0, %v9516_v7  ;;  %v17736_v7 = vsel %vm477_vm1, %v17733_v5, %v17735_v3  ;;  %v10184_v5 = vrot.slane %v26929_v50, 1 }
 0x5f0   : > { %24628 = vmatmul.mubr.msk.bf16.gmra.mrb[76].mxu0 %vm547_vm0, %v26889_v15  ;;  %23891 = vmatprep.mubr.msk.bf16.mxu1 %vm547_vm0, %v9518_v54  ;;  %v17737_v15 = vrot.slane %v26913_v26, 3  ;;  %v26914_v54 = vld [vmem:[%s27795_s13 + $0xc8] sm:$0xff]   ;;  %v26935_v26 = vld [vmem:[%s27795_s13 + $0x110] sm:$0xff]  }
 0x5f1   : > { %24631 = vmatprep.mubr.msk.bf16.mxu0 %vm547_vm0, %v26890_v23  ;;  %v9553_v23 = vrot.slane %v31239_v31, 3  ;;  %v17739_v31 = vrot.slane %v26914_v54, 3 }
 0x5f3   : > { %v9556_v17 = vsel %vm477_vm1, %v9553_v23, %v9555_v19 }
 0x5f7   : > { %23892 = vmatmul.mubr.msk.bf16.gmra.mrb[184].mxu1 %vm547_vm0, %v9520_v14  ;;  %v9554_v14 = vsel %vm477_vm1, %v9551_v25, %v9553_v23  ;;  %v17757_v23 = vrot.slane %v26935_v26, 3 }
 0x5f8   : > { %24632 = vmatmul.mubr.msk.bf16.gmra.mrb[80].mxu0 %vm547_vm0, %v26891_v10  ;;  %23895 = vmatprep.mubr.msk.bf16.mxu1 %vm547_vm0, %v9522_v4  ;;  %v17738_v10 = vsel %vm477_vm1, %v17735_v3, %v17737_v15  ;;  %v26915_v4 = vld [vmem:[%s27795_s13 + $0x58] sm:$0xfe]   ;;  %v26933_v3 = vld [vmem:[%s27795_s13 + $0xa0] sm:$0xff]  }
 0x5f9   : > { %24635 = vmatprep.mubr.msk.bf16.mxu0 %vm547_vm0, %v26892_v53  ;;  %v26919_v53 = vld [vmem:[%s27795_s13 + $0xd0] sm:$0xff]  }
 0x5ff   : > { %23896 = vmatmul.mubr.msk.bf16.gmra.mrb[188].mxu1 %vm547_vm0, %v9524_v56  ;;  %v10172_v56 = vrot.slane %v26916_v27, 1  ;;  %v26937_v27 = vld [vmem:[%s27795_s13 + $0xb0] sm:$0xff]  }
 0x600   : > { %24636 = vmatmul.mubr.msk.bf16.gmra.mrb[84].mxu0 %vm547_vm0, %v26893_v41  ;;  %23899 = vmatprep.mubr.msk.bf16.mxu1 %vm547_vm0, %v9526_v62  ;;  %v17741_v41 = vrot.slane %v26919_v53, 3  ;;  %v17740_v62 = vsel %vm477_vm1, %v17737_v15, %v17739_v31 }
 0x601   : > { %24639 = vmatprep.mubr.msk.bf16.mxu0 %vm547_vm0, %v26894_v57  ;;  %v10171_v57 = vrot.slane %v26915_v4, 1 }
 0x607   : > { %23900 = vmatmul.mubr.msk.bf16.gmra.mrb[192].mxu1 %vm547_vm0, %v9528_v39  ;;  %v26923_v39 = vld [vmem:[%s27795_s13 + $0xe0] sm:$0xff]  }
 0x608   : > { %24640 = vmatmul.mubr.msk.bf16.gmra.mrb[88].mxu0 %vm547_vm0, %v26895_v28  ;;  %23903 = vmatprep.mubr.msk.bf16.mxu1 %vm547_vm0, %v9530_v18  ;;  %v26917_v28 = vld [vmem:[%s27795_s13 + $0x68] sm:$0xff]   ;;  %v10173_v18 = vsel %vm7734_vm3, %v10171_v57, %v10172_v56 }
 0x609   : > { %24643 = vmatprep.mubr.msk.bf16.mxu0 %vm547_vm0, %v26897_v51  ;;  %v17742_v51 = vsel %vm477_vm1, %v17739_v31, %v17741_v41 }
 0x60f   : > { %23904 = vmatmul.mubr.msk.bf16.gmra.mrb[196].mxu1 %vm547_vm0, %v9532_v11  ;;  %v10176_v11 = vrot.slane %v26921_v37, 1  ;;  %v10194_v37 = vrot.slane %v26938_v0, 1 }
 0x610   : > { %24644 = vmatmul.mubr.msk.bf16.gmra.mrb[92].mxu0 %vm547_vm0, %v26898_v9  ;;  %23907 = vmatprep.mubr.msk.bf16.mxu1 %vm547_vm0, %v9534_v36  ;;  %v10174_v9 = vrot.slane %v26917_v28, 1  ;;  %v17744_v36 = vsel %vm477_vm1, %v17741_v41, %v17743_v2  ;;  %v10192_v41 = vrot.slane %v26937_v27, 1  ;;  %v26943_v28 = vld [vmem:[%s27795_s13 + $0x130] sm:$0xff]  }
 0x611   : > { %24647 = vmatprep.mubr.msk.bf16.mxu0 %vm547_vm0, %v26899_v48  ;;  %v17745_v48 = vrot.slane %v26923_v39, 3  ;;  %v26941_v39 = vld [vmem:[%s27795_s13 + $0xc0] sm:$0xff]  }
 0x612   : > { %v10175_v33 = vsel %vm7734_vm3, %v10172_v56, %v10174_v9  ;;  %v26940_v56 = vld [vmem:[%s27795_s13 + $0x128] sm:$0xff]  }
 0x617   : > { %23908 = vmatmul.mubr.msk.bf16.gmra.mrb[200].mxu1 %vm547_vm0, %v9536_v34  ;;  %v26927_v34 = vld [vmem:[%s27795_s13 + $0xf0] sm:$0xff]  }
 0x618   : > { %24648 = vmatmul.mubr.msk.bf16.gmra.mrb[96].mxu0 %vm547_vm0, %v26900_v40  ;;  %23911 = vmatprep.mubr.msk.bf16.mxu1 %vm547_vm0, %v9538_v52  ;;  %v26922_v40 = vld [vmem:[%s27795_s13 + $0x78] sm:$0xff]   ;;  %v10177_v52 = vsel %vm7734_vm3, %v10174_v9, %v10176_v11  ;;  %v10196_v9 = vrot.slane %v26941_v39, 1 }
 0x619   : > { %24651 = vmatprep.mubr.msk.bf16.mxu0 %vm547_vm0, %v26901_v47  ;;  %v17746_v47 = vsel %vm477_vm1, %v17743_v2, %v17745_v48  ;;  %v17765_v2 = vrot.slane %v26943_v28, 3 }
 0x61f   : > { %23912 = vmatmul.mubr.msk.bf16.gmra.mrb[204].mxu1 %vm547_vm0, %v9540_v30  ;;  %v17749_v30 = vrot.slane %v26927_v34, 3  ;;  %v26945_v34 = vld [vmem:[%s27795_s13 + $0xd0] sm:$0xff]  }
 0x620   : > { %24652 = vmatmul.mubr.msk.bf16.gmra.mrb[100].mxu0 %vm547_vm0, %v26902_v29  ;;  %23915 = vmatprep.mubr.msk.bf16.mxu1 %vm547_vm0, %v9542_v1  ;;  %v17747_v29 = vrot.slane %v26924_v42, 3  ;;  %v10180_v1 = vrot.slane %v26925_v43, 1  ;;  %v26942_v42 = vld [vmem:[%s27795_s13 + $0xc8] sm:$0xff]  }
 0x621   : > { %24655 = vmatprep.mubr.msk.bf16.mxu0 %vm547_vm0, %v26903_v24  ;;  %v10178_v24 = vrot.slane %v26922_v40, 1  ;;  %v26948_v40 = vld [vmem:[%s27795_s13 + $0x140] sm:$0xff]   ;;  %v10198_v43 = vrot.slane %v26942_v42, 1  ;;  %v26971_v42 = vld [vmem:[%s27795_s13 + $0xb4] sm:$0xff]  }
 0x622   : > { %v17748_v61 = vsel %vm477_vm1, %v17745_v48, %v17747_v29 }
 0x623   : > { %v10181_v60 = vsel %vm7734_vm3, %v10178_v24, %v10180_v1 }
 0x627   : > { %23916 = vmatmul.mubr.msk.bf16.gmra.mrb[208].mxu1 %vm547_vm0, %v9544_v49  ;;  %v26931_v49 = vld [vmem:[%s27795_s13 + $0x100] sm:$0xff]  }
 0x628   : > { %24656 = vmatmul.mubr.msk.bf16.gmra.mrb[104].mxu0 %vm547_vm0, %v26904_v45  ;;  %23919 = vmatprep.mubr.msk.bf16.mxu1 %vm547_vm0, %v9546_v21  ;;  %v10179_v45 = vsel %vm7734_vm3, %v10176_v11, %v10178_v24  ;;  %v17751_v21 = vrot.slane %v26928_v59, 3  ;;  %v17753_v6 = vrot.slane %v26931_v49, 3  ;;  %v26944_v11 = vld [vmem:[%s27795_s13 + $0x138] sm:$0xff]  }
 0x629   : > { %24659 = vmatprep.mubr.msk.bf16.mxu0 %vm547_vm0, %v26905_v58  ;;  %v26926_v58 = vld [vmem:[%s27795_s13 + $0x88] sm:$0xff]  }
 0x62a   : > { %v10182_v22 = vrot.slane %v26926_v58, 1  ;;  %v17752_v63 = vsel %vm477_vm1, %v17749_v30, %v17751_v21 }
 0x62c   : > { %v10183_v44 = vsel %vm7734_vm3, %v10180_v1, %v10182_v22  ;;  %v10199_v1 = vsel %vm7734_vm3, %v10196_v9, %v10198_v43 }
 0x62f   : > { %23920 = vmatmul.mubr.msk.bf16.gmra.mrb[212].mxu1 %vm547_vm0, %v9548_v46  ;;  %v26930_v46 = vld [vmem:[%s27795_s13 + $0x98] sm:$0xff]  }
 0x630   : > { %24660 = vmatmul.mubr.msk.bf16.gmra.mrb[108].mxu0 %vm547_vm0, %v26906_v35  ;;  %23923 = vmatprep.mubr.msk.bf16.mxu1 %vm547_vm0, %v9550_v55  ;;  %v26932_v35 = vld [vmem:[%s27795_s13 + $0x108] sm:$0xff]   ;;  %v10185_v55 = vsel %vm7734_vm3, %v10182_v22, %v10184_v5  ;;  %v10186_v15 = vrot.slane %v26930_v46, 1 }
 0x631   : > { %24667 = vmatprep.mubr.msk.bf16.mxu0 %vm547_vm0, %v17734_v32  ;;  %v17754_v32 = vsel %vm477_vm1, %v17751_v21, %v17753_v6  ;;  %v17755_v25 = vrot.slane %v26932_v35, 3 }
 0x632   : > { %v10187_v12 = vsel %vm7734_vm3, %v10184_v5, %v10186_v15 }
 0x633   : > { %v17756_v54 = vsel %vm477_vm1, %v17753_v6, %v17755_v25  ;;  %v17758_v53 = vsel %vm477_vm1, %v17755_v25, %v17757_v23  ;;  %v26953_v6 = vld [vmem:[%s27795_s13 + $0x158] sm:$0xff]  }
 0x634   : > { %v17775_v26 = vrot.slane %v26953_v6, 3 }
 0x637   : > { %23924 = vmatmul.mubr.msk.bf16.gmra.mrb[216].mxu1 %vm547_vm0, %v9552_v20  ;;  %v26936_v20 = vld [vmem:[%s27795_s13 + $0x118] sm:$0xff]  }
 0x638   : > { %24668 = vmatmul.mubr.msk.bf16.vlgmr.msra.gmra.mrb[56].mxu0 %vm547_vm0, %v17736_v7  ;;  %23927 = vmatprep.mubr.msk.bf16.mxu1 %vm547_vm0, %v9554_v14  ;;  %v10188_v7 = vrot.slane %v26933_v3, 1  ;;  %v26939_v14 = vld [vmem:[%s27795_s13 + $0x120] sm:$0xff]  }
 0x639   : > { %24671 = vmatprep.mubr.msk.bf16.mxu0 %vm547_vm0, %v17738_v10  ;;  %24724 = vmatpush3.bf16.msra.mxu0 %v26966_v38  ;;  %v31456_v38 = vld [vmem:[%s33239_s2 + $0x100] sm:$0xff]   ;;  %v26934_v10 = vld [vmem:[%s27795_s13 + $0xa8] sm:$0xff]   ;;  %v17761_v19 = vrot.slane %v26939_v14, 3 }
 0x63a   : > { %24725 = vmatprep.subr.bf16.mxu0 %v26967_v16  ;;  %v10189_v4 = vsel %vm7734_vm3, %v10186_v15, %v10188_v7  ;;  %v10190_v31 = vrot.slane %v26934_v10, 1 }
 0x63d   : > { %24726 = vmatpush3.bf16.msra.mxu0 %v26967_v16  ;;  %v17759_v16 = vrot.slane %v26936_v20, 3 }
 0x63f   : > { %23928 = vmatmul.mubr.msk.bf16.gmra.mrb[220].mxu1 %vm547_vm0, %v9556_v17  ;;  %v17760_v57 = vsel %vm477_vm1, %v17757_v23, %v17759_v16  ;;  %v17762_v17 = vsel %vm477_vm1, %v17759_v16, %v17761_v19  ;;  %v26957_v23 = vld [vmem:[%s27795_s13 + $0x168] sm:$0xff]  }
 0x640   : > { %24672 = vmatmul.mubr.msk.bf16.gmra.mrb[60].mxu0 %vm547_vm0, %v17740_v62  ;;  %23935 = vmatprep.mubr.msk.bf16.mxu1 %vm547_vm0, %v10173_v18  ;;  %v10191_v62 = vsel %vm7734_vm3, %v10188_v7, %v10190_v31  ;;  %v17763_v18 = vrot.slane %v26940_v56, 3  ;;  %v17779_v14 = vrot.slane %v26957_v23, 3 }
 0x641   : > { %24675 = vmatprep.mubr.msk.bf16.mxu0 %vm547_vm0, %v17742_v51  ;;  %v10193_v51 = vsel %vm7734_vm3, %v10190_v31, %v10192_v41 }
 0x642   : > { %v17764_v48 = vsel %vm477_vm1, %v17761_v19, %v17763_v18  ;;  %v26961_v19 = vld [vmem:[%s27795_s13 + $0x178] sm:$0xff]  }
 0x643   : > { %v17783_v28 = vrot.slane %v26961_v19, 3 }
 0x647   : > { %23936 = vmatmul.mubr.msk.bf16.vlgmr.msra.gmra.mrb[168].mxu1 %vm547_vm0, %v10175_v33  ;;  %v17766_v33 = vsel %vm477_vm1, %v17763_v18, %v17765_v2 }
 0x648   : > { %24676 = vmatmul.mubr.msk.bf16.gmra.mrb[64].mxu0 %vm547_vm0, %v17744_v36  ;;  %23992 = vmatpush3.bf16.msra.mxu1 %v31289_v13  ;;  %v17750_v13 = vsel %vm477_vm1, %v17747_v29, %v17749_v30  ;;  %v10195_v36 = vsel %vm7734_vm3, %v10192_v41, %v10194_v37  ;;  %v10200_v29 = vrot.slane %v26945_v34, 1  ;;  %v26949_v30 = vld [vmem:[%s27795_s13 + $0x148] sm:$0xff]  }
 0x649   : > { %24679 = vmatprep.mubr.msk.bf16.mxu0 %vm547_vm0, %v17746_v47  ;;  %23939 = vmatprep.mubr.msk.bf16.mxu1 %vm547_vm0, %v10177_v52  ;;  %v10197_v47 = vsel %vm7734_vm3, %v10194_v37, %v10196_v9  ;;  %v17767_v52 = vrot.slane %v26944_v11, 3  ;;  %v17771_v49 = vrot.slane %v26949_v30, 3 }
 0x64a   : > { %23993 = vmatprep.subr.bf16.mxu1 %v26947_v8  ;;  %v10201_v58 = vsel %vm7734_vm3, %v10198_v43, %v10200_v29  ;;  %v18404_v43 = vrot.slane %v26971_v42, 2  ;;  %v26990_v42 = vld [vmem:[%s27795_s13 + $0xfc] sm:$0xff]  }
 0x64b   : > { %v17768_v24 = vsel %vm477_vm1, %v17765_v2, %v17767_v52  ;;  %v26965_v2 = vld [vmem:[%s27795_s13 + $0x188] ss:$0 sps:$4 sm:$0x77]  }
 0x64c   : > { %23994 = vmatpush3.bf16.msra.mxu1 %v26947_v8  ;;  %v17769_v8 = vrot.slane %v26948_v40, 3  ;;  %v26968_v40 = vld [vmem:[%s27795_s13 + $0x120] sm:$0xff]  }
 0x64d   : > { %24051 = vmatprep.subr.bf16.mxu1 %v31456_v38 }
 0x64e   : > { %v17770_v59 = vsel %vm477_vm1, %v17767_v52, %v17769_v8  ;;  %v17772_v22 = vsel %vm477_vm1, %v17769_v8, %v17771_v49  ;;  %v10220_v8 = vrot.slane %v26968_v40, 1  ;;  %v31661_v40 = vld [vmem:[%s27795_s13 + $0xbc] sm:$0xff]  }
 0x64f   : > { %23940 = vmatmul.mubr.msk.bf16.gmra.mrb[172].mxu1 %vm547_vm0, %v10179_v45  ;;  %v26952_v45 = vld [vmem:[%s27795_s13 + $0x150] sm:$0xff]  }
 0x650   : > { %24680 = vmatmul.mubr.msk.bf16.gmra.mrb[68].mxu0 %vm547_vm0, %v17748_v61  ;;  %23943 = vmatprep.mubr.msk.bf16.mxu1 %vm547_vm0, %v10181_v60  ;;  %v26946_v61 = vld [vmem:[%s27795_s13 + $0xd8] sm:$0xff]   ;;  %v17773_v50 = vrot.slane %v26952_v45, 3 }
 0x651   : > { %24683 = vmatprep.mubr.msk.bf16.mxu0 %vm547_vm0, %v17750_v13  ;;  %v26950_v13 = vld [vmem:[%s27795_s13 + $0xe0] sm:$0xff]   ;;  %v10202_v60 = vrot.slane %v26946_v61, 1 }
 0x652   : > { %v10204_v21 = vrot.slane %v26950_v13, 1  ;;  %v17774_v35 = vsel %vm477_vm1, %v17771_v49, %v17773_v50  ;;  %v17776_v15 = vsel %vm477_vm1, %v17773_v50, %v17775_v26 }
 0x653   : > { %v10203_v5 = vsel %vm7734_vm3, %v10200_v29, %v10202_v60 }
 0x654   : > { %v10205_v46 = vsel %vm7734_vm3, %v10202_v60, %v10204_v21 }
 0x657   : > { %23944 = vmatmul.mubr.msk.bf16.gmra.mrb[176].mxu1 %vm547_vm0, %v10183_v44  ;;  %v26956_v44 = vld [vmem:[%s27795_s13 + $0x160] sm:$0xff]  }
 0x658   : > { %24684 = vmatmul.mubr.msk.bf16.gmra.mrb[72].mxu0 %vm547_vm0, %v17752_v63  ;;  %23947 = vmatprep.mubr.msk.bf16.mxu1 %vm547_vm0, %v10185_v55  ;;  %v26951_v63 = vld [vmem:[%s27795_s13 + $0xe8] sm:$0xff]   ;;  %v17777_v3 = vrot.slane %v26956_v44, 3 }
 0x659   : > { %24687 = vmatprep.mubr.msk.bf16.mxu0 %vm547_vm0, %v17754_v32  ;;  %v26954_v32 = vld [vmem:[%s27795_s13 + $0xf0] sm:$0xff]   ;;  %v10206_v55 = vrot.slane %v26951_v63, 1 }
 0x65a   : > { %v10208_v25 = vrot.slane %v26954_v32, 1  ;;  %v17778_v20 = vsel %vm477_vm1, %v17775_v26, %v17777_v3  ;;  %v17780_v31 = vsel %vm477_vm1, %v17777_v3, %v17779_v14 }
 0x65b   : > { %v10207_v7 = vsel %vm7734_vm3, %v10204_v21, %v10206_v55  ;;  %v10637_v21 = vld [vmem:[%s27795_s13 + $0x8c] sm:$0xe] }
 0x65c   : > { %v10209_v10 = vsel %vm7734_vm3, %v10206_v55, %v10208_v25  ;;  %v31605_v55 = vld [vmem:[%s27795_s13 + $0x94] sm:$0xff]  }
 0x65f   : > { %23948 = vmatmul.mubr.msk.bf16.gmra.mrb[180].mxu1 %vm547_vm0, %v10187_v12  ;;  %v26960_v12 = vld [vmem:[%s27795_s13 + $0x170] sm:$0xff]  }
 0x660   : > { %24688 = vmatmul.mubr.msk.bf16.gmra.mrb[76].mxu0 %vm547_vm0, %v17756_v54  ;;  %23951 = vmatprep.mubr.msk.bf16.mxu1 %vm547_vm0, %v10189_v4  ;;  %v26955_v54 = vld [vmem:[%s27795_s13 + $0xf8] sm:$0xff]   ;;  %v17781_v27 = vrot.slane %v26960_v12, 3 }
 0x661   : > { %24691 = vmatprep.mubr.msk.bf16.mxu0 %vm547_vm0, %v17758_v53  ;;  %v26958_v53 = vld [vmem:[%s27795_s13 + $0x100] sm:$0xff]   ;;  %v10210_v4 = vrot.slane %v26955_v54, 1 }
 0x662   : > { %v10212_v16 = vrot.slane %v26958_v53, 1  ;;  %v17782_v56 = vsel %vm477_vm1, %v17779_v14, %v17781_v27  ;;  %v17784_v37 = vsel %vm477_vm1, %v17781_v27, %v17783_v28  ;;  %v26985_v14 = vld [vmem:[%s27795_s13 + $0xe4] sm:$0xff]  }
 0x663   : > { %v10211_v41 = vsel %vm7734_vm3, %v10208_v25, %v10210_v4  ;;  %v31622_v27 = vld [vmem:[%s27795_s13 + $0xa4] sm:$0xff]   ;;  %v18416_v19 = vrot.slane %v26985_v14, 2 }
 0x664   : > { %v10213_v0 = vsel %vm7734_vm3, %v10210_v4, %v10212_v16 }
 0x667   : > { %23952 = vmatmul.mubr.msk.bf16.gmra.mrb[184].mxu1 %vm547_vm0, %v10191_v62  ;;  %v26964_v62 = vld [vmem:[%s27795_s13 + $0x180] sm:$0xff]  }
 0x668   : > { %24692 = vmatmul.mubr.msk.bf16.gmra.mrb[80].mxu0 %vm547_vm0, %v17760_v57  ;;  %23955 = vmatprep.mubr.msk.bf16.mxu1 %vm547_vm0, %v10193_v51  ;;  %v26959_v57 = vld [vmem:[%s27795_s13 + $0x108] sm:$0xff]   ;;  %v17785_v39 = vrot.slane %v26964_v62, 3 }
 0x669   : > { %24695 = vmatprep.mubr.msk.bf16.mxu0 %vm547_vm0, %v17762_v17  ;;  %v26962_v17 = vld [vmem:[%s27795_s13 + $0x110] sm:$0xff]   ;;  %v10214_v51 = vrot.slane %v26959_v57, 1 }
 0x66a   : > { %v10216_v18 = vrot.slane %v26962_v17, 1  ;;  %v17786_v11 = vsel %vm477_vm1, %v17783_v28, %v17785_v39  ;;  %v26989_v28 = vld [vmem:[%s27795_s13 + $0xf4] sm:$0xff]  }
 0x66b   : > { %v10215_v9 = vsel %vm7734_vm3, %v10212_v16, %v10214_v51 }
 0x66f   : > { %23956 = vmatmul.mubr.msk.bf16.gmra.mrb[188].mxu1 %vm547_vm0, %v10195_v36  ;;  %v26970_v36 = vld [vmem:[%s27795_s13 + $0xac] sm:$0xfc]  }
 0x670   : > { %24696 = vmatmul.mubr.msk.bf16.gmra.mrb[84].mxu0 %vm547_vm0, %v17764_v48  ;;  %23959 = vmatprep.mubr.msk.bf16.mxu1 %vm547_vm0, %v10197_v47  ;;  %v26963_v48 = vld [vmem:[%s27795_s13 + $0x118] sm:$0xff]   ;;  %v17787_v47 = vrot.slane %v26965_v2, 3  ;;  %v18403_v52 = vrot.slane %v26970_v36, 2 }
 0x671   : > { %24699 = vmatprep.mubr.msk.bf16.mxu0 %vm547_vm0, %v17766_v33  ;;  %v10217_v33 = vsel %vm7734_vm3, %v10214_v51, %v10216_v18  ;;  %v10218_v34 = vrot.slane %v26963_v48, 1 }
 0x672   : > { %v17788_v29 = vsel %vm477_vm1, %v17785_v39, %v17787_v47  ;;  %v18405_v61 = vsel %vm2201_vm2, %v18403_v52, %v18404_v43  ;;  %v31640_v39 = vld [vmem:[%s27795_s13 + $0xb4] sm:$0xff]   ;;  %v26993_v47 = vld [vmem:[%s27795_s13 + $0x104] sm:$0xff]  }
 0x673   : > { %v10219_v30 = vsel %vm7734_vm3, %v10216_v18, %v10218_v34  ;;  %v10221_v45 = vsel %vm7734_vm3, %v10218_v34, %v10220_v8  ;;  %v27009_v18 = vld [vmem:[%s33239_s2 + $0x108] sm:$0xff]   ;;  %v10851_v48 = vrot.slane %v31640_v39, 1 }
 0x674   : > { %v31667_v52 = vld [vmem:[%s27795_s13 + $0xc4] sm:$0xff]  }
 0x677   : > { %23960 = vmatmul.mubr.msk.bf16.gmra.mrb[192].mxu1 %vm547_vm0, %v10199_v1  ;;  %v26969_v1 = vld [vmem:[%s27795_s13 + $0x128] sm:$0xff]  }
 0x678   : > { %24700 = vmatmul.mubr.msk.bf16.gmra.mrb[88].mxu0 %vm547_vm0, %v17768_v24  ;;  %23963 = vmatprep.mubr.msk.bf16.mxu1 %vm547_vm0, %v10201_v58  ;;  %v26972_v24 = vld [vmem:[%s27795_s13 + $0xbc] sm:$0xff]   ;;  %v26973_v58 = vld [vmem:[%s27795_s13 + $0x130] sm:$0xff]   ;;  %v10222_v49 = vrot.slane %v26969_v1, 1 }
 0x679   : > { %24703 = vmatprep.mubr.msk.bf16.mxu0 %vm547_vm0, %v17770_v59  ;;  %v26975_v59 = vld [vmem:[%s27795_s13 + $0xc4] sm:$0xff]   ;;  %v18406_v13 = vrot.slane %v26972_v24, 2  ;;  %v10224_v50 = vrot.slane %v26973_v58, 1  ;;  %v10855_v24 = vrot.slane %v31667_v52, 1  ;;  %v26994_v1 = vld [vmem:[%s27795_s13 + $0x10c] sm:$0xff]   ;;  %v26997_v58 = vld [vmem:[%s27795_s13 + $0x114] sm:$0xff]  }
 0x67a   : > { %v18408_v60 = vrot.slane %v26975_v59, 2  ;;  %v10223_v63 = vsel %vm7734_vm3, %v10220_v8, %v10222_v49  ;;  %v10853_v8 = vrot.slane %v31661_v40, 1  ;;  %v31680_v59 = vld [vmem:[%s27795_s13 + $0xcc] sm:$0xff]  }
 0x67b   : > { %v18407_v6 = vsel %vm2201_vm2, %v18404_v43, %v18406_v13  ;;  %v10225_v32 = vsel %vm7734_vm3, %v10222_v49, %v10224_v50  ;;  %v18422_v43 = vrot.slane %v26990_v42, 2  ;;  %v31686_v49 = vld [vmem:[%s27795_s13 + $0xd4] sm:$0xff]  }
 0x67c   : > { %v18409_v44 = vsel %vm2201_vm2, %v18406_v13, %v18408_v60  ;;  %v10856_v13 = vsel %vm7734_vm3, %v10853_v8, %v10855_v24 }
 0x67f   : > { %23964 = vmatmul.mubr.msk.bf16.gmra.mrb[196].mxu1 %vm547_vm0, %v10203_v5  ;;  %v26976_v5 = vld [vmem:[%s27795_s13 + $0xcc] sm:$0xff]  }
 0x680   : > { %24704 = vmatmul.mubr.msk.bf16.gmra.mrb[92].mxu0 %vm547_vm0, %v17772_v22  ;;  %23967 = vmatprep.mubr.msk.bf16.mxu1 %vm547_vm0, %v10205_v46  ;;  %v31594_v22 = vld [vmem:[%s27795_s13 + $0x90] sm:$0xf]  ;;  %v26981_v46 = vld [vmem:[%s27795_s13 + $0xd4] sm:$0xff]   ;;  %v18410_v3 = vrot.slane %v26976_v5, 2 }
 0x681   : > { %24707 = vmatprep.mubr.msk.bf16.mxu0 %vm547_vm0, %v17774_v35  ;;  %v26974_v35 = vld [vmem:[%s27795_s13 + $0x138] ss:$0 sps:$4 sm:$0x11]   ;;  %v21155_v26 = vcombine.low %v10637_v21, %v31594_v22  ;;  %v18428_v21 = vrot.slane %v26997_v58, 2 }
 0x682   : > { %v10226_v25 = vrot.slane %v26974_v35, 1  ;;  %v18411_v54 = vsel %vm2201_vm2, %v18408_v60, %v18410_v3  ;;  %v18426_v60 = vrot.slane %v26994_v1, 2 }
 0x683   : > { %v10842_v23 = vrot.slane %v21155_v26, 1 }
 0x684   : > { %v10227_v12 = vsel %vm7734_vm3, %v10224_v50, %v10226_v25  ;;  %v10857_v50 = vrot.slane %v31680_v59, 1 }
 0x686   : > { %v10858_v35 = vsel %vm7734_vm3, %v10855_v24, %v10857_v50 }
 0x687   : > { %23968 = vmatmul.mubr.msk.bf16.gmra.mrb[200].mxu1 %vm547_vm0, %v10207_v7  ;;  %v10843_v7 = vrot.slane %v31605_v55, 1 }
 0x688   : > { %24708 = vmatmul.mubr.msk.bf16.gmra.mrb[96].mxu0 %vm547_vm0, %v17776_v15  ;;  %23971 = vmatprep.mubr.msk.bf16.mxu1 %vm547_vm0, %v10209_v10  ;;  %v18412_v15 = vrot.slane %v26981_v46, 2  ;;  %v31616_v10 = vld [vmem:[%s27795_s13 + $0x9c] sm:$0xff]   ;;  %v18429_v46 = vsel %vm2201_vm2, %v18426_v60, %v18428_v21 }
 0x689   : > { %24711 = vmatprep.mubr.msk.bf16.mxu0 %vm547_vm0, %v17778_v20  ;;  %v26982_v20 = vld [vmem:[%s27795_s13 + $0xdc] sm:$0xff]   ;;  %v10844_v4 = vsel %vm7734_vm3, %v10842_v23, %v10843_v7 }
 0x68a   : > { %v18413_v53 = vsel %vm2201_vm2, %v18410_v3, %v18412_v15  ;;  %v18414_v16 = vrot.slane %v26982_v20, 2  ;;  %v31704_v3 = vld [vmem:[%s27795_s13 + $0xe4] sm:$0xff]   ;;  %v27002_v20 = vld [vmem:[%s27795_s13 + $0x12c] sm:$0xff]  }
 0x68c   : > { %v18415_v57 = vsel %vm2201_vm2, %v18412_v15, %v18414_v16  ;;  %v18417_v17 = vsel %vm2201_vm2, %v18414_v16, %v18416_v19 }
 0x68f   : > { %23972 = vmatmul.mubr.msk.bf16.gmra.mrb[204].mxu1 %vm547_vm0, %v10211_v41  ;;  %v10847_v41 = vrot.slane %v31622_v27, 1 }
 0x690   : > { %24712 = vmatmul.mubr.msk.bf16.gmra.mrb[100].mxu0 %vm547_vm0, %v17780_v31  ;;  %23975 = vmatprep.mubr.msk.bf16.mxu1 %vm547_vm0, %v10213_v0  ;;  %v10845_v31 = vrot.slane %v31616_v10, 1  ;;  %v31634_v0 = vld [vmem:[%s27795_s13 + $0xac] sm:$0xff]  }
 0x691   : > { %24715 = vmatprep.mubr.msk.bf16.mxu0 %vm547_vm0, %v17782_v56  ;;  %v26986_v56 = vld [vmem:[%s27795_s13 + $0xec] sm:$0xff]   ;;  %v10849_v2 = vrot.slane %v31634_v0, 1 }
 0x692   : > { %v10846_v62 = vsel %vm7734_vm3, %v10843_v7, %v10845_v31  ;;  %v10848_v51 = vsel %vm7734_vm3, %v10845_v31, %v10847_v41  ;;  %v10863_v7 = vrot.slane %v31704_v3, 1  ;;  %v31722_v31 = vld [vmem:[%s27795_s13 + $0xf4] sm:$0xff]  }
 0x693   : > { %v10852_v34 = vsel %vm7734_vm3, %v10849_v2, %v10851_v48 }
 0x697   : > { %23976 = vmatmul.mubr.msk.bf16.gmra.mrb[208].mxu1 %vm547_vm0, %v10215_v9  ;;  %v18420_v9 = vrot.slane %v26989_v28, 2 }
 0x698   : > { %24716 = vmatmul.mubr.msk.bf16.gmra.mrb[104].mxu0 %vm547_vm0, %v17784_v37  ;;  %23979 = vmatprep.mubr.msk.bf16.mxu1 %vm547_vm0, %v10217_v33  ;;  %v18418_v37 = vrot.slane %v26986_v56, 2  ;;  %v10850_v33 = vsel %vm7734_vm3, %v10847_v41, %v10849_v2  ;;  %v10867_v56 = vrot.slane %v31722_v31, 1 }
 0x699   : > { %24719 = vmatprep.mubr.msk.bf16.mxu0 %vm547_vm0, %v17786_v11  ;;  %v31655_v11 = vld [vmem:[%s33239_s2 + $0x110] sm:$0xff]  }
 0x69a   : > { %v18419_v36 = vsel %vm2201_vm2, %v18416_v19, %v18418_v37  ;;  %v18434_v19 = vrot.slane %v27002_v20, 2 }
 0x69f   : > { %23980 = vmatmul.mubr.msk.bf16.gmra.mrb[212].mxu1 %vm547_vm0, %v10219_v30  ;;  %v18423_v30 = vsel %vm2201_vm2, %v18420_v9, %v18422_v43 }
 0x6a0   : > { %24720 = vmatmul.mubr.msk.bf16.gmra.mrb[108].mxu0 %vm547_vm0, %v17788_v29  ;;  %23983 = vmatprep.mubr.msk.bf16.mxu1 %vm547_vm0, %v10221_v45  ;;  %v18424_v29 = vrot.slane %v26993_v47, 2  ;;  %v27011_v47 = vld [vmem:[%s27795_s13 + $0x14c] sm:$0xff]  }
 0x6a1   : > { %24727 = vmatprep.mubr.msk.bf16.mxu0 %vm547_vm0, %v18405_v61  ;;  %v10854_v61 = vsel %vm7734_vm3, %v10851_v48, %v10853_v8  ;;  %v18442_v1 = vrot.slane %v27011_v47, 2 }
 0x6a2   : > { %v18425_v45 = vsel %vm2201_vm2, %v18422_v43, %v18424_v29  ;;  %v18427_v5 = vsel %vm2201_vm2, %v18424_v29, %v18426_v60  ;;  %v31752_v43 = vld [vmem:[%s27795_s13 + $0x10c] sm:$0xff]   ;;  %v27014_v29 = vld [vmem:[%s27795_s13 + $0x154] sm:$0xff]   ;;  %v27015_v60 = vld [vmem:[%s27795_s13 + $0x15c] sm:$0xff]  }
 0x6a7   : > { %23984 = vmatmul.mubr.msk.bf16.gmra.mrb[216].mxu1 %vm547_vm0, %v10223_v63  ;;  %v26998_v63 = vld [vmem:[%s27795_s13 + $0x11c] sm:$0xff]  }
 0x6a8   : > { %24728 = vmatmul.mubr.msk.bf16.vlgmr.msra.gmra.mrb[56].mxu0 %vm547_vm0, %v18407_v6  ;;  %23987 = vmatprep.mubr.msk.bf16.mxu1 %vm547_vm0, %v10225_v32  ;;  %v10859_v6 = vrot.slane %v31686_v49, 1  ;;  %v27001_v32 = vld [vmem:[%s27795_s13 + $0x124] sm:$0xff]   ;;  %v18430_v25 = vrot.slane %v26998_v63, 2 }
 0x6a9   : > { %24731 = vmatprep.mubr.msk.bf16.mxu0 %vm547_vm0, %v18409_v44  ;;  %v31698_v44 = vld [vmem:[%s27795_s13 + $0xdc] sm:$0xff]   ;;  %v18432_v23 = vrot.slane %v27001_v32, 2 }
 0x6aa   : > { %v10860_v26 = vsel %vm7734_vm3, %v10857_v50, %v10859_v6  ;;  %v10861_v15 = vrot.slane %v31698_v44, 1 }
 0x6ab   : > { %v18433_v14 = vsel %vm2201_vm2, %v18430_v25, %v18432_v23 }
 0x6ac   : > { %v10864_v16 = vsel %vm7734_vm3, %v10861_v15, %v10863_v7 }
 0x6af   : > { %23988 = vmatmul.mubr.msk.bf16.gmra.mrb[220].mxu1 %vm547_vm0, %v10227_v12  ;;  %v10862_v12 = vsel %vm7734_vm3, %v10859_v6, %v10861_v15 }
 0x6b0   : > { %24732 = vmatmul.mubr.msk.bf16.gmra.mrb[60].mxu0 %vm547_vm0, %v18411_v54  ;;  %23995 = vmatprep.mubr.msk.bf16.mxu1 %vm547_vm0, %v10844_v4  ;;  %v18431_v54 = vsel %vm2201_vm2, %v18428_v21, %v18430_v25  ;;  %v27005_v4 = vld [vmem:[%s27795_s13 + $0x134] sm:$0xff]   ;;  %v31770_v21 = vld [vmem:[%s27795_s13 + $0x11c] sm:$0xff]  }
 0x6b1   : > { %24735 = vmatprep.mubr.msk.bf16.mxu0 %vm547_vm0, %v18413_v53  ;;  %v31716_v53 = vld [vmem:[%s27795_s13 + $0xec] sm:$0xff]   ;;  %v10877_v32 = vrot.slane %v31770_v21, 1 }
 0x6b2   : > { %v10865_v41 = vrot.slane %v31716_v53, 1 }
 0x6b4   : > { %v10866_v28 = vsel %vm7734_vm3, %v10863_v7, %v10865_v41  ;;  %v10868_v2 = vsel %vm7734_vm3, %v10865_v41, %v10867_v56 }
 0x6b7   : > { %23996 = vmatmul.mubr.msk.bf16.vlgmr.msra.gmra.mrb[168].mxu1 %vm547_vm0, %v10846_v62  ;;  %v18435_v62 = vsel %vm2201_vm2, %v18432_v23, %v18434_v19  ;;  %v27019_v23 = vld [vmem:[%s27795_s13 + $0x16c] sm:$0xff]  }
 0x6b8   : > { %24736 = vmatmul.mubr.msk.bf16.gmra.mrb[64].mxu0 %vm547_vm0, %v18415_v57  ;;  %24052 = vmatpush3.bf16.msra.mxu1 %v31456_v38  ;;  %v18421_v38 = vsel %vm2201_vm2, %v18418_v37, %v18420_v9  ;;  %v18436_v57 = vrot.slane %v27005_v4, 2  ;;  %v27010_v37 = vld [vmem:[%s27795_s13 + $0x144] sm:$0xff]   ;;  %v31794_v4 = vld [vmem:[%s27795_s13 + $0x134] sm:$0xff]  }
 0x6b9   : > { %24739 = vmatprep.mubr.msk.bf16.mxu0 %vm547_vm0, %v18417_v17  ;;  %23999 = vmatprep.mubr.msk.bf16.mxu1 %vm547_vm0, %v10848_v51  ;;  %v27006_v17 = vld [vmem:[%s27795_s13 + $0x13c] sm:$0xff]   ;;  %v31740_v9 = vld [vmem:[%s27795_s13 + $0x104] sm:$0xff]   ;;  %v18440_v42 = vrot.slane %v27010_v37, 2 }
 0x6ba   : > { %24053 = vmatprep.subr.bf16.mxu1 %v27009_v18  ;;  %v31734_v51 = vld [vmem:[%s27795_s13 + $0xfc] sm:$0xff]   ;;  %v18438_v48 = vrot.slane %v27006_v17, 2  ;;  %v27026_v37 = vld [vmem:[%s27795_s13 + $0x184] sm:$0xff]  }
 0x6bc   : > { %24054 = vmatpush3.bf16.msra.mxu1 %v27009_v18  ;;  %v18437_v18 = vsel %vm2201_vm2, %v18434_v19, %v18436_v57  ;;  %v18441_v8 = vsel %vm2201_vm2, %v18438_v48, %v18440_v42 }
 0x6bd   : > { %24111 = vmatprep.subr.bf16.mxu1 %v31655_v11 }
 0x6bf   : > { %24000 = vmatmul.mubr.msk.bf16.gmra.mrb[172].mxu1 %vm547_vm0, %v10850_v33  ;;  %v10871_v33 = vrot.slane %v31740_v9, 1 }
 0x6c0   : > { %24740 = vmatmul.mubr.msk.bf16.gmra.mrb[68].mxu0 %vm547_vm0, %v18419_v36  ;;  %24003 = vmatprep.mubr.msk.bf16.mxu1 %vm547_vm0, %v10852_v34  ;;  %v10869_v36 = vrot.slane %v31734_v51, 1 }
 0x6c1   : > { %24743 = vmatprep.mubr.msk.bf16.mxu0 %vm547_vm0, %v18421_v38  ;;  %v18439_v38 = vsel %vm2201_vm2, %v18436_v57, %v18438_v48  ;;  %v10883_v57 = vrot.slane %v31794_v4, 1  ;;  %v31812_v48 = vld [vmem:[%s27795_s13 + $0x144] sm:$0xff]  }
 0x6c2   : > { %v10870_v34 = vsel %vm7734_vm3, %v10867_v56, %v10869_v36  ;;  %v10872_v24 = vsel %vm7734_vm3, %v10869_v36, %v10871_v33 }
 0x6c7   : > { %24004 = vmatmul.mubr.msk.bf16.gmra.mrb[176].mxu1 %vm547_vm0, %v10854_v61  ;;  %v10873_v61 = vrot.slane %v31752_v43, 1 }
 0x6c8   : > { %24744 = vmatmul.mubr.msk.bf16.gmra.mrb[72].mxu0 %vm547_vm0, %v18423_v30  ;;  %24007 = vmatprep.mubr.msk.bf16.mxu1 %vm547_vm0, %v10856_v13  ;;  %v31758_v30 = vld [vmem:[%s27795_s13 + $0x114] sm:$0xff]   ;;  %v18443_v13 = vsel %vm2201_vm2, %v18440_v42, %v18442_v1 }
 0x6c9   : > { %24747 = vmatprep.mubr.msk.bf16.mxu0 %vm547_vm0, %v18425_v45  ;;  %v18444_v45 = vrot.slane %v27014_v29, 2  ;;  %v10875_v58 = vrot.slane %v31758_v30, 1  ;;  %v10874_v50 = vsel %vm7734_vm3, %v10871_v33, %v10873_v61  ;;  %v18456_v33 = vrot.slane %v27026_v37, 2  ;;  %v31824_v29 = vld [vmem:[%s27795_s13 + $0x14c] sm:$0xff]  }
 0x6cb   : > { %v18445_v6 = vsel %vm2201_vm2, %v18442_v1, %v18444_v45  ;;  %v10876_v63 = vsel %vm7734_vm3, %v10873_v61, %v10875_v58  ;;  %v10878_v7 = vsel %vm7734_vm3, %v10875_v58, %v10877_v32  ;;  %v31829_v61 = vld [vmem:[%s27795_s13 + $0x154] sm:$0xff]   ;;  %v10889_v58 = vrot.slane %v31824_v29, 1 }
 0x6cf   : > { %24008 = vmatmul.mubr.msk.bf16.gmra.mrb[180].mxu1 %vm547_vm0, %v10858_v35  ;;  %v31776_v35 = vld [vmem:[%s27795_s13 + $0x124] sm:$0xff]  }
 0x6d0   : > { %24748 = vmatmul.mubr.msk.bf16.gmra.mrb[76].mxu0 %vm547_vm0, %v18427_v5  ;;  %24011 = vmatprep.mubr.msk.bf16.mxu1 %vm547_vm0, %v10860_v26  ;;  %v27018_v5 = vld [vmem:[%s27795_s13 + $0x164] sm:$0xff]   ;;  %v10879_v25 = vrot.slane %v31776_v35, 1 }
 0x6d1   : > { %24751 = vmatprep.mubr.msk.bf16.mxu0 %vm547_vm0, %v18429_v46  ;;  %v18446_v46 = vrot.slane %v27015_v60, 2  ;;  %v18448_v26 = vrot.slane %v27018_v5, 2 }
 0x6d3   : > { %v18447_v15 = vsel %vm2201_vm2, %v18444_v45, %v18446_v46  ;;  %v18449_v20 = vsel %vm2201_vm2, %v18446_v46, %v18448_v26 }
 0x6d7   : > { %24012 = vmatmul.mubr.msk.bf16.gmra.mrb[184].mxu1 %vm547_vm0, %v10862_v12  ;;  %v27022_v12 = vld [vmem:[%s27795_s13 + $0x174] sm:$0xff]  }
 0x6d8   : > { %24752 = vmatmul.mubr.msk.bf16.gmra.mrb[80].mxu0 %vm547_vm0, %v18431_v54  ;;  %24015 = vmatprep.mubr.msk.bf16.mxu1 %vm547_vm0, %v10864_v16  ;;  %v31788_v54 = vld [vmem:[%s27795_s13 + $0x12c] sm:$0xff]   ;;  %v18450_v16 = vrot.slane %v27019_v23, 2  ;;  %v18452_v41 = vrot.slane %v27022_v12, 2 }
 0x6d9   : > { %24755 = vmatprep.mubr.msk.bf16.mxu0 %vm547_vm0, %v18433_v14  ;;  %v10880_v14 = vsel %vm7734_vm3, %v10877_v32, %v10879_v25  ;;  %v10881_v19 = vrot.slane %v31788_v54, 1 }
 0x6da   : > { %v18451_v56 = vsel %vm2201_vm2, %v18448_v26, %v18450_v16  ;;  %v11308_v26 = vld [vmem:[%s27795_s13 + $0x8c] sm:$0x8] }
 0x6db   : > { %v10882_v17 = vsel %vm7734_vm3, %v10879_v25, %v10881_v19 }
 0x6df   : > { %24016 = vmatmul.mubr.msk.bf16.gmra.mrb[188].mxu1 %vm547_vm0, %v10866_v28  ;;  %v31806_v28 = vld [vmem:[%s27795_s13 + $0x13c] sm:$0xff]  }
 0x6e0   : > { %24756 = vmatmul.mubr.msk.bf16.gmra.mrb[84].mxu0 %vm547_vm0, %v18435_v62  ;;  %24019 = vmatprep.mubr.msk.bf16.mxu1 %vm547_vm0, %v10868_v2  ;;  %v27023_v62 = vld [vmem:[%s27795_s13 + $0x17c] sm:$0xff]   ;;  %v10884_v2 = vsel %vm7734_vm3, %v10881_v19, %v10883_v57  ;;  %v10885_v42 = vrot.slane %v31806_v28, 1 }
 0x6e1   : > { %24759 = vmatprep.mubr.msk.bf16.mxu0 %vm547_vm0, %v18437_v18  ;;  %v18453_v18 = vsel %vm2201_vm2, %v18450_v16, %v18452_v41  ;;  %v18454_v36 = vrot.slane %v27023_v62, 2  ;;  %v11328_v62 = vrot.slane %v31634_v0, 3 }
 0x6e3   : > { %v18455_v47 = vsel %vm2201_vm2, %v18452_v41, %v18454_v36  ;;  %v11324_v41 = vrot.slane %v31616_v10, 3  ;;  %v11330_v10 = vrot.slane %v31640_v39, 3  ;;  %v11336_v39 = vrot.slane %v31680_v59, 3 }
 0x6e4   : > { %v11344_v59 = vrot.slane %v31716_v53, 3  ;;  %v11352_v53 = vrot.slane %v31752_v43, 3  ;;  %v11360_v43 = vrot.slane %v31788_v54, 3  ;;  %v31935_v54 = vld [vmem:[%s33240_s3 + $0x3] ss:$0 sm:$0xff] }
 0x6e7   : > { %24020 = vmatmul.mubr.msk.bf16.gmra.mrb[192].mxu1 %vm547_vm0, %v10870_v34  ;;  %v27027_v34 = vld [vmem:[%s27795_s13 + $0x18c] ss:$0 sps:$4 sm:$0x33]  }
 0x6e8   : > { %24760 = vmatmul.mubr.msk.bf16.gmra.mrb[88].mxu0 %vm547_vm0, %v18439_v38  ;;  %24023 = vmatprep.mubr.msk.bf16.mxu1 %vm547_vm0, %v10872_v24  ;;  %v10887_v38 = vrot.slane %v31812_v48, 1  ;;  %v18457_v24 = vsel %vm2201_vm2, %v18454_v36, %v18456_v33  ;;  %v18458_v45 = vrot.slane %v27027_v34, 2 }
 0x6e9   : > { %24763 = vmatprep.mubr.msk.bf16.mxu0 %vm547_vm0, %v18441_v8  ;;  %v10886_v8 = vsel %vm7734_vm3, %v10883_v57, %v10885_v42 }
 0x6ea   : > { %v10888_v1 = vsel %vm7734_vm3, %v10885_v42, %v10887_v38  ;;  %v18459_v60 = vsel %vm2201_vm2, %v18456_v33, %v18458_v45 }
 0x6ef   : > { %24024 = vmatmul.mubr.msk.bf16.gmra.mrb[196].mxu1 %vm547_vm0, %v10874_v50  ;;  %v10890_v50 = vsel %vm7734_vm3, %v10887_v38, %v10889_v58 }
 0x6f0   : > { %24764 = vmatmul.mubr.msk.bf16.gmra.mrb[92].mxu0 %vm547_vm0, %v18443_v13  ;;  %24027 = vmatprep.mubr.msk.bf16.mxu1 %vm547_vm0, %v10876_v63  ;;  %v10891_v13 = vrot.slane %v31829_v61, 1  ;;  %v31844_v63 = vld [vmem:[%s27795_s13 + $0x164] sm:$0xff]  }
 0x6f1   : > { %24767 = vmatprep.mubr.msk.bf16.mxu0 %vm547_vm0, %v18445_v6  ;;  %v31840_v6 = vld [vmem:[%s27795_s13 + $0x15c] sm:$0xff]   ;;  %v10895_v32 = vrot.slane %v31844_v63, 1 }
 0x6f2   : > { %v10892_v5 = vsel %vm7734_vm3, %v10889_v58, %v10891_v13  ;;  %v10893_v46 = vrot.slane %v31840_v6, 1 }
 0x6f4   : > { %v10894_v25 = vsel %vm7734_vm3, %v10891_v13, %v10893_v46  ;;  %v10896_v23 = vsel %vm7734_vm3, %v10893_v46, %v10895_v32 }
 0x6f7   : > { %24028 = vmatmul.mubr.msk.bf16.gmra.mrb[200].mxu1 %vm547_vm0, %v10878_v7  ;;  %v21218_v7 = vcombine.low %v11308_v26, %v31594_v22  ;;  %v11326_v22 = vrot.slane %v31622_v27, 3 }
 0x6f8   : > { %24768 = vmatmul.mubr.msk.bf16.gmra.mrb[96].mxu0 %vm547_vm0, %v18447_v15  ;;  %24031 = vmatprep.mubr.msk.bf16.mxu1 %vm547_vm0, %v10880_v14  ;;  %v27031_v15 = vld [vmem:[%s27795_s13 + $0x16c] ss:$0 sps:$4 sm:$0x11]   ;;  %v11322_v14 = vrot.slane %v31605_v55, 3  ;;  %v27034_v55 = vld [vmem:[%s33239_s2 + $0x118] sm:$0xff]  }
 0x6f9   : > { %24771 = vmatprep.mubr.msk.bf16.mxu0 %vm547_vm0, %v18449_v20  ;;  %v10897_v20 = vrot.slane %v27031_v15, 1  ;;  %v11321_v12 = vrot.slane %v21218_v7, 3  ;;  %v11329_v27 = vsel %vm477_vm1, %v11326_v22, %v11328_v62 }
 0x6fa   : > { %v11325_v57 = vsel %vm477_vm1, %v11322_v14, %v11324_v41 }
 0x6fb   : > { %v10898_v16 = vsel %vm7734_vm3, %v10895_v32, %v10897_v20  ;;  %v11323_v19 = vsel %vm477_vm1, %v11321_v12, %v11322_v14 }
 0x6ff   : > { %24032 = vmatmul.mubr.msk.bf16.gmra.mrb[204].mxu1 %vm547_vm0, %v10882_v17  ;;  %v11331_v17 = vsel %vm477_vm1, %v11328_v62, %v11330_v10 }
 0x700   : > { %24772 = vmatmul.mubr.msk.bf16.gmra.mrb[100].mxu0 %vm547_vm0, %v18451_v56  ;;  %24035 = vmatprep.mubr.msk.bf16.mxu1 %vm547_vm0, %v10884_v2  ;;  %v11327_v56 = vsel %vm477_vm1, %v11324_v41, %v11326_v22  ;;  %v11338_v2 = vrot.slane %v31686_v49, 3  ;;  %v11346_v49 = vrot.slane %v31722_v31, 3  ;;  %v11354_v31 = vrot.slane %v31758_v30, 3  ;;  %v31956_v41 = vld [vmem:[%s33241_s4 + $0x80] sm:$0xff]  }
 0x701   : > { %24775 = vmatprep.mubr.msk.bf16.mxu0 %vm547_vm0, %v18453_v18  ;;  %v11332_v18 = vrot.slane %v31661_v40, 3  ;;  %v11340_v40 = vrot.slane %v31698_v44, 3  ;;  %v11348_v44 = vrot.slane %v31734_v51, 3  ;;  %v11356_v51 = vrot.slane %v31770_v21, 3 }
 0x702   : > { %v11339_v42 = vsel %vm477_vm1, %v11336_v39, %v11338_v2  ;;  %v11347_v34 = vsel %vm477_vm1, %v11344_v59, %v11346_v49  ;;  %v11355_v45 = vsel %vm477_vm1, %v11352_v53, %v11354_v31  ;;  %v11362_v30 = vrot.slane %v31794_v4, 3 }
 0x703   : > { %v11333_v37 = vsel %vm477_vm1, %v11330_v10, %v11332_v18  ;;  %v11341_v33 = vsel %vm477_vm1, %v11338_v2, %v11340_v40  ;;  %v11357_v58 = vsel %vm477_vm1, %v11354_v31, %v11356_v51  ;;  %v11364_v21 = vrot.slane %v31806_v28, 3 }
 0x704   : > { %v11368_v4 = vrot.slane %v31824_v29, 3  ;;  %v11370_v28 = vrot.slane %v31829_v61, 3  ;;  %v11372_v22 = vrot.slane %v31840_v6, 3 }
 0x706   : > { %v11371_v14 = vsel %vm477_vm1, %v11368_v4, %v11370_v28 }
 0x707   : > { %24036 = vmatmul.mubr.msk.bf16.gmra.mrb[208].mxu1 %vm547_vm0, %v10886_v8  ;;  %v11349_v8 = vsel %vm477_vm1, %v11346_v49, %v11348_v44 }
 0x708   : > { %24776 = vmatmul.mubr.msk.bf16.gmra.mrb[104].mxu0 %vm547_vm0, %v18455_v47  ;;  %24039 = vmatprep.mubr.msk.bf16.mxu1 %vm547_vm0, %v10888_v1 }
 0x709   : > { %24779 = vmatprep.mubr.msk.bf16.mxu0 %vm547_vm0, %v18457_v24 }
 0x70f   : > { %24040 = vmatmul.mubr.msk.bf16.gmra.mrb[212].mxu1 %vm547_vm0, %v10890_v50  ;;  %v11363_v50 = vsel %vm477_vm1, %v11360_v43, %v11362_v30 }
 0x710   : > { %24780 = vmatmul.mubr.msk.bf16.gmra.mrb[108].mxu0 %vm547_vm0, %v18459_v60  ;;  %24043 = vmatprep.mubr.msk.bf16.mxu1 %vm547_vm0, %v10892_v5  ;;  %v11365_v5 = vsel %vm477_vm1, %v11362_v30, %v11364_v21 }
 0x717   : > { %24044 = vmatmul.mubr.msk.bf16.gmra.mrb[216].mxu1 %vm547_vm0, %v10894_v25 }
 0x718   : > { %24047 = vmatprep.mubr.msk.bf16.mxu1 %vm547_vm0, %v10896_v23 }
 0x71f   : > { %24048 = vmatmul.mubr.msk.bf16.gmra.mrb[220].mxu1 %vm547_vm0, %v10898_v16 }
 0x720   : > { %24055 = vmatprep.mubr.msk.bf16.mxu1 %vm547_vm0, %v11323_v19 }
 0x727   : > { %24056 = vmatmul.mubr.msk.bf16.vlgmr.msra.gmra.mrb[168].mxu1 %vm547_vm0, %v11325_v57 }
 0x728   : > { %24112 = vmatpush3.bf16.msra.mxu1 %v31655_v11  ;;  %24059 = vmatprep.mubr.msk.bf16.mxu1 %vm547_vm0, %v11327_v56  ;;  %v11334_v11 = vrot.slane %v31667_v52, 3  ;;  %v11342_v52 = vrot.slane %v31704_v3, 3  ;;  %v11350_v3 = vrot.slane %v31740_v9, 3  ;;  %v11358_v9 = vrot.slane %v31776_v35, 3 }
 0x729   : > { %24113 = vmatprep.subr.bf16.mxu1 %v27034_v55  ;;  %v11366_v35 = vrot.slane %v31812_v48, 3  ;;  %v11374_v56 = vrot.slane %v31844_v63, 3 }
 0x72a   : > { %v11335_v0 = vsel %vm477_vm1, %v11332_v18, %v11334_v11  ;;  %v11337_v36 = vsel %vm477_vm1, %v11334_v11, %v11336_v39  ;;  %v11343_v38 = vsel %vm477_vm1, %v11340_v40, %v11342_v52  ;;  %v11345_v47 = vsel %vm477_vm1, %v11342_v52, %v11344_v59  ;;  %v27038_v40 = vld [vmem:[%s27795_s13 + $0xa0] sm:$0xff]   ;;  %v31987_v59 = vld [vmem:[%s27795_s13 + $0xa8] sm:$0xff]  }
 0x72b   : > { %v11351_v24 = vsel %vm477_vm1, %v11348_v44, %v11350_v3  ;;  %v11353_v1 = vsel %vm477_vm1, %v11350_v3, %v11352_v53  ;;  %v11359_v13 = vsel %vm477_vm1, %v11356_v51, %v11358_v9  ;;  %v11361_v60 = vsel %vm477_vm1, %v11358_v9, %v11360_v43 }
 0x72c   : > { %24114 = vmatpush3.bf16.msra.mxu1 %v27034_v55  ;;  %v11367_v46 = vsel %vm477_vm1, %v11364_v21, %v11366_v35  ;;  %v11369_v12 = vsel %vm477_vm1, %v11366_v35, %v11368_v4  ;;  %v27035_v55 = vld [vmem:[%s27795_s13 + $0x16c] ss:$0 sps:$4 sm:$0x77]   ;;  %v11997_v9 = vrot.slane %v31987_v59, 1 }
 0x72d   : > { %24171 = vmatprep.subr.bf16.mxu1 %v31956_v41 }
 0x72f   : > { %24060 = vmatmul.mubr.msk.bf16.gmra.mrb[172].mxu1 %vm547_vm0, %v11329_v27  ;;  %v27036_v27 = vld [vmem:[%s27795_s13 + $0x90] sm:$0xfe]  }
 0x730   : > { %24063 = vmatprep.mubr.msk.bf16.mxu1 %vm547_vm0, %v11331_v17  ;;  %v31968_v17 = vld [vmem:[%s27795_s13 + $0x98] sm:$0xff]  }
 0x737   : > { %24064 = vmatmul.mubr.msk.bf16.gmra.mrb[176].mxu1 %vm547_vm0, %v11333_v37 }
 0x738   : > { %24067 = vmatprep.mubr.msk.bf16.mxu1 %vm547_vm0, %v11335_v0  ;;  %v11373_v0 = vsel %vm477_vm1, %v11370_v28, %v11372_v22 }
 0x73f   : > { %24068 = vmatmul.mubr.msk.bf16.gmra.mrb[180].mxu1 %vm547_vm0, %v11337_v36  ;;  %v11375_v36 = vsel %vm477_vm1, %v11372_v22, %v11374_v56 }
 0x740   : > { %24071 = vmatprep.mubr.msk.bf16.mxu1 %vm547_vm0, %v11339_v42  ;;  %v11376_v42 = vrot.slane %v27035_v55, 3 }
 0x747   : > { %24072 = vmatmul.mubr.msk.bf16.gmra.mrb[184].mxu1 %vm547_vm0, %v11341_v33  ;;  %v11992_v33 = vrot.slane %v27036_v27, 1 }
 0x748   : > { %24075 = vmatprep.mubr.msk.bf16.mxu1 %vm547_vm0, %v11343_v38  ;;  %v11993_v38 = vrot.slane %v31968_v17, 1 }
 0x74a   : > { %v11994_v51 = vsel %vm7734_vm3, %v11992_v33, %v11993_v38 }
 0x74f   : > { %24076 = vmatmul.mubr.msk.bf16.gmra.mrb[188].mxu1 %vm547_vm0, %v11345_v47 }
 0x750   : > { %24079 = vmatprep.mubr.msk.bf16.mxu1 %vm547_vm0, %v11347_v34 }
 0x757   : > { %24080 = vmatmul.mubr.msk.bf16.gmra.mrb[192].mxu1 %vm547_vm0, %v11349_v8  ;;  %v11377_v8 = vsel %vm477_vm1, %v11374_v56, %v11376_v42 }
 0x758   : > { %24083 = vmatprep.mubr.msk.bf16.mxu1 %vm547_vm0, %v11351_v24  ;;  %v11995_v24 = vrot.slane %v27038_v40, 1 }
 0x75a   : > { %v11998_v55 = vsel %vm7734_vm3, %v11995_v24, %v11997_v9 }
 0x75f   : > { %24084 = vmatmul.mubr.msk.bf16.gmra.mrb[196].mxu1 %vm547_vm0, %v11353_v1 }
 0x760   : > { %24087 = vmatprep.mubr.msk.bf16.mxu1 %vm547_vm0, %v11355_v45 }
 0x767   : > { %24088 = vmatmul.mubr.msk.bf16.gmra.mrb[200].mxu1 %vm547_vm0, %v11357_v58 }
 0x768   : > { %24091 = vmatprep.mubr.msk.bf16.mxu1 %vm547_vm0, %v11359_v13 }
 0x76f   : > { %24092 = vmatmul.mubr.msk.bf16.gmra.mrb[204].mxu1 %vm547_vm0, %v11361_v60 }
 0x770   : > { %24095 = vmatprep.mubr.msk.bf16.mxu1 %vm547_vm0, %v11363_v50 }
 0x777   : > { %24096 = vmatmul.mubr.msk.bf16.gmra.mrb[208].mxu1 %vm547_vm0, %v11365_v5 }
 0x778   : > { %24099 = vmatprep.mubr.msk.bf16.mxu1 %vm547_vm0, %v11367_v46 }
 0x77b   : > { %v24729_v32 = vpop.f32.mrb[56].mxu0 }
 0x77c   : > { %v31941_v48 = vadd.f32 %v24729_v32, %v31935_v54  ;;  %v18590_v26 = vpop.f32.mrb[57].mxu0 }
 0x77d   : > { %v31944_v25 = vadd.f32 %v31935_v54, %v18590_v26  ;;  %v24730_v15 = vpop.f32.mrb[58].mxu0 }
 0x77e   : > { %v18988_v23 = vmul.f32 0.70710677, %v31941_v48  ;;  %v18877_v7 = vadd.f32 %v24730_v15, %v31935_v54  ;;  %v18593_v20 = vpop.f32.mrb[59].mxu0  ;;  %v18932_v13 = vmul.f32 0.5, %v31941_v48  ;;  %v32013_v15 = vld [vmem:[%s27795_s13 + $0xb0] sm:$0xff]  }
 0x77f   : > { %v18986_v29 = vmul.f32 0.70710677, %v31944_v25  ;;  %v18875_v61 = vadd.f32 %v31935_v54, %v18593_v20  ;;  %24100 = vmatmul.mubr.msk.bf16.gmra.mrb[212].mxu1 %vm547_vm0, %v11369_v12  ;;  %v18930_v21 = vmul.f32 0.5, %v31944_v25  ;;  %v32023_v20 = vld [vmem:[%s27795_s13 + $0xb8] sm:$0xff]  }
 0x780   : > { %27305 = verf.f32 %v18988_v23  ;;  %v18989_v16 = vmul.f32 0.70710677, %v18877_v7  ;;  %24103 = vmatprep.mubr.msk.bf16.mxu1 %vm547_vm0, %v11371_v14  ;;  %v18933_v43 = vmul.f32 0.5, %v18877_v7 }
 0x781   : > { %27307 = verf.f32 %v18986_v29  ;;  %v18987_v19 = vmul.f32 0.70710677, %v18875_v61  ;;  %v18931_v35 = vmul.f32 0.5, %v18875_v61 }
 0x782   : > { %27309 = verf.f32 %v18989_v16  ;;  %v11996_v16 = vsel %vm7734_vm3, %v11993_v38, %v11995_v24 }
 0x783   : > { %27311 = verf.f32 %v18987_v19  ;;  %v24733_v57 = vpop.f32.mrb[60].mxu0 }
 0x784   : > { %v31964_v62 = vadd.f32 %v24733_v57, %v31935_v54  ;;  %v18606_v10 = vpop.f32.mrb[61].mxu0 }
 0x785   : > { %v31971_v18 = vadd.f32 %v31935_v54, %v18606_v10  ;;  %v24734_v6 = vpop.f32.mrb[62].mxu0  ;;  %v11999_v10 = vrot.slane %v32013_v15, 1 }
 0x786   : > { %v18992_v11 = vmul.f32 0.70710677, %v31964_v62  ;;  %v31975_v63 = vadd.f32 %v24734_v6, %v31935_v54  ;;  %v18609_v37 = vpop.f32.mrb[63].mxu0 }
 0x787   : > { %v18990_v39 = vmul.f32 0.70710677, %v31971_v18  ;;  %v31980_v2 = vadd.f32 %v31935_v54, %v18609_v37  ;;  %24104 = vmatmul.mubr.msk.bf16.gmra.mrb[216].mxu1 %vm547_vm0, %v11373_v0  ;;  %v12001_v37 = vrot.slane %v32023_v20, 1  ;;  %v18934_v33 = vmul.f32 0.5, %v31971_v18  ;;  %v27066_v18 = vld [vmem:[%s33241_s4 + $0x88] sm:$0xff]  }
 0x788   : > { %27313 = verf.f32 %v18992_v11  ;;  %v18993_v52 = vmul.f32 0.70710677, %v31975_v63  ;;  %24107 = vmatprep.mubr.msk.bf16.mxu1 %vm547_vm0, %v11375_v36  ;;  %v18937_v36 = vmul.f32 0.5, %v31975_v63 }
 0x789   : > { %27315 = verf.f32 %v18990_v39  ;;  %v18991_v49 = vmul.f32 0.70710677, %v31980_v2  ;;  %v18936_v39 = vmul.f32 0.5, %v31964_v62  ;;  %v18935_v38 = vmul.f32 0.5, %v31980_v2 }
 0x78a   : > { %v27306_v47 = vpop.eup %27305  ;;  %27317 = verf.f32 %v18993_v52 }
 0x78b   : > { %v27308_v34 = vpop.eup %27307  ;;  %v19100_v44 = vadd.f32 1.0, %v27306_v47  ;;  %27319 = verf.f32 %v18991_v49  ;;  %v24737_v3 = vpop.f32.mrb[64].mxu0 }
 0x78c   : > { %v27310_v53 = vpop.eup %27309  ;;  %v19098_v31 = vadd.f32 1.0, %v27308_v34  ;;  %v31994_v1 = vadd.f32 %v24737_v3, %v31935_v54  ;;  %v18622_v45 = vpop.f32.mrb[65].mxu0 }
 0x78d   : > { %v27312_v58 = vpop.eup %27311  ;;  %v19101_v30 = vadd.f32 1.0, %v27310_v53  ;;  %v32000_v60 = vadd.f32 %v31935_v54, %v18622_v45  ;;  %v24738_v50 = vpop.f32.mrb[66].mxu0  ;;  %v32004_v32 = vmul.f32 %v19100_v44, %v18932_v13  ;;  %v32074_v45 = vld [vmem:[%s27795_s13 + $0xc8] sm:$0xff]  }
 0x78e   : > { %v19099_v5 = vadd.f32 1.0, %v27312_v58  ;;  %v18996_v46 = vmul.f32 0.70710677, %v31994_v1  ;;  %v18625_v4 = vpop.f32.mrb[67].mxu0  ;;  %v32010_v26 = vadd.f32 %v24738_v50, %v31935_v54  ;;  %v32015_v23 = vmul.f32 %v19098_v31, %v18930_v21 }
 0x78f   : > { %v32006_v28 = vmul.f32 %v19101_v30, %v18933_v43  ;;  %v18994_v48 = vmul.f32 0.70710677, %v32000_v60  ;;  %v32020_v25 = vadd.f32 %v31935_v54, %v18625_v4  ;;  %24108 = vmatmul.mubr.msk.bf16.gmra.mrb[220].mxu1 %vm547_vm0, %v11377_v8  ;;  %v32059_v8 = vld [vmem:[%s27795_s13 + $0xc0] sm:$0xff]   ;;  %v12000_v21 = vsel %vm7734_vm3, %v11997_v9, %v11999_v10 }
 0x790   : > { %v32017_v7 = vmul.f32 %v19099_v5, %v18931_v35  ;;  %27321 = verf.f32 %v18996_v46  ;;  %v18997_v29 = vmul.f32 0.70710677, %v32010_v26  ;;  %24115 = vmatprep.mubr.msk.bf16.mxu1 %vm547_vm0, %v11994_v51  ;;  %v12003_v35 = vrot.slane %v32059_v8, 1  ;;  %v27067_v5 = vld [vmem:[%s33241_s4 + $0x90] sm:$0xff]   ;;  %v32362_v51 = vld [vmem:[%s27795_s13 + $0x120] sm:$0xff]  }
 0x791   : > { %27323 = verf.f32 %v18994_v48  ;;  %v18995_v14 = vmul.f32 0.70710677, %v32020_v25  ;;  %v12002_v48 = vsel %vm7734_vm3, %v11999_v10, %v12001_v37  ;;  %v18940_v9 = vmul.f32 0.5, %v31994_v1 }
 0x792   : > { %v27314_v61 = vpop.eup %27313  ;;  %27325 = verf.f32 %v18997_v29  ;;  %v18939_v1 = vmul.f32 0.5, %v32020_v25  ;;  %v12004_v8 = vsel %vm7734_vm3, %v12001_v37, %v12003_v35 }
 0x793   : > { %v27316_v22 = vpop.eup %27315  ;;  %v19104_v57 = vadd.f32 1.0, %v27314_v61  ;;  %v24741_v56 = vpop.f32.mrb[68].mxu0  ;;  %27327 = verf.f32 %v18995_v14  ;;  %v12005_v14 = vrot.slane %v32074_v45, 1 }
 0x794   : > { %v27318_v27 = vpop.eup %27317  ;;  %v19102_v17 = vadd.f32 1.0, %v27316_v22  ;;  %v32039_v6 = vadd.f32 %v24741_v56, %v31935_v54  ;;  %v18638_v11 = vpop.f32.mrb[69].mxu0  ;;  %v18938_v22 = vmul.f32 0.5, %v32000_v60  ;;  %v27068_v60 = vld [vmem:[%s33241_s4 + $0x98] sm:$0xff]  }
 0x795   : > { %v27320_v0 = vpop.eup %27319  ;;  %v19105_v42 = vadd.f32 1.0, %v27318_v27  ;;  %v32045_v40 = vadd.f32 %v31935_v54, %v18638_v11  ;;  %v24742_v52 = vpop.f32.mrb[70].mxu0  ;;  %v32050_v44 = vmul.f32 %v19104_v57, %v18936_v39  ;;  %v18941_v57 = vmul.f32 0.5, %v32010_v26 }
 0x796   : > { %v19103_v49 = vadd.f32 1.0, %v27320_v0  ;;  %v19000_v47 = vmul.f32 0.70710677, %v32039_v6  ;;  %v18641_v34 = vpop.f32.mrb[71].mxu0  ;;  %v32056_v63 = vadd.f32 %v24742_v52, %v31935_v54  ;;  %v32064_v2 = vmul.f32 %v19102_v17, %v18934_v33  ;;  %v32110_v0 = vld [vmem:[%s27795_s13 + $0xd0] sm:$0xff]   ;;  %v32129_v33 = vld [vmem:[%s27795_s13 + $0xd8] sm:$0xff]  }
 0x797   : > { %v32052_v3 = vmul.f32 %v19105_v42, %v18937_v36  ;;  %v18998_v62 = vmul.f32 0.70710677, %v32045_v40  ;;  %v32069_v53 = vadd.f32 %v31935_v54, %v18641_v34  ;;  %24116 = vmatmul.mubr.msk.bf16.vlgmr.msra.gmra.mrb[168].mxu1 %vm547_vm0, %v11996_v16  ;;  %v12006_v20 = vsel %vm7734_vm3, %v12003_v35, %v12005_v14 }
 0x798   : > { %v32066_v24 = vmul.f32 %v19103_v49, %v18935_v38  ;;  %27329 = verf.f32 %v19000_v47  ;;  %v19001_v31 = vmul.f32 0.70710677, %v32056_v63  ;;  %24119 = vmatprep.mubr.msk.bf16.mxu1 %vm547_vm0, %v11998_v55  ;;  %24172 = vmatpush3.bf16.msra.mxu1 %v31956_v41 }
 0x799   : > { %27331 = verf.f32 %v18998_v62  ;;  %v18999_v13 = vmul.f32 0.70710677, %v32069_v53  ;;  %24173 = vmatprep.subr.bf16.mxu1 %v27066_v18 }
 0x79a   : > { %v27322_v58 = vpop.eup %27321  ;;  %27333 = verf.f32 %v19001_v31  ;;  %v27069_v31 = vld [vmem:[%s33241_s4 + $0xa0] sm:$0xff]  }
 0x79b   : > { %v27324_v30 = vpop.eup %27323  ;;  %v24745_v50 = vpop.f32.mrb[72].mxu0  ;;  %v19108_v46 = vadd.f32 1.0, %v27322_v58  ;;  %27335 = verf.f32 %v18999_v13 }
 0x79c   : > { %v32091_v41 = vadd.f32 %v24745_v50, %v31935_v54  ;;  %v18654_v4 = vpop.f32.mrb[73].mxu0  ;;  %v27326_v59 = vpop.eup %27325  ;;  %v19106_v15 = vadd.f32 1.0, %v27324_v30  ;;  %24174 = vmatpush3.bf16.msra.mxu1 %v27066_v18  ;;  %v12007_v18 = vrot.slane %v32110_v0, 1  ;;  %v32183_v0 = vld [vmem:[%s27795_s13 + $0xe8] sm:$0xff]  }
 0x79d   : > { %v32098_v29 = vadd.f32 %v31935_v54, %v18654_v4  ;;  %v24746_v61 = vpop.f32.mrb[74].mxu0  ;;  %v27328_v16 = vpop.eup %27327  ;;  %v19109_v56 = vadd.f32 1.0, %v27326_v59  ;;  %24175 = vmatprep.subr.bf16.mxu1 %v27067_v5  ;;  %v32115_v26 = vmul.f32 %v19108_v46, %v18940_v9  ;;  %v18942_v9 = vmul.f32 0.5, %v32045_v40  ;;  %v27070_v40 = vld [vmem:[%s33241_s4 + $0xa8] sm:$0xff]  }
 0x79e   : > { %v19004_v55 = vmul.f32 0.70710677, %v32091_v41  ;;  %v18657_v10 = vpop.f32.mrb[75].mxu0  ;;  %v19107_v27 = vadd.f32 1.0, %v27328_v16  ;;  %v32107_v11 = vadd.f32 %v24746_v61, %v31935_v54  ;;  %v32122_v36 = vmul.f32 %v19106_v15, %v18938_v22 }
 0x79f   : > { %v19002_v17 = vmul.f32 0.70710677, %v32098_v29  ;;  %v32117_v39 = vmul.f32 %v19109_v56, %v18941_v57  ;;  %v32120_v25 = vadd.f32 %v31935_v54, %v18657_v10  ;;  %24120 = vmatmul.mubr.msk.bf16.gmra.mrb[172].mxu1 %vm547_vm0, %v12000_v21  ;;  %v18944_v21 = vmul.f32 0.5, %v32039_v6 }
 0x7a0   : > { %27337 = verf.f32 %v19004_v55  ;;  %v32124_v42 = vmul.f32 %v19107_v27, %v18939_v1  ;;  %v19005_v52 = vmul.f32 0.70710677, %v32107_v11  ;;  %24123 = vmatprep.mubr.msk.bf16.mxu1 %vm547_vm0, %v12002_v48  ;;  %24176 = vmatpush3.bf16.msra.mxu1 %v27067_v5  ;;  %v12009_v48 = vrot.slane %v32129_v33, 1  ;;  %v32164_v55 = vld [vmem:[%s27795_s13 + $0xe0] sm:$0xff]  }
 0x7a1   : > { %27339 = verf.f32 %v19002_v17  ;;  %v19003_v49 = vmul.f32 0.70710677, %v32120_v25  ;;  %24177 = vmatprep.subr.bf16.mxu1 %v27068_v60  ;;  %v18945_v15 = vmul.f32 0.5, %v32056_v63  ;;  %v18943_v6 = vmul.f32 0.5, %v32069_v53 }
 0x7a2   : > { %v27330_v38 = vpop.eup %27329  ;;  %27341 = verf.f32 %v19005_v52  ;;  %v12010_v45 = vsel %vm7734_vm3, %v12007_v18, %v12009_v48 }
 0x7a3   : > { %v27332_v34 = vpop.eup %27331  ;;  %v24749_v62 = vpop.f32.mrb[76].mxu0  ;;  %v19112_v13 = vadd.f32 1.0, %v27330_v38  ;;  %27343 = verf.f32 %v19003_v49  ;;  %v32314_v38 = vld [vmem:[%s27795_s13 + $0x110] sm:$0xff]  }
 0x7a4   : > { %v32145_v30 = vadd.f32 %v24749_v62, %v31935_v54  ;;  %v18670_v50 = vpop.f32.mrb[77].mxu0  ;;  %v27334_v37 = vpop.eup %27333  ;;  %v19110_v5 = vadd.f32 1.0, %v27332_v34  ;;  %24178 = vmatpush3.bf16.msra.mxu1 %v27068_v60  ;;  %v12008_v62 = vsel %vm7734_vm3, %v12005_v14, %v12007_v18 }
 0x7a5   : > { %v32152_v46 = vadd.f32 %v31935_v54, %v18670_v50  ;;  %v24750_v4 = vpop.f32.mrb[78].mxu0  ;;  %v27336_v59 = vpop.eup %27335  ;;  %v19113_v61 = vadd.f32 1.0, %v27334_v37  ;;  %24179 = vmatprep.subr.bf16.mxu1 %v27069_v31  ;;  %v32169_v63 = vmul.f32 %v19112_v13, %v18944_v21  ;;  %v27071_v13 = vld [vmem:[%s33241_s4 + $0xb0] sm:$0xff]   ;;  %v18948_v21 = vmul.f32 0.5, %v32091_v41 }
 0x7a6   : > { %v19008_v16 = vmul.f32 0.70710677, %v32145_v30  ;;  %v18673_v35 = vpop.f32.mrb[79].mxu0  ;;  %v19111_v22 = vadd.f32 1.0, %v27336_v59  ;;  %v32161_v56 = vadd.f32 %v24750_v4, %v31935_v54  ;;  %v32176_v1 = vmul.f32 %v19110_v5, %v18942_v9 }
 0x7a7   : > { %v19006_v57 = vmul.f32 0.70710677, %v32152_v46  ;;  %v32171_v10 = vmul.f32 %v19113_v61, %v18945_v15  ;;  %v32174_v53 = vadd.f32 %v31935_v54, %v18673_v35  ;;  %24124 = vmatmul.mubr.msk.bf16.gmra.mrb[176].mxu1 %vm547_vm0, %v12004_v8  ;;  %v12011_v8 = vrot.slane %v32164_v55, 1 }
 0x7a8   : > { %27345 = verf.f32 %v19008_v16  ;;  %v32178_v27 = vmul.f32 %v19111_v22, %v18943_v6  ;;  %v19009_v17 = vmul.f32 0.70710677, %v32161_v56  ;;  %24127 = vmatprep.mubr.msk.bf16.mxu1 %vm547_vm0, %v12006_v20  ;;  %24180 = vmatpush3.bf16.msra.mxu1 %v27069_v31  ;;  %v12013_v9 = vrot.slane %v32183_v0, 1 }
 0x7a9   : > { %27347 = verf.f32 %v19006_v57  ;;  %v19007_v52 = vmul.f32 0.70710677, %v32174_v53  ;;  %24181 = vmatprep.subr.bf16.mxu1 %v27070_v40  ;;  %v18946_v61 = vmul.f32 0.5, %v32098_v29  ;;  %v18949_v16 = vmul.f32 0.5, %v32107_v11 }
 0x7aa   : > { %v27338_v60 = vpop.eup %27337  ;;  %27349 = verf.f32 %v19009_v17  ;;  %v18947_v41 = vmul.f32 0.5, %v32120_v25  ;;  %v32218_v17 = vld [vmem:[%s27795_s13 + $0xf0] sm:$0xff]   ;;  %v18952_v33 = vmul.f32 0.5, %v32145_v30 }
 0x7ab   : > { %v27340_v49 = vpop.eup %27339  ;;  %v24753_v34 = vpop.f32.mrb[80].mxu0  ;;  %v19116_v50 = vadd.f32 1.0, %v27338_v60  ;;  %27351 = verf.f32 %v19007_v52 }
 0x7ac   : > { %v32199_v20 = vadd.f32 %v24753_v34, %v31935_v54  ;;  %v18686_v37 = vpop.f32.mrb[81].mxu0  ;;  %v27342_v14 = vpop.eup %27341  ;;  %v19114_v5 = vadd.f32 1.0, %v27340_v49  ;;  %24182 = vmatpush3.bf16.msra.mxu1 %v27070_v40  ;;  %v32234_v49 = vld [vmem:[%s27795_s13 + $0xf8] sm:$0xff]  }
 0x7ad   : > { %v32206_v4 = vadd.f32 %v31935_v54, %v18686_v37  ;;  %v24754_v59 = vpop.f32.mrb[82].mxu0  ;;  %v27344_v15 = vpop.eup %27343  ;;  %v19117_v35 = vadd.f32 1.0, %v27342_v14  ;;  %24183 = vmatprep.subr.bf16.mxu1 %v27071_v13  ;;  %v32220_v29 = vmul.f32 %v19116_v50, %v18948_v21 }
 0x7ae   : > { %v19012_v6 = vmul.f32 0.70710677, %v32199_v20  ;;  %v18689_v18 = vpop.f32.mrb[83].mxu0  ;;  %v19115_v22 = vadd.f32 1.0, %v27344_v15  ;;  %v32215_v55 = vadd.f32 %v24754_v59, %v31935_v54  ;;  %v32227_v40 = vmul.f32 %v19114_v5, %v18946_v61 }
 0x7af   : > { %v19010_v57 = vmul.f32 0.70710677, %v32206_v4  ;;  %v32222_v11 = vmul.f32 %v19117_v35, %v18949_v16  ;;  %v32225_v60 = vadd.f32 %v31935_v54, %v18689_v18  ;;  %24128 = vmatmul.mubr.msk.bf16.gmra.mrb[180].mxu1 %vm547_vm0, %v12008_v62  ;;  %v12012_v5 = vsel %vm7734_vm3, %v12009_v48, %v12011_v8 }
 0x7b0   : > { %27353 = verf.f32 %v19012_v6  ;;  %v32229_v25 = vmul.f32 %v19115_v22, %v18947_v41  ;;  %v19013_v52 = vmul.f32 0.70710677, %v32215_v55  ;;  %24131 = vmatprep.mubr.msk.bf16.mxu1 %vm547_vm0, %v12010_v45  ;;  %24184 = vmatpush3.bf16.msra.mxu1 %v27071_v13  ;;  %v12015_v62 = vrot.slane %v32218_v17, 1 }
 0x7b1   : > { %27355 = verf.f32 %v19010_v57  ;;  %v19011_v50 = vmul.f32 0.70710677, %v32225_v60  ;;  %v12014_v61 = vsel %vm7734_vm3, %v12011_v8, %v12013_v9  ;;  %v12017_v18 = vrot.slane %v32234_v49, 1 }
 0x7b2   : > { %v27346_v34 = vpop.eup %27345  ;;  %27357 = verf.f32 %v19013_v52  ;;  %v18950_v22 = vmul.f32 0.5, %v32152_v46  ;;  %v18953_v57 = vmul.f32 0.5, %v32161_v56  ;;  %v18956_v0 = vmul.f32 0.5, %v32199_v20 }
 0x7b3   : > { %v27348_v14 = vpop.eup %27347  ;;  %v24757_v21 = vpop.f32.mrb[84].mxu0  ;;  %v19120_v15 = vadd.f32 1.0, %v27346_v34  ;;  %27359 = verf.f32 %v19011_v50  ;;  %v18951_v34 = vmul.f32 0.5, %v32174_v53  ;;  %v18955_v59 = vmul.f32 0.5, %v32225_v60 }
 0x7b4   : > { %v32247_v45 = vadd.f32 %v24757_v21, %v31935_v54  ;;  %v18702_v13 = vpop.f32.mrb[85].mxu0  ;;  %v27350_v16 = vpop.eup %27349  ;;  %v19118_v48 = vadd.f32 1.0, %v27348_v14  ;;  %v32266_v21 = vld [vmem:[%s27795_s13 + $0x100] sm:$0xff]  }
 0x7b5   : > { %v32254_v35 = vadd.f32 %v31935_v54, %v18702_v13  ;;  %v24758_v6 = vpop.f32.mrb[86].mxu0  ;;  %v27352_v41 = vpop.eup %27351  ;;  %v19121_v17 = vadd.f32 1.0, %v27350_v16  ;;  %v32268_v13 = vmul.f32 %v19120_v15, %v18952_v33 }
 0x7b6   : > { %v19016_v52 = vmul.f32 0.70710677, %v32247_v45  ;;  %v18705_v8 = vpop.f32.mrb[87].mxu0  ;;  %v19119_v30 = vadd.f32 1.0, %v27352_v41  ;;  %v32263_v14 = vadd.f32 %v24758_v6, %v31935_v54  ;;  %v32275_v16 = vmul.f32 %v19118_v48, %v18950_v22  ;;  %v32282_v6 = vld [vmem:[%s27795_s13 + $0x108] sm:$0xff]  }
 0x7b7   : > { %v19014_v50 = vmul.f32 0.70710677, %v32254_v35  ;;  %v32270_v46 = vmul.f32 %v19121_v17, %v18953_v57  ;;  %v32273_v56 = vadd.f32 %v31935_v54, %v18705_v8  ;;  %24132 = vmatmul.mubr.msk.bf16.gmra.mrb[184].mxu1 %vm547_vm0, %v12012_v5  ;;  %v12016_v22 = vsel %vm7734_vm3, %v12013_v9, %v12015_v62 }
 0x7b8   : > { %27361 = verf.f32 %v19016_v52  ;;  %v32277_v37 = vmul.f32 %v19119_v30, %v18951_v34  ;;  %v19017_v53 = vmul.f32 0.70710677, %v32263_v14  ;;  %24135 = vmatprep.mubr.msk.bf16.mxu1 %vm547_vm0, %v12014_v61  ;;  %v12019_v17 = vrot.slane %v32266_v21, 1 }
 0x7b9   : > { %27363 = verf.f32 %v19014_v50  ;;  %v19015_v15 = vmul.f32 0.70710677, %v32273_v56  ;;  %v12018_v34 = vsel %vm7734_vm3, %v12015_v62, %v12017_v18  ;;  %v18960_v49 = vmul.f32 0.5, %v32247_v45 }
 0x7ba   : > { %v27354_v41 = vpop.eup %27353  ;;  %27365 = verf.f32 %v19017_v53  ;;  %v12021_v53 = vrot.slane %v32282_v6, 1  ;;  %v18959_v58 = vmul.f32 0.5, %v32273_v56 }
 0x7bb   : > { %v27356_v57 = vpop.eup %27355  ;;  %v24761_v48 = vpop.f32.mrb[88].mxu0  ;;  %v19124_v52 = vadd.f32 1.0, %v27354_v41  ;;  %27367 = verf.f32 %v19015_v15  ;;  %v18954_v15 = vmul.f32 0.5, %v32206_v4 }
 0x7bc   : > { %v32295_v8 = vadd.f32 %v24761_v48, %v31935_v54  ;;  %v18718_v61 = vpop.f32.mrb[89].mxu0  ;;  %v27358_v30 = vpop.eup %27357  ;;  %v19122_v9 = vadd.f32 1.0, %v27356_v57  ;;  %v18957_v48 = vmul.f32 0.5, %v32215_v55 }
 0x7bd   : > { %v32302_v50 = vadd.f32 %v31935_v54, %v18718_v61  ;;  %v24762_v21 = vpop.f32.mrb[90].mxu0  ;;  %v27360_v41 = vpop.eup %27359  ;;  %v19125_v33 = vadd.f32 1.0, %v27358_v30  ;;  %v32316_v31 = vmul.f32 %v19124_v52, %v18956_v0 }
 0x7be   : > { %v19020_v5 = vmul.f32 0.70710677, %v32295_v8  ;;  %v18721_v62 = vpop.f32.mrb[91].mxu0  ;;  %v19123_v20 = vadd.f32 1.0, %v27360_v41  ;;  %v32311_v61 = vadd.f32 %v24762_v21, %v31935_v54  ;;  %v32323_v30 = vmul.f32 %v19122_v9, %v18954_v15  ;;  %v32330_v21 = vld [vmem:[%s27795_s13 + $0x118] sm:$0xff]  }
 0x7bf   : > { %v19018_v57 = vmul.f32 0.70710677, %v32302_v50  ;;  %v32318_v4 = vmul.f32 %v19125_v33, %v18957_v48  ;;  %v32321_v55 = vadd.f32 %v31935_v54, %v18721_v62  ;;  %24136 = vmatmul.mubr.msk.bf16.gmra.mrb[188].mxu1 %vm547_vm0, %v12016_v22  ;;  %v12023_v9 = vrot.slane %v32314_v38, 1 }
 0x7c0   : > { %27369 = verf.f32 %v19020_v5  ;;  %v32325_v47 = vmul.f32 %v19123_v20, %v18955_v59  ;;  %v19021_v60 = vmul.f32 0.70710677, %v32311_v61  ;;  %24139 = vmatprep.mubr.msk.bf16.mxu1 %vm547_vm0, %v12018_v34  ;;  %v12020_v59 = vsel %vm7734_vm3, %v12017_v18, %v12019_v17 }
 0x7c1   : > { %27371 = verf.f32 %v19018_v57  ;;  %v19019_v52 = vmul.f32 0.70710677, %v32321_v55  ;;  %v12022_v62 = vsel %vm7734_vm3, %v12019_v17, %v12021_v53  ;;  %v18964_v6 = vmul.f32 0.5, %v32295_v8 }
 0x7c2   : > { %v27362_v41 = vpop.eup %27361  ;;  %27373 = verf.f32 %v19021_v60  ;;  %v33304_v60 = vrot.slane %v32330_v21, 1  ;;  %v18963_v19 = vmul.f32 0.5, %v32321_v55 }
 0x7c3   : > { %v27364_v5 = vpop.eup %27363  ;;  %v24765_v0 = vpop.f32.mrb[92].mxu0  ;;  %v19128_v15 = vadd.f32 1.0, %v27362_v41  ;;  %27375 = verf.f32 %v19019_v52  ;;  %v18958_v52 = vmul.f32 0.5, %v32254_v35 }
 0x7c4   : > { %v32343_v48 = vadd.f32 %v24765_v0, %v31935_v54  ;;  %v18734_v34 = vpop.f32.mrb[93].mxu0  ;;  %v27366_v20 = vpop.eup %27365  ;;  %v19126_v18 = vadd.f32 1.0, %v27364_v5  ;;  %v18961_v0 = vmul.f32 0.5, %v32263_v14 }
 0x7c5   : > { %v32350_v38 = vadd.f32 %v31935_v54, %v18734_v34  ;;  %v24766_v57 = vpop.f32.mrb[94].mxu0  ;;  %v27368_v41 = vpop.eup %27367  ;;  %v19129_v33 = vadd.f32 1.0, %v27366_v20  ;;  %v32364_v43 = vmul.f32 %v19128_v15, %v18960_v49 }
 0x7c6   : > { %v19024_v22 = vmul.f32 0.70710677, %v32343_v48  ;;  %v18737_v17 = vpop.f32.mrb[95].mxu0  ;;  %v19127_v45 = vadd.f32 1.0, %v27368_v41  ;;  %v32359_v34 = vadd.f32 %v24766_v57, %v31935_v54  ;;  %v32371_v20 = vmul.f32 %v19126_v18, %v18958_v52  ;;  %v32378_v57 = vld [vmem:[%s27795_s13 + $0x128] sm:$0xff]  }
 0x7c7   : > { %v19022_v5 = vmul.f32 0.70710677, %v32350_v38  ;;  %33520 = vst [vmem:[#allocation26_spill] sm:$0xff] %v32364_v43  ;;  %v32366_v35 = vmul.f32 %v19129_v33, %v18961_v0  ;;  %v32369_v14 = vadd.f32 %v31935_v54, %v18737_v17  ;;  %24140 = vmatmul.mubr.msk.bf16.gmra.mrb[192].mxu1 %vm547_vm0, %v12020_v59  ;;  %v12027_v18 = vrot.slane %v32362_v51, 1 }
 0x7c8   : > { %27377 = verf.f32 %v19024_v22  ;;  %v32373_v12 = vmul.f32 %v19127_v45, %v18959_v58  ;;  %v19025_v56 = vmul.f32 0.70710677, %v32359_v34  ;;  %24143 = vmatprep.mubr.msk.bf16.mxu1 %vm547_vm0, %v12022_v62  ;;  %v12024_v58 = vsel %vm7734_vm3, %v12021_v53, %v12023_v9 }
 0x7c9   : > { %33521 = vst [vmem:[#allocation29_spill] sm:$0xff] %v32366_v35  ;;  %27379 = verf.f32 %v19022_v5  ;;  %v19023_v15 = vmul.f32 0.70710677, %v32369_v14  ;;  %v12026_v17 = vsel %vm7734_vm3, %v12023_v9, %v33304_v60  ;;  %v32410_v60 = vld [vmem:[%s27795_s13 + $0x130] sm:$0xff]  }
 0x7ca   : > { %v27370_v41 = vpop.eup %27369  ;;  %27381 = verf.f32 %v19025_v56 }
 0x7cb   : > { %v27372_v22 = vpop.eup %27371  ;;  %v24769_v49 = vpop.f32.mrb[96].mxu0  ;;  %v19132_v52 = vadd.f32 1.0, %v27370_v41  ;;  %27383 = verf.f32 %v19023_v15  ;;  %v18962_v15 = vmul.f32 0.5, %v32302_v50 }
 0x7cc   : > { %v32391_v0 = vadd.f32 %v24769_v49, %v31935_v54  ;;  %v18750_v62 = vpop.f32.mrb[97].mxu0  ;;  %v27374_v45 = vpop.eup %27373  ;;  %v19130_v53 = vadd.f32 1.0, %v27372_v22  ;;  %v18965_v49 = vmul.f32 0.5, %v32311_v61 }
 0x7cd   : > { %v32398_v51 = vadd.f32 %v31935_v54, %v18750_v62  ;;  %v24770_v5 = vpop.f32.mrb[98].mxu0  ;;  %v27376_v41 = vpop.eup %27375  ;;  %v19133_v33 = vadd.f32 1.0, %v27374_v45  ;;  %v32412_v56 = vmul.f32 %v19132_v52, %v18964_v6 }
 0x7ce   : > { %v19028_v59 = vmul.f32 0.70710677, %v32391_v0  ;;  %v18753_v9 = vpop.f32.mrb[99].mxu0  ;;  %v19131_v8 = vadd.f32 1.0, %v27376_v41  ;;  %v32407_v62 = vadd.f32 %v24770_v5, %v31935_v54  ;;  %v32419_v45 = vmul.f32 %v19130_v53, %v18962_v15  ;;  %v32426_v5 = vld [vmem:[%s27795_s13 + $0x138] sm:$0xff]  }
 0x7cf   : > { %v19026_v22 = vmul.f32 0.70710677, %v32398_v51  ;;  %33522 = vst [vmem:[#allocation4_spill] sm:$0xff] %v32412_v56  ;;  %v32414_v50 = vmul.f32 %v19133_v33, %v18965_v49  ;;  %v32417_v61 = vadd.f32 %v31935_v54, %v18753_v9  ;;  %24144 = vmatmul.mubr.msk.bf16.gmra.mrb[196].mxu1 %vm547_vm0, %v12024_v58  ;;  %v12031_v15 = vrot.slane %v32410_v60, 1 }
 0x7d0   : > { %27385 = verf.f32 %v19028_v59  ;;  %33524 = vst [vmem:[#allocation6_spill] sm:$0xff] %v32419_v45  ;;  %v32421_v43 = vmul.f32 %v19131_v8, %v18963_v19  ;;  %v19029_v55 = vmul.f32 0.70710677, %v32407_v62  ;;  %24147 = vmatprep.mubr.msk.bf16.mxu1 %vm547_vm0, %v12026_v17  ;;  %v33526_v19 = vrot.slane %v32330_v21, 1  ;;  %v32458_v45 = vld [vmem:[%s27795_s13 + $0x140] sm:$0xff]  }
 0x7d1   : > { %33523 = vst [vmem:[#allocation3_spill] sm:$0xff] %v32414_v50  ;;  %27387 = verf.f32 %v19026_v22  ;;  %v19027_v52 = vmul.f32 0.70710677, %v32417_v61  ;;  %v33527_v8 = vrot.slane %v32378_v57, 1  ;;  %v18968_v21 = vmul.f32 0.5, %v32343_v48 }
 0x7d2   : > { %33525 = vst [vmem:[#allocation5_spill] sm:$0xff] %v32421_v43  ;;  %v27378_v41 = vpop.eup %27377  ;;  %27389 = verf.f32 %v19029_v55  ;;  %v12028_v53 = vsel %vm7734_vm3, %v33526_v19, %v12027_v18  ;;  %v18969_v58 = vmul.f32 0.5, %v32359_v34 }
 0x7d3   : > { %v27380_v59 = vpop.eup %27379  ;;  %v24773_v6 = vpop.f32.mrb[100].mxu0  ;;  %v19136_v49 = vadd.f32 1.0, %v27378_v41  ;;  %27391 = verf.f32 %v19027_v52  ;;  %v12030_v22 = vsel %vm7734_vm3, %v12027_v18, %v33527_v8  ;;  %v18967_v8 = vmul.f32 0.5, %v32369_v14 }
 0x7d4   : > { %v32439_v9 = vadd.f32 %v24773_v6, %v31935_v54  ;;  %v18766_v17 = vpop.f32.mrb[101].mxu0  ;;  %v27382_v55 = vpop.eup %27381  ;;  %v19134_v19 = vadd.f32 1.0, %v27380_v59  ;;  %v18966_v6 = vmul.f32 0.5, %v32350_v38 }
 0x7d5   : > { %v32446_v60 = vadd.f32 %v31935_v54, %v18766_v17  ;;  %v24774_v33 = vpop.f32.mrb[102].mxu0  ;;  %v27384_v52 = vpop.eup %27383  ;;  %v19137_v56 = vadd.f32 1.0, %v27382_v55  ;;  %v32460_v41 = vmul.f32 %v19136_v49, %v18968_v21  ;;  %v33532_v21 = vrot.slane %v32378_v57, 1 }
 0x7d6   : > { %v19032_v50 = vmul.f32 0.70710677, %v32439_v9  ;;  %v18769_v18 = vpop.f32.mrb[103].mxu0  ;;  %v19135_v48 = vadd.f32 1.0, %v27384_v52  ;;  %v32455_v17 = vadd.f32 %v24774_v33, %v31935_v54  ;;  %v32467_v55 = vmul.f32 %v19134_v19, %v18966_v6  ;;  %v32474_v33 = vld [vmem:[%s27795_s13 + $0x148] sm:$0xff]  }
 0x7d7   : > { %v19030_v59 = vmul.f32 0.70710677, %v32446_v60  ;;  %33528 = vst [vmem:[#allocation28_spill] sm:$0xff] %v32460_v41  ;;  %v32462_v38 = vmul.f32 %v19137_v56, %v18969_v58  ;;  %v32465_v34 = vadd.f32 %v31935_v54, %v18769_v18  ;;  %24148 = vmatmul.mubr.msk.bf16.gmra.mrb[200].mxu1 %vm547_vm0, %v12028_v53  ;;  %v12032_v19 = vsel %vm7734_vm3, %v33532_v21, %v12031_v15 }
 0x7d8   : > { %27393 = verf.f32 %v19032_v50  ;;  %33530 = vst [vmem:[#allocation8_spill] sm:$0xff] %v32467_v55  ;;  %v32469_v43 = vmul.f32 %v19135_v48, %v18967_v8  ;;  %v19033_v14 = vmul.f32 0.70710677, %v32455_v17  ;;  %24151 = vmatprep.mubr.msk.bf16.mxu1 %vm547_vm0, %v12030_v22  ;;  %v12035_v6 = vrot.slane %v32458_v45, 1 }
 0x7d9   : > { %33529 = vst [vmem:[#allocation31_spill] sm:$0xff] %v32462_v38  ;;  %27395 = verf.f32 %v19030_v59  ;;  %v19031_v49 = vmul.f32 0.70710677, %v32465_v34  ;;  %v33533_v48 = vrot.slane %v32426_v5, 1  ;;  %v18972_v57 = vmul.f32 0.5, %v32391_v0 }
 0x7da   : > { %33531 = vst [vmem:[#allocation7_spill] sm:$0xff] %v32469_v43  ;;  %v27386_v52 = vpop.eup %27385  ;;  %27397 = verf.f32 %v19033_v14 }
 0x7db   : > { %v27388_v50 = vpop.eup %27387  ;;  %v24777_v58 = vpop.f32.mrb[104].mxu0  ;;  %v19140_v18 = vadd.f32 1.0, %v27386_v52  ;;  %27399 = verf.f32 %v19031_v49  ;;  %v12034_v59 = vsel %vm7734_vm3, %v12031_v15, %v33533_v48  ;;  %v18970_v49 = vmul.f32 0.5, %v32398_v51 }
 0x7dc   : > { %v32487_v8 = vadd.f32 %v24777_v58, %v31935_v54  ;;  %v18782_v22 = vpop.f32.mrb[105].mxu0  ;;  %v27390_v14 = vpop.eup %27389  ;;  %v19138_v56 = vadd.f32 1.0, %v27388_v50  ;;  %v18973_v58 = vmul.f32 0.5, %v32407_v62  ;;  %v18971_v15 = vmul.f32 0.5, %v32417_v61 }
 0x7dd   : > { %v32494_v21 = vadd.f32 %v31935_v54, %v18782_v22  ;;  %v24778_v45 = vpop.f32.mrb[106].mxu0  ;;  %v27392_v52 = vpop.eup %27391  ;;  %v19141_v41 = vadd.f32 1.0, %v27390_v14  ;;  %v27718_v54 = vld [vmem:[%s33240_s3 + $0x3] ss:$0 sm:$0xff]  ;;  %v32507_v22 = vmul.f32 %v19140_v18, %v18972_v57 }
 0x7de   : > { %v19036_v38 = vmul.f32 0.70710677, %v32487_v8  ;;  %v18785_v55 = vpop.f32.mrb[107].mxu0  ;;  %v19139_v48 = vadd.f32 1.0, %v27392_v52  ;;  %v32505_v50 = vadd.f32 %v27718_v54, %v24778_v45  ;;  %v32513_v14 = vmul.f32 %v19138_v56, %v18970_v49 }
 0x7df   : > { %v19034_v0 = vmul.f32 0.70710677, %v32494_v21  ;;  %33534 = vst [vmem:[#allocation9_spill] sm:$0xff] %v32507_v22  ;;  %v32509_v51 = vmul.f32 %v19141_v41, %v18973_v58  ;;  %v32511_v62 = vadd.f32 %v27718_v54, %v18785_v55  ;;  %24152 = vmatmul.mubr.msk.bf16.gmra.mrb[204].mxu1 %vm547_vm0, %v12032_v19  ;;  %v33538_v49 = vrot.slane %v32426_v5, 1 }
 0x7e0   : > { %27401 = verf.f32 %v19036_v38  ;;  %33536 = vst [vmem:[#allocation30_spill] sm:$0xff] %v32513_v14  ;;  %v32515_v53 = vmul.f32 %v19139_v48, %v18971_v15  ;;  %v19037_v61 = vmul.f32 0.70710677, %v32505_v50  ;;  %24155 = vmatprep.mubr.msk.bf16.mxu1 %vm547_vm0, %v12034_v59  ;;  %v18976_v15 = vmul.f32 0.5, %v32439_v9 }
 0x7e1   : > { %33535 = vst [vmem:[#allocation11_spill] sm:$0xff] %v32509_v51  ;;  %27403 = verf.f32 %v19034_v0  ;;  %v19035_v45 = vmul.f32 0.70710677, %v32511_v62  ;;  %v12036_v58 = vsel %vm7734_vm3, %v33538_v49, %v12035_v6  ;;  %v33539_v41 = vrot.slane %v32474_v33, 1 }
 0x7e2   : > { %33537 = vst [vmem:[#allocation32_spill] sm:$0xff] %v32515_v53  ;;  %v27394_v52 = vpop.eup %27393  ;;  %27405 = verf.f32 %v19037_v61  ;;  %v18974_v56 = vmul.f32 0.5, %v32446_v60  ;;  %v18977_v5 = vmul.f32 0.5, %v32455_v17  ;;  %v18975_v9 = vmul.f32 0.5, %v32465_v34  ;;  %v27061_v53 = vld [vmem:[%s27795_s13 + $0x158] sm:$0xff]  }
 0x7e3   : > { %v27396_v38 = vpop.eup %27395  ;;  %v24781_v55 = vpop.f32.mrb[108].mxu0  ;;  %v19144_v18 = vadd.f32 1.0, %v27394_v52  ;;  %27407 = verf.f32 %v19035_v45  ;;  %v12038_v52 = vsel %vm7734_vm3, %v12035_v6, %v33539_v41  ;;  %v27060_v45 = vld [vmem:[%s27795_s13 + $0x150] sm:$0xff]  }
 0x7e4   : > { %v32525_v57 = vadd.f32 %v27718_v54, %v24781_v55  ;;  %v18798_v19 = vpop.f32.mrb[109].mxu0  ;;  %v27398_v59 = vpop.eup %27397  ;;  %v19142_v48 = vadd.f32 1.0, %v27396_v38 }
 0x7e5   : > { %v32531_v0 = vadd.f32 %v27718_v54, %v18798_v19  ;;  %v24782_v61 = vpop.f32.mrb[110].mxu0  ;;  %v27400_v55 = vpop.eup %27399  ;;  %v19145_v22 = vadd.f32 1.0, %v27398_v59  ;;  %v32543_v43 = vmul.f32 %v19144_v18, %v18976_v15 }
 0x7e6   : > { %v19040_v49 = vmul.f32 0.70710677, %v32525_v57  ;;  %v18801_v51 = vpop.f32.mrb[111].mxu0  ;;  %v19143_v38 = vadd.f32 1.0, %v27400_v55  ;;  %v18929_v14 = vadd.f32 %v27718_v54, %v24782_v61  ;;  %v32547_v60 = vmul.f32 %v19142_v48, %v18974_v56 }
 0x7e7   : > { %v19038_v19 = vmul.f32 0.70710677, %v32531_v0  ;;  %33540 = vst [vmem:[#allocation10_spill] sm:$0xff] %v32543_v43  ;;  %v32545_v6 = vmul.f32 %v19145_v22, %v18977_v5  ;;  %v18927_v41 = vadd.f32 %v27718_v54, %v18801_v51  ;;  %24156 = vmatmul.mubr.msk.bf16.gmra.mrb[208].mxu1 %vm547_vm0, %v12036_v58  ;;  %v12039_v61 = vrot.slane %v27060_v45, 1 }
 0x7e8   : > { %27409 = verf.f32 %v19040_v49  ;;  %33542 = vst [vmem:[#allocation12_spill] sm:$0xff] %v32547_v60  ;;  %v32549_v17 = vmul.f32 %v19143_v38, %v18975_v9  ;;  %v19041_v59 = vmul.f32 0.70710677, %v18929_v14  ;;  %24159 = vmatprep.mubr.msk.bf16.mxu1 %vm547_vm0, %v12038_v52  ;;  %v12041_v54 = vrot.slane %v27061_v53, 1  ;;  %v27062_v38 = vld [vmem:[%s27795_s13 + $0x160] sm:$0xff]  }
 0x7e9   : > { %33541 = vst [vmem:[#allocation13_spill] sm:$0xff] %v32545_v6  ;;  %27411 = verf.f32 %v19038_v19  ;;  %v19039_v55 = vmul.f32 0.70710677, %v18927_v41  ;;  %v18980_v5 = vmul.f32 0.5, %v32487_v8  ;;  %v18981_v52 = vmul.f32 0.5, %v32505_v50 }
 0x7ea   : > { %33543 = vst [vmem:[#allocation14_spill] sm:$0xff] %v32549_v17  ;;  %v27402_v34 = vpop.eup %27401  ;;  %27413 = verf.f32 %v19041_v59  ;;  %v33544_v49 = vrot.slane %v32474_v33, 1  ;;  %v18978_v53 = vmul.f32 0.5, %v32494_v21  ;;  %v18979_v19 = vmul.f32 0.5, %v32511_v62 }
 0x7eb   : > { %v27404_v18 = vpop.eup %27403  ;;  %v19148_v56 = vadd.f32 1.0, %v27402_v34  ;;  %27415 = verf.f32 %v19039_v55  ;;  %v12042_v34 = vsel %vm7734_vm3, %v12039_v61, %v12041_v54  ;;  %v27063_v55 = vld [vmem:[%s27795_s13 + $0x168] sm:$0xff]   ;;  %v12043_v21 = vrot.slane %v27062_v38, 1 }
 0x7ec   : > { %v27406_v15 = vpop.eup %27405  ;;  %v19146_v58 = vadd.f32 1.0, %v27404_v18  ;;  %v12040_v9 = vsel %vm7734_vm3, %v33544_v49, %v12039_v61  ;;  %v18985_v49 = vmul.f32 0.5, %v18929_v14  ;;  %v18982_v38 = vmul.f32 0.5, %v32531_v0 }
 0x7ed   : > { %v27408_v48 = vpop.eup %27407  ;;  %v19149_v45 = vadd.f32 1.0, %v27406_v15  ;;  %v32567_v18 = vmul.f32 %v19148_v56, %v18980_v5  ;;  %v12045_v15 = vrot.slane %v27063_v55, 1 }
 0x7ee   : > { %v19147_v59 = vadd.f32 1.0, %v27408_v48  ;;  %v32571_v8 = vmul.f32 %v19146_v58, %v18978_v53  ;;  %v12044_v53 = vsel %vm7734_vm3, %v12041_v54, %v12043_v21  ;;  %v27072_v54 = vld [vmem:[%s33241_s4 + $0xb8] sm:$0xff]  }
 0x7ef   : > { %33545 = vst [vmem:[#allocation34_spill] sm:$0xff] %v32567_v18  ;;  %v32569_v22 = vmul.f32 %v19149_v45, %v18981_v52  ;;  %24160 = vmatmul.mubr.msk.bf16.gmra.mrb[212].mxu1 %vm547_vm0, %v12040_v9  ;;  %v18984_v45 = vmul.f32 0.5, %v32525_v57  ;;  %v12046_v55 = vsel %vm7734_vm3, %v12043_v21, %v12045_v15  ;;  %24185 = vmatprep.subr.bf16.mxu1 %v27072_v54  ;;  %v32608_v21 = vld [vmem:[%s33241_s4 + $0xc0] sm:$0xff]  }
 0x7f0   : > { %33547 = vst [vmem:[#allocation15_spill] sm:$0xff] %v32571_v8  ;;  %v32573_v50 = vmul.f32 %v19147_v59, %v18979_v19  ;;  %24163 = vmatprep.mubr.msk.bf16.mxu1 %vm547_vm0, %v12042_v34  ;;  %v27064_v19 = vld [vmem:[%s27795_s13 + $0x170] ss:$0 sps:$4 sm:$0x11]   ;;  %v18983_v59 = vmul.f32 0.5, %v18927_v41  ;;  %24186 = vmatpush3.bf16.msra.mxu1 %v27072_v54 }
 0x7f1   : > { %33546 = vst [vmem:[#allocation33_spill] sm:$0xff] %v32569_v22  ;;  %v12047_v14 = vrot.slane %v27064_v19, 1  ;;  %24783 = vmatprep.subr.bf16.mxu1 %v32608_v21 }
 0x7f2   : > { %33548 = vst [vmem:[#allocation17_spill] sm:$0xff] %v32573_v50  ;;  %v27410_v33 = vpop.eup %27409 }
 0x7f3   : > { %v27412_v61 = vpop.eup %27411  ;;  %v19152_v48 = vadd.f32 1.0, %v27410_v33  ;;  %v12048_v41 = vsel %vm7734_vm3, %v12045_v15, %v12047_v14 }
 0x7f4   : > { %v27414_v58 = vpop.eup %27413  ;;  %v19150_v5 = vadd.f32 1.0, %v27412_v61 }
 0x7f5   : > { %v27416_v52 = vpop.eup %27415  ;;  %v19153_v9 = vadd.f32 1.0, %v27414_v58  ;;  %v32586_v62 = vmul.f32 %v19152_v48, %v18984_v45  ;;  %v32614_v48 = vld [vmem:[%s33240_s3 + $0x2] ss:$0 sm:$0xff] }
 0x7f6   : > { %v19151_v34 = vadd.f32 1.0, %v27416_v52  ;;  %v32590_v33 = vmul.f32 %v19150_v5, %v18982_v38 }
 0x7f7   : > { %33549 = vst [vmem:[#allocation16_spill] sm:$0xff] %v32586_v62  ;;  %v32588_v56 = vmul.f32 %v19153_v9, %v18985_v49  ;;  %24164 = vmatmul.mubr.msk.bf16.gmra.mrb[216].mxu1 %vm547_vm0, %v12044_v53 }
 0x7f8   : > { %33551 = vst [vmem:[#allocation35_spill] sm:$0xff] %v32590_v33  ;;  %v32592_v61 = vmul.f32 %v19151_v34, %v18983_v59  ;;  %24167 = vmatprep.mubr.msk.bf16.mxu1 %vm547_vm0, %v12046_v55 }
 0x7f9   : > { %33550 = vst [vmem:[#allocation19_spill] sm:$0xff] %v32588_v56 }
 0x7fa   : > { %33552 = vst [vmem:[#allocation36_spill] sm:$0xff] %v32592_v61 }
 0x7ff   : > { %24168 = vmatmul.mubr.msk.bf16.gmra.mrb[220].mxu1 %vm547_vm0, %v12048_v41 }
 0x86a   : > { %v24117_v15 = vpop.f32.mrb[168].mxu1 }
 0x86b   : > { %v12465_v58 = vadd.f32 %v24117_v15, %v32614_v48  ;;  %v12179_v5 = vpop.f32.mrb[169].mxu1 }
 0x86c   : > { %v12463_v52 = vadd.f32 %v32614_v48, %v12179_v5  ;;  %v24118_v45 = vpop.f32.mrb[170].mxu1 }
 0x86d   : > { %v12577_v49 = vmul.f32 0.70710677, %v12465_v58  ;;  %v12466_v9 = vadd.f32 %v24118_v45, %v32614_v48  ;;  %v12182_v53 = vpop.f32.mrb[171].mxu1  ;;  %v12521_v61 = vmul.f32 0.5, %v12465_v58 }
 0x86e   : > { %v12575_v19 = vmul.f32 0.70710677, %v12463_v52  ;;  %v12464_v38 = vadd.f32 %v32614_v48, %v12182_v53  ;;  %v12519_v22 = vmul.f32 0.5, %v12463_v52 }
 0x86f   : > { %27417 = verf.f32 %v12577_v49  ;;  %v12578_v59 = vmul.f32 0.70710677, %v12466_v9  ;;  %v12522_v18 = vmul.f32 0.5, %v12466_v9 }
 0x870   : > { %27419 = verf.f32 %v12575_v19  ;;  %v12576_v34 = vmul.f32 0.70710677, %v12464_v38 }
 0x871   : > { %27421 = verf.f32 %v12578_v59 }
 0x872   : > { %27423 = verf.f32 %v12576_v34  ;;  %v24121_v55 = vpop.f32.mrb[172].mxu1 }
 0x873   : > { %v12469_v14 = vadd.f32 %v24121_v55, %v32614_v48  ;;  %v12195_v41 = vpop.f32.mrb[173].mxu1 }
 0x874   : > { %v32622_v54 = vadd.f32 %v32614_v48, %v12195_v41  ;;  %v24122_v15 = vpop.f32.mrb[174].mxu1 }
 0x875   : > { %v12581_v5 = vmul.f32 0.70710677, %v12469_v14  ;;  %v12470_v45 = vadd.f32 %v24122_v15, %v32614_v48  ;;  %v12198_v57 = vpop.f32.mrb[175].mxu1 }
 0x876   : > { %v12579_v53 = vmul.f32 0.70710677, %v32622_v54  ;;  %v12468_v49 = vadd.f32 %v32614_v48, %v12198_v57 }
 0x877   : > { %27425 = verf.f32 %v12581_v5  ;;  %v12582_v19 = vmul.f32 0.70710677, %v12470_v45 }
 0x878   : > { %27427 = verf.f32 %v12579_v53  ;;  %v12580_v59 = vmul.f32 0.70710677, %v12468_v49 }
 0x879   : > { %v27418_v34 = vpop.eup %27417  ;;  %27429 = verf.f32 %v12582_v19  ;;  %v12520_v19 = vmul.f32 0.5, %v12464_v38 }
 0x87a   : > { %v27420_v55 = vpop.eup %27419  ;;  %v12689_v0 = vadd.f32 1.0, %v27418_v34  ;;  %27431 = verf.f32 %v12580_v59  ;;  %v24125_v41 = vpop.f32.mrb[176].mxu1 }
 0x87b   : > { %v27422_v51 = vpop.eup %27421  ;;  %v12687_v62 = vadd.f32 1.0, %v27420_v55  ;;  %v32628_v56 = vadd.f32 %v24125_v41, %v32614_v48  ;;  %v12211_v15 = vpop.f32.mrb[177].mxu1 }
 0x87c   : > { %v27424_v33 = vpop.eup %27423  ;;  %v12690_v57 = vadd.f32 1.0, %v27422_v51  ;;  %v32631_v5 = vadd.f32 %v32614_v48, %v12211_v15  ;;  %v24126_v53 = vpop.f32.mrb[178].mxu1  ;;  %v12745_v50 = vmul.f32 %v12689_v0, %v12521_v61 }
 0x87d   : > { %v12688_v8 = vadd.f32 1.0, %v27424_v33  ;;  %v12585_v59 = vmul.f32 0.70710677, %v32628_v56  ;;  %v12214_v34 = vpop.f32.mrb[179].mxu1  ;;  %v32636_v43 = vadd.f32 %v24126_v53, %v32614_v48  ;;  %v12743_v58 = vmul.f32 %v12687_v62, %v12519_v22  ;;  %v27074_v22 = vld [vmem:[%s33241_s4 + $0xc8] sm:$0xff]  }
 0x87e   : > { %v12746_v55 = vmul.f32 %v12690_v57, %v12522_v18  ;;  %v12583_v41 = vmul.f32 0.70710677, %v32631_v5  ;;  %v32639_v51 = vadd.f32 %v32614_v48, %v12214_v34  ;;  %v12526_v34 = vmul.f32 0.5, %v12470_v45 }
 0x87f   : > { %v12744_v9 = vmul.f32 %v12688_v8, %v12520_v19  ;;  %27433 = verf.f32 %v12585_v59  ;;  %v12586_v33 = vmul.f32 0.70710677, %v32636_v43  ;;  %v12525_v59 = vmul.f32 0.5, %v12469_v14 }
 0x880   : > { %v12800_v15 = vpack.c.bf16 %v12746_v55, %v12745_v50  ;;  %27435 = verf.f32 %v12583_v41  ;;  %v12584_v38 = vmul.f32 0.70710677, %v32639_v51 }
 0x881   : > { %v27426_v52 = vpop.eup %27425  ;;  %v12799_v61 = vpack.c.bf16 %v12744_v9, %v12743_v58  ;;  %27437 = verf.f32 %v12586_v33  ;;  %v12523_v9 = vmul.f32 0.5, %v32622_v54  ;;  %v12524_v33 = vmul.f32 0.5, %v12468_v49 }
 0x882   : > { %v27428_v18 = vpop.eup %27427  ;;  %v12693_v0 = vadd.f32 1.0, %v27426_v52  ;;  %v24129_v57 = vpop.f32.mrb[180].mxu1  ;;  %27439 = verf.f32 %v12584_v38 }
 0x883   : > { %v27430_v8 = vpop.eup %27429  ;;  %v12691_v62 = vadd.f32 1.0, %v27428_v18  ;;  %v32647_v50 = vadd.f32 %v24129_v57, %v32614_v48  ;;  %v12227_v53 = vpop.f32.mrb[181].mxu1  ;;  %24187 = vmatprep.mubr.bf16.mxu1 %v12799_v61 }
 0x884   : > { %v27432_v19 = vpop.eup %27431  ;;  %v12694_v55 = vadd.f32 1.0, %v27430_v8  ;;  %v32650_v41 = vadd.f32 %v32614_v48, %v12227_v53  ;;  %v24130_v58 = vpop.f32.mrb[182].mxu1  ;;  %24188 = vmatmul.mubr.bf16.vlgmr.msra.gmra.mrb[56].mxu1 %v12800_v15  ;;  %v12749_v57 = vmul.f32 %v12693_v0, %v12525_v59  ;;  %v27075_v15 = vld [vmem:[%s33241_s4 + $0xd0] sm:$0xff]  }
 0x885   : > { %v12692_v52 = vadd.f32 1.0, %v27432_v19  ;;  %v12589_v38 = vmul.f32 0.70710677, %v32647_v50  ;;  %v12230_v18 = vpop.f32.mrb[183].mxu1  ;;  %24784 = vmatpush3.bf16.msra.mxu1 %v32608_v21  ;;  %v32657_v45 = vadd.f32 %v24130_v58, %v32614_v48  ;;  %v12747_v54 = vmul.f32 %v12691_v62, %v12523_v9  ;;  %v27076_v62 = vld [vmem:[%s33241_s4 + $0xd8] sm:$0xff]  }
 0x886   : > { %v12750_v61 = vmul.f32 %v12694_v55, %v12526_v34  ;;  %v12587_v14 = vmul.f32 0.70710677, %v32650_v41  ;;  %24785 = vmatprep.subr.bf16.mxu1 %v27074_v22  ;;  %v32663_v8 = vadd.f32 %v32614_v48, %v12230_v18 }
 0x887   : > { %v12748_v49 = vmul.f32 %v12692_v52, %v12524_v33  ;;  %27441 = verf.f32 %v12589_v38  ;;  %v12590_v21 = vmul.f32 0.70710677, %v32657_v45  ;;  %v12529_v38 = vmul.f32 0.5, %v32628_v56 }
 0x888   : > { %27443 = verf.f32 %v12587_v14  ;;  %v12802_v0 = vpack.c.bf16 %v12750_v61, %v12749_v57  ;;  %v12588_v19 = vmul.f32 0.70710677, %v32663_v8  ;;  %v12527_v14 = vmul.f32 0.5, %v32631_v5  ;;  %v27077_v5 = vld [vmem:[%s33241_s4 + $0xe0] sm:$0xff]  }
 0x889   : > { %v27434_v53 = vpop.eup %27433  ;;  %v12801_v59 = vpack.c.bf16 %v12748_v49, %v12747_v54  ;;  %24786 = vmatpush3.bf16.msra.mxu1 %v27074_v22  ;;  %27445 = verf.f32 %v12590_v21  ;;  %v12530_v54 = vmul.f32 0.5, %v32636_v43 }
 0x88a   : > { %v27436_v34 = vpop.eup %27435  ;;  %v24133_v55 = vpop.f32.mrb[184].mxu1  ;;  %24787 = vmatprep.subr.bf16.mxu1 %v27075_v15  ;;  %v12697_v58 = vadd.f32 1.0, %v27434_v53  ;;  %27447 = verf.f32 %v12588_v19  ;;  %v12528_v19 = vmul.f32 0.5, %v32639_v51 }
 0x88b   : > { %v32671_v9 = vadd.f32 %v24133_v55, %v32614_v48  ;;  %v12243_v33 = vpop.f32.mrb[185].mxu1  ;;  %24191 = vmatprep.mubr.bf16.mxu1 %v12801_v59  ;;  %v27438_v52 = vpop.eup %27437  ;;  %v12695_v18 = vadd.f32 1.0, %v27436_v34 }
 0x88c   : > { %v32675_v22 = vadd.f32 %v32614_v48, %v12243_v33  ;;  %v24134_v57 = vpop.f32.mrb[186].mxu1  ;;  %24192 = vmatmul.mubr.bf16.gmra.mrb[60].mxu1 %v12802_v0  ;;  %v27440_v61 = vpop.eup %27439  ;;  %v12698_v49 = vadd.f32 1.0, %v27438_v52  ;;  %v12753_v0 = vmul.f32 %v12697_v58, %v12529_v38 }
 0x88d   : > { %v12593_v21 = vmul.f32 0.70710677, %v32671_v9  ;;  %v12246_v53 = vpop.f32.mrb[187].mxu1  ;;  %24788 = vmatpush3.bf16.msra.mxu1 %v27075_v15  ;;  %v12696_v59 = vadd.f32 1.0, %v27440_v61  ;;  %v32683_v34 = vadd.f32 %v24134_v57, %v32614_v48  ;;  %v12751_v15 = vmul.f32 %v12695_v18, %v12527_v14  ;;  %v27078_v14 = vld [vmem:[%s33241_s4 + $0xe8] sm:$0xff]  }
 0x88e   : > { %v12591_v56 = vmul.f32 0.70710677, %v32675_v22  ;;  %24789 = vmatprep.subr.bf16.mxu1 %v27076_v62  ;;  %v12754_v43 = vmul.f32 %v12698_v49, %v12530_v54  ;;  %v32689_v55 = vadd.f32 %v32614_v48, %v12246_v53  ;;  %v12533_v49 = vmul.f32 0.5, %v32647_v50 }
 0x88f   : > { %27449 = verf.f32 %v12593_v21  ;;  %v12752_v33 = vmul.f32 %v12696_v59, %v12528_v19  ;;  %v12594_v51 = vmul.f32 0.70710677, %v32683_v34  ;;  %v12531_v59 = vmul.f32 0.5, %v32650_v41 }
 0x890   : > { %27451 = verf.f32 %v12591_v56  ;;  %v12592_v57 = vmul.f32 0.70710677, %v32689_v55  ;;  %v12804_v61 = vpack.c.bf16 %v12754_v43, %v12753_v0 }
 0x891   : > { %v27442_v52 = vpop.eup %27441  ;;  %24790 = vmatpush3.bf16.msra.mxu1 %v27076_v62  ;;  %27453 = verf.f32 %v12594_v51  ;;  %v12803_v17 = vpack.c.bf16 %v12752_v33, %v12751_v15  ;;  %v12532_v15 = vmul.f32 0.5, %v32663_v8 }
 0x892   : > { %v27444_v6 = vpop.eup %27443  ;;  %v24137_v60 = vpop.f32.mrb[188].mxu1  ;;  %24791 = vmatprep.subr.bf16.mxu1 %v27077_v5  ;;  %v12701_v58 = vadd.f32 1.0, %v27442_v52  ;;  %27455 = verf.f32 %v12592_v57 }
 0x893   : > { %v32694_v38 = vadd.f32 %v24137_v60, %v32614_v48  ;;  %v12259_v18 = vpop.f32.mrb[189].mxu1  ;;  %v27446_v54 = vpop.eup %27445  ;;  %v12699_v21 = vadd.f32 1.0, %v27444_v6  ;;  %24195 = vmatprep.mubr.bf16.mxu1 %v12803_v17  ;;  %v12534_v60 = vmul.f32 0.5, %v32657_v45  ;;  %v27079_v45 = vld [vmem:[%s33241_s4 + $0xf0] sm:$0xff]  }
 0x894   : > { %v32701_v62 = vadd.f32 %v32614_v48, %v12259_v18  ;;  %v24138_v53 = vpop.f32.mrb[190].mxu1  ;;  %v27448_v19 = vpop.eup %27447  ;;  %v12702_v56 = vadd.f32 1.0, %v27446_v54  ;;  %24196 = vmatmul.mubr.bf16.gmra.mrb[64].mxu1 %v12804_v61  ;;  %v12757_v17 = vmul.f32 %v12701_v58, %v12533_v49 }
 0x895   : > { %v12597_v0 = vmul.f32 0.70710677, %v32694_v38  ;;  %v12262_v43 = vpop.f32.mrb[191].mxu1  ;;  %v12700_v33 = vadd.f32 1.0, %v27448_v19  ;;  %v32709_v50 = vadd.f32 %v24138_v53, %v32614_v48  ;;  %24792 = vmatpush3.bf16.msra.mxu1 %v27077_v5  ;;  %v12755_v52 = vmul.f32 %v12699_v21, %v12531_v59  ;;  %v27080_v21 = vld [vmem:[%s33241_s4 + $0xf8] sm:$0xff]  }
 0x896   : > { %v12595_v6 = vmul.f32 0.70710677, %v32701_v62  ;;  %v12758_v51 = vmul.f32 %v12702_v56, %v12534_v60  ;;  %v32712_v41 = vadd.f32 %v32614_v48, %v12262_v43  ;;  %24793 = vmatprep.subr.bf16.mxu1 %v27078_v14  ;;  %v12537_v56 = vmul.f32 0.5, %v32671_v9 }
 0x897   : > { %27457 = verf.f32 %v12597_v0  ;;  %v12756_v8 = vmul.f32 %v12700_v33, %v12532_v15  ;;  %v12598_v57 = vmul.f32 0.70710677, %v32709_v50  ;;  %v12535_v33 = vmul.f32 0.5, %v32675_v22 }
 0x898   : > { %27459 = verf.f32 %v12595_v6  ;;  %v12596_v18 = vmul.f32 0.70710677, %v32712_v41  ;;  %v12806_v5 = vpack.c.bf16 %v12758_v51, %v12757_v17  ;;  %v12538_v6 = vmul.f32 0.5, %v32683_v34 }
 0x899   : > { %v27450_v61 = vpop.eup %27449  ;;  %27461 = verf.f32 %v12598_v57  ;;  %v12805_v49 = vpack.c.bf16 %v12756_v8, %v12755_v52  ;;  %24794 = vmatpush3.bf16.msra.mxu1 %v27078_v14  ;;  %v12536_v8 = vmul.f32 0.5, %v32689_v55 }
 0x89a   : > { %v27452_v58 = vpop.eup %27451  ;;  %v24141_v54 = vpop.f32.mrb[192].mxu1  ;;  %v12705_v53 = vadd.f32 1.0, %v27450_v61  ;;  %27463 = verf.f32 %v12596_v18  ;;  %24795 = vmatprep.subr.bf16.mxu1 %v27079_v45 }
 0x89b   : > { %v32720_v19 = vadd.f32 %v24141_v54, %v32614_v48  ;;  %v12275_v60 = vpop.f32.mrb[193].mxu1  ;;  %v27454_v59 = vpop.eup %27453  ;;  %v12703_v0 = vadd.f32 1.0, %v27452_v58  ;;  %24199 = vmatprep.mubr.bf16.mxu1 %v12805_v49 }
 0x89c   : > { %v32727_v43 = vadd.f32 %v32614_v48, %v12275_v60  ;;  %v24142_v14 = vpop.f32.mrb[194].mxu1  ;;  %v27456_v15 = vpop.eup %27455  ;;  %v12706_v17 = vadd.f32 1.0, %v27454_v59  ;;  %24200 = vmatmul.mubr.bf16.gmra.mrb[68].mxu1 %v12806_v5  ;;  %v12761_v18 = vmul.f32 %v12705_v53, %v12537_v56 }
 0x89d   : > { %v12601_v51 = vmul.f32 0.70710677, %v32720_v19  ;;  %v12278_v52 = vpop.f32.mrb[195].mxu1  ;;  %v12704_v57 = vadd.f32 1.0, %v27456_v15  ;;  %v32735_v61 = vadd.f32 %v24142_v14, %v32614_v48  ;;  %24796 = vmatpush3.bf16.msra.mxu1 %v27079_v45  ;;  %v12759_v34 = vmul.f32 %v12703_v0, %v12535_v33 }
 0x89e   : > { %v12599_v9 = vmul.f32 0.70710677, %v32727_v43  ;;  %v12762_v58 = vmul.f32 %v12706_v17, %v12538_v6  ;;  %v32738_v22 = vadd.f32 %v32614_v48, %v12278_v52  ;;  %24797 = vmatprep.subr.bf16.mxu1 %v27080_v21  ;;  %v12541_v33 = vmul.f32 0.5, %v32694_v38 }
 0x89f   : > { %27465 = verf.f32 %v12601_v51  ;;  %v12760_v54 = vmul.f32 %v12704_v57, %v12536_v8  ;;  %v12602_v5 = vmul.f32 0.70710677, %v32735_v61  ;;  %v12539_v8 = vmul.f32 0.5, %v32701_v62 }
 0x8a0   : > { %27467 = verf.f32 %v12599_v9  ;;  %v12600_v49 = vmul.f32 0.70710677, %v32738_v22  ;;  %v12808_v60 = vpack.c.bf16 %v12762_v58, %v12761_v18  ;;  %v12540_v58 = vmul.f32 0.5, %v32712_v41 }
 0x8a1   : > { %v27458_v55 = vpop.eup %27457  ;;  %27469 = verf.f32 %v12602_v5  ;;  %v12807_v45 = vpack.c.bf16 %v12760_v54, %v12759_v34  ;;  %24798 = vmatpush3.bf16.msra.mxu1 %v27080_v21  ;;  %v12542_v21 = vmul.f32 0.5, %v32709_v50 }
 0x8a2   : > { %v27460_v59 = vpop.eup %27459  ;;  %v24145_v14 = vpop.f32.mrb[196].mxu1  ;;  %v12709_v53 = vadd.f32 1.0, %v27458_v55  ;;  %27471 = verf.f32 %v12600_v49 }
 0x8a3   : > { %v32743_v56 = vadd.f32 %v24145_v14, %v32614_v48  ;;  %v12291_v15 = vpop.f32.mrb[197].mxu1  ;;  %v27462_v0 = vpop.eup %27461  ;;  %v12707_v6 = vadd.f32 1.0, %v27460_v59  ;;  %24203 = vmatprep.mubr.bf16.mxu1 %v12807_v45 }
 0x8a4   : > { %v32747_v17 = vadd.f32 %v32614_v48, %v12291_v15  ;;  %v24146_v51 = vpop.f32.mrb[198].mxu1  ;;  %v27464_v52 = vpop.eup %27463  ;;  %v12710_v57 = vadd.f32 1.0, %v27462_v0  ;;  %24204 = vmatmul.mubr.bf16.gmra.mrb[72].mxu1 %v12808_v60  ;;  %v12765_v5 = vmul.f32 %v12709_v53, %v12541_v33 }
 0x8a5   : > { %v12605_v9 = vmul.f32 0.70710677, %v32743_v56  ;;  %v12294_v18 = vpop.f32.mrb[199].mxu1  ;;  %v12708_v34 = vadd.f32 1.0, %v27464_v52  ;;  %v32755_v54 = vadd.f32 %v24146_v51, %v32614_v48  ;;  %v12763_v50 = vmul.f32 %v12707_v6, %v12539_v8 }
 0x8a6   : > { %v12603_v38 = vmul.f32 0.70710677, %v32747_v17  ;;  %v12766_v55 = vmul.f32 %v12710_v57, %v12542_v21  ;;  %v32758_v62 = vadd.f32 %v32614_v48, %v12294_v18  ;;  %v12545_v6 = vmul.f32 0.5, %v32720_v19 }
 0x8a7   : > { %27473 = verf.f32 %v12605_v9  ;;  %v12764_v49 = vmul.f32 %v12708_v34, %v12540_v58  ;;  %v12606_v60 = vmul.f32 0.70710677, %v32755_v54  ;;  %v12543_v18 = vmul.f32 0.5, %v32727_v43 }
 0x8a8   : > { %27475 = verf.f32 %v12603_v38  ;;  %v12604_v41 = vmul.f32 0.70710677, %v32758_v62  ;;  %v12810_v14 = vpack.c.bf16 %v12766_v55, %v12765_v5  ;;  %v12546_v58 = vmul.f32 0.5, %v32735_v61 }
 0x8a9   : > { %v27466_v59 = vpop.eup %27465  ;;  %27477 = verf.f32 %v12606_v60  ;;  %v12809_v0 = vpack.c.bf16 %v12764_v49, %v12763_v50  ;;  %v12544_v55 = vmul.f32 0.5, %v32738_v22 }
 0x8aa   : > { %v27468_v45 = vpop.eup %27467  ;;  %v24149_v15 = vpop.f32.mrb[200].mxu1  ;;  %v12713_v51 = vadd.f32 1.0, %v27466_v59  ;;  %27479 = verf.f32 %v12604_v41 }
 0x8ab   : > { %v32763_v53 = vadd.f32 %v24149_v15, %v32614_v48  ;;  %v12307_v33 = vpop.f32.mrb[201].mxu1  ;;  %v27470_v52 = vpop.eup %27469  ;;  %v12711_v8 = vadd.f32 1.0, %v27468_v45  ;;  %24207 = vmatprep.mubr.bf16.mxu1 %v12809_v0 }
 0x8ac   : > { %v32767_v21 = vadd.f32 %v32614_v48, %v12307_v33  ;;  %v24150_v57 = vpop.f32.mrb[202].mxu1  ;;  %v27472_v9 = vpop.eup %27471  ;;  %v12714_v34 = vadd.f32 1.0, %v27470_v52  ;;  %24208 = vmatmul.mubr.bf16.gmra.mrb[76].mxu1 %v12810_v14  ;;  %v12769_v60 = vmul.f32 %v12713_v51, %v12545_v6 }
 0x8ad   : > { %v12609_v38 = vmul.f32 0.70710677, %v32763_v53  ;;  %v12310_v5 = vpop.f32.mrb[203].mxu1  ;;  %v12712_v50 = vadd.f32 1.0, %v27472_v9  ;;  %v32775_v49 = vadd.f32 %v24150_v57, %v32614_v48  ;;  %v12767_v61 = vmul.f32 %v12711_v8, %v12543_v18 }
 0x8ae   : > { %v12607_v19 = vmul.f32 0.70710677, %v32767_v21  ;;  %v12770_v59 = vmul.f32 %v12714_v34, %v12546_v58  ;;  %v32778_v43 = vadd.f32 %v32614_v48, %v12310_v5  ;;  %v12549_v8 = vmul.f32 0.5, %v32743_v56 }
 0x8af   : > { %27481 = verf.f32 %v12609_v38  ;;  %v12768_v41 = vmul.f32 %v12712_v50, %v12544_v55  ;;  %v12610_v14 = vmul.f32 0.70710677, %v32775_v49  ;;  %v12547_v5 = vmul.f32 0.5, %v32747_v17 }
 0x8b0   : > { %27483 = verf.f32 %v12607_v19  ;;  %v12608_v22 = vmul.f32 0.70710677, %v32778_v43  ;;  %v12812_v15 = vpack.c.bf16 %v12770_v59, %v12769_v60  ;;  %v12550_v55 = vmul.f32 0.5, %v32755_v54 }
 0x8b1   : > { %v27474_v45 = vpop.eup %27473  ;;  %27485 = verf.f32 %v12610_v14  ;;  %v12811_v52 = vpack.c.bf16 %v12768_v41, %v12767_v61  ;;  %v12548_v59 = vmul.f32 0.5, %v32758_v62 }
 0x8b2   : > { %v27476_v0 = vpop.eup %27475  ;;  %v24153_v33 = vpop.f32.mrb[204].mxu1  ;;  %v12717_v57 = vadd.f32 1.0, %v27474_v45  ;;  %27487 = verf.f32 %v12608_v22 }
 0x8b3   : > { %v32783_v51 = vadd.f32 %v24153_v33, %v32614_v48  ;;  %v12323_v6 = vpop.f32.mrb[205].mxu1  ;;  %v27478_v9 = vpop.eup %27477  ;;  %v12715_v18 = vadd.f32 1.0, %v27476_v0  ;;  %24211 = vmatprep.mubr.bf16.mxu1 %v12811_v52 }
 0x8b4   : > { %v32787_v58 = vadd.f32 %v32614_v48, %v12323_v6  ;;  %v24154_v34 = vpop.f32.mrb[206].mxu1  ;;  %v27480_v38 = vpop.eup %27479  ;;  %v12718_v50 = vadd.f32 1.0, %v27478_v9  ;;  %24212 = vmatmul.mubr.bf16.gmra.mrb[80].mxu1 %v12812_v15  ;;  %v12773_v14 = vmul.f32 %v12717_v57, %v12549_v8 }
 0x8b5   : > { %v12613_v19 = vmul.f32 0.70710677, %v32783_v51  ;;  %v12326_v60 = vpop.f32.mrb[207].mxu1  ;;  %v12716_v61 = vadd.f32 1.0, %v27480_v38  ;;  %v32795_v41 = vadd.f32 %v24154_v34, %v32614_v48  ;;  %v12771_v54 = vmul.f32 %v12715_v18, %v12547_v5 }
 0x8b6   : > { %v12611_v56 = vmul.f32 0.70710677, %v32787_v58  ;;  %v12774_v45 = vmul.f32 %v12718_v50, %v12550_v55  ;;  %v32798_v17 = vadd.f32 %v32614_v48, %v12326_v60  ;;  %v12553_v18 = vmul.f32 0.5, %v32763_v53 }
 0x8b7   : > { %27489 = verf.f32 %v12613_v19  ;;  %v12772_v22 = vmul.f32 %v12716_v61, %v12548_v59  ;;  %v12614_v15 = vmul.f32 0.70710677, %v32795_v41  ;;  %v12551_v60 = vmul.f32 0.5, %v32767_v21 }
 0x8b8   : > { %27491 = verf.f32 %v12611_v56  ;;  %v12612_v62 = vmul.f32 0.70710677, %v32798_v17  ;;  %v12814_v33 = vpack.c.bf16 %v12774_v45, %v12773_v14  ;;  %v12554_v59 = vmul.f32 0.5, %v32775_v49 }
 0x8b9   : > { %v27482_v0 = vpop.eup %27481  ;;  %27493 = verf.f32 %v12614_v15  ;;  %v12813_v9 = vpack.c.bf16 %v12772_v22, %v12771_v54  ;;  %v12552_v45 = vmul.f32 0.5, %v32778_v43 }
 0x8ba   : > { %v27484_v52 = vpop.eup %27483  ;;  %v24157_v6 = vpop.f32.mrb[208].mxu1  ;;  %v12721_v34 = vadd.f32 1.0, %v27482_v0  ;;  %27495 = verf.f32 %v12612_v62 }
 0x8bb   : > { %v32803_v57 = vadd.f32 %v24157_v6, %v32614_v48  ;;  %v12339_v8 = vpop.f32.mrb[209].mxu1  ;;  %v27486_v38 = vpop.eup %27485  ;;  %v12719_v5 = vadd.f32 1.0, %v27484_v52  ;;  %24215 = vmatprep.mubr.bf16.mxu1 %v12813_v9 }
 0x8bc   : > { %v32807_v55 = vadd.f32 %v32614_v48, %v12339_v8  ;;  %v24158_v50 = vpop.f32.mrb[210].mxu1  ;;  %v27488_v19 = vpop.eup %27487  ;;  %v12722_v61 = vadd.f32 1.0, %v27486_v38  ;;  %24216 = vmatmul.mubr.bf16.gmra.mrb[84].mxu1 %v12814_v33  ;;  %v12777_v15 = vmul.f32 %v12721_v34, %v12553_v18 }
 0x8bd   : > { %v12617_v56 = vmul.f32 0.70710677, %v32803_v57  ;;  %v12342_v14 = vpop.f32.mrb[211].mxu1  ;;  %v12720_v54 = vadd.f32 1.0, %v27488_v19  ;;  %v32815_v22 = vadd.f32 %v24158_v50, %v32614_v48  ;;  %v12775_v49 = vmul.f32 %v12719_v5, %v12551_v60 }
 0x8be   : > { %v12615_v53 = vmul.f32 0.70710677, %v32807_v55  ;;  %v12778_v0 = vmul.f32 %v12722_v61, %v12554_v59  ;;  %v32818_v21 = vadd.f32 %v32614_v48, %v12342_v14  ;;  %v12557_v5 = vmul.f32 0.5, %v32783_v51 }
 0x8bf   : > { %27497 = verf.f32 %v12617_v56  ;;  %v12776_v62 = vmul.f32 %v12720_v54, %v12552_v45  ;;  %v12618_v33 = vmul.f32 0.70710677, %v32815_v22  ;;  %v12555_v14 = vmul.f32 0.5, %v32787_v58 }
 0x8c0   : > { %27499 = verf.f32 %v12615_v53  ;;  %v12616_v43 = vmul.f32 0.70710677, %v32818_v21  ;;  %v12816_v6 = vpack.c.bf16 %v12778_v0, %v12777_v15  ;;  %v12558_v45 = vmul.f32 0.5, %v32795_v41 }
 0x8c1   : > { %v27490_v52 = vpop.eup %27489  ;;  %27501 = verf.f32 %v12618_v33  ;;  %v12815_v38 = vpack.c.bf16 %v12776_v62, %v12775_v49  ;;  %v12556_v0 = vmul.f32 0.5, %v32798_v17 }
 0x8c2   : > { %v27492_v9 = vpop.eup %27491  ;;  %v24161_v8 = vpop.f32.mrb[212].mxu1  ;;  %v12725_v50 = vadd.f32 1.0, %v27490_v52  ;;  %27503 = verf.f32 %v12616_v43 }
 0x8c3   : > { %v32823_v34 = vadd.f32 %v24161_v8, %v32614_v48  ;;  %v12355_v18 = vpop.f32.mrb[213].mxu1  ;;  %v27494_v19 = vpop.eup %27493  ;;  %v12723_v60 = vadd.f32 1.0, %v27492_v9  ;;  %24219 = vmatprep.mubr.bf16.mxu1 %v12815_v38 }
 0x8c4   : > { %v32827_v59 = vadd.f32 %v32614_v48, %v12355_v18  ;;  %v24162_v61 = vpop.f32.mrb[214].mxu1  ;;  %v27496_v56 = vpop.eup %27495  ;;  %v12726_v54 = vadd.f32 1.0, %v27494_v19  ;;  %24220 = vmatmul.mubr.bf16.gmra.mrb[88].mxu1 %v12816_v6  ;;  %v12781_v33 = vmul.f32 %v12725_v50, %v12557_v5 }
 0x8c5   : > { %v12621_v53 = vmul.f32 0.70710677, %v32823_v34  ;;  %v12358_v15 = vpop.f32.mrb[215].mxu1  ;;  %v12724_v49 = vadd.f32 1.0, %v27496_v56  ;;  %v32835_v62 = vadd.f32 %v24162_v61, %v32614_v48  ;;  %v12779_v41 = vmul.f32 %v12723_v60, %v12555_v14 }
 0x8c6   : > { %v12619_v51 = vmul.f32 0.70710677, %v32827_v59  ;;  %v12782_v52 = vmul.f32 %v12726_v54, %v12558_v45  ;;  %v32838_v58 = vadd.f32 %v32614_v48, %v12358_v15  ;;  %v12561_v60 = vmul.f32 0.5, %v32803_v57 }
 0x8c7   : > { %27505 = verf.f32 %v12621_v53  ;;  %v12780_v43 = vmul.f32 %v12724_v49, %v12556_v0  ;;  %v12622_v6 = vmul.f32 0.70710677, %v32835_v62  ;;  %v12559_v15 = vmul.f32 0.5, %v32807_v55 }
 0x8c8   : > { %27507 = verf.f32 %v12619_v51  ;;  %v12620_v17 = vmul.f32 0.70710677, %v32838_v58  ;;  %v12818_v8 = vpack.c.bf16 %v12782_v52, %v12781_v33  ;;  %v12562_v0 = vmul.f32 0.5, %v32815_v22 }
 0x8c9   : > { %v27498_v9 = vpop.eup %27497  ;;  %27509 = verf.f32 %v12622_v6  ;;  %v12817_v19 = vpack.c.bf16 %v12780_v43, %v12779_v41  ;;  %v12560_v52 = vmul.f32 0.5, %v32818_v21 }
 0x8ca   : > { %v27500_v38 = vpop.eup %27499  ;;  %v24165_v18 = vpop.f32.mrb[216].mxu1  ;;  %v12729_v61 = vadd.f32 1.0, %v27498_v9  ;;  %27511 = verf.f32 %v12620_v17 }
 0x8cb   : > { %v32843_v50 = vadd.f32 %v24165_v18, %v32614_v48  ;;  %v12371_v5 = vpop.f32.mrb[217].mxu1  ;;  %v27502_v56 = vpop.eup %27501  ;;  %v12727_v14 = vadd.f32 1.0, %v27500_v38  ;;  %24223 = vmatprep.mubr.bf16.mxu1 %v12817_v19 }
 0x8cc   : > { %v32847_v45 = vadd.f32 %v32614_v48, %v12371_v5  ;;  %v24166_v54 = vpop.f32.mrb[218].mxu1  ;;  %v27504_v53 = vpop.eup %27503  ;;  %v12730_v49 = vadd.f32 1.0, %v27502_v56  ;;  %24224 = vmatmul.mubr.bf16.gmra.mrb[92].mxu1 %v12818_v8  ;;  %v12785_v6 = vmul.f32 %v12729_v61, %v12561_v60 }
 0x8cd   : > { %v12625_v51 = vmul.f32 0.70710677, %v32843_v50  ;;  %v12374_v33 = vpop.f32.mrb[219].mxu1  ;;  %v12728_v41 = vadd.f32 1.0, %v27504_v53  ;;  %v12514_v43 = vadd.f32 %v24166_v54, %v32614_v48  ;;  %v12783_v55 = vmul.f32 %v12727_v14, %v12559_v15 }
 0x8ce   : > { %v12623_v57 = vmul.f32 0.70710677, %v32847_v45  ;;  %v12786_v9 = vmul.f32 %v12730_v49, %v12562_v0  ;;  %v12512_v17 = vadd.f32 %v32614_v48, %v12374_v33  ;;  %v12565_v0 = vmul.f32 0.5, %v32823_v34 }
 0x8cf   : > { %27513 = verf.f32 %v12625_v51  ;;  %v12784_v38 = vmul.f32 %v12728_v41, %v12560_v52  ;;  %v12626_v22 = vmul.f32 0.70710677, %v12514_v43  ;;  %v12563_v33 = vmul.f32 0.5, %v32827_v59 }
 0x8d0   : > { %27515 = verf.f32 %v12623_v57  ;;  %v12624_v19 = vmul.f32 0.70710677, %v12512_v17  ;;  %v12820_v8 = vpack.c.bf16 %v12786_v9, %v12785_v6  ;;  %v12566_v52 = vmul.f32 0.5, %v32835_v62 }
 0x8d1   : > { %v27506_v18 = vpop.eup %27505  ;;  %27517 = verf.f32 %v12626_v22  ;;  %v12819_v56 = vpack.c.bf16 %v12784_v38, %v12783_v55  ;;  %v12564_v9 = vmul.f32 0.5, %v32838_v58 }
 0x8d2   : > { %v27508_v5 = vpop.eup %27507  ;;  %v24169_v21 = vpop.f32.mrb[220].mxu1  ;;  %v12733_v53 = vadd.f32 1.0, %v27506_v18  ;;  %27519 = verf.f32 %v12624_v19 }
 0x8d3   : > { %v12517_v54 = vadd.f32 %v24169_v21, %v32614_v48  ;;  %v12387_v61 = vpop.f32.mrb[221].mxu1  ;;  %v27510_v60 = vpop.eup %27509  ;;  %v12731_v49 = vadd.f32 1.0, %v27508_v5  ;;  %24227 = vmatprep.mubr.bf16.mxu1 %v12819_v56 }
 0x8d4   : > { %v12515_v14 = vadd.f32 %v32614_v48, %v12387_v61  ;;  %v24170_v15 = vpop.f32.mrb[222].mxu1  ;;  %v27512_v51 = vpop.eup %27511  ;;  %v12734_v41 = vadd.f32 1.0, %v27510_v60  ;;  %24228 = vmatmul.mubr.bf16.gmra.mrb[96].mxu1 %v12820_v8  ;;  %v12789_v22 = vmul.f32 %v12733_v53, %v12565_v0  ;;  %v12569_v0 = vmul.f32 0.5, %v32843_v50 }
 0x8d5   : > { %v12629_v57 = vmul.f32 0.70710677, %v12517_v54  ;;  %v12390_v6 = vpop.f32.mrb[223].mxu1  ;;  %v12732_v55 = vadd.f32 1.0, %v27512_v51  ;;  %v12518_v34 = vadd.f32 %v24170_v15, %v32614_v48  ;;  %v12787_v5 = vmul.f32 %v12731_v49, %v12563_v33 }
 0x8d6   : > { %v12627_v38 = vmul.f32 0.70710677, %v12515_v14  ;;  %v12790_v18 = vmul.f32 %v12734_v41, %v12566_v52  ;;  %v12516_v19 = vadd.f32 %v32614_v48, %v12390_v6  ;;  %v12570_v15 = vmul.f32 0.5, %v12514_v43 }
 0x8d7   : > { %27521 = verf.f32 %v12629_v57  ;;  %v12788_v21 = vmul.f32 %v12732_v55, %v12564_v9  ;;  %v12630_v59 = vmul.f32 0.70710677, %v12518_v34  ;;  %v12567_v49 = vmul.f32 0.5, %v32847_v45 }
 0x8d8   : > { %27523 = verf.f32 %v12627_v38  ;;  %v12628_v56 = vmul.f32 0.70710677, %v12516_v19  ;;  %v12822_v61 = vpack.c.bf16 %v12790_v18, %v12789_v22  ;;  %v12568_v33 = vmul.f32 0.5, %v12512_v17 }
 0x8d9   : > { %v27514_v62 = vpop.eup %27513  ;;  %27525 = verf.f32 %v12630_v59  ;;  %v12821_v60 = vpack.c.bf16 %v12788_v21, %v12787_v5  ;;  %v12573_v43 = vmul.f32 0.5, %v12517_v54  ;;  %v12571_v45 = vmul.f32 0.5, %v12515_v14 }
 0x8da   : > { %v27516_v8 = vpop.eup %27515  ;;  %v12737_v58 = vadd.f32 1.0, %v27514_v62  ;;  %27527 = verf.f32 %v12628_v56  ;;  %v12574_v62 = vmul.f32 0.5, %v12518_v34  ;;  %v12572_v17 = vmul.f32 0.5, %v12516_v19 }
 0x8db   : > { %v27518_v51 = vpop.eup %27517  ;;  %v12735_v35 = vadd.f32 1.0, %v27516_v8  ;;  %24231 = vmatprep.mubr.bf16.mxu1 %v12821_v60  ;;  %v33554_v54 = vpack.c.bf16 %v32006_v28, %v32004_v32  ;;  %v33555_v14 = vpack.c.bf16 %v32066_v24, %v32064_v2  ;;  %v33556_v34 = vpack.c.bf16 %v32052_v3, %v32050_v44 }
 0x8dc   : > { %v27520_v53 = vpop.eup %27519  ;;  %v12738_v48 = vadd.f32 1.0, %v27518_v51  ;;  %24232 = vmatmul.mubr.bf16.gmra.mrb[100].mxu1 %v12822_v61  ;;  %v12793_v41 = vmul.f32 %v12737_v58, %v12569_v0  ;;  %v33553_v0 = vpack.c.bf16 %v32017_v7, %v32015_v23  ;;  %v33557_v19 = vpack.c.bf16 %v32124_v42, %v32122_v36  ;;  %v33568_v36 = vld [vmem:[#allocation29_spill] sm:$0xff]  ;;  %v33569_v42 = vld [vmem:[#allocation26_spill] sm:$0xff] }
 0x8dd   : > { %v12736_v52 = vadd.f32 1.0, %v27520_v53  ;;  %v12791_v6 = vmul.f32 %v12735_v35, %v12567_v49  ;;  %v33558_v23 = vpack.c.bf16 %v32117_v39, %v32115_v26  ;;  %v33559_v32 = vpack.c.bf16 %v32178_v27, %v32176_v1  ;;  %v33572_v1 = vld [vmem:[#allocation6_spill] sm:$0xff]  ;;  %v33590_v49 = vld [vmem:[#allocation12_spill] sm:$0xff] }
 0x8de   : > { %v12794_v57 = vmul.f32 %v12738_v48, %v12570_v15  ;;  %v33560_v28 = vpack.c.bf16 %v32171_v10, %v32169_v63  ;;  %v33561_v7 = vpack.c.bf16 %v32229_v25, %v32227_v40  ;;  %v33562_v44 = vpack.c.bf16 %v32222_v11, %v32220_v29  ;;  %v33571_v10 = vld [vmem:[#allocation5_spill] sm:$0xff]  ;;  %v33574_v29 = vld [vmem:[#allocation3_spill] sm:$0xff]  ;;  %v33589_v48 = vld [vmem:[#allocation14_spill] sm:$0xff] }
 0x8df   : > { %v12792_v9 = vmul.f32 %v12736_v52, %v12568_v33  ;;  %v33563_v3 = vpack.c.bf16 %v32277_v37, %v32275_v16  ;;  %v33564_v2 = vpack.c.bf16 %v32270_v46, %v32268_v13  ;;  %v33565_v24 = vpack.c.bf16 %v32325_v47, %v32323_v30  ;;  %v33575_v47 = vld [vmem:[#allocation4_spill] sm:$0xff]  ;;  %v33577_v40 = vld [vmem:[#allocation7_spill] sm:$0xff]  ;;  %v33584_v16 = vld [vmem:[#allocation30_spill] sm:$0xff] }
 0x8e0   : > { %v12824_v38 = vpack.c.bf16 %v12794_v57, %v12793_v41  ;;  %v33566_v26 = vpack.c.bf16 %v32318_v4, %v32316_v31  ;;  %v33567_v39 = vpack.c.bf16 %v32373_v12, %v32371_v20  ;;  %v33570_v63 = vpack.c.bf16 %v33568_v36, %v33569_v42  ;;  %v33578_v31 = vld [vmem:[#allocation8_spill] sm:$0xff]  ;;  %v33580_v37 = vld [vmem:[#allocation31_spill] sm:$0xff]  ;;  %v33587_v20 = vld [vmem:[#allocation9_spill] sm:$0xff] }
 0x8e1   : > { %v27522_v55 = vpop.eup %27521  ;;  %v12823_v18 = vpack.c.bf16 %v12792_v9, %v12791_v6  ;;  %v33573_v27 = vpack.c.bf16 %v33571_v10, %v33572_v1  ;;  %v33576_v11 = vpack.c.bf16 %v33574_v29, %v33575_v47  ;;  %v33579_v25 = vpack.c.bf16 %v33577_v40, %v33578_v31  ;;  %v33581_v12 = vld [vmem:[#allocation28_spill] sm:$0xff]  ;;  %v33586_v30 = vld [vmem:[#allocation11_spill] sm:$0xff]  ;;  %v33592_v52 = vld [vmem:[#allocation13_spill] sm:$0xff] }
 0x8e2   : > { %v27524_v22 = vpop.eup %27523  ;;  %v12741_v5 = vadd.f32 1.0, %v27522_v55  ;;  %v33582_v13 = vpack.c.bf16 %v33580_v37, %v33581_v12  ;;  %v33583_v46 = vld [vmem:[#allocation32_spill] sm:$0xff]  ;;  %v33588_v15 = vpack.c.bf16 %v33586_v30, %v33587_v20  ;;  %v33591_v33 = vpack.c.bf16 %v33589_v48, %v33590_v49  ;;  %v33593_v41 = vld [vmem:[#allocation10_spill] sm:$0xff]  ;;  %v33595_v6 = vld [vmem:[#allocation17_spill] sm:$0xff] }
 0x8e3   : > { %v27526_v21 = vpop.eup %27525  ;;  %v12739_v59 = vadd.f32 1.0, %v27524_v22  ;;  %24235 = vmatprep.mubr.bf16.mxu1 %v12823_v18  ;;  %v33585_v4 = vpack.c.bf16 %v33583_v46, %v33584_v16  ;;  %v33594_v57 = vpack.c.bf16 %v33592_v52, %v33593_v41  ;;  %v33596_v9 = vld [vmem:[#allocation15_spill] sm:$0xff]  ;;  %v33599_v22 = vld [vmem:[#allocation34_spill] sm:$0xff] }
 0x8e4   : > { %v27528_v50 = vpop.eup %27527  ;;  %v12742_v56 = vadd.f32 1.0, %v27526_v21  ;;  %24236 = vmatmul.mubr.bf16.gmra.mrb[104].mxu1 %v12824_v38  ;;  %v12797_v8 = vmul.f32 %v12741_v5, %v12573_v43  ;;  %v33597_v55 = vpack.c.bf16 %v33595_v6, %v33596_v9  ;;  %v33598_v38 = vld [vmem:[#allocation33_spill] sm:$0xff]  ;;  %v33601_v5 = vld [vmem:[#allocation36_spill] sm:$0xff]  ;;  %v33602_v21 = vld [vmem:[#allocation35_spill] sm:$0xff] }
 0x8e5   : > { %v12740_v61 = vadd.f32 1.0, %v27528_v50  ;;  %v12795_v35 = vmul.f32 %v12739_v59, %v12571_v45  ;;  %v33600_v18 = vpack.c.bf16 %v33598_v38, %v33599_v22  ;;  %v33603_v59 = vpack.c.bf16 %v33601_v5, %v33602_v21  ;;  %v33604_v50 = vld [vmem:[#allocation19_spill] sm:$0xff]  ;;  %v33605_v43 = vld [vmem:[#allocation16_spill] sm:$0xff] }
 0x8e6   : > { %v12798_v60 = vmul.f32 %v12742_v56, %v12574_v62  ;;  %v33606_v62 = vpack.c.bf16 %v33604_v50, %v33605_v43  ;;  %v32954_v56 = vld [vmem:[%s260_s18] ss:$0 sm:$0xff] }
 0x8e7   : > { %v12796_v58 = vmul.f32 %v12740_v61, %v12572_v17 }
 0x8e8   : > { %v12826_v51 = vpack.c.bf16 %v12798_v60, %v12797_v8 }
 0x8e9   : > { %v12825_v53 = vpack.c.bf16 %v12796_v58, %v12795_v35 }
 0x8eb   : > { %24239 = vmatprep.mubr.bf16.mxu1 %v12825_v53 }
 0x8ec   : > { %24240 = vmatmul.mubr.bf16.gmra.mrb[108].mxu1 %v12826_v51 }
 0x8ed   : > { %24799 = vmatprep.mubr.bf16.mxu1 %v33553_v0 }
 0x8f4   : > { %24800 = vmatmul.mubr.bf16.vlgmr.msra.gmra.mrb[56].mxu1 %v33554_v54 }
 0x8f5   : > { %24803 = vmatprep.mubr.bf16.mxu1 %v33555_v14 }
 0x8fc   : > { %24804 = vmatmul.mubr.bf16.gmra.mrb[60].mxu1 %v33556_v34 }
 0x8fd   : > { %24807 = vmatprep.mubr.bf16.mxu1 %v33557_v19 }
 0x904   : > { %24808 = vmatmul.mubr.bf16.gmra.mrb[64].mxu1 %v33558_v23 }
 0x905   : > { %24811 = vmatprep.mubr.bf16.mxu1 %v33559_v32 }
 0x90c   : > { %24812 = vmatmul.mubr.bf16.gmra.mrb[68].mxu1 %v33560_v28 }
 0x90d   : > { %24815 = vmatprep.mubr.bf16.mxu1 %v33561_v7 }
 0x914   : > { %24816 = vmatmul.mubr.bf16.gmra.mrb[72].mxu1 %v33562_v44 }
 0x915   : > { %24819 = vmatprep.mubr.bf16.mxu1 %v33563_v3 }
 0x91c   : > { %24820 = vmatmul.mubr.bf16.gmra.mrb[76].mxu1 %v33564_v2 }
 0x91d   : > { %24823 = vmatprep.mubr.bf16.mxu1 %v33565_v24 }
 0x924   : > { %24824 = vmatmul.mubr.bf16.gmra.mrb[80].mxu1 %v33566_v26 }
 0x925   : > { %24827 = vmatprep.mubr.bf16.mxu1 %v33567_v39 }
 0x92c   : > { %24828 = vmatmul.mubr.bf16.gmra.mrb[84].mxu1 %v33570_v63 }
 0x92d   : > { %24831 = vmatprep.mubr.bf16.mxu1 %v33573_v27 }
 0x934   : > { %24832 = vmatmul.mubr.bf16.gmra.mrb[88].mxu1 %v33576_v11 }
 0x935   : > { %24835 = vmatprep.mubr.bf16.mxu1 %v33579_v25 }
 0x93c   : > { %24836 = vmatmul.mubr.bf16.gmra.mrb[92].mxu1 %v33582_v13 }
 0x93d   : > { %24839 = vmatprep.mubr.bf16.mxu1 %v33585_v4 }
 0x944   : > { %24840 = vmatmul.mubr.bf16.gmra.mrb[96].mxu1 %v33588_v15 }
 0x945   : > { %24843 = vmatprep.mubr.bf16.mxu1 %v33591_v33 }
 0x94c   : > { %24844 = vmatmul.mubr.bf16.gmra.mrb[100].mxu1 %v33594_v57 }
 0x94d   : > { %24847 = vmatprep.mubr.bf16.mxu1 %v33597_v55 }
 0x954   : > { %24848 = vmatmul.mubr.bf16.gmra.mrb[104].mxu1 %v33600_v18 }
 0x955   : > { %24851 = vmatprep.mubr.bf16.mxu1 %v33603_v59 }
 0x95c   : > { %24852 = vmatmul.mubr.bf16.gmra.mrb[108].mxu1 %v33606_v62 }
 0x9c7   : > { %v24801_v45 = vpop.f32.mrb[56].mxu1 }
 0x9c8   : > { %v19793_v17 = vadd.f32 %v24801_v45, %v32954_v56  ;;  %v19393_v61 = vpop.f32.mrb[57].mxu1 }
 0x9c9   : > { %v19791_v8 = vadd.f32 %v32954_v56, %v19393_v61  ;;  %v24802_v60 = vpop.f32.mrb[58].mxu1 }
 0x9ca   : > { %v19905_v35 = vmul.f32 0.70710677, %v19793_v17  ;;  %v19794_v58 = vadd.f32 %v24802_v60, %v32954_v56  ;;  %v19396_v51 = vpop.f32.mrb[59].mxu1  ;;  %v19849_v63 = vmul.f32 0.5, %v19793_v17 }
 0x9cb   : > { %v19903_v53 = vmul.f32 0.70710677, %v19791_v8  ;;  %v19792_v0 = vadd.f32 %v32954_v56, %v19396_v51  ;;  %v19847_v29 = vmul.f32 0.5, %v19791_v8 }
 0x9cc   : > { %27529 = verf.f32 %v19905_v35  ;;  %v19906_v54 = vmul.f32 0.70710677, %v19794_v58  ;;  %v19850_v37 = vmul.f32 0.5, %v19794_v58 }
 0x9cd   : > { %27531 = verf.f32 %v19903_v53  ;;  %v19904_v14 = vmul.f32 0.70710677, %v19792_v0  ;;  %v19848_v4 = vmul.f32 0.5, %v19792_v0 }
 0x9ce   : > { %27533 = verf.f32 %v19906_v54 }
 0x9cf   : > { %27535 = verf.f32 %v19904_v14  ;;  %v24805_v34 = vpop.f32.mrb[60].mxu1 }
 0x9d0   : > { %v19797_v19 = vadd.f32 %v24805_v34, %v32954_v56  ;;  %v19409_v23 = vpop.f32.mrb[61].mxu1 }
 0x9d1   : > { %v19795_v32 = vadd.f32 %v32954_v56, %v19409_v23  ;;  %v24806_v28 = vpop.f32.mrb[62].mxu1 }
 0x9d2   : > { %v19909_v7 = vmul.f32 0.70710677, %v19797_v19  ;;  %v19798_v44 = vadd.f32 %v24806_v28, %v32954_v56  ;;  %v19412_v3 = vpop.f32.mrb[63].mxu1  ;;  %v19853_v38 = vmul.f32 0.5, %v19797_v19 }
 0x9d3   : > { %v19907_v2 = vmul.f32 0.70710677, %v19795_v32  ;;  %v19796_v24 = vadd.f32 %v32954_v56, %v19412_v3  ;;  %v19851_v21 = vmul.f32 0.5, %v19795_v32 }
 0x9d4   : > { %27537 = verf.f32 %v19909_v7  ;;  %v19910_v26 = vmul.f32 0.70710677, %v19798_v44  ;;  %v19854_v17 = vmul.f32 0.5, %v19798_v44 }
 0x9d5   : > { %27539 = verf.f32 %v19907_v2  ;;  %v19908_v39 = vmul.f32 0.70710677, %v19796_v24  ;;  %v19852_v58 = vmul.f32 0.5, %v19796_v24 }
 0x9d6   : > { %v27530_v36 = vpop.eup %27529  ;;  %27541 = verf.f32 %v19910_v26 }
 0x9d7   : > { %v27532_v42 = vpop.eup %27531  ;;  %v20017_v10 = vadd.f32 1.0, %v27530_v36  ;;  %27543 = verf.f32 %v19908_v39  ;;  %v24809_v1 = vpop.f32.mrb[64].mxu1 }
 0x9d8   : > { %v27534_v27 = vpop.eup %27533  ;;  %v20015_v47 = vadd.f32 1.0, %v27532_v42  ;;  %v32971_v11 = vadd.f32 %v24809_v1, %v32954_v56  ;;  %v19425_v40 = vpop.f32.mrb[65].mxu1 }
 0x9d9   : > { %v27536_v31 = vpop.eup %27535  ;;  %v20073_v25 = vmul.f32 %v20017_v10, %v19849_v63  ;;  %v20018_v12 = vadd.f32 1.0, %v27534_v27  ;;  %v19799_v13 = vadd.f32 %v32954_v56, %v19425_v40  ;;  %v24810_v46 = vpop.f32.mrb[66].mxu1 }
 0x9da   : > { %v20071_v16 = vmul.f32 %v20015_v47, %v19847_v29  ;;  %v20016_v30 = vadd.f32 1.0, %v27536_v31  ;;  %v19913_v20 = vmul.f32 0.70710677, %v32971_v11  ;;  %v19428_v15 = vpop.f32.mrb[67].mxu1  ;;  %v32977_v33 = vadd.f32 %v24810_v46, %v32954_v56 }
 0x9db   : > { %20129 = vst [vmem:[%s32968_s23 + $0x10] sm:$0xff] %v20073_v25  ;;  %v20074_v48 = vmul.f32 %v20018_v12, %v19850_v37  ;;  %v19911_v49 = vmul.f32 0.70710677, %v19799_v13  ;;  %v32981_v41 = vadd.f32 %v32954_v56, %v19428_v15  ;;  %v19857_v3 = vmul.f32 0.5, %v32971_v11 }
 0x9dc   : > { %20127 = vst [vmem:[%s32968_s23] sm:$0xff] %v20071_v16  ;;  %v20072_v52 = vmul.f32 %v20016_v30, %v19848_v4  ;;  %27545 = verf.f32 %v19913_v20  ;;  %v19914_v57 = vmul.f32 0.70710677, %v32977_v33  ;;  %v19855_v26 = vmul.f32 0.5, %v19799_v13 }
 0x9dd   : > { %20130 = vst [vmem:[%s32968_s23 + $0x18] sm:$0xff] %v20074_v48  ;;  %27547 = verf.f32 %v19911_v49  ;;  %v19912_v9 = vmul.f32 0.70710677, %v32981_v41  ;;  %v19858_v11 = vmul.f32 0.5, %v32977_v33  ;;  %v19856_v37 = vmul.f32 0.5, %v32981_v41 }
 0x9de   : > { %v27538_v6 = vpop.eup %27537  ;;  %20128 = vst [vmem:[%s32968_s23 + $0x8] sm:$0xff] %v20072_v52  ;;  %27549 = verf.f32 %v19914_v57 }
 0x9df   : > { %v27540_v55 = vpop.eup %27539  ;;  %v20021_v22 = vadd.f32 1.0, %v27538_v6  ;;  %v24813_v18 = vpop.f32.mrb[68].mxu1  ;;  %27551 = verf.f32 %v19912_v9 }
 0x9e0   : > { %v27542_v5 = vpop.eup %27541  ;;  %v20019_v59 = vadd.f32 1.0, %v27540_v55  ;;  %v32988_v50 = vadd.f32 %v24813_v18, %v32954_v56  ;;  %v19441_v43 = vpop.f32.mrb[69].mxu1 }
 0x9e1   : > { %v27544_v62 = vpop.eup %27543  ;;  %v20077_v45 = vmul.f32 %v20021_v22, %v19853_v38  ;;  %v20022_v61 = vadd.f32 1.0, %v27542_v5  ;;  %v19803_v8 = vadd.f32 %v32954_v56, %v19441_v43  ;;  %v24814_v60 = vpop.f32.mrb[70].mxu1 }
 0x9e2   : > { %v20075_v35 = vmul.f32 %v20019_v59, %v19851_v21  ;;  %v20020_v51 = vadd.f32 1.0, %v27544_v62  ;;  %v19917_v53 = vmul.f32 0.70710677, %v32988_v50  ;;  %v19444_v0 = vpop.f32.mrb[71].mxu1  ;;  %v32994_v34 = vadd.f32 %v24814_v60, %v32954_v56 }
 0x9e3   : > { %20133 = vst [vmem:[%s32968_s23 + $0x30] sm:$0xff] %v20077_v45  ;;  %v20078_v54 = vmul.f32 %v20022_v61, %v19854_v17  ;;  %v19915_v14 = vmul.f32 0.70710677, %v19803_v8  ;;  %v32998_v23 = vadd.f32 %v32954_v56, %v19444_v0  ;;  %v19861_v33 = vmul.f32 0.5, %v32988_v50 }
 0x9e4   : > { %20131 = vst [vmem:[%s32968_s23 + $0x20] sm:$0xff] %v20075_v35  ;;  %v20076_v19 = vmul.f32 %v20020_v51, %v19852_v58  ;;  %27553 = verf.f32 %v19917_v53  ;;  %v19918_v32 = vmul.f32 0.70710677, %v32994_v34  ;;  %v19859_v57 = vmul.f32 0.5, %v19803_v8 }
 0x9e5   : > { %20134 = vst [vmem:[%s32968_s23 + $0x38] sm:$0xff] %v20078_v54  ;;  %27555 = verf.f32 %v19915_v14  ;;  %v19916_v7 = vmul.f32 0.70710677, %v32998_v23  ;;  %v19862_v50 = vmul.f32 0.5, %v32994_v34  ;;  %v19860_v17 = vmul.f32 0.5, %v32998_v23 }
 0x9e6   : > { %v27546_v28 = vpop.eup %27545  ;;  %20132 = vst [vmem:[%s32968_s23 + $0x28] sm:$0xff] %v20076_v19  ;;  %27557 = verf.f32 %v19918_v32 }
 0x9e7   : > { %v27548_v44 = vpop.eup %27547  ;;  %v20025_v2 = vadd.f32 1.0, %v27546_v28  ;;  %v24817_v24 = vpop.f32.mrb[72].mxu1  ;;  %27559 = verf.f32 %v19916_v7 }
 0x9e8   : > { %v20023_v39 = vadd.f32 1.0, %v27548_v44  ;;  %v33006_v36 = vadd.f32 %v24817_v24, %v32954_v56  ;;  %v19457_v42 = vpop.f32.mrb[73].mxu1  ;;  %v27550_v63 = vpop.eup %27549 }
 0x9e9   : > { %v20081_v10 = vmul.f32 %v20025_v2, %v19857_v3  ;;  %v33009_v1 = vadd.f32 %v32954_v56, %v19457_v42  ;;  %v24818_v27 = vpop.f32.mrb[74].mxu1  ;;  %v27552_v29 = vpop.eup %27551  ;;  %v20026_v40 = vadd.f32 1.0, %v27550_v63 }
 0x9ea   : > { %v20079_v47 = vmul.f32 %v20023_v39, %v19855_v26  ;;  %v19921_v31 = vmul.f32 0.70710677, %v33006_v36  ;;  %v19460_v25 = vpop.f32.mrb[75].mxu1  ;;  %v20024_v12 = vadd.f32 1.0, %v27552_v29  ;;  %v33017_v46 = vadd.f32 %v24818_v27, %v32954_v56 }
 0x9eb   : > { %20137 = vst [vmem:[%s32968_s23 + $0x50] sm:$0xff] %v20081_v10  ;;  %v19919_v13 = vmul.f32 0.70710677, %v33009_v1  ;;  %v20082_v16 = vmul.f32 %v20026_v40, %v19858_v11  ;;  %v33021_v4 = vadd.f32 %v32954_v56, %v19460_v25  ;;  %v19865_v34 = vmul.f32 0.5, %v33006_v36 }
 0x9ec   : > { %20135 = vst [vmem:[%s32968_s23 + $0x40] sm:$0xff] %v20079_v47  ;;  %27561 = verf.f32 %v19921_v31  ;;  %v20080_v30 = vmul.f32 %v20024_v12, %v19856_v37  ;;  %v19922_v20 = vmul.f32 0.70710677, %v33017_v46  ;;  %v19863_v32 = vmul.f32 0.5, %v33009_v1 }
 0x9ed   : > { %27563 = verf.f32 %v19919_v13  ;;  %20138 = vst [vmem:[%s32968_s23 + $0x58] sm:$0xff] %v20082_v16  ;;  %v19920_v48 = vmul.f32 0.70710677, %v33021_v4  ;;  %v19866_v42 = vmul.f32 0.5, %v33017_v46  ;;  %v19864_v27 = vmul.f32 0.5, %v33021_v4 }
 0x9ee   : > { %v27554_v15 = vpop.eup %27553  ;;  %20136 = vst [vmem:[%s32968_s23 + $0x48] sm:$0xff] %v20080_v30  ;;  %27565 = verf.f32 %v19922_v20 }
 0x9ef   : > { %v27556_v49 = vpop.eup %27555  ;;  %v20029_v52 = vadd.f32 1.0, %v27554_v15  ;;  %v24821_v41 = vpop.f32.mrb[76].mxu1  ;;  %27567 = verf.f32 %v19920_v48 }
 0x9f0   : > { %v20027_v6 = vadd.f32 1.0, %v27556_v49  ;;  %v33029_v9 = vadd.f32 %v24821_v41, %v32954_v56  ;;  %v19473_v55 = vpop.f32.mrb[77].mxu1  ;;  %v27558_v38 = vpop.eup %27557 }
 0x9f1   : > { %v20085_v22 = vmul.f32 %v20029_v52, %v19861_v33  ;;  %v33032_v18 = vadd.f32 %v32954_v56, %v19473_v55  ;;  %v24822_v5 = vpop.f32.mrb[78].mxu1  ;;  %v27560_v21 = vpop.eup %27559  ;;  %v20030_v43 = vadd.f32 1.0, %v27558_v38 }
 0x9f2   : > { %v20083_v59 = vmul.f32 %v20027_v6, %v19859_v57  ;;  %v19925_v62 = vmul.f32 0.70710677, %v33029_v9  ;;  %v19476_v45 = vpop.f32.mrb[79].mxu1  ;;  %v20028_v61 = vadd.f32 1.0, %v27560_v21  ;;  %v33040_v60 = vadd.f32 %v24822_v5, %v32954_v56 }
 0x9f3   : > { %20141 = vst [vmem:[%s32968_s23 + $0x70] sm:$0xff] %v20085_v22  ;;  %v19923_v8 = vmul.f32 0.70710677, %v33032_v18  ;;  %v20086_v35 = vmul.f32 %v20030_v43, %v19862_v50  ;;  %v33044_v58 = vadd.f32 %v32954_v56, %v19476_v45  ;;  %v19869_v16 = vmul.f32 0.5, %v33029_v9 }
 0x9f4   : > { %20139 = vst [vmem:[%s32968_s23 + $0x60] sm:$0xff] %v20083_v59  ;;  %27569 = verf.f32 %v19925_v62  ;;  %v20084_v51 = vmul.f32 %v20028_v61, %v19860_v17  ;;  %v19926_v53 = vmul.f32 0.70710677, %v33040_v60  ;;  %v19867_v20 = vmul.f32 0.5, %v33032_v18 }
 0x9f5   : > { %27571 = verf.f32 %v19923_v8  ;;  %20142 = vst [vmem:[%s32968_s23 + $0x78] sm:$0xff] %v20086_v35  ;;  %v19924_v54 = vmul.f32 0.70710677, %v33044_v58  ;;  %v19870_v55 = vmul.f32 0.5, %v33040_v60  ;;  %v19868_v5 = vmul.f32 0.5, %v33044_v58 }
 0x9f6   : > { %v27562_v0 = vpop.eup %27561  ;;  %20140 = vst [vmem:[%s32968_s23 + $0x68] sm:$0xff] %v20084_v51  ;;  %27573 = verf.f32 %v19926_v53 }
 0x9f7   : > { %v27564_v14 = vpop.eup %27563  ;;  %v20033_v19 = vadd.f32 1.0, %v27562_v0  ;;  %v24825_v23 = vpop.f32.mrb[80].mxu1  ;;  %27575 = verf.f32 %v19924_v54 }
 0x9f8   : > { %v20031_v28 = vadd.f32 1.0, %v27564_v14  ;;  %v33053_v7 = vadd.f32 %v24825_v23, %v32954_v56  ;;  %v19489_v44 = vpop.f32.mrb[81].mxu1  ;;  %v27566_v3 = vpop.eup %27565 }
 0x9f9   : > { %v20089_v2 = vmul.f32 %v20033_v19, %v19865_v34  ;;  %v33056_v24 = vadd.f32 %v32954_v56, %v19489_v44  ;;  %v24826_v26 = vpop.f32.mrb[82].mxu1  ;;  %v27568_v39 = vpop.eup %27567  ;;  %v20034_v63 = vadd.f32 1.0, %v27566_v3 }
 0x9fa   : > { %v20087_v36 = vmul.f32 %v20031_v28, %v19863_v32  ;;  %v19929_v10 = vmul.f32 0.70710677, %v33053_v7  ;;  %v19492_v1 = vpop.f32.mrb[83].mxu1  ;;  %v20032_v29 = vadd.f32 1.0, %v27568_v39  ;;  %v33064_v11 = vadd.f32 %v24826_v26, %v32954_v56 }
 0x9fb   : > { %20145 = vst [vmem:[%s32968_s23 + $0x90] sm:$0xff] %v20089_v2  ;;  %v19927_v47 = vmul.f32 0.70710677, %v33056_v24  ;;  %v20090_v40 = vmul.f32 %v20034_v63, %v19866_v42  ;;  %v33068_v31 = vadd.f32 %v32954_v56, %v19492_v1  ;;  %v19873_v35 = vmul.f32 0.5, %v33053_v7 }
 0x9fc   : > { %20143 = vst [vmem:[%s32968_s23 + $0x80] sm:$0xff] %v20087_v36  ;;  %27577 = verf.f32 %v19929_v10  ;;  %v20088_v25 = vmul.f32 %v20032_v29, %v19864_v27  ;;  %v19930_v37 = vmul.f32 0.70710677, %v33064_v11  ;;  %v19871_v53 = vmul.f32 0.5, %v33056_v24 }
 0x9fd   : > { %27579 = verf.f32 %v19927_v47  ;;  %20146 = vst [vmem:[%s32968_s23 + $0x98] sm:$0xff] %v20090_v40  ;;  %v19928_v13 = vmul.f32 0.70710677, %v33068_v31  ;;  %v19874_v44 = vmul.f32 0.5, %v33064_v11  ;;  %v19872_v26 = vmul.f32 0.5, %v33068_v31 }
 0x9fe   : > { %v27570_v12 = vpop.eup %27569  ;;  %20144 = vst [vmem:[%s32968_s23 + $0x88] sm:$0xff] %v20088_v25  ;;  %27581 = verf.f32 %v19930_v37 }
 0x9ff   : > { %v27572_v46 = vpop.eup %27571  ;;  %v20037_v4 = vadd.f32 1.0, %v27570_v12  ;;  %v24829_v30 = vpop.f32.mrb[84].mxu1  ;;  %27583 = verf.f32 %v19928_v13 }
 0xa00   : > { %v20035_v15 = vadd.f32 1.0, %v27572_v46  ;;  %v33077_v48 = vadd.f32 %v24829_v30, %v32954_v56  ;;  %v19505_v49 = vpop.f32.mrb[85].mxu1  ;;  %v27574_v33 = vpop.eup %27573 }
 0xa01   : > { %v20093_v52 = vmul.f32 %v20037_v4, %v19869_v16  ;;  %v33080_v41 = vadd.f32 %v32954_v56, %v19505_v49  ;;  %v24830_v57 = vpop.f32.mrb[86].mxu1  ;;  %v27576_v6 = vpop.eup %27575  ;;  %v20038_v38 = vadd.f32 1.0, %v27574_v33 }
 0xa02   : > { %v20091_v9 = vmul.f32 %v20035_v15, %v19867_v20  ;;  %v19933_v22 = vmul.f32 0.70710677, %v33077_v48  ;;  %v19508_v18 = vpop.f32.mrb[87].mxu1  ;;  %v20036_v21 = vadd.f32 1.0, %v27576_v6  ;;  %v33088_v50 = vadd.f32 %v24830_v57, %v32954_v56 }
 0xa03   : > { %20149 = vst [vmem:[%s32968_s23 + $0xb0] sm:$0xff] %v20093_v52  ;;  %v19931_v59 = vmul.f32 0.70710677, %v33080_v41  ;;  %v20094_v43 = vmul.f32 %v20038_v38, %v19870_v55  ;;  %v33092_v62 = vadd.f32 %v32954_v56, %v19508_v18  ;;  %v19877_v40 = vmul.f32 0.5, %v33077_v48 }
 0xa04   : > { %20147 = vst [vmem:[%s32968_s23 + $0xa0] sm:$0xff] %v20091_v9  ;;  %27585 = verf.f32 %v19933_v22  ;;  %v20092_v45 = vmul.f32 %v20036_v21, %v19868_v5  ;;  %v19934_v17 = vmul.f32 0.70710677, %v33088_v50  ;;  %v19875_v37 = vmul.f32 0.5, %v33080_v41 }
 0xa05   : > { %27587 = verf.f32 %v19931_v59  ;;  %20150 = vst [vmem:[%s32968_s23 + $0xb8] sm:$0xff] %v20094_v43  ;;  %v19932_v8 = vmul.f32 0.70710677, %v33092_v62  ;;  %v19878_v49 = vmul.f32 0.5, %v33088_v50  ;;  %v19876_v57 = vmul.f32 0.5, %v33092_v62 }
 0xa06   : > { %v27578_v61 = vpop.eup %27577  ;;  %20148 = vst [vmem:[%s32968_s23 + $0xa8] sm:$0xff] %v20092_v45  ;;  %27589 = verf.f32 %v19934_v17 }
 0xa07   : > { %v27580_v60 = vpop.eup %27579  ;;  %v20041_v58 = vadd.f32 1.0, %v27578_v61  ;;  %v24833_v51 = vpop.f32.mrb[88].mxu1  ;;  %27591 = verf.f32 %v19932_v8 }
 0xa08   : > { %v20039_v0 = vadd.f32 1.0, %v27580_v60  ;;  %v33101_v54 = vadd.f32 %v24833_v51, %v32954_v56  ;;  %v19521_v14 = vpop.f32.mrb[89].mxu1  ;;  %v27582_v34 = vpop.eup %27581 }
 0xa09   : > { %v20097_v19 = vmul.f32 %v20041_v58, %v19873_v35  ;;  %v33104_v23 = vadd.f32 %v32954_v56, %v19521_v14  ;;  %v24834_v32 = vpop.f32.mrb[90].mxu1  ;;  %v27584_v28 = vpop.eup %27583  ;;  %v20042_v3 = vadd.f32 1.0, %v27582_v34 }
 0xa0a   : > { %v20095_v7 = vmul.f32 %v20039_v0, %v19871_v53  ;;  %v19937_v2 = vmul.f32 0.70710677, %v33101_v54  ;;  %v19524_v24 = vpop.f32.mrb[91].mxu1  ;;  %v20040_v39 = vadd.f32 1.0, %v27584_v28  ;;  %v33112_v42 = vadd.f32 %v24834_v32, %v32954_v56 }
 0xa0b   : > { %20153 = vst [vmem:[%s32968_s23 + $0xd0] sm:$0xff] %v20097_v19  ;;  %v19935_v36 = vmul.f32 0.70710677, %v33104_v23  ;;  %v20098_v63 = vmul.f32 %v20042_v3, %v19874_v44  ;;  %v33116_v10 = vadd.f32 %v32954_v56, %v19524_v24  ;;  %v19881_v43 = vmul.f32 0.5, %v33101_v54 }
 0xa0c   : > { %20151 = vst [vmem:[%s32968_s23 + $0xc0] sm:$0xff] %v20095_v7  ;;  %27593 = verf.f32 %v19937_v2  ;;  %v20096_v1 = vmul.f32 %v20040_v39, %v19872_v26  ;;  %v19938_v27 = vmul.f32 0.70710677, %v33112_v42  ;;  %v19879_v17 = vmul.f32 0.5, %v33104_v23 }
 0xa0d   : > { %27595 = verf.f32 %v19935_v36  ;;  %20154 = vst [vmem:[%s32968_s23 + $0xd8] sm:$0xff] %v20098_v63  ;;  %v19936_v47 = vmul.f32 0.70710677, %v33116_v10  ;;  %v19882_v14 = vmul.f32 0.5, %v33112_v42  ;;  %v19880_v32 = vmul.f32 0.5, %v33116_v10 }
 0xa0e   : > { %v27586_v29 = vpop.eup %27585  ;;  %20152 = vst [vmem:[%s32968_s23 + $0xc8] sm:$0xff] %v20096_v1  ;;  %27597 = verf.f32 %v19938_v27 }
 0xa0f   : > { %v27588_v11 = vpop.eup %27587  ;;  %v20045_v31 = vadd.f32 1.0, %v27586_v29  ;;  %v24837_v25 = vpop.f32.mrb[92].mxu1  ;;  %27599 = verf.f32 %v19936_v47 }
 0xa10   : > { %v20043_v12 = vadd.f32 1.0, %v27588_v11  ;;  %v33125_v13 = vadd.f32 %v24837_v25, %v32954_v56  ;;  %v19537_v46 = vpop.f32.mrb[93].mxu1  ;;  %v27590_v16 = vpop.eup %27589 }
 0xa11   : > { %v20101_v4 = vmul.f32 %v20045_v31, %v19877_v40  ;;  %v33128_v30 = vadd.f32 %v32954_v56, %v19537_v46  ;;  %v24838_v20 = vpop.f32.mrb[94].mxu1  ;;  %v27592_v15 = vpop.eup %27591  ;;  %v20046_v33 = vadd.f32 1.0, %v27590_v16 }
 0xa12   : > { %v20099_v48 = vmul.f32 %v20043_v12, %v19875_v37  ;;  %v19941_v52 = vmul.f32 0.70710677, %v33125_v13  ;;  %v19540_v41 = vpop.f32.mrb[95].mxu1  ;;  %v20044_v6 = vadd.f32 1.0, %v27592_v15  ;;  %v33136_v55 = vadd.f32 %v24838_v20, %v32954_v56 }
 0xa13   : > { %20157 = vst [vmem:[%s32968_s23 + $0xf0] sm:$0xff] %v20101_v4  ;;  %v19939_v9 = vmul.f32 0.70710677, %v33128_v30  ;;  %v20102_v38 = vmul.f32 %v20046_v33, %v19878_v49  ;;  %v33140_v22 = vadd.f32 %v32954_v56, %v19540_v41  ;;  %v19885_v63 = vmul.f32 0.5, %v33125_v13 }
 0xa14   : > { %20155 = vst [vmem:[%s32968_s23 + $0xe0] sm:$0xff] %v20099_v48  ;;  %27601 = verf.f32 %v19941_v52  ;;  %v20100_v18 = vmul.f32 %v20044_v6, %v19876_v57  ;;  %v19942_v5 = vmul.f32 0.70710677, %v33136_v55  ;;  %v19883_v27 = vmul.f32 0.5, %v33128_v30 }
 0xa15   : > { %27603 = verf.f32 %v19939_v9  ;;  %20158 = vst [vmem:[%s32968_s23 + $0xf8] sm:$0xff] %v20102_v38  ;;  %v19940_v59 = vmul.f32 0.70710677, %v33140_v22  ;;  %v19886_v46 = vmul.f32 0.5, %v33136_v55  ;;  %v19884_v20 = vmul.f32 0.5, %v33140_v22 }
 0xa16   : > { %v27594_v21 = vpop.eup %27593  ;;  %20156 = vst [vmem:[%s32968_s23 + $0xe8] sm:$0xff] %v20100_v18  ;;  %27605 = verf.f32 %v19942_v5 }
 0xa17   : > { %v27596_v50 = vpop.eup %27595  ;;  %v20049_v62 = vadd.f32 1.0, %v27594_v21  ;;  %v24841_v45 = vpop.f32.mrb[96].mxu1  ;;  %27607 = verf.f32 %v19940_v59 }
 0xa18   : > { %v20047_v61 = vadd.f32 1.0, %v27596_v50  ;;  %v33149_v8 = vadd.f32 %v24841_v45, %v32954_v56  ;;  %v19553_v60 = vpop.f32.mrb[97].mxu1  ;;  %v27598_v35 = vpop.eup %27597 }
 0xa19   : > { %v20105_v58 = vmul.f32 %v20049_v62, %v19881_v43  ;;  %v33152_v51 = vadd.f32 %v32954_v56, %v19553_v60  ;;  %v24842_v53 = vpop.f32.mrb[98].mxu1  ;;  %v27600_v0 = vpop.eup %27599  ;;  %v20050_v34 = vadd.f32 1.0, %v27598_v35 }
 0xa1a   : > { %v20103_v54 = vmul.f32 %v20047_v61, %v19879_v17  ;;  %v19945_v19 = vmul.f32 0.70710677, %v33149_v8  ;;  %v19556_v23 = vpop.f32.mrb[99].mxu1  ;;  %v20048_v28 = vadd.f32 1.0, %v27600_v0  ;;  %v33160_v44 = vadd.f32 %v24842_v53, %v32954_v56 }
 0xa1b   : > { %20161 = vst [vmem:[%s32968_s23 + $0x110] sm:$0xff] %v20105_v58  ;;  %v19943_v7 = vmul.f32 0.70710677, %v33152_v51  ;;  %v20106_v3 = vmul.f32 %v20050_v34, %v19882_v14  ;;  %v33164_v2 = vadd.f32 %v32954_v56, %v19556_v23  ;;  %v19889_v38 = vmul.f32 0.5, %v33149_v8 }
 0xa1c   : > { %20159 = vst [vmem:[%s32968_s23 + $0x100] sm:$0xff] %v20103_v54  ;;  %27609 = verf.f32 %v19945_v19  ;;  %v20104_v24 = vmul.f32 %v20048_v28, %v19880_v32  ;;  %v19946_v26 = vmul.f32 0.70710677, %v33160_v44  ;;  %v19887_v5 = vmul.f32 0.5, %v33152_v51 }
 0xa1d   : > { %27611 = verf.f32 %v19943_v7  ;;  %20162 = vst [vmem:[%s32968_s23 + $0x118] sm:$0xff] %v20106_v3  ;;  %v19944_v36 = vmul.f32 0.70710677, %v33164_v2  ;;  %v19890_v60 = vmul.f32 0.5, %v33160_v44  ;;  %v19888_v53 = vmul.f32 0.5, %v33164_v2 }
 0xa1e   : > { %v27602_v39 = vpop.eup %27601  ;;  %20160 = vst [vmem:[%s32968_s23 + $0x108] sm:$0xff] %v20104_v24  ;;  %27613 = verf.f32 %v19946_v26 }
 0xa1f   : > { %v27604_v42 = vpop.eup %27603  ;;  %v20053_v10 = vadd.f32 1.0, %v27602_v39  ;;  %v24845_v1 = vpop.f32.mrb[100].mxu1  ;;  %27615 = verf.f32 %v19944_v36 }
 0xa20   : > { %v20051_v29 = vadd.f32 1.0, %v27604_v42  ;;  %v33173_v47 = vadd.f32 %v24845_v1, %v32954_v56  ;;  %v19569_v11 = vpop.f32.mrb[101].mxu1  ;;  %v27606_v40 = vpop.eup %27605 }
 0xa21   : > { %v20109_v31 = vmul.f32 %v20053_v10, %v19885_v63  ;;  %v33176_v25 = vadd.f32 %v32954_v56, %v19569_v11  ;;  %v24846_v37 = vpop.f32.mrb[102].mxu1  ;;  %v27608_v12 = vpop.eup %27607  ;;  %v20054_v16 = vadd.f32 1.0, %v27606_v40 }
 0xa22   : > { %v20107_v13 = vmul.f32 %v20051_v29, %v19883_v27  ;;  %v19949_v4 = vmul.f32 0.70710677, %v33173_v47  ;;  %v19572_v30 = vpop.f32.mrb[103].mxu1  ;;  %v20052_v15 = vadd.f32 1.0, %v27608_v12  ;;  %v33184_v49 = vadd.f32 %v24846_v37, %v32954_v56 }
 0xa23   : > { %20165 = vst [vmem:[%s32968_s23 + $0x130] sm:$0xff] %v20109_v31  ;;  %v19947_v48 = vmul.f32 0.70710677, %v33176_v25  ;;  %v20110_v33 = vmul.f32 %v20054_v16, %v19886_v46  ;;  %v33188_v52 = vadd.f32 %v32954_v56, %v19572_v30  ;;  %v19893_v3 = vmul.f32 0.5, %v33173_v47 }
 0xa24   : > { %20163 = vst [vmem:[%s32968_s23 + $0x120] sm:$0xff] %v20107_v13  ;;  %27617 = verf.f32 %v19949_v4  ;;  %v20108_v41 = vmul.f32 %v20052_v15, %v19884_v20  ;;  %v19950_v57 = vmul.f32 0.70710677, %v33184_v49  ;;  %v19891_v26 = vmul.f32 0.5, %v33176_v25 }
 0xa25   : > { %27619 = verf.f32 %v19947_v48  ;;  %20166 = vst [vmem:[%s32968_s23 + $0x138] sm:$0xff] %v20110_v33  ;;  %v19948_v9 = vmul.f32 0.70710677, %v33188_v52  ;;  %v19894_v47 = vmul.f32 0.5, %v33184_v49  ;;  %v19892_v25 = vmul.f32 0.5, %v33188_v52 }
 0xa26   : > { %v27610_v6 = vpop.eup %27609  ;;  %20164 = vst [vmem:[%s32968_s23 + $0x128] sm:$0xff] %v20108_v41  ;;  %27621 = verf.f32 %v19950_v57 }
 0xa27   : > { %v27612_v55 = vpop.eup %27611  ;;  %v20057_v22 = vadd.f32 1.0, %v27610_v6  ;;  %v24849_v18 = vpop.f32.mrb[104].mxu1  ;;  %27623 = verf.f32 %v19948_v9 }
 0xa28   : > { %v20055_v21 = vadd.f32 1.0, %v27612_v55  ;;  %v33197_v59 = vadd.f32 %v24849_v18, %v32954_v56  ;;  %v19585_v50 = vpop.f32.mrb[105].mxu1  ;;  %v27614_v43 = vpop.eup %27613 }
 0xa29   : > { %v20113_v62 = vmul.f32 %v20057_v22, %v19889_v38  ;;  %v33200_v45 = vadd.f32 %v32954_v56, %v19585_v50  ;;  %v24850_v17 = vpop.f32.mrb[106].mxu1  ;;  %v27616_v61 = vpop.eup %27615  ;;  %v20058_v35 = vadd.f32 1.0, %v27614_v43 }
 0xa2a   : > { %v20111_v8 = vmul.f32 %v20055_v21, %v19887_v5  ;;  %v19953_v58 = vmul.f32 0.70710677, %v33197_v59  ;;  %v19588_v51 = vpop.f32.mrb[107].mxu1  ;;  %v20056_v0 = vadd.f32 1.0, %v27616_v61  ;;  %v19842_v14 = vadd.f32 %v24850_v17, %v32954_v56 }
 0xa2b   : > { %20169 = vst [vmem:[%s32968_s23 + $0x150] sm:$0xff] %v20113_v62  ;;  %v19951_v54 = vmul.f32 0.70710677, %v33200_v45  ;;  %v20114_v34 = vmul.f32 %v20058_v35, %v19890_v60  ;;  %v19840_v19 = vadd.f32 %v32954_v56, %v19588_v51  ;;  %v19897_v33 = vmul.f32 0.5, %v33197_v59 }
 0xa2c   : > { %20167 = vst [vmem:[%s32968_s23 + $0x140] sm:$0xff] %v20111_v8  ;;  %27625 = verf.f32 %v19953_v58  ;;  %v20112_v23 = vmul.f32 %v20056_v0, %v19888_v53  ;;  %v19954_v32 = vmul.f32 0.70710677, %v19842_v14  ;;  %v19895_v41 = vmul.f32 0.5, %v33200_v45 }
 0xa2d   : > { %27627 = verf.f32 %v19951_v54  ;;  %20170 = vst [vmem:[%s32968_s23 + $0x158] sm:$0xff] %v20114_v34  ;;  %v19952_v7 = vmul.f32 0.70710677, %v19840_v19  ;;  %v19898_v38 = vmul.f32 0.5, %v19842_v14  ;;  %v19896_v18 = vmul.f32 0.5, %v19840_v19 }
 0xa2e   : > { %v27618_v28 = vpop.eup %27617  ;;  %20168 = vst [vmem:[%s32968_s23 + $0x148] sm:$0xff] %v20112_v23  ;;  %27629 = verf.f32 %v19954_v32 }
 0xa2f   : > { %v27620_v44 = vpop.eup %27619  ;;  %v20061_v2 = vadd.f32 1.0, %v27618_v28  ;;  %v24853_v24 = vpop.f32.mrb[108].mxu1  ;;  %27631 = verf.f32 %v19952_v7 }
 0xa30   : > { %v20059_v39 = vadd.f32 1.0, %v27620_v44  ;;  %v19845_v36 = vadd.f32 %v24853_v24, %v32954_v56  ;;  %v19601_v42 = vpop.f32.mrb[109].mxu1  ;;  %v27622_v63 = vpop.eup %27621 }
 0xa31   : > { %v20117_v10 = vmul.f32 %v20061_v2, %v19893_v3  ;;  %v19843_v1 = vadd.f32 %v32954_v56, %v19601_v42  ;;  %v24854_v27 = vpop.f32.mrb[110].mxu1  ;;  %v27624_v29 = vpop.eup %27623  ;;  %v20062_v40 = vadd.f32 1.0, %v27622_v63 }
 0xa32   : > { %v20115_v11 = vmul.f32 %v20059_v39, %v19891_v26  ;;  %v19957_v31 = vmul.f32 0.70710677, %v19845_v36  ;;  %v19604_v37 = vpop.f32.mrb[111].mxu1  ;;  %v20060_v12 = vadd.f32 1.0, %v27624_v29  ;;  %v19846_v46 = vadd.f32 %v24854_v27, %v32954_v56 }
 0xa33   : > { %20173 = vst [vmem:[%s32968_s23 + $0x170] sm:$0xff] %v20117_v10  ;;  %v19955_v13 = vmul.f32 0.70710677, %v19843_v1  ;;  %v20118_v16 = vmul.f32 %v20062_v40, %v19894_v47  ;;  %v19844_v4 = vadd.f32 %v32954_v56, %v19604_v37  ;;  %v19901_v62 = vmul.f32 0.5, %v19845_v36 }
 0xa34   : > { %20171 = vst [vmem:[%s32968_s23 + $0x160] sm:$0xff] %v20115_v11  ;;  %27633 = verf.f32 %v19957_v31  ;;  %v20116_v30 = vmul.f32 %v20060_v12, %v19892_v25  ;;  %v19958_v20 = vmul.f32 0.70710677, %v19846_v46  ;;  %v19899_v17 = vmul.f32 0.5, %v19843_v1 }
 0xa35   : > { %27635 = verf.f32 %v19955_v13  ;;  %20174 = vst [vmem:[%s32968_s23 + $0x178] sm:$0xff] %v20118_v16  ;;  %v19956_v48 = vmul.f32 0.70710677, %v19844_v4  ;;  %v19902_v51 = vmul.f32 0.5, %v19846_v46  ;;  %v19900_v0 = vmul.f32 0.5, %v19844_v4 }
 0xa36   : > { %v27626_v15 = vpop.eup %27625  ;;  %20172 = vst [vmem:[%s32968_s23 + $0x168] sm:$0xff] %v20116_v30  ;;  %27637 = verf.f32 %v19958_v20 }
 0xa37   : > { %v27628_v49 = vpop.eup %27627  ;;  %v20065_v52 = vadd.f32 1.0, %v27626_v15  ;;  %27639 = verf.f32 %v19956_v48 }
 0xa38   : > { %v20063_v57 = vadd.f32 1.0, %v27628_v49  ;;  %v27630_v56 = vpop.eup %27629 }
 0xa39   : > { %v20121_v6 = vmul.f32 %v20065_v52, %v19897_v33  ;;  %v27632_v9 = vpop.eup %27631  ;;  %v20066_v22 = vadd.f32 1.0, %v27630_v56 }
 0xa3a   : > { %v20119_v55 = vmul.f32 %v20063_v57, %v19895_v41  ;;  %v20064_v5 = vadd.f32 1.0, %v27632_v9 }
 0xa3b   : > { %20177 = vst [vmem:[%s32968_s23 + $0x190] sm:$0xff] %v20121_v6  ;;  %v20122_v21 = vmul.f32 %v20066_v22, %v19898_v38 }
 0xa3c   : > { %20175 = vst [vmem:[%s32968_s23 + $0x180] sm:$0xff] %v20119_v55  ;;  %v20120_v59 = vmul.f32 %v20064_v5, %v19896_v18 }
 0xa3d   : > { %20178 = vst [vmem:[%s32968_s23 + $0x198] sm:$0xff] %v20122_v21 }
 0xa3e   : > { %v27634_v50 = vpop.eup %27633  ;;  %20176 = vst [vmem:[%s32968_s23 + $0x188] sm:$0xff] %v20120_v59 }
 0xa3f   : > { %v27636_v43 = vpop.eup %27635  ;;  %v20069_v45 = vadd.f32 1.0, %v27634_v50 }
 0xa40   : > { %v20067_v61 = vadd.f32 1.0, %v27636_v43  ;;  %v27638_v8 = vpop.eup %27637 }
 0xa41   : > { %v20125_v60 = vmul.f32 %v20069_v45, %v19901_v62  ;;  %v27640_v35 = vpop.eup %27639  ;;  %v20070_v53 = vadd.f32 1.0, %v27638_v8 }
 0xa42   : > { %v20123_v58 = vmul.f32 %v20067_v61, %v19899_v17  ;;  %v20068_v54 = vadd.f32 1.0, %v27640_v35 }
 0xa43   : > { %20181 = vst [vmem:[%s32968_s23 + $0x1b0] sm:$0xff] %v20125_v60  ;;  %v20126_v14 = vmul.f32 %v20070_v53, %v19902_v51 }
 0xa44   : > { %20179 = vst [vmem:[%s32968_s23 + $0x1a0] sm:$0xff] %v20123_v58  ;;  %v20124_v34 = vmul.f32 %v20068_v54, %v19900_v0 }
 0xa45   : > { %20182 = vst [vmem:[%s32968_s23 + $0x1b8] sm:$0xff] %v20126_v14 }
 0xa46   : > { %20180 = vst [vmem:[%s32968_s23 + $0x1a8] sm:$0xff] %v20124_v34 }
 0xa47 PF: > { %s16_s21 = sadd.s32 1, %s27725_s21  }
 0xa48   : > { %p13_p5 = scmp.ge.s32.totalorder %s16_s21, 4  }
 0xa4a   :  { %15 = sbr.rel (!%p13_p5) target bundleno = 1 (0x1), region = 106 }

</bundles_post_ra>
